<compile_context>
chip_gen: v7x
topology: tpu7x:2x2x1
jax: 0.10.0
libtpu: 0.0.40
codegen_flags: <defaults>
</compile_context>

<pallas_src>
import functools

import jax
import jax.numpy as jnp
from jax.experimental import pallas as pl
from jax.experimental.pallas import tpu as pltpu


# ----------------------------------------------------------------------------
# helpers
# ----------------------------------------------------------------------------
def _pick_row_tile(h, row_bytes, budget):
    """Largest divisor of h whose row-tile working set fits `budget` bytes."""
    best = 1
    for d in range(1, h + 1):
        if h % d == 0 and d * row_bytes <= budget:
            best = d
    return best


# ----------------------------------------------------------------------------
# kernel 1: instance-norm statistics (Chan/Welford combine over row tiles)
# ----------------------------------------------------------------------------
def _inorm_stats_kernel(x_ref, mean_ref, inv_ref, *, th, w, hw, eps):
    ti = pl.program_id(1)

    @pl.when(ti == 0)
    def _():
        mean_ref[...] = jnp.zeros_like(mean_ref)
        inv_ref[...] = jnp.zeros_like(inv_ref)     # holds running M2 until finalize

    x = x_ref[...].astype(jnp.float32)             # (1, th, W, C)
    tile_n = float(th * w)
    t_mean = jnp.sum(x, axis=(1, 2), keepdims=True) * (1.0 / tile_n)
    xc = x - t_mean
    t_m2 = jnp.sum(xc * xc, axis=(1, 2), keepdims=True)

    # Chan parallel combine of (running mean, running M2) with this tile.
    ti_f = ti.astype(jnp.float32)
    inv_cnt = 1.0 / (ti_f + 1.0)                   # = tile_n / (n_a + tile_n)
    delta = t_mean - mean_ref[...]
    mean_ref[...] = mean_ref[...] + delta * inv_cnt
    inv_ref[...] = inv_ref[...] + t_m2 + delta * delta * (tile_n * ti_f * inv_cnt)

    @pl.when(ti == pl.num_programs(1) - 1)
    def _():
        var = inv_ref[...] * (1.0 / hw)            # biased variance (PyTorch IN)
        inv_ref[...] = jax.lax.rsqrt(var + eps)


def instance_norm_stats_pallas(x, eps=1e-5):
    n, h, w, c = x.shape
    th = _pick_row_tile(h, w * c * 4, budget=8 << 20)   # elementwise: big tiles
    nt = h // th
    stat_spec = pl.BlockSpec((1, 1, 1, c), lambda bi, ti: (bi, 0, 0, 0))
    return pl.pallas_call(
        functools.partial(_inorm_stats_kernel, th=th, w=w, hw=float(h * w), eps=eps),
        out_shape=(jax.ShapeDtypeStruct((n, 1, 1, c), jnp.float32),
                   jax.ShapeDtypeStruct((n, 1, 1, c), jnp.float32)),
        grid=(n, nt),
        in_specs=[pl.BlockSpec((1, th, w, c), lambda bi, ti: (bi, ti, 0, 0))],
        out_specs=(stat_spec, stat_spec),
        compiler_params=pltpu.CompilerParams(
            dimension_semantics=("parallel", "arbitrary"),
            vmem_limit_bytes=32 * 1024 * 1024),
    )(x)


# ----------------------------------------------------------------------------
# kernel 2: fused SPADE (shared conv + gamma|beta conv) + AdaIN modulation
# ----------------------------------------------------------------------------
def _spade_adain_kernel(i2c_ref, w1_ref, b1_ref, w2_ref, b2_ref,
                        x_ref, mean_ref, inv_ref, gs_ref, bs_ref,
                        o_ref, actv_ref, acc_ref, *, th, w, c, nh, p):
    ti = pl.program_id(1)
    nt = pl.num_programs(1)

    # ---- conv1 (mlp_shared): single MXU matmul with K = 9*p, fused bias+ReLU.
    # i2c block holds the 3x3 neighborhoods of the zero-padded segmap for
    # activation rows [r0-1, r0+th+1) (built on the host; segmap is tiny).
    i2c = i2c_ref[...].reshape((th + 2) * w, 9 * p)
    a1 = jnp.dot(i2c, w1_ref[...], preferred_element_type=jnp.float32)
    a1 = jnp.maximum(a1 + b1_ref[...], 0.0).astype(jnp.bfloat16)
    actv_ref[:, 1:w + 1, :] = a1.reshape(th + 2, w, nh)

    # Zero column halos (SAME padding of the second conv over actv).
    zcol = jnp.zeros((th + 2, 1, nh), jnp.bfloat16)
    actv_ref[:, 0:1, :] = zcol
    actv_ref[:, w + 1:w + 2, :] = zcol

    # Zero row halos at the image top / bottom (actv rows -1 and H are zero).
    zrow = jnp.zeros((1, w + 2, nh), jnp.bfloat16)

    @pl.when(ti == 0)
    def _():
        actv_ref[0:1, :, :] = zrow

    @pl.when(ti == nt - 1)
    def _():
        actv_ref[th + 1:th + 2, :, :] = zrow

    # ---- conv2 (mlp_gamma | mlp_beta fused along Cout): 9 shifted flattened-M
    #      matmuls accumulated in an explicit f32 VMEM scratch.
    for dh in range(3):
        for dw in range(3):
            slab = actv_ref[dh:dh + th, dw:dw + w, :].reshape(th * w, nh)
            part = jnp.dot(slab, w2_ref[dh * 3 + dw],
                           preferred_element_type=jnp.float32)
            if dh == 0 and dw == 0:
                acc_ref[...] = part
            else:
                acc_ref[...] += part

    gates = jax.nn.sigmoid(acc_ref[...] + b2_ref[...]).reshape(th, w, 2 * c)
    gg = gates[:, :, :c][None]                      # (1, th, W, C)  gamma gate
    bg = gates[:, :, c:][None]                      # (1, th, W, C)  beta gate

    # ---- AdaIN modulation: (gamma*gate + 1) * (x - mean) * invstd + beta*gate
    xb = x_ref[...].astype(jnp.float32)
    normed = (xb - mean_ref[...]) * inv_ref[...]
    out = (gs_ref[...] * gg + 1.0) * normed + bs_ref[...] * bg
    o_ref[...] = out.astype(o_ref.dtype)


def spade_adain_pallas(x, seg, mean, invstd, gamma_s, beta_s, params):
    n, h, w, c = x.shape
    p = seg.shape[-1]
    nh = params["shared_w"].shape[-1]

    # Row tile from a VMEM byte budget (x + out + acc + actv + im2col rows).
    row_bytes = (w * c * 4 * 2            # x block + out block (f32)
                 + w * 2 * c * 4          # conv2 f32 accumulator rows
                 + (w + 2) * nh * 2       # actv scratch rows (bf16)
                 + w * 9 * p * 2)         # segmap im2col rows (bf16)
    th = _pick_row_tile(h, row_bytes, budget=6 << 20)
    nt = h // th

    # Host-side prep (tiny tensors).  im2col of the zero-padded segmap with the
    # 3x3 taps folded into the contraction dim (K = 9*p); windows cover
    # activation rows [ti*th - 1, ti*th + th + 1) per tile, so the kernel needs
    # no edge-aware DMA and no padded copy of any large tensor.
    ps = jnp.pad(seg, ((0, 0), (2, 2), (1, 1), (0, 0)))          # (N, H+4, W+2, P)
    rows = (jnp.arange(nt)[:, None, None] * th
            + jnp.arange(th + 2)[None, :, None]
            + jnp.arange(3)[None, None, :])                       # (nt, th+2, 3)
    cols = jnp.arange(w)[:, None] + jnp.arange(3)[None, :]        # (W, 3)
    g = ps[:, rows]                                               # (N, nt, th+2, 3, W+2, P)
    g = g[:, :, :, :, cols]                                       # (N, nt, th+2, 3, W, 3, P)
    seg_i2c = jnp.transpose(g, (0, 1, 2, 4, 3, 5, 6)).reshape(
        n, nt, th + 2, w, 9 * p).astype(jnp.bfloat16)

    w1 = params["shared_w"].reshape(9 * p, nh).astype(jnp.bfloat16)
    b1 = params["shared_b"].reshape(1, nh).astype(jnp.float32)
    w2 = jnp.concatenate([params["gamma_w"], params["beta_w"]], axis=-1)
    w2 = w2.reshape(9, nh, 2 * c).astype(jnp.bfloat16)
    b2 = jnp.concatenate([params["gamma_b"], params["beta_b"]], axis=0)
    b2 = b2.reshape(1, 2 * c).astype(jnp.float32)

    kernel = functools.partial(_spade_adain_kernel, th=th, w=w, c=c, nh=nh, p=p)
    vec = pl.BlockSpec((1, 1, 1, c), lambda bi, ti: (bi, 0, 0, 0))
    tile = pl.BlockSpec((1, th, w, c), lambda bi, ti: (bi, ti, 0, 0))

    return pl.pallas_call(
        kernel,
        out_shape=jax.ShapeDtypeStruct((n, h, w, c), x.dtype),
        grid=(n, nt),
        in_specs=[
            pl.BlockSpec((1, 1, th + 2, w, 9 * p), lambda bi, ti: (bi, ti, 0, 0, 0)),
            pl.BlockSpec((9 * p, nh), lambda bi, ti: (0, 0)),
            pl.BlockSpec((1, nh), lambda bi, ti: (0, 0)),
            pl.BlockSpec((9, nh, 2 * c), lambda bi, ti: (0, 0, 0)),
            pl.BlockSpec((1, 2 * c), lambda bi, ti: (0, 0)),
            tile,           # x
            vec, vec,       # mean, invstd
            vec, vec,       # gamma_style, beta_style
        ],
        out_specs=tile,
        scratch_shapes=[
            pltpu.VMEM((th + 2, w + 2, nh), jnp.bfloat16),   # actv (+ halos)
            pltpu.VMEM((th * w, 2 * c), jnp.float32),        # conv2 accumulator
        ],
        compiler_params=pltpu.CompilerParams(
            dimension_semantics=("parallel", "parallel"),
            vmem_limit_bytes=32 * 1024 * 1024),
    )(seg_i2c, w1, b1, w2, b2, x, mean, invstd, gamma_s, beta_s)


# ----------------------------------------------------------------------------
# AdaptiveInstanceNorm forward (NCHW in / NCHW out, PyTorch semantics)
# ----------------------------------------------------------------------------
def adaptive_instance_norm_forward(x_nchw, style, seg_nchw, params, eps=1e-5):
    x = jnp.transpose(x_nchw, (0, 2, 3, 1)).astype(jnp.float32)      # NCHW -> NHWC
    seg = jnp.transpose(seg_nchw, (0, 2, 3, 1)).astype(jnp.float32)
    n, h, w, c = x.shape

    # style Linear + chunk(2, dim=1): tiny GEMM, left to XLA.
    sv = jnp.dot(style.astype(jnp.float32), params["style_w"],
                 precision=jax.lax.Precision.HIGHEST) + params["style_b"]
    gamma_s = sv[:, :c].reshape(n, 1, 1, c)
    beta_s = sv[:, c:].reshape(n, 1, 1, c)

    # InstanceNorm2d(affine=False): stats only; application fused downstream.
    mean, invstd = instance_norm_stats_pallas(x, eps=eps)

    # Fused SPADE gate + AdaIN modulation.
    out = spade_adain_pallas(x, seg, mean, invstd, gamma_s, beta_s, params)
    return jnp.transpose(out, (0, 3, 1, 2))                          # back to NCHW


# ----------------------------------------------------------------------------
# pure-JAX reference (for correctness check)
# ----------------------------------------------------------------------------
def _conv3x3_ref(x, w, b, relu=False, sigmoid=False):
    out = jax.lax.conv_general_dilated(
        x, w, window_strides=(1, 1), padding="SAME",
        dimension_numbers=("NHWC", "HWIO", "NHWC"),
        precision=jax.lax.Precision.HIGHEST) + b
    if relu:
        out = jnp.maximum(out, 0.0)
    if sigmoid:
        out = jax.nn.sigmoid(out)
    return out


def adaptive_instance_norm_reference(x_nchw, style, seg_nchw, params):
    n, c, h, w = x_nchw.shape
    sv = jnp.dot(style, params["style_w"],
                 precision=jax.lax.Precision.HIGHEST) + params["style_b"]
    gamma = sv[:, :c][:, :, None, None]
    beta = sv[:, c:][:, :, None, None]

    mean = jnp.mean(x_nchw, axis=(2, 3), keepdims=True)
    var = jnp.mean((x_nchw - mean) ** 2, axis=(2, 3), keepdims=True)
    normed = (x_nchw - mean) * jax.lax.rsqrt(var + 1e-5)

    seg = jnp.transpose(seg_nchw, (0, 2, 3, 1))
    actv = _conv3x3_ref(seg, params["shared_w"], params["shared_b"], relu=True)
    gam_gate = _conv3x3_ref(actv, params["gamma_w"], params["gamma_b"], sigmoid=True)
    bet_gate = _conv3x3_ref(actv, params["beta_w"], params["beta_b"], sigmoid=True)
    gam_gate = jnp.transpose(gam_gate, (0, 3, 1, 2))
    bet_gate = jnp.transpose(bet_gate, (0, 3, 1, 2))
    return (gamma * gam_gate + 1.0) * normed + beta * bet_gate


# ----------------------------------------------------------------------------
# deterministic synthetic parameters (conv weights HWIO; linear (in, out))
# ----------------------------------------------------------------------------
def init_params(key, in_channel, style_dim, p_num, nhidden=128):
    ks = jax.random.split(key, 8)

    def nrm(k, shape, scale=0.1):
        return jax.random.normal(k, shape, jnp.float32) * scale

    return {
        "style_w": nrm(ks[0], (style_dim, 2 * in_channel)),           # nn.Linear
        "style_b": nrm(ks[1], (2 * in_channel,), 0.05),
        "shared_w": nrm(ks[2], (3, 3, p_num, nhidden)),               # mlp_shared
        "shared_b": nrm(ks[3], (nhidden,), 0.05),
        "gamma_w": nrm(ks[4], (3, 3, nhidden, in_channel), 0.05),     # mlp_gamma
        "gamma_b": nrm(ks[5], (in_channel,), 0.05),
        "beta_w": nrm(ks[6], (3, 3, nhidden, in_channel), 0.05),      # mlp_beta
        "beta_b": nrm(ks[7], (in_channel,), 0.05),
    }


if __name__ == "__main__":
    key = jax.random.PRNGKey(0)
    N, C, H, W = 2, 8, 16, 16     # in_channel = 8
    STYLE_DIM = 32                # style_dim
    P_NUM = 4                     # cfg.GAN.P_NUM (segmentation-map channels)

    kx, kz, ks, kp = jax.random.split(key, 4)
    x = jax.random.normal(kx, (N, C, H, W), jnp.float32)
    style = jax.random.normal(kz, (N, STYLE_DIM), jnp.float32)
    seg = jax.random.normal(ks, (N, P_NUM, H, W), jnp.float32)
    params = init_params(kp, C, STYLE_DIM, P_NUM)

    out = jax.jit(adaptive_instance_norm_forward)(x, style, seg, params)
    out = jax.block_until_ready(out)

    ref = adaptive_instance_norm_reference(x, style, seg, params)
    assert out.shape == (N, C, H, W), out.shape
    max_err = float(jnp.max(jnp.abs(out - ref)))
    # bf16 MXU operands in the SPADE convs -> relaxed tolerance vs f32 reference
    assert max_err < 2e-2, f"mismatch vs reference: {max_err}"

    print("KERNEL_OK")
</pallas_src>

<mosaic_0001>
module attributes {stable_mosaic.version = 11 : i64} {
  func.func @_inorm_stats_kernel(%arg0: i32, %arg1: i32, %arg2: memref<1x16x16x8xf32, #tpu.memory_space<vmem>>, %arg3: memref<1x1x1x8xf32, #tpu.memory_space<vmem>>, %arg4: memref<1x1x1x8xf32, #tpu.memory_space<vmem>>) attributes {dimension_semantics = [#tpu.dimension_semantics<parallel>, #tpu.dimension_semantics<arbitrary>], iteration_bounds = array<i64: 2, 1>, scalar_prefetch = 0 : i64, scratch_operands = 0 : i64, tpu.core_type = #tpu.core_type<tc>, window_params = [{transform_indices = @transform_0, window_bounds = array<i64: 1, 16, 16, 8>}, {transform_indices = @transform_1, window_bounds = array<i64: 1, 1, 1, 8>}, {transform_indices = @transform_2, window_bounds = array<i64: 1, 1, 1, 8>}]} {
    %c0_i32 = arith.constant 0 : i32
    %0 = arith.cmpi eq, %arg1, %c0_i32 : i32
    %1 = arith.extui %0 : i1 to i32
    %c0_i32_0 = arith.constant 0 : i32
    %2 = arith.cmpi ne, %1, %c0_i32_0 : i32
    scf.if %2 {
      %cst_31 = arith.constant 0.000000e+00 : f32
      %35 = vector.broadcast %cst_31 : f32 to vector<1x1x1x8xf32>
      %c0_32 = arith.constant 0 : index
      %c0_33 = arith.constant 0 : index
      %c0_34 = arith.constant 0 : index
      %c0_35 = arith.constant 0 : index
      %36 = vector.load %arg3[%c0_32, %c0_33, %c0_34, %c0_35] : memref<1x1x1x8xf32, #tpu.memory_space<vmem>>, vector<1x1x1x8xf32>
      tpu.vector_store %arg3[%c0_32, %c0_33, %c0_34, %c0_35], %35 {strides = array<i32>} : memref<1x1x1x8xf32, #tpu.memory_space<vmem>>, vector<1x1x1x8xf32>,
      %cst_36 = arith.constant 0.000000e+00 : f32
      %37 = vector.broadcast %cst_36 : f32 to vector<1x1x1x8xf32>
      %c0_37 = arith.constant 0 : index
      %c0_38 = arith.constant 0 : index
      %c0_39 = arith.constant 0 : index
      %c0_40 = arith.constant 0 : index
      %38 = vector.load %arg4[%c0_37, %c0_38, %c0_39, %c0_40] : memref<1x1x1x8xf32, #tpu.memory_space<vmem>>, vector<1x1x1x8xf32>
      tpu.vector_store %arg4[%c0_37, %c0_38, %c0_39, %c0_40], %37 {strides = array<i32>} : memref<1x1x1x8xf32, #tpu.memory_space<vmem>>, vector<1x1x1x8xf32>,
    } else {
    }
    %c0 = arith.constant 0 : index
    %c0_1 = arith.constant 0 : index
    %c0_2 = arith.constant 0 : index
    %c0_3 = arith.constant 0 : index
    %3 = vector.load %arg2[%c0, %c0_1, %c0_2, %c0_3] : memref<1x16x16x8xf32, #tpu.memory_space<vmem>>, vector<1x16x16x8xf32>
    %cst = arith.constant dense<0.000000e+00> : vector<1x8xf32>
    %4 = vector.multi_reduction <add>, %3, %cst [1, 2] : vector<1x16x16x8xf32> to vector<1x8xf32>
    %5 = vector.shape_cast %4 : vector<1x8xf32> to vector<1x1x1x8xf32>
    %cst_4 = arith.constant 3.906250e-03 : f32
    %6 = vector.broadcast %cst_4 : f32 to vector<1x1x1x8xf32>
    %7 = arith.mulf %5, %6 : vector<1x1x1x8xf32>
    %8 = vector.broadcast %7 : vector<1x1x1x8xf32> to vector<1x16x16x8xf32>
    %9 = arith.subf %3, %8 : vector<1x16x16x8xf32>
    %10 = arith.mulf %9, %9 : vector<1x16x16x8xf32>
    %cst_5 = arith.constant dense<0.000000e+00> : vector<1x8xf32>
    %11 = vector.multi_reduction <add>, %10, %cst_5 [1, 2] : vector<1x16x16x8xf32> to vector<1x8xf32>
    %12 = vector.shape_cast %11 : vector<1x8xf32> to vector<1x1x1x8xf32>
    %13 = arith.sitofp %arg1 : i32 to f32
    %cst_6 = arith.constant 1.000000e+00 : f32
    %14 = arith.addf %13, %cst_6 : f32
    %cst_7 = arith.constant 1.000000e+00 : f32
    %15 = arith.divf %cst_7, %14 : f32
    %c0_8 = arith.constant 0 : index
    %c0_9 = arith.constant 0 : index
    %c0_10 = arith.constant 0 : index
    %c0_11 = arith.constant 0 : index
    %16 = vector.load %arg3[%c0_8, %c0_9, %c0_10, %c0_11] : memref<1x1x1x8xf32, #tpu.memory_space<vmem>>, vector<1x1x1x8xf32>
    %17 = arith.subf %7, %16 : vector<1x1x1x8xf32>
    %c0_12 = arith.constant 0 : index
    %c0_13 = arith.constant 0 : index
    %c0_14 = arith.constant 0 : index
    %c0_15 = arith.constant 0 : index
    %18 = vector.load %arg3[%c0_12, %c0_13, %c0_14, %c0_15] : memref<1x1x1x8xf32, #tpu.memory_space<vmem>>, vector<1x1x1x8xf32>
    %19 = vector.broadcast %15 : f32 to vector<1x1x1x8xf32>
    %20 = arith.mulf %17, %19 : vector<1x1x1x8xf32>
    %21 = arith.addf %18, %20 : vector<1x1x1x8xf32>
    %c0_16 = arith.constant 0 : index
    %c0_17 = arith.constant 0 : index
    %c0_18 = arith.constant 0 : index
    %c0_19 = arith.constant 0 : index
    %22 = vector.load %arg3[%c0_16, %c0_17, %c0_18, %c0_19] : memref<1x1x1x8xf32, #tpu.memory_space<vmem>>, vector<1x1x1x8xf32>
    tpu.vector_store %arg3[%c0_16, %c0_17, %c0_18, %c0_19], %21 {strides = array<i32>} : memref<1x1x1x8xf32, #tpu.memory_space<vmem>>, vector<1x1x1x8xf32>,
    %c0_20 = arith.constant 0 : index
    %c0_21 = arith.constant 0 : index
    %c0_22 = arith.constant 0 : index
    %c0_23 = arith.constant 0 : index
    %23 = vector.load %arg4[%c0_20, %c0_21, %c0_22, %c0_23] : memref<1x1x1x8xf32, #tpu.memory_space<vmem>>, vector<1x1x1x8xf32>
    %24 = arith.addf %23, %12 : vector<1x1x1x8xf32>
    %25 = arith.mulf %17, %17 : vector<1x1x1x8xf32>
    %cst_24 = arith.constant 2.560000e+02 : f32
    %26 = arith.mulf %cst_24, %13 : f32
    %27 = arith.mulf %26, %15 : f32
    %28 = vector.broadcast %27 : f32 to vector<1x1x1x8xf32>
    %29 = arith.mulf %25, %28 : vector<1x1x1x8xf32>
    %30 = arith.addf %24, %29 : vector<1x1x1x8xf32>
    %c0_25 = arith.constant 0 : index
    %c0_26 = arith.constant 0 : index
    %c0_27 = arith.constant 0 : index
    %c0_28 = arith.constant 0 : index
    %31 = vector.load %arg4[%c0_25, %c0_26, %c0_27, %c0_28] : memref<1x1x1x8xf32, #tpu.memory_space<vmem>>, vector<1x1x1x8xf32>
    tpu.vector_store %arg4[%c0_25, %c0_26, %c0_27, %c0_28], %30 {strides = array<i32>} : memref<1x1x1x8xf32, #tpu.memory_space<vmem>>, vector<1x1x1x8xf32>,
    %c0_i32_29 = arith.constant 0 : i32
    %32 = arith.cmpi eq, %arg1, %c0_i32_29 : i32
    %33 = arith.extui %32 : i1 to i32
    %c0_i32_30 = arith.constant 0 : i32
    %34 = arith.cmpi ne, %33, %c0_i32_30 : i32
    scf.if %34 {
      %c0_31 = arith.constant 0 : index
      %c0_32 = arith.constant 0 : index
      %c0_33 = arith.constant 0 : index
      %c0_34 = arith.constant 0 : index
      %35 = vector.load %arg4[%c0_31, %c0_32, %c0_33, %c0_34] : memref<1x1x1x8xf32, #tpu.memory_space<vmem>>, vector<1x1x1x8xf32>
      %cst_35 = arith.constant 3.906250e-03 : f32
      %36 = vector.broadcast %cst_35 : f32 to vector<1x1x1x8xf32>
      %37 = arith.mulf %35, %36 : vector<1x1x1x8xf32>
      %cst_36 = arith.constant 9.99999974E-6 : f32
      %38 = vector.broadcast %cst_36 : f32 to vector<1x1x1x8xf32>
      %39 = arith.addf %37, %38 : vector<1x1x1x8xf32>
      %40 = math.rsqrt %39 : vector<1x1x1x8xf32>
      %c0_37 = arith.constant 0 : index
      %c0_38 = arith.constant 0 : index
      %c0_39 = arith.constant 0 : index
      %c0_40 = arith.constant 0 : index
      %41 = vector.load %arg4[%c0_37, %c0_38, %c0_39, %c0_40] : memref<1x1x1x8xf32, #tpu.memory_space<vmem>>, vector<1x1x1x8xf32>
      tpu.vector_store %arg4[%c0_37, %c0_38, %c0_39, %c0_40], %40 {strides = array<i32>} : memref<1x1x1x8xf32, #tpu.memory_space<vmem>>, vector<1x1x1x8xf32>,
    } else {
    }
    return
  }
  func.func @transform_0(%arg0: i32, %arg1: i32) -> (i32, i32, i32, i32) {
    %c0_i32 = arith.constant 0 : i32
    %c0_i32_0 = arith.constant 0 : i32
    %c0_i32_1 = arith.constant 0 : i32
    return %arg0, %arg1, %c0_i32, %c0_i32_0 : i32, i32, i32, i32
  }
  func.func @transform_1(%arg0: i32, %arg1: i32) -> (i32, i32, i32, i32) {
    %c0_i32 = arith.constant 0 : i32
    %c0_i32_0 = arith.constant 0 : i32
    %c0_i32_1 = arith.constant 0 : i32
    %c0_i32_2 = arith.constant 0 : i32
    return %arg0, %c0_i32, %c0_i32_0, %c0_i32_1 : i32, i32, i32, i32
  }
  func.func @transform_2(%arg0: i32, %arg1: i32) -> (i32, i32, i32, i32) {
    %c0_i32 = arith.constant 0 : i32
    %c0_i32_0 = arith.constant 0 : i32
    %c0_i32_1 = arith.constant 0 : i32
    %c0_i32_2 = arith.constant 0 : i32
    return %arg0, %c0_i32, %c0_i32_0, %c0_i32_1 : i32, i32, i32, i32
  }
}

module attributes {stable_mosaic.version = 11 : i64} {
  func.func @_spade_adain_kernel(%arg0: i32, %arg1: i32, %arg2: memref<1x1x18x16x36xbf16, #tpu.memory_space<vmem>>, %arg3: memref<36x128xbf16, #tpu.memory_space<vmem>>, %arg4: memref<1x128xf32, #tpu.memory_space<vmem>>, %arg5: memref<9x128x16xbf16, #tpu.memory_space<vmem>>, %arg6: memref<1x16xf32, #tpu.memory_space<vmem>>, %arg7: memref<1x16x16x8xf32, #tpu.memory_space<vmem>>, %arg8: memref<1x1x1x8xf32, #tpu.memory_space<vmem>>, %arg9: memref<1x1x1x8xf32, #tpu.memory_space<vmem>>, %arg10: memref<1x1x1x8xf32, #tpu.memory_space<vmem>>, %arg11: memref<1x1x1x8xf32, #tpu.memory_space<vmem>>, %arg12: memref<1x16x16x8xf32, #tpu.memory_space<vmem>>, %arg13: memref<18x18x128xbf16, #tpu.memory_space<vmem>>, %arg14: memref<256x16xf32, #tpu.memory_space<vmem>>) attributes {dimension_semantics = [#tpu.dimension_semantics<parallel>, #tpu.dimension_semantics<parallel>], iteration_bounds = array<i64: 2, 1>, scalar_prefetch = 0 : i64, scratch_operands = 2 : i64, tpu.core_type = #tpu.core_type<tc>, window_params = [{transform_indices = @transform_0, window_bounds = array<i64: 1, 1, 18, 16, 36>}, {pipeline_mode = #tpu.pipeline_mode<synchronous>, transform_indices = @transform_1, window_bounds = array<i64: 36, 128>}, {pipeline_mode = #tpu.pipeline_mode<synchronous>, transform_indices = @transform_2, window_bounds = array<i64: 1, 128>}, {pipeline_mode = #tpu.pipeline_mode<synchronous>, transform_indices = @transform_3, window_bounds = array<i64: 9, 128, 16>}, {pipeline_mode = #tpu.pipeline_mode<synchronous>, transform_indices = @transform_4, window_bounds = array<i64: 1, 16>}, {transform_indices = @transform_5, window_bounds = array<i64: 1, 16, 16, 8>}, {transform_indices = @transform_6, window_bounds = array<i64: 1, 1, 1, 8>}, {transform_indices = @transform_7, window_bounds = array<i64: 1, 1, 1, 8>}, {transform_indices = @transform_8, window_bounds = array<i64: 1, 1, 1, 8>}, {transform_indices = @transform_9, window_bounds = array<i64: 1, 1, 1, 8>}, {transform_indices = @transform_10, window_bounds = array<i64: 1, 16, 16, 8>}]} {
    %c0 = arith.constant 0 : index
    %c0_0 = arith.constant 0 : index
    %c0_1 = arith.constant 0 : index
    %c0_2 = arith.constant 0 : index
    %c0_3 = arith.constant 0 : index
    %0 = vector.load %arg2[%c0, %c0_0, %c0_1, %c0_2, %c0_3] : memref<1x1x18x16x36xbf16, #tpu.memory_space<vmem>>, vector<1x1x18x16x36xbf16>
    %1 = vector.shape_cast %0 : vector<1x1x18x16x36xbf16> to vector<288x36xbf16>
    %c0_4 = arith.constant 0 : index
    %c0_5 = arith.constant 0 : index
    %2 = vector.load %arg3[%c0_4, %c0_5] : memref<36x128xbf16, #tpu.memory_space<vmem>>, vector<36x128xbf16>
    %cst = arith.constant dense<0.000000e+00> : vector<288x128xf32>
    %3 = tpu.matmul %1, %2, %cst {dimension_numbers = #tpu.dot_dimension_numbers<[1], [0], [0], [1], [0, 0, 1, 1], [], []>} : vector<288x36xbf16>, vector<36x128xbf16>, vector<288x128xf32> -> vector<288x128xf32>
    %c0_6 = arith.constant 0 : index
    %c0_7 = arith.constant 0 : index
    %4 = vector.load %arg4[%c0_6, %c0_7] : memref<1x128xf32, #tpu.memory_space<vmem>>, vector<1x128xf32>
    %5 = vector.broadcast %4 : vector<1x128xf32> to vector<288x128xf32>
    %6 = arith.addf %3, %5 : vector<288x128xf32>
    %cst_8 = arith.constant 0.000000e+00 : f32
    %7 = vector.broadcast %cst_8 : f32 to vector<288x128xf32>
    %8 = arith.maximumf %6, %7 : vector<288x128xf32>
    %9 = arith.truncf %8 : vector<288x128xf32> to vector<288x128xbf16>
    %10 = vector.shape_cast %9 : vector<288x128xbf16> to vector<18x16x128xbf16>
    %c0_9 = arith.constant 0 : index
    %c1 = arith.constant 1 : index
    %c0_10 = arith.constant 0 : index
    %11 = vector.load %arg13[%c0_9, %c1, %c0_10] : memref<18x18x128xbf16, #tpu.memory_space<vmem>>, vector<18x16x128xbf16>
    tpu.vector_store %arg13[%c0_9, %c1, %c0_10], %10 {strides = array<i32>} : memref<18x18x128xbf16, #tpu.memory_space<vmem>>, vector<18x16x128xbf16>,
    %cst_11 = arith.constant 0.000000e+00 : bf16
    %12 = vector.broadcast %cst_11 : bf16 to vector<18x1x128xbf16>
    %c0_12 = arith.constant 0 : index
    %c0_13 = arith.constant 0 : index
    %c0_14 = arith.constant 0 : index
    %13 = vector.load %arg13[%c0_12, %c0_13, %c0_14] : memref<18x18x128xbf16, #tpu.memory_space<vmem>>, vector<18x1x128xbf16>
    tpu.vector_store %arg13[%c0_12, %c0_13, %c0_14], %12 {strides = array<i32>} : memref<18x18x128xbf16, #tpu.memory_space<vmem>>, vector<18x1x128xbf16>,
    %c0_15 = arith.constant 0 : index
    %c17 = arith.constant 17 : index
    %c0_16 = arith.constant 0 : index
    %14 = vector.load %arg13[%c0_15, %c17, %c0_16] : memref<18x18x128xbf16, #tpu.memory_space<vmem>>, vector<18x1x128xbf16>
    tpu.vector_store %arg13[%c0_15, %c17, %c0_16], %12 {strides = array<i32>} : memref<18x18x128xbf16, #tpu.memory_space<vmem>>, vector<18x1x128xbf16>,
    %cst_17 = arith.constant 0.000000e+00 : bf16
    %15 = vector.broadcast %cst_17 : bf16 to vector<1x18x128xbf16>
    %c0_i32 = arith.constant 0 : i32
    %16 = arith.cmpi eq, %arg1, %c0_i32 : i32
    %17 = arith.extui %16 : i1 to i32
    %c0_i32_18 = arith.constant 0 : i32
    %18 = arith.cmpi ne, %17, %c0_i32_18 : i32
    scf.if %18 {
      %c0_141 = arith.constant 0 : index
      %c0_142 = arith.constant 0 : index
      %c0_143 = arith.constant 0 : index
      %124 = vector.load %arg13[%c0_141, %c0_142, %c0_143] : memref<18x18x128xbf16, #tpu.memory_space<vmem>>, vector<1x18x128xbf16>
      tpu.vector_store %arg13[%c0_141, %c0_142, %c0_143], %15 {strides = array<i32>} : memref<18x18x128xbf16, #tpu.memory_space<vmem>>, vector<1x18x128xbf16>,
    } else {
    }
    %c0_i32_19 = arith.constant 0 : i32
    %19 = arith.cmpi eq, %arg1, %c0_i32_19 : i32
    %20 = arith.extui %19 : i1 to i32
    %c0_i32_20 = arith.constant 0 : i32
    %21 = arith.cmpi ne, %20, %c0_i32_20 : i32
    scf.if %21 {
      %c17_141 = arith.constant 17 : index
      %c0_142 = arith.constant 0 : index
      %c0_143 = arith.constant 0 : index
      %124 = vector.load %arg13[%c17_141, %c0_142, %c0_143] : memref<18x18x128xbf16, #tpu.memory_space<vmem>>, vector<1x18x128xbf16>
      tpu.vector_store %arg13[%c17_141, %c0_142, %c0_143], %15 {strides = array<i32>} : memref<18x18x128xbf16, #tpu.memory_space<vmem>>, vector<1x18x128xbf16>,
    } else {
    }
    %c0_21 = arith.constant 0 : index
    %c0_22 = arith.constant 0 : index
    %c0_23 = arith.constant 0 : index
    %22 = vector.load %arg13[%c0_21, %c0_22, %c0_23] : memref<18x18x128xbf16, #tpu.memory_space<vmem>>, vector<16x16x128xbf16>
    %23 = vector.shape_cast %22 : vector<16x16x128xbf16> to vector<256x128xbf16>
    %c0_24 = arith.constant 0 : index
    %c0_25 = arith.constant 0 : index
    %c0_26 = arith.constant 0 : index
    %24 = vector.load %arg5[%c0_24, %c0_25, %c0_26] : memref<9x128x16xbf16, #tpu.memory_space<vmem>>, vector<1x128x16xbf16>
    %25 = vector.shape_cast %24 : vector<1x128x16xbf16> to vector<128x16xbf16>
    %cst_27 = arith.constant dense<0.000000e+00> : vector<256x16xf32>
    %26 = tpu.matmul %23, %25, %cst_27 {dimension_numbers = #tpu.dot_dimension_numbers<[1], [0], [0], [1], [0, 0, 1, 1], [], []>} : vector<256x128xbf16>, vector<128x16xbf16>, vector<256x16xf32> -> vector<256x16xf32>
    %c0_28 = arith.constant 0 : index
    %c0_29 = arith.constant 0 : index
    %27 = vector.load %arg14[%c0_28, %c0_29] : memref<256x16xf32, #tpu.memory_space<vmem>>, vector<256x16xf32>
    tpu.vector_store %arg14[%c0_28, %c0_29], %26 {strides = array<i32>} : memref<256x16xf32, #tpu.memory_space<vmem>>, vector<256x16xf32>,
    %c0_30 = arith.constant 0 : index
    %c1_31 = arith.constant 1 : index
    %c0_32 = arith.constant 0 : index
    %28 = vector.load %arg13[%c0_30, %c1_31, %c0_32] : memref<18x18x128xbf16, #tpu.memory_space<vmem>>, vector<16x16x128xbf16>
    %29 = vector.shape_cast %28 : vector<16x16x128xbf16> to vector<256x128xbf16>
    %c1_33 = arith.constant 1 : index
    %c0_34 = arith.constant 0 : index
    %c0_35 = arith.constant 0 : index
    %30 = vector.load %arg5[%c1_33, %c0_34, %c0_35] : memref<9x128x16xbf16, #tpu.memory_space<vmem>>, vector<1x128x16xbf16>
    %31 = vector.shape_cast %30 : vector<1x128x16xbf16> to vector<128x16xbf16>
    %cst_36 = arith.constant dense<0.000000e+00> : vector<256x16xf32>
    %32 = tpu.matmul %29, %31, %cst_36 {dimension_numbers = #tpu.dot_dimension_numbers<[1], [0], [0], [1], [0, 0, 1, 1], [], []>} : vector<256x128xbf16>, vector<128x16xbf16>, vector<256x16xf32> -> vector<256x16xf32>
    %c0_37 = arith.constant 0 : index
    %c0_38 = arith.constant 0 : index
    %33 = vector.load %arg14[%c0_37, %c0_38] : memref<256x16xf32, #tpu.memory_space<vmem>>, vector<256x16xf32>
    %34 = arith.addf %33, %32 : vector<256x16xf32>
    %c0_39 = arith.constant 0 : index
    %c0_40 = arith.constant 0 : index
    %35 = vector.load %arg14[%c0_39, %c0_40] : memref<256x16xf32, #tpu.memory_space<vmem>>, vector<256x16xf32>
    tpu.vector_store %arg14[%c0_39, %c0_40], %34 {strides = array<i32>} : memref<256x16xf32, #tpu.memory_space<vmem>>, vector<256x16xf32>,
    %c0_41 = arith.constant 0 : index
    %c2 = arith.constant 2 : index
    %c0_42 = arith.constant 0 : index
    %36 = vector.load %arg13[%c0_41, %c2, %c0_42] : memref<18x18x128xbf16, #tpu.memory_space<vmem>>, vector<16x16x128xbf16>
    %37 = vector.shape_cast %36 : vector<16x16x128xbf16> to vector<256x128xbf16>
    %c2_43 = arith.constant 2 : index
    %c0_44 = arith.constant 0 : index
    %c0_45 = arith.constant 0 : index
    %38 = vector.load %arg5[%c2_43, %c0_44, %c0_45] : memref<9x128x16xbf16, #tpu.memory_space<vmem>>, vector<1x128x16xbf16>
    %39 = vector.shape_cast %38 : vector<1x128x16xbf16> to vector<128x16xbf16>
    %cst_46 = arith.constant dense<0.000000e+00> : vector<256x16xf32>
    %40 = tpu.matmul %37, %39, %cst_46 {dimension_numbers = #tpu.dot_dimension_numbers<[1], [0], [0], [1], [0, 0, 1, 1], [], []>} : vector<256x128xbf16>, vector<128x16xbf16>, vector<256x16xf32> -> vector<256x16xf32>
    %c0_47 = arith.constant 0 : index
    %c0_48 = arith.constant 0 : index
    %41 = vector.load %arg14[%c0_47, %c0_48] : memref<256x16xf32, #tpu.memory_space<vmem>>, vector<256x16xf32>
    %42 = arith.addf %41, %40 : vector<256x16xf32>
    %c0_49 = arith.constant 0 : index
    %c0_50 = arith.constant 0 : index
    %43 = vector.load %arg14[%c0_49, %c0_50] : memref<256x16xf32, #tpu.memory_space<vmem>>, vector<256x16xf32>
    tpu.vector_store %arg14[%c0_49, %c0_50], %42 {strides = array<i32>} : memref<256x16xf32, #tpu.memory_space<vmem>>, vector<256x16xf32>,
    %c1_51 = arith.constant 1 : index
    %c0_52 = arith.constant 0 : index
    %c0_53 = arith.constant 0 : index
    %44 = vector.load %arg13[%c1_51, %c0_52, %c0_53] : memref<18x18x128xbf16, #tpu.memory_space<vmem>>, vector<16x16x128xbf16>
    %45 = vector.shape_cast %44 : vector<16x16x128xbf16> to vector<256x128xbf16>
    %c3 = arith.constant 3 : index
    %c0_54 = arith.constant 0 : index
    %c0_55 = arith.constant 0 : index
    %46 = vector.load %arg5[%c3, %c0_54, %c0_55] : memref<9x128x16xbf16, #tpu.memory_space<vmem>>, vector<1x128x16xbf16>
    %47 = vector.shape_cast %46 : vector<1x128x16xbf16> to vector<128x16xbf16>
    %cst_56 = arith.constant dense<0.000000e+00> : vector<256x16xf32>
    %48 = tpu.matmul %45, %47, %cst_56 {dimension_numbers = #tpu.dot_dimension_numbers<[1], [0], [0], [1], [0, 0, 1, 1], [], []>} : vector<256x128xbf16>, vector<128x16xbf16>, vector<256x16xf32> -> vector<256x16xf32>
    %c0_57 = arith.constant 0 : index
    %c0_58 = arith.constant 0 : index
    %49 = vector.load %arg14[%c0_57, %c0_58] : memref<256x16xf32, #tpu.memory_space<vmem>>, vector<256x16xf32>
    %50 = arith.addf %49, %48 : vector<256x16xf32>
    %c0_59 = arith.constant 0 : index
    %c0_60 = arith.constant 0 : index
    %51 = vector.load %arg14[%c0_59, %c0_60] : memref<256x16xf32, #tpu.memory_space<vmem>>, vector<256x16xf32>
    tpu.vector_store %arg14[%c0_59, %c0_60], %50 {strides = array<i32>} : memref<256x16xf32, #tpu.memory_space<vmem>>, vector<256x16xf32>,
    %c1_61 = arith.constant 1 : index
    %c1_62 = arith.constant 1 : index
    %c0_63 = arith.constant 0 : index
    %52 = vector.load %arg13[%c1_61, %c1_62, %c0_63] : memref<18x18x128xbf16, #tpu.memory_space<vmem>>, vector<16x16x128xbf16>
    %53 = vector.shape_cast %52 : vector<16x16x128xbf16> to vector<256x128xbf16>
    %c4 = arith.constant 4 : index
    %c0_64 = arith.constant 0 : index
    %c0_65 = arith.constant 0 : index
    %54 = vector.load %arg5[%c4, %c0_64, %c0_65] : memref<9x128x16xbf16, #tpu.memory_space<vmem>>, vector<1x128x16xbf16>
    %55 = vector.shape_cast %54 : vector<1x128x16xbf16> to vector<128x16xbf16>
    %cst_66 = arith.constant dense<0.000000e+00> : vector<256x16xf32>
    %56 = tpu.matmul %53, %55, %cst_66 {dimension_numbers = #tpu.dot_dimension_numbers<[1], [0], [0], [1], [0, 0, 1, 1], [], []>} : vector<256x128xbf16>, vector<128x16xbf16>, vector<256x16xf32> -> vector<256x16xf32>
    %c0_67 = arith.constant 0 : index
    %c0_68 = arith.constant 0 : index
    %57 = vector.load %arg14[%c0_67, %c0_68] : memref<256x16xf32, #tpu.memory_space<vmem>>, vector<256x16xf32>
    %58 = arith.addf %57, %56 : vector<256x16xf32>
    %c0_69 = arith.constant 0 : index
    %c0_70 = arith.constant 0 : index
    %59 = vector.load %arg14[%c0_69, %c0_70] : memref<256x16xf32, #tpu.memory_space<vmem>>, vector<256x16xf32>
    tpu.vector_store %arg14[%c0_69, %c0_70], %58 {strides = array<i32>} : memref<256x16xf32, #tpu.memory_space<vmem>>, vector<256x16xf32>,
    %c1_71 = arith.constant 1 : index
    %c2_72 = arith.constant 2 : index
    %c0_73 = arith.constant 0 : index
    %60 = vector.load %arg13[%c1_71, %c2_72, %c0_73] : memref<18x18x128xbf16, #tpu.memory_space<vmem>>, vector<16x16x128xbf16>
    %61 = vector.shape_cast %60 : vector<16x16x128xbf16> to vector<256x128xbf16>
    %c5 = arith.constant 5 : index
    %c0_74 = arith.constant 0 : index
    %c0_75 = arith.constant 0 : index
    %62 = vector.load %arg5[%c5, %c0_74, %c0_75] : memref<9x128x16xbf16, #tpu.memory_space<vmem>>, vector<1x128x16xbf16>
    %63 = vector.shape_cast %62 : vector<1x128x16xbf16> to vector<128x16xbf16>
    %cst_76 = arith.constant dense<0.000000e+00> : vector<256x16xf32>
    %64 = tpu.matmul %61, %63, %cst_76 {dimension_numbers = #tpu.dot_dimension_numbers<[1], [0], [0], [1], [0, 0, 1, 1], [], []>} : vector<256x128xbf16>, vector<128x16xbf16>, vector<256x16xf32> -> vector<256x16xf32>
    %c0_77 = arith.constant 0 : index
    %c0_78 = arith.constant 0 : index
    %65 = vector.load %arg14[%c0_77, %c0_78] : memref<256x16xf32, #tpu.memory_space<vmem>>, vector<256x16xf32>
    %66 = arith.addf %65, %64 : vector<256x16xf32>
    %c0_79 = arith.constant 0 : index
    %c0_80 = arith.constant 0 : index
    %67 = vector.load %arg14[%c0_79, %c0_80] : memref<256x16xf32, #tpu.memory_space<vmem>>, vector<256x16xf32>
    tpu.vector_store %arg14[%c0_79, %c0_80], %66 {strides = array<i32>} : memref<256x16xf32, #tpu.memory_space<vmem>>, vector<256x16xf32>,
    %c2_81 = arith.constant 2 : index
    %c0_82 = arith.constant 0 : index
    %c0_83 = arith.constant 0 : index
    %68 = vector.load %arg13[%c2_81, %c0_82, %c0_83] : memref<18x18x128xbf16, #tpu.memory_space<vmem>>, vector<16x16x128xbf16>
    %69 = vector.shape_cast %68 : vector<16x16x128xbf16> to vector<256x128xbf16>
    %c6 = arith.constant 6 : index
    %c0_84 = arith.constant 0 : index
    %c0_85 = arith.constant 0 : index
    %70 = vector.load %arg5[%c6, %c0_84, %c0_85] : memref<9x128x16xbf16, #tpu.memory_space<vmem>>, vector<1x128x16xbf16>
    %71 = vector.shape_cast %70 : vector<1x128x16xbf16> to vector<128x16xbf16>
    %cst_86 = arith.constant dense<0.000000e+00> : vector<256x16xf32>
    %72 = tpu.matmul %69, %71, %cst_86 {dimension_numbers = #tpu.dot_dimension_numbers<[1], [0], [0], [1], [0, 0, 1, 1], [], []>} : vector<256x128xbf16>, vector<128x16xbf16>, vector<256x16xf32> -> vector<256x16xf32>
    %c0_87 = arith.constant 0 : index
    %c0_88 = arith.constant 0 : index
    %73 = vector.load %arg14[%c0_87, %c0_88] : memref<256x16xf32, #tpu.memory_space<vmem>>, vector<256x16xf32>
    %74 = arith.addf %73, %72 : vector<256x16xf32>
    %c0_89 = arith.constant 0 : index
    %c0_90 = arith.constant 0 : index
    %75 = vector.load %arg14[%c0_89, %c0_90] : memref<256x16xf32, #tpu.memory_space<vmem>>, vector<256x16xf32>
    tpu.vector_store %arg14[%c0_89, %c0_90], %74 {strides = array<i32>} : memref<256x16xf32, #tpu.memory_space<vmem>>, vector<256x16xf32>,
    %c2_91 = arith.constant 2 : index
    %c1_92 = arith.constant 1 : index
    %c0_93 = arith.constant 0 : index
    %76 = vector.load %arg13[%c2_91, %c1_92, %c0_93] : memref<18x18x128xbf16, #tpu.memory_space<vmem>>, vector<16x16x128xbf16>
    %77 = vector.shape_cast %76 : vector<16x16x128xbf16> to vector<256x128xbf16>
    %c7 = arith.constant 7 : index
    %c0_94 = arith.constant 0 : index
    %c0_95 = arith.constant 0 : index
    %78 = vector.load %arg5[%c7, %c0_94, %c0_95] : memref<9x128x16xbf16, #tpu.memory_space<vmem>>, vector<1x128x16xbf16>
    %79 = vector.shape_cast %78 : vector<1x128x16xbf16> to vector<128x16xbf16>
    %cst_96 = arith.constant dense<0.000000e+00> : vector<256x16xf32>
    %80 = tpu.matmul %77, %79, %cst_96 {dimension_numbers = #tpu.dot_dimension_numbers<[1], [0], [0], [1], [0, 0, 1, 1], [], []>} : vector<256x128xbf16>, vector<128x16xbf16>, vector<256x16xf32> -> vector<256x16xf32>
    %c0_97 = arith.constant 0 : index
    %c0_98 = arith.constant 0 : index
    %81 = vector.load %arg14[%c0_97, %c0_98] : memref<256x16xf32, #tpu.memory_space<vmem>>, vector<256x16xf32>
    %82 = arith.addf %81, %80 : vector<256x16xf32>
    %c0_99 = arith.constant 0 : index
    %c0_100 = arith.constant 0 : index
    %83 = vector.load %arg14[%c0_99, %c0_100] : memref<256x16xf32, #tpu.memory_space<vmem>>, vector<256x16xf32>
    tpu.vector_store %arg14[%c0_99, %c0_100], %82 {strides = array<i32>} : memref<256x16xf32, #tpu.memory_space<vmem>>, vector<256x16xf32>,
    %c2_101 = arith.constant 2 : index
    %c2_102 = arith.constant 2 : index
    %c0_103 = arith.constant 0 : index
    %84 = vector.load %arg13[%c2_101, %c2_102, %c0_103] : memref<18x18x128xbf16, #tpu.memory_space<vmem>>, vector<16x16x128xbf16>
    %85 = vector.shape_cast %84 : vector<16x16x128xbf16> to vector<256x128xbf16>
    %c8 = arith.constant 8 : index
    %c0_104 = arith.constant 0 : index
    %c0_105 = arith.constant 0 : index
    %86 = vector.load %arg5[%c8, %c0_104, %c0_105] : memref<9x128x16xbf16, #tpu.memory_space<vmem>>, vector<1x128x16xbf16>
    %87 = vector.shape_cast %86 : vector<1x128x16xbf16> to vector<128x16xbf16>
    %cst_106 = arith.constant dense<0.000000e+00> : vector<256x16xf32>
    %88 = tpu.matmul %85, %87, %cst_106 {dimension_numbers = #tpu.dot_dimension_numbers<[1], [0], [0], [1], [0, 0, 1, 1], [], []>} : vector<256x128xbf16>, vector<128x16xbf16>, vector<256x16xf32> -> vector<256x16xf32>
    %c0_107 = arith.constant 0 : index
    %c0_108 = arith.constant 0 : index
    %89 = vector.load %arg14[%c0_107, %c0_108] : memref<256x16xf32, #tpu.memory_space<vmem>>, vector<256x16xf32>
    %90 = arith.addf %89, %88 : vector<256x16xf32>
    %c0_109 = arith.constant 0 : index
    %c0_110 = arith.constant 0 : index
    %91 = vector.load %arg14[%c0_109, %c0_110] : memref<256x16xf32, #tpu.memory_space<vmem>>, vector<256x16xf32>
    tpu.vector_store %arg14[%c0_109, %c0_110], %90 {strides = array<i32>} : memref<256x16xf32, #tpu.memory_space<vmem>>, vector<256x16xf32>,
    %c0_111 = arith.constant 0 : index
    %c0_112 = arith.constant 0 : index
    %92 = vector.load %arg14[%c0_111, %c0_112] : memref<256x16xf32, #tpu.memory_space<vmem>>, vector<256x16xf32>
    %c0_113 = arith.constant 0 : index
    %c0_114 = arith.constant 0 : index
    %93 = vector.load %arg6[%c0_113, %c0_114] : memref<1x16xf32, #tpu.memory_space<vmem>>, vector<1x16xf32>
    %94 = vector.broadcast %93 : vector<1x16xf32> to vector<256x16xf32>
    %95 = arith.addf %92, %94 : vector<256x16xf32>
    %96 = arith.negf %95 : vector<256x16xf32>
    %97 = math.exp %96 : vector<256x16xf32>
    %cst_115 = arith.constant 1.000000e+00 : f32
    %98 = vector.broadcast %cst_115 : f32 to vector<256x16xf32>
    %99 = arith.addf %98, %97 : vector<256x16xf32>
    %100 = arith.divf %98, %99 : vector<256x16xf32>
    %101 = vector.shape_cast %100 : vector<256x16xf32> to vector<16x16x16xf32>
    %102 = vector.extract_strided_slice %101 {offsets = [0, 0, 0], sizes = [16, 16, 8], strides = [1, 1, 1]} : vector<16x16x16xf32> to vector<16x16x8xf32>
    %103 = vector.shape_cast %102 : vector<16x16x8xf32> to vector<1x16x16x8xf32>
    %104 = vector.extract_strided_slice %101 {offsets = [0, 0, 8], sizes = [16, 16, 8], strides = [1, 1, 1]} : vector<16x16x16xf32> to vector<16x16x8xf32>
    %105 = vector.shape_cast %104 : vector<16x16x8xf32> to vector<1x16x16x8xf32>
    %c0_116 = arith.constant 0 : index
    %c0_117 = arith.constant 0 : index
    %c0_118 = arith.constant 0 : index
    %c0_119 = arith.constant 0 : index
    %106 = vector.load %arg7[%c0_116, %c0_117, %c0_118, %c0_119] : memref<1x16x16x8xf32, #tpu.memory_space<vmem>>, vector<1x16x16x8xf32>
    %c0_120 = arith.constant 0 : index
    %c0_121 = arith.constant 0 : index
    %c0_122 = arith.constant 0 : index
    %c0_123 = arith.constant 0 : index
    %107 = vector.load %arg8[%c0_120, %c0_121, %c0_122, %c0_123] : memref<1x1x1x8xf32, #tpu.memory_space<vmem>>, vector<1x1x1x8xf32>
    %108 = vector.broadcast %107 : vector<1x1x1x8xf32> to vector<1x16x16x8xf32>
    %109 = arith.subf %106, %108 : vector<1x16x16x8xf32>
    %c0_124 = arith.constant 0 : index
    %c0_125 = arith.constant 0 : index
    %c0_126 = arith.constant 0 : index
    %c0_127 = arith.constant 0 : index
    %110 = vector.load %arg9[%c0_124, %c0_125, %c0_126, %c0_127] : memref<1x1x1x8xf32, #tpu.memory_space<vmem>>, vector<1x1x1x8xf32>
    %111 = vector.broadcast %110 : vector<1x1x1x8xf32> to vector<1x16x16x8xf32>
    %112 = arith.mulf %109, %111 : vector<1x16x16x8xf32>
    %c0_128 = arith.constant 0 : index
    %c0_129 = arith.constant 0 : index
    %c0_130 = arith.constant 0 : index
    %c0_131 = arith.constant 0 : index
    %113 = vector.load %arg10[%c0_128, %c0_129, %c0_130, %c0_131] : memref<1x1x1x8xf32, #tpu.memory_space<vmem>>, vector<1x1x1x8xf32>
    %114 = vector.broadcast %113 : vector<1x1x1x8xf32> to vector<1x16x16x8xf32>
    %115 = arith.mulf %114, %103 : vector<1x16x16x8xf32>
    %cst_132 = arith.constant 1.000000e+00 : f32
    %116 = vector.broadcast %cst_132 : f32 to vector<1x16x16x8xf32>
    %117 = arith.addf %115, %116 : vector<1x16x16x8xf32>
    %118 = arith.mulf %117, %112 : vector<1x16x16x8xf32>
    %c0_133 = arith.constant 0 : index
    %c0_134 = arith.constant 0 : index
    %c0_135 = arith.constant 0 : index
    %c0_136 = arith.constant 0 : index
    %119 = vector.load %arg11[%c0_133, %c0_134, %c0_135, %c0_136] : memref<1x1x1x8xf32, #tpu.memory_space<vmem>>, vector<1x1x1x8xf32>
    %120 = vector.broadcast %119 : vector<1x1x1x8xf32> to vector<1x16x16x8xf32>
    %121 = arith.mulf %120, %105 : vector<1x16x16x8xf32>
    %122 = arith.addf %118, %121 : vector<1x16x16x8xf32>
    %c0_137 = arith.constant 0 : index
    %c0_138 = arith.constant 0 : index
    %c0_139 = arith.constant 0 : index
    %c0_140 = arith.constant 0 : index
    %123 = vector.load %arg12[%c0_137, %c0_138, %c0_139, %c0_140] : memref<1x16x16x8xf32, #tpu.memory_space<vmem>>, vector<1x16x16x8xf32>
    tpu.vector_store %arg12[%c0_137, %c0_138, %c0_139, %c0_140], %122 {strides = array<i32>} : memref<1x16x16x8xf32, #tpu.memory_space<vmem>>, vector<1x16x16x8xf32>,
    return
  }
  func.func @transform_0(%arg0: i32, %arg1: i32) -> (i32, i32, i32, i32, i32) {
    %c0_i32 = arith.constant 0 : i32
    %c0_i32_0 = arith.constant 0 : i32
    %c0_i32_1 = arith.constant 0 : i32
    %c0_i32_2 = arith.constant 0 : i32
    return %arg0, %arg1, %c0_i32, %c0_i32_0, %c0_i32_1 : i32, i32, i32, i32, i32
  }
  func.func @transform_1(%arg0: i32, %arg1: i32) -> (i32, i32) {
    %c0_i32 = arith.constant 0 : i32
    %c0_i32_0 = arith.constant 0 : i32
    %c0_i32_1 = arith.constant 0 : i32
    return %c0_i32, %c0_i32_0 : i32, i32
  }
  func.func @transform_2(%arg0: i32, %arg1: i32) -> (i32, i32) {
    %c0_i32 = arith.constant 0 : i32
    %c0_i32_0 = arith.constant 0 : i32
    %c0_i32_1 = arith.constant 0 : i32
    return %c0_i32, %c0_i32_0 : i32, i32
  }
  func.func @transform_3(%arg0: i32, %arg1: i32) -> (i32, i32, i32) {
    %c0_i32 = arith.constant 0 : i32
    %c0_i32_0 = arith.constant 0 : i32
    %c0_i32_1 = arith.constant 0 : i32
    %c0_i32_2 = arith.constant 0 : i32
    return %c0_i32, %c0_i32_0, %c0_i32_1 : i32, i32, i32
  }
  func.func @transform_4(%arg0: i32, %arg1: i32) -> (i32, i32) {
    %c0_i32 = arith.constant 0 : i32
    %c0_i32_0 = arith.constant 0 : i32
    %c0_i32_1 = arith.constant 0 : i32
    return %c0_i32, %c0_i32_0 : i32, i32
  }
  func.func @transform_5(%arg0: i32, %arg1: i32) -> (i32, i32, i32, i32) {
    %c0_i32 = arith.constant 0 : i32
    %c0_i32_0 = arith.constant 0 : i32
    %c0_i32_1 = arith.constant 0 : i32
    return %arg0, %arg1, %c0_i32, %c0_i32_0 : i32, i32, i32, i32
  }
  func.func @transform_6(%arg0: i32, %arg1: i32) -> (i32, i32, i32, i32) {
    %c0_i32 = arith.constant 0 : i32
    %c0_i32_0 = arith.constant 0 : i32
    %c0_i32_1 = arith.constant 0 : i32
    %c0_i32_2 = arith.constant 0 : i32
    return %arg0, %c0_i32, %c0_i32_0, %c0_i32_1 : i32, i32, i32, i32
  }
  func.func @transform_7(%arg0: i32, %arg1: i32) -> (i32, i32, i32, i32) {
    %c0_i32 = arith.constant 0 : i32
    %c0_i32_0 = arith.constant 0 : i32
    %c0_i32_1 = arith.constant 0 : i32
    %c0_i32_2 = arith.constant 0 : i32
    return %arg0, %c0_i32, %c0_i32_0, %c0_i32_1 : i32, i32, i32, i32
  }
  func.func @transform_8(%arg0: i32, %arg1: i32) -> (i32, i32, i32, i32) {
    %c0_i32 = arith.constant 0 : i32
    %c0_i32_0 = arith.constant 0 : i32
    %c0_i32_1 = arith.constant 0 : i32
    %c0_i32_2 = arith.constant 0 : i32
    return %arg0, %c0_i32, %c0_i32_0, %c0_i32_1 : i32, i32, i32, i32
  }
  func.func @transform_9(%arg0: i32, %arg1: i32) -> (i32, i32, i32, i32) {
    %c0_i32 = arith.constant 0 : i32
    %c0_i32_0 = arith.constant 0 : i32
    %c0_i32_1 = arith.constant 0 : i32
    %c0_i32_2 = arith.constant 0 : i32
    return %arg0, %c0_i32, %c0_i32_0, %c0_i32_1 : i32, i32, i32, i32
  }
  func.func @transform_10(%arg0: i32, %arg1: i32) -> (i32, i32, i32, i32) {
    %c0_i32 = arith.constant 0 : i32
    %c0_i32_0 = arith.constant 0 : i32
    %c0_i32_1 = arith.constant 0 : i32
    return %arg0, %arg1, %c0_i32, %c0_i32_0 : i32, i32, i32, i32
  }
}

</mosaic_0001>

<bundles_post_ra>
// kernel: adaptive_instance_norm_forward.2
= control target key start
LH: loop header
LB: loop body
LE: loop exit
PB: predicated region body
PF: predicated region fallthrough
CT: control target
= control target key end

     0   :  { %s618_s9 = smov 0   ;;  %s620_s10 = smov 0   ;;  %s937_s0 = inlined_call_operand.vmem [shape: f32[2,16,16,8], index: 0, kind: input, shape index: {}]   ;;  %s938_s1 = inlined_call_operand.vmem [shape: f32[2,1,1,8], index: 1, kind: output, shape index: {0}]   ;;  %s939_s2 = inlined_call_operand.vmem [shape: f32[2,1,1,8], index: 2, kind: output, shape index: {1}]  }
   0x1   :  { %s622_s11 = smov 0  }
   0x2 LB: > { %s25_s12 = sadd.s32 1, %s596_s10  ;;  %p545_p0 = scmp.ge.s32.totalorder %s600_s11, 1  ;;  %s600_s11 = sphi %s622_s11, %s13_s11   ;;  %s596_s10 = sphi %s620_s10, %s941_s10   ;;  %s592_s9 = sphi %s618_s9, %s940_s9  }
   0x3   : > { %p27_p1 = scmp.ge.s32.totalorder %s25_s12, 2  ;;  %p135_p2 = scmp.lt.s32.totalorder %s600_s11, 3 }
   0x5   : > { %s943_s12 = smov (%p27_p1, %s25_s12), 0  ;;  %p136_p3 = pnand %p545_p0, %p135_p2 }
   0x6   : > { %p164_p4 = scmp.lt.s32.totalorder (!%p136_p3), %s592_s9, 1  ;;  %vm184_vm0 = vcmask (!%p136_p3), 57344   ;;  %vm219_vm1 = vcmask (!%p136_p3), 64512   ;;  %v602_v0 = vmov (!%p136_p3), 0.0  }
   0x7   : > { %139 = sbr.rel (%p136_p3) target bundleno = 202 (0xca), region = 24 }
   0xe   : > { %s945_s9 = smov (!%p164_p4, %s592_s9), 1 }
   0xf   : > { %s550_s13 = sshll.u32 %s945_s9, 8  ;;  %s639_s16 = scalar_lea.vmem %s938_s1, %s945_s9 }
  0x10   : > { %s644_s19 = scalar_lea.vmem %s937_s0, %s550_s13  ;;  %185 = vst.msk [vmem:[%s639_s16] sm:$0x1] %vm184_vm0, %v602_v0  ;;  %s651_s22 = scalar_lea.vmem %s939_s2, %s945_s9 }
  0x11   : > { %v654_v1 = vld [vmem:[%s644_s19] sm:$0xff]  ;;  %v657_v2 = vld [vmem:[%s644_s19 + $0x8] sm:$0xff]  ;;  %v660_v3 = vld [vmem:[%s644_s19 + $0x10] sm:$0xff]  ;;  %186 = vst.msk [vmem:[%s651_s22] sm:$0x1] %vm184_vm0, %v602_v0 }
  0x12   : > { %v665_v4 = vld [vmem:[%s644_s19 + $0x18] sm:$0xff]  ;;  %v220_v5 = vsel %vm219_vm1, %v654_v1, 0.0  ;;  %v221_v6 = vsel %vm219_vm1, %v657_v2, 0.0  ;;  %v223_v7 = vsel %vm219_vm1, %v660_v3, 0.0  ;;  %v674_v8 = vld [vmem:[%s644_s19 + $0x20] sm:$0xff]  ;;  %v679_v11 = vld [vmem:[%s644_s19 + $0x28] sm:$0xff] }
  0x13   : > { %v222_v9 = vadd.f32 %v221_v6, %v220_v5  ;;  %v225_v10 = vsel %vm219_vm1, %v665_v4, 0.0  ;;  %v227_v13 = vsel %vm219_vm1, %v674_v8, 0.0  ;;  %v684_v14 = vld [vmem:[%s644_s19 + $0x30] sm:$0xff]  ;;  %v229_v16 = vsel %vm219_vm1, %v679_v11, 0.0  ;;  %v689_v17 = vld [vmem:[%s644_s19 + $0x38] sm:$0xff]  ;;  %v694_v20 = vld [vmem:[%s644_s19 + $0x40] sm:$0xff] }
  0x14   : > { %v231_v19 = vsel %vm219_vm1, %v684_v14, 0.0  ;;  %v233_v22 = vsel %vm219_vm1, %v689_v17, 0.0  ;;  %v699_v23 = vld [vmem:[%s644_s19 + $0x48] sm:$0xff]  ;;  %v235_v25 = vsel %vm219_vm1, %v694_v20, 0.0  ;;  %v704_v26 = vld [vmem:[%s644_s19 + $0x50] sm:$0xff]  ;;  %v709_v29 = vld [vmem:[%s644_s19 + $0x58] sm:$0xff] }
  0x15   : > { %v224_v12 = vadd.f32 %v223_v7, %v222_v9  ;;  %v237_v28 = vsel %vm219_vm1, %v699_v23, 0.0  ;;  %v239_v31 = vsel %vm219_vm1, %v704_v26, 0.0  ;;  %v714_v32 = vld [vmem:[%s644_s19 + $0x60] sm:$0xff]  ;;  %v241_v34 = vsel %vm219_vm1, %v709_v29, 0.0  ;;  %v719_v35 = vld [vmem:[%s644_s19 + $0x68] sm:$0xff]  ;;  %v724_v38 = vld [vmem:[%s644_s19 + $0x70] sm:$0xff] }
  0x16   : > { %v243_v37 = vsel %vm219_vm1, %v714_v32, 0.0  ;;  %v245_v40 = vsel %vm219_vm1, %v719_v35, 0.0  ;;  %v729_v41 = vld [vmem:[%s644_s19 + $0x78] sm:$0xff]  ;;  %v247_v43 = vsel %vm219_vm1, %v724_v38, 0.0  ;;  %v734_v44 = vld [vmem:[%s644_s19 + $0x80] sm:$0xff]  ;;  %v739_v47 = vld [vmem:[%s644_s19 + $0x88] sm:$0xff] }
  0x17   : > { %v226_v15 = vadd.f32 %v225_v10, %v224_v12  ;;  %v249_v46 = vsel %vm219_vm1, %v729_v41, 0.0  ;;  %v251_v49 = vsel %vm219_vm1, %v734_v44, 0.0  ;;  %v744_v50 = vld [vmem:[%s644_s19 + $0x90] sm:$0xff]  ;;  %v253_v52 = vsel %vm219_vm1, %v739_v47, 0.0  ;;  %v749_v53 = vld [vmem:[%s644_s19 + $0x98] sm:$0xff]  ;;  %v754_v56 = vld [vmem:[%s644_s19 + $0xa0] sm:$0xff] }
  0x18   : > { %v255_v55 = vsel %vm219_vm1, %v744_v50, 0.0  ;;  %v257_v58 = vsel %vm219_vm1, %v749_v53, 0.0  ;;  %v759_v59 = vld [vmem:[%s644_s19 + $0xa8] sm:$0xff]  ;;  %v259_v61 = vsel %vm219_vm1, %v754_v56, 0.0  ;;  %v764_v62 = vld [vmem:[%s644_s19 + $0xb0] sm:$0xff]  ;;  %v769_v5 = vld [vmem:[%s644_s19 + $0xb8] sm:$0xff] }
  0x19   : > { %v228_v18 = vadd.f32 %v227_v13, %v226_v15  ;;  %v261_v0 = vsel %vm219_vm1, %v759_v59, 0.0  ;;  %v263_v7 = vsel %vm219_vm1, %v764_v62, 0.0  ;;  %v774_v9 = vld [vmem:[%s644_s19 + $0xc0] sm:$0xff]  ;;  %v265_v12 = vsel %vm219_vm1, %v769_v5, 0.0  ;;  %v779_v13 = vld [vmem:[%s644_s19 + $0xc8] sm:$0xff] }
  0x1b   : > { %v230_v21 = vadd.f32 %v229_v16, %v228_v18  ;;  %v267_v16 = vsel %vm219_vm1, %v774_v9, 0.0  ;;  %v784_v18 = vld [vmem:[%s644_s19 + $0xd0] sm:$0xff] }
  0x1d   : > { %v232_v24 = vadd.f32 %v231_v19, %v230_v21  ;;  %v269_v21 = vsel %vm219_vm1, %v779_v13, 0.0 }
  0x1f   : > { %v234_v27 = vadd.f32 %v233_v22, %v232_v24  ;;  %v789_v22 = vld [vmem:[%s644_s19 + $0xd8] sm:$0xff] }
  0x21   : > { %v236_v30 = vadd.f32 %v235_v25, %v234_v27  ;;  %v271_v25 = vsel %vm219_vm1, %v784_v18, 0.0  ;;  %v794_v27 = vld [vmem:[%s644_s19 + $0xe0] sm:$0xff] }
  0x23   : > { %v238_v33 = vadd.f32 %v237_v28, %v236_v30  ;;  %v273_v30 = vsel %vm219_vm1, %v789_v22, 0.0 }
  0x25   : > { %v240_v36 = vadd.f32 %v239_v31, %v238_v33  ;;  %v799_v31 = vld [vmem:[%s644_s19 + $0xe8] sm:$0xff] }
  0x27   : > { %v242_v39 = vadd.f32 %v241_v34, %v240_v36  ;;  %v275_v34 = vsel %vm219_vm1, %v794_v27, 0.0  ;;  %v804_v36 = vld [vmem:[%s644_s19 + $0xf0] sm:$0xff] }
  0x29   : > { %v244_v42 = vadd.f32 %v243_v37, %v242_v39  ;;  %v277_v39 = vsel %vm219_vm1, %v799_v31, 0.0 }
  0x2b   : > { %v246_v45 = vadd.f32 %v245_v40, %v244_v42  ;;  %v809_v40 = vld [vmem:[%s644_s19 + $0xf8] sm:$0xff] }
  0x2d   : > { %v248_v48 = vadd.f32 %v247_v43, %v246_v45  ;;  %v279_v43 = vsel %vm219_vm1, %v804_v36, 0.0 }
  0x2f   : > { %v250_v51 = vadd.f32 %v249_v46, %v248_v48  ;;  %v281_v46 = vsel %vm219_vm1, %v809_v40, 0.0 }
  0x31   : > { %v252_v54 = vadd.f32 %v251_v49, %v250_v51 }
  0x33   : > { %v254_v57 = vadd.f32 %v253_v52, %v252_v54 }
  0x35   : > { %v256_v60 = vadd.f32 %v255_v55, %v254_v57 }
  0x37   : > { %v258_v63 = vadd.f32 %v257_v58, %v256_v60  ;;  %v428_v60 = vld [vmem:[%s639_s16] sm:$0x1] }
  0x39   : > { %v260_v6 = vadd.f32 %v259_v61, %v258_v63 }
  0x3b   : > { %v262_v10 = vadd.f32 %v261_v0, %v260_v6 }
  0x3d   : > { %v264_v15 = vadd.f32 %v263_v7, %v262_v10 }
  0x3f   : > { %v266_v19 = vadd.f32 %v265_v12, %v264_v15 }
  0x41   : > { %v268_v24 = vadd.f32 %v267_v16, %v266_v19 }
  0x43   : > { %v270_v28 = vadd.f32 %v269_v21, %v268_v24 }
  0x45   : > { %v272_v33 = vadd.f32 %v271_v25, %v270_v28 }
  0x47   : > { %v274_v37 = vadd.f32 %v273_v30, %v272_v33 }
  0x49   : > { %v276_v42 = vadd.f32 %v275_v34, %v274_v37 }
  0x4b   : > { %v278_v45 = vadd.f32 %v277_v39, %v276_v42 }
  0x4d   : > { %v280_v48 = vadd.f32 %v279_v43, %v278_v45 }
  0x4f   : > { %v282_v49 = vadd.f32 %v281_v46, %v280_v48 }
  0x51   : > { %v283_v51 = vrot.slane %v282_v49, 4 }
  0x53   : > { %v284_v52 = vadd.f32 %v283_v51, %v282_v49 }
  0x55   : > { %v285_v54 = vrot.slane %v284_v52, 2 }
  0x57   : > { %v286_v55 = vadd.f32 %v285_v54, %v284_v52 }
  0x59   : > { %v287_v57 = vrot.slane %v286_v55, 1 }
  0x5b   : > { %v288_v58 = vadd.f32 %v287_v57, %v286_v55 }
  0x5d   : > { %v816_v61 = vmul.f32 0.00390625, %v288_v58 }
  0x5f   : > { %v819_v63 = vsub.f32 %v816_v61, %v428_v60  ;;  %v290_v6 = vsub.f32 %v654_v1, %v816_v61  ;;  %v291_v7 = vsub.f32 %v657_v2, %v816_v61  ;;  %v292_v10 = vsub.f32 %v660_v3, %v816_v61 }
  0x60   : > { %v293_v12 = vsub.f32 %v665_v4, %v816_v61  ;;  %v294_v15 = vsub.f32 %v674_v8, %v816_v61  ;;  %v295_v24 = vsub.f32 %v679_v11, %v816_v61  ;;  %v296_v1 = vsub.f32 %v684_v14, %v816_v61 }
  0x61   : > { %v432_v0 = vadd.f32 %v819_v63, %v428_v60  ;;  %v322_v16 = vmul.f32 %v290_v6, %v290_v6  ;;  %v323_v19 = vmul.f32 %v291_v7, %v291_v7  ;;  %v324_v21 = vmul.f32 %v292_v10, %v292_v10 }
  0x62   : > { %v325_v25 = vmul.f32 %v293_v12, %v293_v12  ;;  %v326_v2 = vmul.f32 %v294_v15, %v294_v15  ;;  %v297_v8 = vsub.f32 %v689_v17, %v816_v61  ;;  %v327_v33 = vmul.f32 %v295_v24, %v295_v24 }
  0x63   : > { %434 = vst.msk [vmem:[%s639_s16] sm:$0x1] %vm184_vm0, %v432_v0  ;;  %v354_v28 = vsel %vm219_vm1, %v322_v16, 0.0  ;;  %v355_v3 = vsel %vm219_vm1, %v323_v19, 0.0  ;;  %v357_v4 = vsel %vm219_vm1, %v324_v21, 0.0  ;;  %v298_v11 = vsub.f32 %v694_v20, %v816_v61 }
  0x64   : > { %v356_v30 = vadd.f32 %v355_v3, %v354_v28  ;;  %v359_v34 = vsel %vm219_vm1, %v325_v25, 0.0  ;;  %v328_v39 = vmul.f32 %v296_v1, %v296_v1  ;;  %v361_v14 = vsel %vm219_vm1, %v326_v2, 0.0 }
  0x65   : > { %v299_v43 = vsub.f32 %v699_v23, %v816_v61  ;;  %v329_v45 = vmul.f32 %v297_v8, %v297_v8  ;;  %v363_v46 = vsel %vm219_vm1, %v327_v33, 0.0  ;;  %v300_v17 = vsub.f32 %v704_v26, %v816_v61 }
  0x66   : > { %v358_v37 = vadd.f32 %v357_v4, %v356_v30  ;;  %v330_v49 = vmul.f32 %v298_v11, %v298_v11  ;;  %v365_v51 = vsel %vm219_vm1, %v328_v39, 0.0  ;;  %v301_v20 = vsub.f32 %v709_v29, %v816_v61 }
  0x67   : > { %v331_v54 = vmul.f32 %v299_v43, %v299_v43  ;;  %v367_v55 = vsel %vm219_vm1, %v329_v45, 0.0  ;;  %v302_v23 = vsub.f32 %v714_v32, %v816_v61  ;;  %v332_v58 = vmul.f32 %v300_v17, %v300_v17 }
  0x68   : > { %v360_v42 = vadd.f32 %v359_v34, %v358_v37  ;;  %v369_v60 = vsel %vm219_vm1, %v330_v49, 0.0  ;;  %v303_v26 = vsub.f32 %v719_v35, %v816_v61  ;;  %v333_v6 = vmul.f32 %v301_v20, %v301_v20 }
  0x69   : > { %v371_v7 = vsel %vm219_vm1, %v331_v54, 0.0  ;;  %v304_v29 = vsub.f32 %v724_v38, %v816_v61  ;;  %v334_v12 = vmul.f32 %v302_v23, %v302_v23  ;;  %v373_v15 = vsel %vm219_vm1, %v332_v58, 0.0 }
  0x6a   : > { %v362_v48 = vadd.f32 %v361_v14, %v360_v42  ;;  %v305_v32 = vsub.f32 %v729_v41, %v816_v61  ;;  %v335_v19 = vmul.f32 %v303_v26, %v303_v26  ;;  %v375_v21 = vsel %vm219_vm1, %v333_v6, 0.0 }
  0x6b   : > { %v306_v35 = vsub.f32 %v734_v44, %v816_v61  ;;  %v336_v25 = vmul.f32 %v304_v29, %v304_v29  ;;  %v377_v1 = vsel %vm219_vm1, %v334_v12, 0.0  ;;  %v307_v38 = vsub.f32 %v739_v47, %v816_v61 }
  0x6c   : > { %v364_v52 = vadd.f32 %v363_v46, %v362_v48  ;;  %v337_v28 = vmul.f32 %v305_v32, %v305_v32  ;;  %v379_v3 = vsel %vm219_vm1, %v335_v19, 0.0  ;;  %v308_v41 = vsub.f32 %v744_v50, %v816_v61 }
  0x6d   : > { %v338_v30 = vmul.f32 %v306_v35, %v306_v35  ;;  %v381_v8 = vsel %vm219_vm1, %v336_v25, 0.0  ;;  %v309_v44 = vsub.f32 %v749_v53, %v816_v61  ;;  %v339_v34 = vmul.f32 %v307_v38, %v307_v38 }
  0x6e   : > { %v366_v57 = vadd.f32 %v365_v51, %v364_v52  ;;  %v383_v37 = vsel %vm219_vm1, %v337_v28, 0.0  ;;  %v310_v47 = vsub.f32 %v754_v56, %v816_v61  ;;  %v340_v39 = vmul.f32 %v308_v41, %v308_v41 }
  0x6f   : > { %v385_v14 = vsel %vm219_vm1, %v338_v30, 0.0  ;;  %v311_v50 = vsub.f32 %v759_v59, %v816_v61  ;;  %v341_v43 = vmul.f32 %v309_v44, %v309_v44  ;;  %v387_v45 = vsel %vm219_vm1, %v339_v34, 0.0 }
  0x70   : > { %v368_v0 = vadd.f32 %v367_v55, %v366_v57  ;;  %v312_v53 = vsub.f32 %v764_v62, %v816_v61  ;;  %v342_v48 = vmul.f32 %v310_v47, %v310_v47  ;;  %v389_v17 = vsel %vm219_vm1, %v340_v39, 0.0 }
  0x71   : > { %v313_v56 = vsub.f32 %v769_v5, %v816_v61  ;;  %v343_v51 = vmul.f32 %v311_v50, %v311_v50  ;;  %v391_v52 = vsel %vm219_vm1, %v341_v43, 0.0  ;;  %v314_v59 = vsub.f32 %v774_v9, %v816_v61 }
  0x72   : > { %v370_v10 = vadd.f32 %v369_v60, %v368_v0  ;;  %v344_v54 = vmul.f32 %v312_v53, %v312_v53  ;;  %v393_v55 = vsel %vm219_vm1, %v342_v48, 0.0  ;;  %v315_v62 = vsub.f32 %v779_v13, %v816_v61 }
  0x73   : > { %v345_v23 = vmul.f32 %v313_v56, %v313_v56  ;;  %v395_v58 = vsel %vm219_vm1, %v343_v51, 0.0  ;;  %v316_v5 = vsub.f32 %v784_v18, %v816_v61  ;;  %v346_v0 = vmul.f32 %v314_v59, %v314_v59 }
  0x74   : > { %v372_v16 = vadd.f32 %v371_v7, %v370_v10  ;;  %v397_v26 = vsel %vm219_vm1, %v344_v54, 0.0  ;;  %v317_v9 = vsub.f32 %v789_v22, %v816_v61  ;;  %v347_v7 = vmul.f32 %v315_v62, %v315_v62 }
  0x75   : > { %v399_v10 = vsel %vm219_vm1, %v345_v23, 0.0  ;;  %v318_v13 = vsub.f32 %v794_v27, %v816_v61  ;;  %v348_v12 = vmul.f32 %v316_v5, %v316_v5  ;;  %v319_v18 = vsub.f32 %v799_v31, %v816_v61 }
  0x76   : > { %v374_v24 = vadd.f32 %v373_v15, %v372_v16  ;;  %v401_v15 = vsel %vm219_vm1, %v346_v0, 0.0  ;;  %v349_v32 = vmul.f32 %v317_v9, %v317_v9  ;;  %v403_v19 = vsel %vm219_vm1, %v347_v7, 0.0 }
  0x77   : > { %v320_v22 = vsub.f32 %v804_v36, %v816_v61  ;;  %v405_v35 = vsel %vm219_vm1, %v348_v12, 0.0  ;;  %v321_v27 = vsub.f32 %v809_v40, %v816_v61 }
  0x78   : > { %v376_v2 = vadd.f32 %v375_v21, %v374_v24  ;;  %v350_v24 = vmul.f32 %v318_v13, %v318_v13 }
  0x79   : > { %v352_v28 = vmul.f32 %v320_v22, %v320_v22 }
  0x7a   : > { %v378_v4 = vadd.f32 %v377_v1, %v376_v2  ;;  %v351_v1 = vmul.f32 %v319_v18, %v319_v18  ;;  %v407_v2 = vsel %vm219_vm1, %v349_v32, 0.0  ;;  %v409_v31 = vsel %vm219_vm1, %v350_v24, 0.0 }
  0x7b   : > { %v413_v30 = vsel %vm219_vm1, %v352_v28, 0.0 }
  0x7c   : > { %v380_v33 = vadd.f32 %v379_v3, %v378_v4  ;;  %v353_v4 = vmul.f32 %v321_v27, %v321_v27  ;;  %v411_v41 = vsel %vm219_vm1, %v351_v1, 0.0 }
  0x7e   : > { %v382_v11 = vadd.f32 %v381_v8, %v380_v33  ;;  %v415_v40 = vsel %vm219_vm1, %v353_v4, 0.0 }
  0x80   : > { %v384_v42 = vadd.f32 %v383_v37, %v382_v11  ;;  %v437_v11 = vmul.f32 %v819_v63, %v819_v63 }
  0x82   : > { %v386_v46 = vadd.f32 %v385_v14, %v384_v42  ;;  %v435_v14 = vld [vmem:[%s651_s22] sm:$0x1]  ;;  %v441_v42 = vmul.f32 0.0, %v437_v11 }
  0x84   : > { %v388_v49 = vadd.f32 %v387_v45, %v386_v46 }
  0x86   : > { %v390_v20 = vadd.f32 %v389_v17, %v388_v49 }
  0x88   : > { %v392_v57 = vadd.f32 %v391_v52, %v390_v20 }
  0x8a   : > { %v394_v60 = vadd.f32 %v393_v55, %v392_v57 }
  0x8c   : > { %v396_v6 = vadd.f32 %v395_v58, %v394_v60 }
  0x8e   : > { %v398_v29 = vadd.f32 %v397_v26, %v396_v6 }
  0x90   : > { %v400_v16 = vadd.f32 %v399_v10, %v398_v29 }
  0x92   : > { %v402_v21 = vadd.f32 %v401_v15, %v400_v16 }
  0x94   : > { %v404_v25 = vadd.f32 %v403_v19, %v402_v21 }
  0x96   : > { %v406_v38 = vadd.f32 %v405_v35, %v404_v25 }
  0x98   : > { %v408_v3 = vadd.f32 %v407_v2, %v406_v38 }
  0x9a   : > { %v410_v36 = vadd.f32 %v409_v31, %v408_v3 }
  0x9c   : > { %v412_v8 = vadd.f32 %v411_v41, %v410_v36 }
  0x9e   : > { %v414_v61 = vadd.f32 %v413_v30, %v412_v8 }
  0xa0   : > { %v416_v33 = vadd.f32 %v415_v40, %v414_v61 }
  0xa2   : > { %v417_v44 = vrot.slane %v416_v33, 4 }
  0xa4   : > { %v418_v34 = vadd.f32 %v417_v44, %v416_v33 }
  0xa6   : > { %v419_v37 = vrot.slane %v418_v34, 2 }
  0xa8   : > { %v420_v47 = vadd.f32 %v419_v37, %v418_v34 }
  0xaa   : > { %v421_v39 = vrot.slane %v420_v47, 1 }
  0xac   : > { %v422_v50 = vadd.f32 %v421_v39, %v420_v47 }
  0xae   : > { %v436_v43 = vadd.f32 %v435_v14, %v422_v50 }
  0xb0   : > { %v442_v45 = vadd.f32 %v441_v42, %v436_v43 }
  0xb2   : > { %443 = vst.msk [vmem:[%s651_s22] sm:$0x1] %vm184_vm0, %v442_v45 }
  0xb9   : > { %v447_v46 = vld [vmem:[%s651_s22] sm:$0x1] }
  0xba   : > { %v448_v53 = vmul.f32 0.00390625, %v447_v46 }
  0xbc   : > { %v449_v48 = vadd.f32 1e-05, %v448_v53 }
  0xbe   : > { %576 = vrsqrt.f32 %v449_v48 }
  0xc8   : > { %v577_v17 = vpop.eup %576 }
  0xc9   : > { %451 = vst.msk [vmem:[%s651_s22] sm:$0x1] %vm184_vm0, %v577_v17 }
  0xca PF: > { %s13_s11 = sadd.s32 1, %s600_s11   ;;  %s940_s9 = smov %s596_s10 }
  0xcb   : > { %p10_p5 = scmp.ge.s32.totalorder %s13_s11, 4   ;;  %s941_s10 = smov %s943_s12 }
  0xcd   :  { %12 = sbr.rel (!%p10_p5) target bundleno = 2 (0x2), region = 74 }

// kernel: adaptive_instance_norm_forward.3
= control target key start
LH: loop header
LB: loop body
LE: loop exit
PB: predicated region body
PF: predicated region fallthrough
CT: control target
= control target key end

     0   :  { %s9681_s13 = smov 0   ;;  %s9683_s14 = smov 0   ;;  %s11931_s0 = inlined_call_operand.vmem [shape: bf16[2,1,18,16,36], index: 0, kind: input, shape index: {}]   ;;  %s11932_s1 = inlined_call_operand.vmem [shape: bf16[36,128], index: 1, kind: input, shape index: {}]   ;;  %s11933_s2 = inlined_call_operand.vmem [shape: f32[1,128], index: 2, kind: input, shape index: {}]   ;;  %s11934_s3 = inlined_call_operand.vmem [shape: bf16[9,128,16], index: 3, kind: input, shape index: {}]   ;;  %s11935_s4 = inlined_call_operand.vmem [shape: f32[1,16], index: 4, kind: input, shape index: {}]   ;;  %s11936_s5 = inlined_call_operand.vmem [shape: f32[2,16,16,8], index: 5, kind: input, shape index: {}]   ;;  %s11937_s6 = inlined_call_operand.vmem [shape: f32[2,1,1,8], index: 6, kind: input, shape index: {}]   ;;  %s11938_s7 = inlined_call_operand.vmem [shape: f32[2,1,1,8], index: 7, kind: input, shape index: {}]   ;;  %s11939_s8 = inlined_call_operand.vmem [shape: f32[2,1,1,8], index: 8, kind: input, shape index: {}]   ;;  %s11940_s9 = inlined_call_operand.vmem [shape: f32[2,1,1,8], index: 9, kind: input, shape index: {}]   ;;  %s11941_s10 = inlined_call_operand.vmem [shape: f32[2,16,16,8], index: 10, kind: output, shape index: {}]  }
   0x1   :  { %s9685_s15 = smov 0  }
   0x2 LB: > { %s32_s16 = sadd.s32 1, %s9618_s14  ;;  %p8037_p0 = scmp.ge.s32.totalorder %s9622_s15, 1  ;;  %s9622_s15 = sphi %s9685_s15, %s20_s15   ;;  %s9618_s14 = sphi %s9683_s14, %s11955_s14   ;;  %s9614_s13 = sphi %s9681_s13, %s11954_s13  }
   0x3   : > { %p34_p1 = scmp.ge.s32.totalorder %s32_s16, 2  ;;  %p382_p2 = scmp.lt.s32.totalorder %s9622_s15, 3 }
   0x5   : > { %s11957_s16 = smov (%p34_p1, %s32_s16), 0  ;;  %p383_p3 = pnand %p8037_p0, %p382_p2 }
   0x6   : > { %v9327_v0 = vld [vmem:[%s11932_s1] sm:$0xff] (!%p383_p3)   ;;  %v9328_v1 = vld [vmem:[%s11932_s1 + $0x8] sm:$0xff] (!%p383_p3)   ;;  %p451_p4 = scmp.lt.s32.totalorder (!%p383_p3), %s9614_s13, 1  ;;  %v9329_v2 = vld [vmem:[%s11932_s1 + $0x10] ss:$0 sps:$4 sm:$0x33] (!%p383_p3)  }
   0x7   : > { %386 = sbr.rel (%p383_p3) target bundleno = 1045 (0x415), region = 60  ;;  %8825 = vmatprep.subr.bf16.mxu0 (!%p383_p3), %v9327_v0  ;;  %vm703_vm0 = vcmask (!%p383_p3), 1041408   ;;  %vm648_vm1 = vcmask (!%p383_p3), 293888   ;;  %v9348_v22 = vld [vmem:[%s11934_s3] sm:$0xff] (!%p383_p3)   ;;  %v9349_v23 = vld [vmem:[%s11934_s3 + $0x8] sm:$0xff] (!%p383_p3)   ;;  %v9350_v24 = vld [vmem:[%s11934_s3 + $0x10] sm:$0xff] (!%p383_p3)  }
   0x8   : > { %8826 = vmatpush3.bf16.msra.mxu0 (!%p383_p3), %v9327_v0  ;;  %v705_v3 = vsel (!%p383_p3), %vm703_vm0, %v9329_v2, 0  ;;  %8867 = vmatprep.subr.bf16.mxu1 (!%p383_p3), %v9348_v22  ;;  %v9351_v25 = vld [vmem:[%s11934_s3 + $0x40] sm:$0xff] (!%p383_p3)   ;;  %v9352_v26 = vld [vmem:[%s11934_s3 + $0x18] sm:$0xff] (!%p383_p3)   ;;  %v9353_v27 = vld [vmem:[%s11934_s3 + $0x48] sm:$0xff] (!%p383_p3)   ;;  %vm1028_vm2 = vsmask.f32 (!%p383_p3), 256 }
   0x9   : > { %8827 = vmatprep.subr.bf16.mxu0 (!%p383_p3), %v9328_v1  ;;  %8868 = vmatpush3.bf16.msra.mxu1 (!%p383_p3), %v9348_v22  ;;  %v9354_v28 = vld [vmem:[%s11934_s3 + $0x20] sm:$0xff] (!%p383_p3)   ;;  %v9355_v29 = vld [vmem:[%s11934_s3 + $0x50] sm:$0xff] (!%p383_p3)   ;;  %v9356_v30 = vld [vmem:[%s11934_s3 + $0x28] sm:$0xff] (!%p383_p3)   ;;  %vm1391_vm3 = vcmask (!%p383_p3), 1043456   ;;  %vm1392_vm4 = vsmask.f32 (!%p383_p3), 7938 }
   0xa   : > { %8869 = vmatprep.subr.bf16.mxu1 (!%p383_p3), %v9349_v23  ;;  %v9357_v31 = vld [vmem:[%s11934_s3 + $0x58] sm:$0xff] (!%p383_p3)   ;;  %v9358_v32 = vld [vmem:[%s11934_s3 + $0x30] sm:$0xff] (!%p383_p3)   ;;  %v9359_v33 = vld [vmem:[%s11934_s3 + $0x60] sm:$0xff] (!%p383_p3)   ;;  %vm1398_vm5 = vcmask (!%p383_p3), 1040384   ;;  %vm1029_vm6 = vsmask.f32 (!%p383_p3), 4368 }
   0xb   : > { %v9360_v34 = vld [vmem:[%s11934_s3 + $0x38] sm:$0xff] (!%p383_p3)   ;;  %v9361_v35 = vld [vmem:[%s11934_s3 + $0x68] sm:$0xff] (!%p383_p3)   ;;  %v9365_v36 = vld [vmem:[%s11934_s3 + $0x70] sm:$0xff] (!%p383_p3)   ;;  %vm2076_vm11 = vsmask.f32 (!%p383_p3), 3328  ;;  %vm2945_vm14 = vcmask (!%p383_p3), 1042432  }
   0xc   : > { %8828 = vmatpush3.bf16.msra.mxu0 (!%p383_p3), %v9328_v1  ;;  %v9366_v37 = vld [vmem:[%s11934_s3 + $0x78] sm:$0xff] (!%p383_p3)   ;;  %v9803_v38 = vld [vmem:[%s11934_s3 + $0x80] sm:$0xff] (!%p383_p3)   ;;  %v1403_v62 = vld [vmem:[#allocation2 + $0xc] sm:$0xf] (!%p383_p3)  ;;  %vm2077_vm12 = vsmask.f32 (!%p383_p3), 7440 }
   0xd   : > { %9299 = vmatprep.subr.msk.bf16.mxu0 (!%p383_p3), %vm703_vm0, %v9329_v2  ;;  %8870 = vmatpush3.bf16.msra.mxu1 (!%p383_p3), %v9349_v23  ;;  %v9809_v39 = vld [vmem:[%s11933_s2] ss:$0 sm:$0xff] (!%p383_p3)  ;;  %vm9818_vm7 = vmand (!%p383_p3), %vm1391_vm3, %vm1392_vm4  ;;  %vm2946_vm15 = vcmask (!%p383_p3), 1046532  }
   0xe   : > { %s11959_s13 = smov (!%p451_p4, %s9614_s13), 1  ;;  %8871 = vmatprep.subr.bf16.mxu1 %v9350_v24  ;;  %vm9825_vm8 = vmand %vm1398_vm5, %vm1028_vm2 }
   0xf   : > { %s9300_s23 = smul.u32 144, %s11959_s13  ;;  %vm9834_vm9 = vmor %vm1028_vm2, %vm1029_vm6  ;;  %s8550_s24 = sshll.u32 %s11959_s13, 8  ;;  %vm7847_vm2 = vcmask 64512  }
  0x10   : > { %8830 = vmatpush3.bf16.msra.mxu0 %v705_v3  ;;  %vm9865_vm10 = vmand %vm1398_vm5, %vm1392_vm4  ;;  %v1519_v3 = vld [vmem:[#allocation2 + $0xd4] sm:$0x1]  ;;  %s473_s27 = scalar_lea.vmem %s11937_s6, %s11959_s13  ;;  %s11630_s30 = scalar_lea.vmem %s11936_s5, %s8550_s24 }
  0x11   : > { %s9714_s26 = scalar_lea.vmem %s11931_s0, %s9300_s23  ;;  %8872 = vmatpush3.bf16.msra.mxu1 %v9350_v24  ;;  %8915 = vmatprep.subr.bf16.mxu0 %v9351_v25  ;;  %vm10104_vm13 = vmor %vm2076_vm11, %vm2077_vm12  ;;  %s9625_s23 = smov 120  }
  0x12   : > { %v9330_v4 = vld [vmem:[%s9714_s26] sm:$0xff]   ;;  %v9331_v5 = vld [vmem:[%s9714_s26 + $0x8] sm:$0xff]   ;;  %v9332_v6 = vld [vmem:[%s9714_s26 + $0x10] sm:$0xff]   ;;  %8873 = vmatprep.subr.bf16.mxu1 %v9352_v26  ;;  %s479_s17 = scalar_lea.vmem %s11939_s8, %s11959_s13  ;;  %s476_s20 = scalar_lea.vmem %s11938_s7, %s11959_s13 }
  0x13   : > { %8831 = vmatprep.mubr.msk.bf16.mxu0 %vm648_vm1, %v9330_v4  ;;  %v9333_v7 = vld [vmem:[%s9714_s26 + $0x18] sm:$0xff]   ;;  %v9334_v8 = vld [vmem:[%s9714_s26 + $0x20] sm:$0xff]   ;;  %v9335_v9 = vld [vmem:[%s9714_s26 + $0x28] sm:$0xff]  }
  0x14   : > { %8832 = vmatmul.mubr.msk.bf16.vlgmr.msra.gmra.mrb[0].mxu0 %vm648_vm1, %v9331_v5  ;;  %v9336_v10 = vld [vmem:[%s9714_s26 + $0x30] sm:$0xff]   ;;  %v9337_v11 = vld [vmem:[%s9714_s26 + $0x38] sm:$0xff]   ;;  %v9338_v12 = vld [vmem:[%s9714_s26 + $0x40] sm:$0xff]  }
  0x15   : > { %8835 = vmatprep.mubr.msk.bf16.mxu0 %vm648_vm1, %v9332_v6  ;;  %v9339_v13 = vld [vmem:[%s9714_s26 + $0x48] sm:$0xff]   ;;  %v9340_v14 = vld [vmem:[%s9714_s26 + $0x50] sm:$0xff]   ;;  %v9341_v15 = vld [vmem:[%s9714_s26 + $0x58] sm:$0xff]   ;;  %8916 = vmatpush3.bf16.msra.mxu0 %v9351_v25 }
  0x16   : > { %v9342_v16 = vld [vmem:[%s9714_s26 + $0x60] sm:$0xff]   ;;  %v9343_v17 = vld [vmem:[%s9714_s26 + $0x68] sm:$0xff]   ;;  %v9344_v18 = vld [vmem:[%s9714_s26 + $0x70] sm:$0xff]   ;;  %8874 = vmatpush3.bf16.msra.mxu1 %v9352_v26  ;;  %8917 = vmatprep.subr.bf16.mxu0 %v9353_v27 }
  0x17   : > { %v9345_v19 = vld [vmem:[%s9714_s26 + $0x78] sm:$0xff]   ;;  %v9346_v20 = vld [vmem:[%s9714_s26 + $0x80] sm:$0xff]   ;;  %v9347_v21 = vld [vmem:[%s9714_s26 + $0x88] sm:$0xff]   ;;  %8875 = vmatprep.subr.bf16.mxu1 %v9354_v28 }
  0x18   : > { %v1394_v5 = vld [vmem:[#allocation2] sm:$0xf]  ;;  %v1400_v26 = vld [vmem:[#allocation2 + $0x8] sm:$0x1]  ;;  %vm10284_vm0 = vmor %vm2945_vm14, %vm2946_vm15 }
  0x19   : > { %8918 = vmatpush3.bf16.msra.mxu0 %v9353_v27 }
  0x1a   : > { %8876 = vmatpush3.bf16.msra.mxu1 %v9354_v28  ;;  %8919 = vmatprep.subr.bf16.mxu0 %v9355_v29 }
  0x1b   : > { %8877 = vmatprep.subr.bf16.mxu1 %v9356_v30 }
  0x1c   : > { %8836 = vmatmul.mubr.msk.bf16.gmra.mrb[4].mxu0 %vm648_vm1, %v9333_v7 }
  0x1d   : > { %8839 = vmatprep.mubr.msk.bf16.mxu0 %vm648_vm1, %v9334_v8  ;;  %8920 = vmatpush3.bf16.msra.mxu0 %v9355_v29 }
  0x1e   : > { %8878 = vmatpush3.bf16.msra.mxu1 %v9356_v30  ;;  %8921 = vmatprep.subr.bf16.mxu0 %v9357_v31 }
  0x1f   : > { %8879 = vmatprep.subr.bf16.mxu1 %v9358_v32 }
  0x21   : > { %8922 = vmatpush3.bf16.msra.mxu0 %v9357_v31 }
  0x22   : > { %8880 = vmatpush3.bf16.msra.mxu1 %v9358_v32  ;;  %8923 = vmatprep.subr.bf16.mxu0 %v9359_v33 }
  0x23   : > { %8881 = vmatprep.subr.bf16.mxu1 %v9360_v34 }
  0x24   : > { %8840 = vmatmul.mubr.msk.bf16.gmra.mrb[8].mxu0 %vm648_vm1, %v9335_v9 }
  0x25   : > { %8843 = vmatprep.mubr.msk.bf16.mxu0 %vm648_vm1, %v9336_v10  ;;  %8924 = vmatpush3.bf16.msra.mxu0 %v9359_v33 }
  0x26   : > { %8882 = vmatpush3.bf16.msra.mxu1 %v9360_v34  ;;  %8925 = vmatprep.subr.bf16.mxu0 %v9361_v35 }
  0x27   : > { %8963 = vmatprep.subr.bf16.mxu1 %v9803_v38 }
  0x29   : > { %8926 = vmatpush3.bf16.msra.mxu0 %v9361_v35 }
  0x2a   : > { %8927 = vmatprep.subr.bf16.mxu0 %v9365_v36 }
  0x2c   : > { %8844 = vmatmul.mubr.msk.bf16.gmra.mrb[12].mxu0 %vm648_vm1, %v9337_v11 }
  0x2d   : > { %8847 = vmatprep.mubr.msk.bf16.mxu0 %vm648_vm1, %v9338_v12  ;;  %8928 = vmatpush3.bf16.msra.mxu0 %v9365_v36  ;;  %v9427_v12 = vld [vmem:[%s11934_s3 + $0x170] sm:$0xff]  }
  0x2e   : > { %8929 = vmatprep.subr.bf16.mxu0 %v9366_v37 }
  0x31   : > { %8930 = vmatpush3.bf16.msra.mxu0 %v9366_v37 }
  0x34   : > { %8848 = vmatmul.mubr.msk.bf16.gmra.mrb[16].mxu0 %vm648_vm1, %v9339_v13 }
  0x35   : > { %8851 = vmatprep.mubr.msk.bf16.mxu0 %vm648_vm1, %v9340_v14 }
  0x3c   : > { %8852 = vmatmul.mubr.msk.bf16.gmra.mrb[20].mxu0 %vm648_vm1, %v9341_v15 }
  0x3d   : > { %8855 = vmatprep.mubr.msk.bf16.mxu0 %vm648_vm1, %v9342_v16  ;;  %v9382_v16 = vld [vmem:[%s11934_s3 + $0xc0] sm:$0xff]  }
  0x3e   : > { %9011 = vmatprep.subr.bf16.mxu0 %v9382_v16 }
  0x44   : > { %8856 = vmatmul.mubr.msk.bf16.gmra.mrb[24].mxu0 %vm648_vm1, %v9343_v17 }
  0x45   : > { %8859 = vmatprep.mubr.msk.bf16.mxu0 %vm648_vm1, %v9344_v18 }
  0x4c   : > { %8860 = vmatmul.mubr.msk.bf16.gmra.mrb[28].mxu0 %vm648_vm1, %v9345_v19 }
  0x4d   : > { %8863 = vmatprep.mubr.msk.bf16.mxu0 %vm648_vm1, %v9346_v20  ;;  %v1407_v20 = vld [vmem:[#allocation2 + $0x14] sm:$0x1] }
  0x54   : > { %8864 = vmatmul.mubr.msk.bf16.gmra.mrb[32].mxu0 %vm648_vm1, %v9347_v21  ;;  %vm1995_vm1 = vcmask 130048  }
  0xe7   : > { %v8833_v40 = vpop.f32.mrb[0].mxu0 }
  0xe8   : > { %v750_v41 = vadd.f32 %v8833_v40, %v9809_v39  ;;  %v741_v42 = vpop.f32.mrb[1].mxu0 }
  0xe9   : > { %v742_v43 = vadd.f32 %v9809_v39, %v741_v42  ;;  %v8834_v44 = vpop.f32.mrb[2].mxu0 }
  0xea   : > { %v886_v45 = vmax.f32 %v750_v41, 0.0  ;;  %v753_v46 = vadd.f32 %v8834_v44, %v9809_v39  ;;  %v744_v47 = vpop.f32.mrb[3].mxu0 }
  0xeb   : > { %v884_v48 = vmax.f32 %v742_v43, 0.0  ;;  %v745_v49 = vadd.f32 %v9809_v39, %v744_v47  ;;  %v9624_v47 = vmov 0  }
  0xec   : > { %v8554_v50 = vpack.c.bf16 %v886_v45, %v886_v45  ;;  %v887_v51 = vmax.f32 %v753_v46, 0.0 }
  0xed   : > { %v8552_v52 = vpack.c.bf16 %v884_v48, %v884_v48  ;;  %v885_v53 = vmax.f32 %v745_v49, 0.0  ;;  %v1417_v48 = vld [vmem:[#allocation2 + $0x24] sm:$0xf] }
  0xee   : > { %v1049_v54 = vshrl.u32 %v8554_v50, 16  ;;  %v8555_v55 = vpack.c.bf16 %v887_v51, %v887_v51  ;;  %v1052_v56 = vshll.u32 %v8554_v50, 16 }
  0xef   : > { %v1032_v57 = vshrl.u32 %v8552_v52, 16  ;;  %v1035_v58 = vshll.u32 %v8552_v52, 16  ;;  %v8553_v59 = vpack.c.bf16 %v885_v53, %v885_v53  ;;  %v8837_v60 = vpop.f32.mrb[4].mxu0 }
  0xf0   : > { %v1051_v61 = vrot.slane %v1049_v54, 7  ;;  %v1057_v63 = vshrl.u32 %v8555_v55, 16  ;;  %v1060_v0 = vshll.u32 %v8555_v55, 16  ;;  %v766_v1 = vadd.f32 %v8837_v60, %v9809_v39  ;;  %v757_v2 = vpop.f32.mrb[5].mxu0  ;;  %v1410_v55 = vld [vmem:[#allocation2 + $0x18] sm:$0xf] }
  0xf1   : > { %v1034_v4 = vrot.slane %v1032_v57, 7  ;;  %v1040_v6 = vshrl.u32 %v8553_v59, 16  ;;  %v1043_v7 = vshll.u32 %v8553_v59, 16  ;;  %v758_v8 = vadd.f32 %v9809_v39, %v757_v2  ;;  %v8838_v9 = vpop.f32.mrb[6].mxu0 }
  0xf2   : > { %v1054_v10 = vor.u32 %v1052_v56, %v1051_v61  ;;  %v1055_v11 = vrot.slane %v1051_v61, 4  ;;  %v1059_v13 = vrot.slane %v1057_v63, 7  ;;  %v890_v14 = vmax.f32 %v766_v1, 0.0  ;;  %v760_v15 = vpop.f32.mrb[7].mxu0 }
  0xf3   : > { %v1037_v17 = vor.u32 %v1035_v58, %v1034_v4  ;;  %v1038_v18 = vrot.slane %v1034_v4, 4  ;;  %v1042_v21 = vrot.slane %v1040_v6, 7  ;;  %v888_v22 = vmax.f32 %v758_v8, 0.0 }
  0xf4   : > { %v1404_v23 = vsel %vm9818_vm7, %v1054_v10, %v1403_v62  ;;  %v1062_v24 = vor.u32 %v1060_v0, %v1059_v13  ;;  %v1064_v25 = vrot.slane %v1059_v13, 4  ;;  %v8558_v27 = vpack.c.bf16 %v890_v14, %v890_v14 }
  0xf5   : > { %1405 = vst [vmem:[#allocation2 + $0xc] sm:$0xf] %v1404_v23  ;;  %v1395_v28 = vsel %vm9818_vm7, %v1037_v17, %v1394_v5  ;;  %v1045_v29 = vor.u32 %v1043_v7, %v1042_v21  ;;  %v1047_v30 = vrot.slane %v1042_v21, 4  ;;  %v8556_v31 = vpack.c.bf16 %v888_v22, %v888_v22  ;;  %v1414_v22 = vld [vmem:[#allocation2 + $0x20] sm:$0x1] }
  0xf6   : > { %1396 = vst [vmem:[#allocation2] sm:$0xf] %v1395_v28  ;;  %v1063_v32 = vsel %vm9834_vm9, %v1055_v11, %v1062_v24  ;;  %v1408_v33 = vsel %vm9825_vm8, %v1064_v25, %v1407_v20  ;;  %v1083_v34 = vshrl.u32 %v8558_v27, 16  ;;  %v1086_v35 = vshll.u32 %v8558_v27, 16  ;;  %v1421_v20 = vld [vmem:[#allocation2 + $0x2c] sm:$0x1] }
  0xf7   : > { %1406 = vst [vmem:[#allocation2 + $0x10] sm:$0xf] %v1063_v32  ;;  %1409 = vst [vmem:[#allocation2 + $0x14] sm:$0x1] %v1408_v33  ;;  %v1046_v36 = vsel %vm9834_vm9, %v1038_v18, %v1045_v29  ;;  %v1401_v37 = vsel %vm9825_vm8, %v1047_v30, %v1400_v26  ;;  %v1066_v40 = vshrl.u32 %v8556_v31, 16  ;;  %v8841_v41 = vpop.f32.mrb[8].mxu0  ;;  %v769_v43 = vadd.f32 %v8838_v9, %v9809_v39 }
  0xf8   : > { %1397 = vst [vmem:[#allocation2 + $0x4] sm:$0xf] %v1046_v36  ;;  %1402 = vst [vmem:[#allocation2 + $0x8] sm:$0x1] %v1401_v37  ;;  %v9850_v42 = vrot.slane %v1083_v34, 7  ;;  %v761_v44 = vadd.f32 %v9809_v39, %v760_v15  ;;  %v782_v45 = vadd.f32 %v8841_v41, %v9809_v39  ;;  %v773_v46 = vpop.f32.mrb[9].mxu0 }
  0xf9   : > { %1636 = vst [vmem:[#allocation2 + $0x4] sm:$0xf] %v9624_v47  ;;  %v9856_v49 = vrot.slane %v1066_v40, 7  ;;  %v1069_v50 = vshll.u32 %v8556_v31, 16  ;;  %v774_v51 = vadd.f32 %v9809_v39, %v773_v46  ;;  %v8842_v52 = vpop.f32.mrb[10].mxu0  ;;  %v891_v56 = vmax.f32 %v769_v43, 0.0 }
  0xfa   : > { %v1088_v53 = vor.u32 %v1086_v35, %v9850_v42  ;;  %v1089_v54 = vrot.slane %v9850_v42, 4  ;;  %v889_v57 = vmax.f32 %v761_v44, 0.0  ;;  %v776_v58 = vpop.f32.mrb[11].mxu0  ;;  %v894_v61 = vmax.f32 %v782_v45, 0.0  ;;  %v1431_v28 = vld [vmem:[#allocation2 + $0x3c] sm:$0xf] }
  0xfb   : > { %v1071_v59 = vor.u32 %v1069_v50, %v9856_v49  ;;  %v1072_v60 = vrot.slane %v9856_v49, 4  ;;  %v892_v62 = vmax.f32 %v774_v51, 0.0  ;;  %v8559_v2 = vpack.c.bf16 %v891_v56, %v891_v56  ;;  %v1424_v56 = vld [vmem:[#allocation2 + $0x30] sm:$0xf] }
  0xfc   : > { %v1525_v63 = vld [vmem:[#allocation2 + $0xc] sm:$0x1]  ;;  %v1418_v1 = vsel %vm9818_vm7, %v1088_v53, %v1417_v48  ;;  %v8557_v4 = vpack.c.bf16 %v889_v57, %v889_v57  ;;  %v785_v5 = vadd.f32 %v8842_v52, %v9809_v39  ;;  %v8562_v9 = vpack.c.bf16 %v894_v61, %v894_v61 }
  0xfd   : > { %v1526_v6 = vsel %vm9825_vm8, 0, %v1525_v63  ;;  %v1522_v7 = vld [vmem:[#allocation2] sm:$0x1]  ;;  %1419 = vst [vmem:[#allocation2 + $0x24] sm:$0xf] %v1418_v1  ;;  %v1411_v8 = vsel %vm9818_vm7, %v1071_v59, %v1410_v55  ;;  %v8560_v10 = vpack.c.bf16 %v892_v62, %v892_v62  ;;  %v1091_v14 = vshrl.u32 %v8559_v2, 16 }
  0xfe   : > { %1527 = vst [vmem:[#allocation2 + $0xc] sm:$0x1] %v1526_v6  ;;  %v1523_v11 = vsel %vm9825_vm8, 0, %v1522_v7  ;;  %v1580_v13 = vld [vmem:[#allocation2 + $0x14] sm:$0x1]  ;;  %v1094_v15 = vshll.u32 %v8559_v2, 16  ;;  %v777_v34 = vadd.f32 %v9809_v39, %v776_v58 }
  0xff   : > { %1412 = vst [vmem:[#allocation2 + $0x18] sm:$0xf] %v1411_v8  ;;  %v1074_v16 = vshrl.u32 %v8557_v4, 16  ;;  %1524 = vst [vmem:[#allocation2] sm:$0x1] %v1523_v11  ;;  %v1581_v17 = vsel %vm9865_vm10, 0, %v1580_v13 }
 0x100   : > { %v1577_v18 = vld [vmem:[#allocation2 + $0x8] sm:$0x1]  ;;  %v1077_v21 = vshll.u32 %v8557_v4, 16  ;;  %v1117_v23 = vshrl.u32 %v8562_v9, 16  ;;  %v1120_v24 = vshll.u32 %v8562_v9, 16  ;;  %v1093_v26 = vrot.slane %v1091_v14, 7 }
 0x101   : > { %1635 = vst [vmem:[#allocation2] sm:$0xf] %v9624_v47  ;;  %1582 = vst [vmem:[#allocation2 + $0x14] sm:$0x1] %v1581_v17  ;;  %v1578_v25 = vsel %vm9865_vm10, 0, %v1577_v18  ;;  %v1076_v27 = vrot.slane %v1074_v16, 7 }
 0x102   : > { %v1100_v29 = vshrl.u32 %v8560_v10, 16  ;;  %v8845_v30 = vpop.f32.mrb[12].mxu0  ;;  %1579 = vst [vmem:[#allocation2 + $0x8] sm:$0x1] %v1578_v25  ;;  %v9883_v31 = vrot.slane %v1117_v23, 7  ;;  %v1103_v32 = vshll.u32 %v8560_v10, 16  ;;  %v1096_v36 = vor.u32 %v1094_v15, %v1093_v26 }
 0x103   : > { %v895_v33 = vmax.f32 %v785_v5, 0.0  ;;  %v789_v35 = vpop.f32.mrb[13].mxu0  ;;  %1637 = vst [vmem:[#allocation2 + $0x8] sm:$0x1] %v9624_v47  ;;  %v1098_v37 = vrot.slane %v1093_v26, 4  ;;  %v1079_v40 = vor.u32 %v1077_v21, %v1076_v27  ;;  %v1081_v41 = vrot.slane %v1076_v27, 4 }
 0x104   : > { %v8846_v43 = vpop.f32.mrb[14].mxu0  ;;  %v1122_v44 = vor.u32 %v1120_v24, %v9883_v31  ;;  %v1123_v45 = vrot.slane %v9883_v31, 4  ;;  %v9889_v46 = vrot.slane %v1100_v29, 7  ;;  %v1531_v50 = vld [vmem:[#allocation2 + $0x24] sm:$0x1]  ;;  %v1097_v51 = vsel %vm9834_vm9, %v1089_v54, %v1096_v36  ;;  %v9368_v15 = vld [vmem:[%s11934_s3 + $0x88] sm:$0xff]  }
 0x105   : > { %v8563_v48 = vpack.c.bf16 %v895_v33, %v895_v33  ;;  %v792_v49 = vpop.f32.mrb[15].mxu0  ;;  %v1422_v52 = vsel %vm9825_vm8, %v1098_v37, %v1421_v20  ;;  %v1080_v53 = vsel %vm9834_vm9, %v1072_v60, %v1079_v40  ;;  %v1415_v55 = vsel %vm9825_vm8, %v1081_v41, %v1414_v22  ;;  %1420 = vst [vmem:[#allocation2 + $0x28] sm:$0xf] %v1097_v51  ;;  %v9364_v14 = vld [vmem:[#allocation2 + $0xc] sm:$0xff]   ;;  %v1435_v16 = vld [vmem:[#allocation2 + $0x44] sm:$0x1] }
 0x106   : > { %v1532_v57 = vsel %vm9825_vm8, 0, %v1531_v50  ;;  %v1528_v58 = vld [vmem:[#allocation2 + $0x18] sm:$0x1]  ;;  %1423 = vst [vmem:[#allocation2 + $0x2c] sm:$0x1] %v1422_v52  ;;  %v1432_v42 = vsel %vm9818_vm7, %v1122_v44, %v1431_v28  ;;  %v1105_v54 = vor.u32 %v1103_v32, %v9889_v46  ;;  %v1106_v59 = vrot.slane %v9889_v46, 4 }
 0x107   : > { %1413 = vst [vmem:[#allocation2 + $0x1c] sm:$0xf] %v1080_v53  ;;  %1416 = vst [vmem:[#allocation2 + $0x20] sm:$0x1] %v1415_v55  ;;  %v1529_v60 = vsel %vm9825_vm8, 0, %v1528_v58  ;;  %v1125_v61 = vshrl.u32 %v8563_v48, 16  ;;  %v798_v2 = vadd.f32 %v8845_v30, %v9809_v39  ;;  %v790_v4 = vadd.f32 %v9809_v39, %v789_v35 }
 0x108   : > { %1533 = vst [vmem:[#allocation2 + $0x24] sm:$0x1] %v1532_v57  ;;  %1433 = vst [vmem:[#allocation2 + $0x3c] sm:$0xf] %v1432_v42  ;;  %v1128_v62 = vshll.u32 %v8563_v48, 16  ;;  %v893_v63 = vmax.f32 %v777_v34, 0.0  ;;  %v1425_v1 = vsel %vm9818_vm7, %v1105_v54, %v1424_v56  ;;  %v801_v5 = vadd.f32 %v8846_v43, %v9809_v39 }
 0x109   : > { %1530 = vst [vmem:[#allocation2 + $0x18] sm:$0x1] %v1529_v60  ;;  %v8849_v6 = vpop.f32.mrb[16].mxu0  ;;  %v9362_v7 = vld [vmem:[#allocation2] sm:$0xff]   ;;  %1426 = vst [vmem:[#allocation2 + $0x30] sm:$0xf] %v1425_v1  ;;  %v9915_v10 = vadd.f32 %v9809_v39, %v792_v49 }
 0x10a   : > { %v1127_v8 = vrot.slane %v1125_v61, 7  ;;  %v8561_v9 = vpack.c.bf16 %v893_v63, %v893_v63  ;;  %v9918_v11 = vadd.f32 %v8849_v6, %v9809_v39  ;;  %v805_v13 = vpop.f32.mrb[17].mxu0  ;;  %v898_v17 = vmax.f32 %v798_v2, 0.0  ;;  %8883 = vmatprep.mubr.bf16.mxu1 %v9362_v7  ;;  %v1428_v28 = vld [vmem:[#allocation2 + $0x38] sm:$0x1]  ;;  %v9371_v34 = vld [vmem:[%s11934_s3 + $0x90] sm:$0xff]  }
 0x10b   : > { %v896_v18 = vmax.f32 %v790_v4, 0.0  ;;  %v899_v20 = vmax.f32 %v801_v5, 0.0  ;;  %v9924_v21 = vadd.f32 %v9809_v39, %v805_v13  ;;  %v9926_v22 = vpop.f32.mrb[18].mxu0  ;;  %8884 = vmatmul.mubr.bf16.vlgmr.msra.gmra.mrb[0].mxu1 %v9364_v14  ;;  %v897_v33 = vmax.f32 %v9915_v10, 0.0  ;;  %v1445_v52 = vld [vmem:[#allocation2 + $0x54] sm:$0xf] }
 0x10c   : > { %v1130_v23 = vor.u32 %v1128_v62, %v1127_v8  ;;  %v1132_v24 = vrot.slane %v1127_v8, 4  ;;  %v1108_v25 = vshrl.u32 %v8561_v9, 16  ;;  %v1111_v26 = vshll.u32 %v8561_v9, 16  ;;  %v9928_v27 = vpop.f32.mrb[19].mxu0  ;;  %8964 = vmatpush3.bf16.msra.mxu1 %v9803_v38  ;;  %v9951_v56 = vld [vmem:[%s11934_s3 + $0x98] sm:$0xff]  }
 0x10d   : > { %v8566_v29 = vpack.c.bf16 %v898_v17, %v898_v17  ;;  %v8564_v30 = vpack.c.bf16 %v896_v18, %v896_v18  ;;  %v8567_v32 = vpack.c.bf16 %v899_v20, %v899_v20  ;;  %v1586_v35 = vld [vmem:[#allocation2 + $0x2c] sm:$0x1]  ;;  %v902_v43 = vmax.f32 %v9918_v11, 0.0  ;;  %8965 = vmatprep.subr.bf16.mxu1 %v9368_v15  ;;  %v1438_v54 = vld [vmem:[#allocation2 + $0x48] sm:$0xf] }
 0x10e   : > { %v1583_v36 = vld [vmem:[#allocation2 + $0x20] sm:$0x1]  ;;  %v1131_v37 = vsel %vm9834_vm9, %v1123_v45, %v1130_v23  ;;  %v1436_v40 = vsel %vm9825_vm8, %v1132_v24, %v1435_v16  ;;  %v1110_v41 = vrot.slane %v1108_v25, 7  ;;  %v1587_v38 = vsel %vm9865_vm10, 0, %v1586_v35  ;;  %v1449_v4 = vld [vmem:[#allocation2 + $0x5c] sm:$0x1] }
 0x10f   : > { %v1584_v44 = vsel %vm9865_vm10, 0, %v1583_v36  ;;  %v1537_v48 = vld [vmem:[#allocation2 + $0x3c] sm:$0x1]  ;;  %1434 = vst [vmem:[#allocation2 + $0x40] sm:$0xf] %v1131_v37  ;;  %v1151_v31 = vshrl.u32 %v8566_v29, 16  ;;  %v8565_v46 = vpack.c.bf16 %v897_v33, %v897_v33  ;;  %v8570_v13 = vpack.c.bf16 %v902_v43, %v902_v43 }
 0x110   : > { %1437 = vst [vmem:[#allocation2 + $0x44] sm:$0x1] %v1436_v40  ;;  %v1154_v49 = vshll.u32 %v8566_v29, 16  ;;  %1588 = vst [vmem:[#allocation2 + $0x2c] sm:$0x1] %v1587_v38  ;;  %v1538_v45 = vsel %vm9825_vm8, 0, %v1537_v48  ;;  %v1113_v50 = vor.u32 %v1111_v26, %v1110_v41  ;;  %8966 = vmatpush3.bf16.msra.mxu1 %v9368_v15  ;;  %v817_v40 = vadd.f32 %v9926_v22, %v9809_v39 }
 0x111   : > { %1585 = vst [vmem:[#allocation2 + $0x20] sm:$0x1] %v1584_v44  ;;  %v1115_v51 = vrot.slane %v1110_v41, 4  ;;  %v1134_v53 = vshrl.u32 %v8564_v30, 16  ;;  %v9367_v55 = vld [vmem:[#allocation2 + $0x18] sm:$0xff]   ;;  %v1153_v58 = vrot.slane %v1151_v31, 7  ;;  %8967 = vmatprep.subr.bf16.mxu1 %v9371_v34  ;;  %v809_v41 = vadd.f32 %v9809_v39, %v9928_v27 }
 0x112   : > { %1539 = vst [vmem:[#allocation2 + $0x3c] sm:$0x1] %v1538_v45  ;;  %v1534_v57 = vld [vmem:[#allocation2 + $0x30] sm:$0x1]  ;;  %v1137_v42 = vshll.u32 %v8564_v30, 16  ;;  %v1159_v60 = vshrl.u32 %v8567_v32, 16  ;;  %v1114_v63 = vsel %vm9834_vm9, %v1106_v59, %v1113_v50  ;;  %8887 = vmatprep.mubr.bf16.mxu1 %v9367_v55 }
 0x113   : > { %v1162_v61 = vshll.u32 %v8567_v32, 16  ;;  %v1535_v62 = vsel %vm9825_vm8, 0, %v1534_v57  ;;  %v1429_v1 = vsel %vm9825_vm8, %v1115_v51, %v1428_v28  ;;  %v9961_v2 = vrot.slane %v1134_v53, 7  ;;  %v8853_v5 = vpop.f32.mrb[20].mxu0  ;;  %v9369_v6 = vld [vmem:[#allocation2 + $0x24] sm:$0xff]  }
 0x114   : > { %1536 = vst [vmem:[#allocation2 + $0x30] sm:$0x1] %v1535_v62  ;;  %1427 = vst [vmem:[#allocation2 + $0x34] sm:$0xf] %v1114_v63  ;;  %v1156_v7 = vor.u32 %v1154_v49, %v1153_v58  ;;  %v1157_v8 = vrot.slane %v1153_v58, 4  ;;  %v1161_v9 = vrot.slane %v1159_v60, 7  ;;  %8888 = vmatmul.mubr.bf16.gmra.mrb[4].mxu1 %v9369_v6  ;;  %v830_v48 = vadd.f32 %v8853_v5, %v9809_v39 }
 0x115   : > { %1430 = vst [vmem:[#allocation2 + $0x38] sm:$0x1] %v1429_v1  ;;  %v821_v10 = vpop.f32.mrb[21].mxu0  ;;  %v1139_v59 = vor.u32 %v1137_v42, %v9961_v2  ;;  %v1140_v11 = vrot.slane %v9961_v2, 4  ;;  %v900_v14 = vmax.f32 %v9924_v21, 0.0  ;;  %v1142_v20 = vshrl.u32 %v8565_v46, 16  ;;  %8968 = vmatpush3.bf16.msra.mxu1 %v9371_v34 }
 0x116   : > { %v9966_v15 = vpop.f32.mrb[22].mxu0  ;;  %v1446_v16 = vsel %vm9818_vm7, %v1156_v7, %v1445_v52  ;;  %v1164_v17 = vor.u32 %v1162_v61, %v1161_v9  ;;  %v1166_v18 = vrot.slane %v1161_v9, 4  ;;  %v1145_v26 = vshll.u32 %v8565_v46, 16  ;;  %8969 = vmatprep.subr.bf16.mxu1 %v9951_v56  ;;  %v9377_v21 = vld [vmem:[%s11934_s3 + $0xa0] sm:$0xff]   ;;  %v1442_v35 = vld [vmem:[#allocation2 + $0x50] sm:$0x1] }
 0x117   : > { %v824_v23 = vpop.f32.mrb[23].mxu0  ;;  %v1592_v24 = vld [vmem:[#allocation2 + $0x44] sm:$0x1]  ;;  %1447 = vst [vmem:[#allocation2 + $0x54] sm:$0xf] %v1446_v16  ;;  %v1439_v25 = vsel %vm9818_vm7, %v1139_v59, %v1438_v54  ;;  %v1185_v28 = vshrl.u32 %v8570_v13, 16  ;;  %v8568_v37 = vpack.c.bf16 %v900_v14, %v900_v14  ;;  %v9990_v31 = vadd.f32 %v9809_v39, %v821_v10 }
 0x118   : > { %v1188_v29 = vshll.u32 %v8570_v13, 16  ;;  %v1593_v30 = vsel %vm9865_vm10, 0, %v1592_v24  ;;  %1440 = vst [vmem:[#allocation2 + $0x48] sm:$0xf] %v1439_v25  ;;  %v1165_v32 = vsel %vm9834_vm9, %v1157_v8, %v1164_v17  ;;  %v1450_v33 = vsel %vm9825_vm8, %v1166_v18, %v1449_v4  ;;  %v1459_v44 = vld [vmem:[#allocation2 + $0x6c] sm:$0xf] }
 0x119   : > { %v1144_v34 = vrot.slane %v1142_v20, 7  ;;  %1594 = vst [vmem:[#allocation2 + $0x44] sm:$0x1] %v1593_v30  ;;  %1448 = vst [vmem:[#allocation2 + $0x58] sm:$0xf] %v1165_v32  ;;  %v9982_v36 = vrot.slane %v1185_v28, 7  ;;  %8970 = vmatpush3.bf16.msra.mxu1 %v9951_v56  ;;  %v10019_v8 = vadd.f32 %v9966_v15, %v9809_v39  ;;  %v10022_v9 = vadd.f32 %v9809_v39, %v824_v23 }
 0x11a   : > { %1451 = vst [vmem:[#allocation2 + $0x5c] sm:$0x1] %v1450_v33  ;;  %v9992_v49 = vpop.f32.mrb[24].mxu0  ;;  %v9380_v45 = vld [vmem:[%s11934_s3 + $0xa8] sm:$0xff]   ;;  %v1168_v51 = vshrl.u32 %v8568_v37, 16  ;;  %v1171_v52 = vshll.u32 %v8568_v37, 16  ;;  %8971 = vmatprep.subr.bf16.mxu1 %v9377_v21 }
 0x11b   : > { %v1147_v43 = vor.u32 %v1145_v26, %v1144_v34  ;;  %v1149_v38 = vrot.slane %v1144_v34, 4  ;;  %v1190_v50 = vor.u32 %v1188_v29, %v9982_v36  ;;  %v1191_v27 = vrot.slane %v9982_v36, 4  ;;  %v10000_v53 = vpop.f32.mrb[25].mxu0  ;;  %v9372_v55 = vld [vmem:[#allocation2 + $0x3c] sm:$0xff]   ;;  %v9370_v60 = vld [vmem:[#allocation2 + $0x30] sm:$0xff]  }
 0x11c   : > { %v1589_v22 = vld [vmem:[#allocation2 + $0x38] sm:$0x1]  ;;  %v903_v42 = vmax.f32 %v817_v40, 0.0  ;;  %v10008_v54 = vpop.f32.mrb[26].mxu0  ;;  %v10012_v62 = vrot.slane %v1168_v51, 7  ;;  %v901_v63 = vmax.f32 %v809_v41, 0.0  ;;  %8891 = vmatprep.mubr.bf16.mxu1 %v9370_v60 }
 0x11d   : > { %v1590_v57 = vsel %vm9865_vm10, 0, %v1589_v22  ;;  %v1148_v56 = vsel %vm9834_vm9, %v1140_v11, %v1147_v43  ;;  %v1443_v58 = vsel %vm9825_vm8, %v1149_v38, %v1442_v35  ;;  %v1460_v61 = vsel %vm9818_vm7, %v1190_v50, %v1459_v44  ;;  %v10014_v2 = vpop.f32.mrb[27].mxu0  ;;  %v1452_v5 = vld [vmem:[#allocation2 + $0x60] sm:$0xf]  ;;  %8972 = vmatpush3.bf16.msra.mxu1 %v9377_v21  ;;  %v9385_v46 = vld [vmem:[%s11934_s3 + $0xb0] sm:$0xff]  }
 0x11e   : > { %1591 = vst [vmem:[#allocation2 + $0x38] sm:$0x1] %v1590_v57  ;;  %1441 = vst [vmem:[#allocation2 + $0x4c] sm:$0xf] %v1148_v56  ;;  %v906_v1 = vmax.f32 %v830_v48, 0.0  ;;  %v8571_v6 = vpack.c.bf16 %v903_v42, %v903_v42  ;;  %v904_v7 = vmax.f32 %v9990_v31, 0.0  ;;  %v1173_v11 = vor.u32 %v1171_v52, %v10012_v62  ;;  %8892 = vmatmul.mubr.bf16.gmra.mrb[8].mxu1 %v9372_v55 }
 0x11f   : > { %1444 = vst [vmem:[#allocation2 + $0x50] sm:$0x1] %v1443_v58  ;;  %v1543_v4 = vld [vmem:[#allocation2 + $0x54] sm:$0x1]  ;;  %1461 = vst [vmem:[#allocation2 + $0x6c] sm:$0xf] %v1460_v61  ;;  %v8569_v14 = vpack.c.bf16 %v901_v63, %v901_v63  ;;  %8973 = vmatprep.subr.bf16.mxu1 %v9380_v45 }
 0x120   : > { %v1544_v10 = vsel %vm9825_vm8, 0, %v1543_v4  ;;  %v1540_v59 = vld [vmem:[#allocation2 + $0x48] sm:$0x1]  ;;  %v1174_v13 = vrot.slane %v10012_v62, 4  ;;  %v10031_v15 = vld [vmem:[#allocation2] sm:$0xf]  ;;  %v8574_v23 = vpack.c.bf16 %v906_v1, %v906_v1  ;;  %v1453_v25 = vsel %vm9818_vm7, %v1173_v11, %v1452_v5 }
 0x121   : > { %1545 = vst [vmem:[#allocation2 + $0x54] sm:$0x1] %v1544_v10  ;;  %v1541_v16 = vsel %vm9825_vm8, 0, %v1540_v59  ;;  %v1598_v17 = vld [vmem:[#allocation2 + $0x5c] sm:$0x1]  ;;  %v1193_v18 = vshrl.u32 %v8571_v6, 16  ;;  %v8572_v34 = vpack.c.bf16 %v904_v7, %v904_v7  ;;  %8974 = vmatpush3.bf16.msra.mxu1 %v9380_v45 }
 0x122   : > { %v1196_v20 = vshll.u32 %v8571_v6, 16  ;;  %1542 = vst [vmem:[#allocation2 + $0x48] sm:$0x1] %v1541_v16  ;;  %v1599_v24 = vsel %vm9865_vm10, 0, %v1598_v17  ;;  %v1463_v26 = vld [vmem:[#allocation2 + $0x74] sm:$0x1]  ;;  %8975 = vmatprep.subr.bf16.mxu1 %v9385_v46 }
 0x123   : > { %v1176_v28 = vshrl.u32 %v8569_v14, 16  ;;  %v1179_v29 = vshll.u32 %v8569_v14, 16  ;;  %1600 = vst [vmem:[#allocation2 + $0x5c] sm:$0x1] %v1599_v24  ;;  %1454 = vst [vmem:[#allocation2 + $0x60] sm:$0xf] %v1453_v25 }
 0x124   : > { %v1195_v21 = vrot.slane %v1193_v18, 7  ;;  %v1456_v30 = vld [vmem:[#allocation2 + $0x68] sm:$0x1]  ;;  %v1219_v32 = vshrl.u32 %v8574_v23, 16  ;;  %v1222_v33 = vshll.u32 %v8574_v23, 16  ;;  %v10039_v35 = vpop.f32.mrb[28].mxu0 }
 0x125   : > { %v1178_v37 = vrot.slane %v1176_v28, 7  ;;  %v1473_v40 = vld [vmem:[#allocation2 + $0x84] sm:$0xf]  ;;  %v907_v41 = vmax.f32 %v10019_v8, 0.0  ;;  %v905_v43 = vmax.f32 %v10022_v9, 0.0  ;;  %v2080_v38 = vshrl.u32 %v10031_v15, 16  ;;  %8976 = vmatpush3.bf16.msra.mxu1 %v9385_v46 }
 0x126   : > { %v10044_v44 = vpop.f32.mrb[29].mxu0  ;;  %v9390_v48 = vld [vmem:[%s11934_s3 + $0xb8] sm:$0xff]   ;;  %v1595_v31 = vld [vmem:[#allocation2 + $0x50] sm:$0x1]  ;;  %v1198_v22 = vor.u32 %v1196_v20, %v1195_v21  ;;  %v1200_v50 = vrot.slane %v1195_v21, 4  ;;  %v10049_v51 = vrot.slane %v1219_v32, 7 }
 0x127   : > { %v1202_v45 = vshrl.u32 %v8572_v34, 16  ;;  %v10051_v52 = vpop.f32.mrb[30].mxu0  ;;  %v1596_v55 = vsel %vm9865_vm10, 0, %v1595_v31  ;;  %v1549_v57 = vld [vmem:[#allocation2 + $0x6c] sm:$0x1]  ;;  %v1181_v56 = vor.u32 %v1179_v29, %v1178_v37  ;;  %v1183_v58 = vrot.slane %v1178_v37, 4  ;;  %8977 = vmatprep.subr.bf16.mxu1 %v9390_v48 }
 0x128   : > { %v1205_v42 = vshll.u32 %v8572_v34, 16  ;;  %v10055_v60 = vpop.f32.mrb[31].mxu0  ;;  %1597 = vst [vmem:[#allocation2 + $0x50] sm:$0x1] %v1596_v55  ;;  %v1550_v61 = vsel %vm9825_vm8, 0, %v1549_v57  ;;  %v1199_v62 = vsel %vm9834_vm9, %v1191_v27, %v1198_v22  ;;  %v1464_v63 = vsel %vm9825_vm8, %v1200_v50, %v1463_v26  ;;  %v9394_v8 = vld [vmem:[%s11934_s3 + $0x100] sm:$0xff]  }
 0x129   : > { %v1224_v1 = vor.u32 %v1222_v33, %v10049_v51  ;;  %v1466_v4 = vld [vmem:[#allocation2 + $0x78] sm:$0xf]  ;;  %v2029_v5 = vld [vmem:[#allocation2 + $0x4] sm:$0xf]  ;;  %1551 = vst [vmem:[#allocation2 + $0x6c] sm:$0x1] %v1550_v61  ;;  %v1182_v6 = vsel %vm9834_vm9, %v1174_v13, %v1181_v56  ;;  %v1457_v36 = vsel %vm9825_vm8, %v1183_v58, %v1456_v30  ;;  %v8575_v46 = vpack.c.bf16 %v907_v41, %v907_v41 }
 0x12a   : > { %1462 = vst [vmem:[#allocation2 + $0x70] sm:$0xf] %v1199_v62  ;;  %1465 = vst [vmem:[#allocation2 + $0x74] sm:$0x1] %v1464_v63  ;;  %v1225_v7 = vrot.slane %v10049_v51, 4  ;;  %v10071_v27 = vrot.slane %v1202_v45, 7  ;;  %v8573_v10 = vpack.c.bf16 %v905_v43, %v905_v43  ;;  %8978 = vmatpush3.bf16.msra.mxu1 %v9390_v48 }
 0x12b   : > { %1455 = vst [vmem:[#allocation2 + $0x64] sm:$0xf] %v1182_v6  ;;  %1458 = vst [vmem:[#allocation2 + $0x68] sm:$0x1] %v1457_v36  ;;  %v1474_v9 = vsel %vm9818_vm7, %v1224_v1, %v1473_v40  ;;  %v2030_v59 = vld [vmem:[#allocation2 + $0x8] sm:$0x1]  ;;  %9059 = vmatprep.subr.bf16.mxu1 %v9394_v8 }
 0x12c   : > { %v2082_v11 = vrot.slane %v2080_v38, 4  ;;  %v10078_v13 = vld [vmem:[#allocation2 + $0x10] sm:$0xf]  ;;  %v9373_v14 = vld [vmem:[#allocation2 + $0x48] sm:$0xff]   ;;  %v1546_v16 = vld [vmem:[#allocation2 + $0x60] sm:$0x1]  ;;  %v1207_v17 = vor.u32 %v1205_v42, %v10071_v27 }
 0x12d   : > { %1475 = vst [vmem:[#allocation2 + $0x84] sm:$0xf] %v1474_v9  ;;  %v1208_v18 = vrot.slane %v10071_v27, 4  ;;  %v2083_v20 = vshll.u32 %v10031_v15, 16  ;;  %v2089_v23 = vshll.u32 %v2029_v5, 16  ;;  %v9375_v24 = vld [vmem:[#allocation2 + $0x54] sm:$0xff]   ;;  %8895 = vmatprep.mubr.bf16.mxu1 %v9373_v14 }
 0x12e   : > { %v1547_v25 = vsel %vm9825_vm8, 0, %v1546_v16  ;;  %v1227_v26 = vshrl.u32 %v8575_v46, 16  ;;  %v1230_v28 = vshll.u32 %v8575_v46, 16  ;;  %v1210_v29 = vshrl.u32 %v8573_v10, 16  ;;  %v2031_v21 = vld [vmem:[#allocation2 + $0xc] sm:$0xf]  ;;  %8896 = vmatmul.mubr.bf16.gmra.mrb[12].mxu1 %v9375_v24 }
 0x12f   : > { %1548 = vst [vmem:[#allocation2 + $0x60] sm:$0x1] %v1547_v25  ;;  %v1467_v30 = vsel %vm9818_vm7, %v1207_v17, %v1466_v4  ;;  %v1213_v32 = vshll.u32 %v8573_v10, 16  ;;  %v2085_v33 = vrot.slane %v2083_v20, 5  ;;  %v10087_v34 = vrot.slane %v2089_v23, 5  ;;  %v10090_v51 = vpop.f32.mrb[32].mxu0 }
 0x130   : > { %1468 = vst [vmem:[#allocation2 + $0x78] sm:$0xf] %v1467_v30  ;;  %v1229_v15 = vrot.slane %v1227_v26, 7  ;;  %v1477_v37 = vld [vmem:[#allocation2 + $0x8c] sm:$0x1]  ;;  %v1212_v40 = vrot.slane %v1210_v29, 7  ;;  %v846_v24 = vadd.f32 %v9992_v49, %v9809_v39  ;;  %v838_v25 = vadd.f32 %v9809_v39, %v10000_v53 }
 0x131   : > { %v2093_v41 = vshrl.u32 %v2029_v5, 16  ;;  %v2099_v43 = vshll.u32 %v2030_v59, 16  ;;  %v1470_v38 = vld [vmem:[#allocation2 + $0x80] sm:$0x1]  ;;  %v2086_v31 = vor.u32 %v2085_v33, %v2082_v11  ;;  %v2104_v22 = vshrl.u32 %v2031_v21, 16  ;;  %v9378_v33 = vld [vmem:[#allocation2 + $0x6c] sm:$0xff]  }
 0x132   : > { %v2107_v48 = vshll.u32 %v2031_v21, 16  ;;  %v2113_v50 = vshll.u32 %v10078_v13, 16  ;;  %v1604_v45 = vld [vmem:[#allocation2 + $0x74] sm:$0x1]  ;;  %v1232_v55 = vor.u32 %v1230_v28, %v1229_v15  ;;  %v1234_v57 = vrot.slane %v1229_v15, 4  ;;  %v10121_v28 = vpop.f32.mrb[33].mxu0 }
 0x133   : > { %v1215_v56 = vor.u32 %v1213_v32, %v1212_v40  ;;  %v1217_v58 = vrot.slane %v1212_v40, 4  ;;  %v2033_v42 = vld [vmem:[#allocation2 + $0x14] sm:$0x1]  ;;  %v1605_v61 = vsel %vm9865_vm10, 0, %v1604_v45  ;;  %v1601_v62 = vld [vmem:[#allocation2 + $0x68] sm:$0x1] }
 0x134   : > { %v2087_v63 = vrot.slane %v2086_v31, 4  ;;  %v2095_v1 = vrot.slane %v2093_v41, 4  ;;  %v2101_v4 = vrot.slane %v2099_v43, 5  ;;  %1606 = vst [vmem:[#allocation2 + $0x74] sm:$0x1] %v1605_v61  ;;  %v1602_v5 = vsel %vm9865_vm10, 0, %v1601_v62 }
 0x135   : > { %v1555_v6 = vld [vmem:[#allocation2 + $0x84] sm:$0x1]  ;;  %v1233_v36 = vsel %vm9834_vm9, %v1225_v7, %v1232_v55  ;;  %v1478_v27 = vsel %vm9825_vm8, %v1234_v57, %v1477_v37  ;;  %v1216_v8 = vsel %vm9834_vm9, %v1208_v18, %v1215_v56  ;;  %1603 = vst [vmem:[#allocation2 + $0x68] sm:$0x1] %v1602_v5  ;;  %v1471_v7 = vsel %vm9825_vm8, %v1217_v58, %v1470_v38  ;;  %v2034_v32 = vld [vmem:[#allocation2 + $0x18] sm:$0xf] }
 0x136   : > { %v1556_v46 = vsel %vm9825_vm8, 0, %v1555_v6  ;;  %1476 = vst [vmem:[#allocation2 + $0x88] sm:$0xf] %v1233_v36  ;;  %1479 = vst [vmem:[#allocation2 + $0x8c] sm:$0x1] %v1478_v27  ;;  %v2092_v10 = vsel %vm10104_vm13, %v2087_v63, %v10087_v34  ;;  %v2096_v59 = vor.u32 %v2095_v1, %v10087_v34  ;;  %v2106_v11 = vrot.slane %v2104_v22, 4 }
 0x137   : > { %1469 = vst [vmem:[#allocation2 + $0x7c] sm:$0xf] %v1216_v8  ;;  %1557 = vst [vmem:[#allocation2 + $0x84] sm:$0x1] %v1556_v46  ;;  %v2109_v14 = vrot.slane %v2107_v48, 5  ;;  %v2115_v16 = vrot.slane %v2113_v50, 5 }
 0x138   : > { %1472 = vst [vmem:[#allocation2 + $0x80] sm:$0x1] %v1471_v7  ;;  %v2117_v17 = vshrl.u32 %v10078_v13, 16  ;;  %v1552_v18 = vld [vmem:[#allocation2 + $0x78] sm:$0x1]  ;;  %v2097_v20 = vrot.slane %v2096_v59, 4  ;;  %v849_v13 = vadd.f32 %v10008_v54, %v9809_v39 }
 0x139   : > { %v2123_v23 = vshll.u32 %v2033_v42, 16  ;;  %v9376_v26 = vld [vmem:[#allocation2 + $0x60] sm:$0xff]   ;;  %v1553_v29 = vsel %vm9825_vm8, 0, %v1552_v18  ;;  %v2110_v21 = vor.u32 %v2109_v14, %v2106_v11  ;;  %v910_v15 = vmax.f32 %v846_v24, 0.0  ;;  %v1487_v1 = vld [vmem:[#allocation2 + $0x9c] sm:$0xf] }
 0x13a   : > { %v2119_v30 = vrot.slane %v2117_v17, 4  ;;  %1554 = vst [vmem:[#allocation2 + $0x78] sm:$0x1] %v1553_v29  ;;  %v2102_v49 = vsel %vm10104_vm13, %v2097_v20, %v2101_v4  ;;  %v908_v53 = vmax.f32 %v838_v25, 0.0  ;;  %8899 = vmatprep.mubr.bf16.mxu1 %v9376_v26  ;;  %v911_v43 = vmax.f32 %v849_v13, 0.0  ;;  %v9383_v59 = vld [vmem:[%s11934_s3 + $0xc8] sm:$0xff]  }
 0x13b   : > { %v2125_v34 = vrot.slane %v2123_v23, 5  ;;  %v8159_v37 = vcombine.low %v2092_v10, %v2102_v49  ;;  %v2111_v40 = vrot.slane %v2110_v21, 4  ;;  %8900 = vmatmul.mubr.bf16.gmra.mrb[16].mxu1 %v9378_v33  ;;  %v8578_v38 = vpack.c.bf16 %v910_v15, %v910_v15  ;;  %v10132_v39 = vld [vmem:[%s11933_s2] ss:$0 sm:$0xff]  ;;  %v1480_v5 = vld [vmem:[#allocation2 + $0x90] sm:$0xf] }
 0x13c   : > { %v2120_v41 = vor.u32 %v2119_v30, %v2115_v16  ;;  %v8576_v31 = vpack.c.bf16 %v908_v53, %v908_v53  ;;  %v841_v54 = vadd.f32 %v10132_v39, %v10014_v2  ;;  %v2128_v22 = vshrl.u32 %v2034_v32, 16  ;;  %v2035_v36 = vld [vmem:[#allocation2 + $0x1c] sm:$0xf]  ;;  %v1491_v10 = vld [vmem:[#allocation2 + $0xa4] sm:$0x1]  ;;  %v10151_v26 = vpop.f32.mrb[34].mxu0 }
 0x13d   : > { %v1610_v48 = vld [vmem:[#allocation2 + $0x8c] sm:$0x1]  ;;  %8931 = vmatprep.mubr.bf16.mxu0 %v8159_v37  ;;  %v2116_v50 = vsel %vm10104_vm13, %v2111_v40, %v2115_v16  ;;  %v8579_v55 = vpack.c.bf16 %v911_v43, %v911_v43  ;;  %v2131_v57 = vshll.u32 %v2034_v32, 16  ;;  %v1253_v42 = vshrl.u32 %v8578_v38, 16  ;;  %v2036_v13 = vld [vmem:[#allocation2 + $0x20] sm:$0x1] }
 0x13e   : > { %v2121_v45 = vrot.slane %v2120_v41, 4  ;;  %v1611_v56 = vsel %vm9865_vm10, 0, %v1610_v48  ;;  %v1256_v61 = vshll.u32 %v8578_v38, 16  ;;  %v1236_v62 = vshrl.u32 %v8576_v31, 16  ;;  %v9381_v33 = vld [vmem:[#allocation2 + $0x84] sm:$0xff]   ;;  %v10159_v15 = vpop.f32.mrb[35].mxu0 }
 0x13f   : > { %v1607_v58 = vld [vmem:[#allocation2 + $0x80] sm:$0x1]  ;;  %1612 = vst [vmem:[#allocation2 + $0x8c] sm:$0x1] %v1611_v56  ;;  %v1239_v4 = vshll.u32 %v8576_v31, 16  ;;  %v1261_v6 = vshrl.u32 %v8579_v55, 16 }
 0x140   : > { %v1608_v2 = vsel %vm9865_vm10, 0, %v1607_v58  ;;  %v2126_v63 = vsel %vm10104_vm13, %v2121_v45, %v2125_v34  ;;  %v1255_v8 = vrot.slane %v1253_v42, 7  ;;  %v10144_v46 = vrot.slane %v1236_v62, 7  ;;  %v9597_v49 = vld [vmem:[%s11934_s3 + $0xc0] sm:$0xff]   ;;  %v9387_v34 = vld [vmem:[%s11934_s3 + $0xd0] sm:$0xff]  }
 0x141   : > { %1609 = vst [vmem:[#allocation2 + $0x80] sm:$0x1] %v1608_v2  ;;  %v8160_v27 = vcombine.low %v2116_v50, %v2126_v63  ;;  %v1264_v7 = vshll.u32 %v8579_v55, 16  ;;  %v1263_v11 = vrot.slane %v1261_v6, 7  ;;  %v909_v14 = vmax.f32 %v841_v54, 0.0  ;;  %v9379_v25 = vld [vmem:[#allocation2 + $0x78] sm:$0xff]  }
 0x142   : > { %v2130_v16 = vrot.slane %v2128_v22, 4  ;;  %v2133_v17 = vrot.slane %v2131_v57, 5  ;;  %v1258_v18 = vor.u32 %v1256_v61, %v1255_v8  ;;  %v1259_v20 = vrot.slane %v1255_v8, 4  ;;  %v2037_v43 = vld [vmem:[#allocation2 + $0x24] sm:$0xf]  ;;  %8903 = vmatprep.mubr.bf16.mxu1 %v9379_v25  ;;  %v9388_v6 = vld [vmem:[%s11934_s3 + $0xd8] sm:$0xff]  }
 0x143   : > { %8932 = vmatmul.mubr.bf16.vlgmr.msra.gmra.mrb[36].mxu0 %v8160_v27  ;;  %v1241_v23 = vor.u32 %v1239_v4, %v10144_v46  ;;  %v1242_v24 = vrot.slane %v10144_v46, 4  ;;  %v1266_v29 = vor.u32 %v1264_v7, %v1263_v11  ;;  %v1268_v21 = vrot.slane %v1263_v11, 4  ;;  %v2038_v38 = vld [vmem:[#allocation2 + $0x28] sm:$0xf]  ;;  %8904 = vmatmul.mubr.bf16.gmra.mrb[20].mxu1 %v9381_v33  ;;  %v2039_v58 = vld [vmem:[#allocation2 + $0x2c] sm:$0x1] }
 0x144   : > { %v8577_v30 = vpack.c.bf16 %v909_v14, %v909_v14  ;;  %v2134_v32 = vor.u32 %v2133_v17, %v2130_v16  ;;  %9012 = vmatpush3.bf16.msra.mxu0 %v9597_v49  ;;  %v1488_v53 = vsel %vm9818_vm7, %v1258_v18, %v1487_v1  ;;  %v2137_v40 = vshll.u32 %v2035_v36, 16  ;;  %v1484_v2 = vld [vmem:[#allocation2 + $0x98] sm:$0x1]  ;;  %v4717_v0 = vld [vmem:[#allocation2 + $0x14] sm:$0x1] }
 0x145   : > { %v1481_v37 = vsel %vm9818_vm7, %v1241_v23, %v1480_v5  ;;  %v2141_v41 = vshrl.u32 %v2035_v36, 16  ;;  %9013 = vmatprep.subr.bf16.mxu0 %v9383_v59  ;;  %1489 = vst [vmem:[#allocation2 + $0x9c] sm:$0xf] %v1488_v53  ;;  %v1267_v31 = vsel %vm9834_vm9, %v1259_v20, %v1266_v29  ;;  %v1492_v54 = vsel %vm9825_vm8, %v1268_v21, %v1491_v10  ;;  %v2040_v20 = vld [vmem:[#allocation2 + $0x30] sm:$0xf] }
 0x146   : > { %1482 = vst [vmem:[#allocation2 + $0x90] sm:$0xf] %v1481_v37  ;;  %v1244_v22 = vshrl.u32 %v8577_v30, 16  ;;  %v1247_v48 = vshll.u32 %v8577_v30, 16  ;;  %1490 = vst [vmem:[#allocation2 + $0xa0] sm:$0xf] %v1267_v31  ;;  %v862_v18 = vadd.f32 %v10132_v39, %v10039_v35 }
 0x147   : > { %1493 = vst [vmem:[#allocation2 + $0xa4] sm:$0x1] %v1492_v54  ;;  %v2135_v50 = vrot.slane %v2134_v32, 4  ;;  %v2139_v45 = vrot.slane %v2137_v40, 5  ;;  %v2143_v55 = vrot.slane %v2141_v41, 4  ;;  %v2147_v57 = vshll.u32 %v2036_v13, 16 }
 0x148   : > { %v1246_v56 = vrot.slane %v1244_v22, 7  ;;  %v2152_v42 = vshrl.u32 %v2037_v43, 16  ;;  %v2155_v61 = vshll.u32 %v2037_v43, 16  ;;  %v2161_v62 = vshll.u32 %v2038_v38, 16  ;;  %9014 = vmatpush3.bf16.msra.mxu0 %v9383_v59  ;;  %v9392_v13 = vld [vmem:[%s11934_s3 + $0xe0] sm:$0xff]  }
 0x149   : > { %v2140_v63 = vsel %vm10104_vm13, %v2135_v50, %v2139_v45  ;;  %v2144_v1 = vor.u32 %v2143_v55, %v2139_v45  ;;  %v2149_v4 = vrot.slane %v2147_v57, 5  ;;  %v2165_v5 = vshrl.u32 %v2038_v38, 16  ;;  %9015 = vmatprep.subr.bf16.mxu0 %v9387_v34  ;;  %v2041_v50 = vld [vmem:[#allocation2 + $0x34] sm:$0xf] }
 0x14a   : > { %v1249_v36 = vor.u32 %v1247_v48, %v1246_v56  ;;  %v1251_v27 = vrot.slane %v1246_v56, 4  ;;  %v2154_v8 = vrot.slane %v2152_v42, 4  ;;  %v2157_v46 = vrot.slane %v2155_v61, 5 }
 0x14b   : > { %v2145_v7 = vrot.slane %v2144_v1, 4  ;;  %v2163_v10 = vrot.slane %v2161_v62, 5  ;;  %v2167_v11 = vrot.slane %v2165_v5, 4  ;;  %v2171_v59 = vshll.u32 %v2039_v58, 16  ;;  %v1494_v1 = vld [vmem:[#allocation2 + $0xa8] sm:$0xf] }
 0x14c   : > { %v1250_v14 = vsel %vm9834_vm9, %v1242_v24, %v1249_v36  ;;  %v1485_v16 = vsel %vm9825_vm8, %v1251_v27, %v1484_v2  ;;  %v2158_v17 = vor.u32 %v2157_v46, %v2154_v8  ;;  %9016 = vmatpush3.bf16.msra.mxu0 %v9387_v34  ;;  %v1561_v23 = vld [vmem:[#allocation2 + $0x9c] sm:$0x1]  ;;  %v854_v24 = vadd.f32 %v10132_v39, %v10044_v44  ;;  %v9395_v27 = vld [vmem:[%s11934_s3 + $0xf0] sm:$0xff]  }
 0x14d   : > { %v1558_v25 = vld [vmem:[#allocation2 + $0x90] sm:$0x1]  ;;  %1483 = vst [vmem:[#allocation2 + $0x94] sm:$0xf] %v1250_v14  ;;  %1486 = vst [vmem:[#allocation2 + $0x98] sm:$0x1] %v1485_v16  ;;  %v2150_v29 = vsel %vm10104_vm13, %v2145_v7, %v2149_v4  ;;  %v2168_v21 = vor.u32 %v2167_v11, %v2163_v10  ;;  %9017 = vmatprep.subr.bf16.mxu0 %v9388_v6  ;;  %v865_v43 = vadd.f32 %v10132_v39, %v10051_v52 }
 0x14e   : > { %v2173_v30 = vrot.slane %v2171_v59, 5  ;;  %v1562_v35 = vsel %vm9825_vm8, 0, %v1561_v23  ;;  %v1559_v32 = vsel %vm9825_vm8, 0, %v1558_v25  ;;  %v1616_v33 = vld [vmem:[#allocation2 + $0xa4] sm:$0x1]  ;;  %v8161_v49 = vcombine.low %v2140_v63, %v2150_v29  ;;  %v9393_v52 = vld [vmem:[%s11934_s3 + $0xe8] sm:$0xff]  }
 0x14f   : > { %v2159_v34 = vrot.slane %v2158_v17, 4  ;;  %1563 = vst [vmem:[#allocation2 + $0x9c] sm:$0x1] %v1562_v35  ;;  %1560 = vst [vmem:[#allocation2 + $0x90] sm:$0x1] %v1559_v32  ;;  %v1617_v53 = vsel %vm9865_vm10, 0, %v1616_v33  ;;  %v857_v38 = vadd.f32 %v10132_v39, %v10055_v60 }
 0x150   : > { %v2169_v44 = vrot.slane %v2168_v21, 4  ;;  %v914_v37 = vmax.f32 %v862_v18, 0.0  ;;  %v912_v40 = vmax.f32 %v854_v24, 0.0  ;;  %1618 = vst [vmem:[#allocation2 + $0xa4] sm:$0x1] %v1617_v53  ;;  %8935 = vmatprep.mubr.bf16.mxu0 %v8161_v49  ;;  %v2176_v31 = vshrl.u32 %v2040_v20, 16  ;;  %9018 = vmatpush3.bf16.msra.mxu0 %v9388_v6 }
 0x151   : > { %v2164_v41 = vsel %vm10104_vm13, %v2159_v34, %v2163_v10  ;;  %v2179_v45 = vshll.u32 %v2040_v20, 16  ;;  %9019 = vmatprep.subr.bf16.mxu0 %v9392_v13  ;;  %v915_v57 = vmax.f32 %v865_v43, 0.0  ;;  %v913_v56 = vmax.f32 %v857_v38, 0.0  ;;  %v1501_v63 = vld [vmem:[#allocation2 + $0xb4] sm:$0xf] }
 0x152   : > { %v2174_v54 = vsel %vm10104_vm13, %v2169_v44, %v2173_v30  ;;  %v8582_v22 = vpack.c.bf16 %v914_v37, %v914_v37  ;;  %v8580_v48 = vpack.c.bf16 %v912_v40, %v912_v40  ;;  %v2178_v58 = vrot.slane %v2176_v31, 4  ;;  %v2042_v10 = vld [vmem:[#allocation2 + $0x38] sm:$0x1]  ;;  %v1505_v29 = vld [vmem:[#allocation2 + $0xbc] sm:$0x1] }
 0x153   : > { %v8162_v55 = vcombine.low %v2164_v41, %v2174_v54  ;;  %v8583_v4 = vpack.c.bf16 %v915_v57, %v915_v57  ;;  %v8581_v5 = vpack.c.bf16 %v913_v56, %v913_v56  ;;  %v2181_v6 = vrot.slane %v2179_v45, 5  ;;  %v1498_v21 = vld [vmem:[#allocation2 + $0xb0] sm:$0x1]  ;;  %v2043_v49 = vld [vmem:[#allocation2 + $0x3c] sm:$0xf] }
 0x154   : > { %v1287_v42 = vshrl.u32 %v8582_v22, 16  ;;  %v1290_v60 = vshll.u32 %v8582_v22, 16  ;;  %v1270_v61 = vshrl.u32 %v8580_v48, 16  ;;  %v1273_v62 = vshll.u32 %v8580_v48, 16  ;;  %v1613_v2 = vld [vmem:[#allocation2 + $0x98] sm:$0x1]  ;;  %9020 = vmatpush3.bf16.msra.mxu0 %v9392_v13 }
 0x155   : > { %8936 = vmatmul.mubr.bf16.gmra.mrb[40].mxu0 %v8162_v55  ;;  %v2185_v36 = vshll.u32 %v2041_v50, 16  ;;  %v1614_v8 = vsel %vm9865_vm10, 0, %v1613_v2  ;;  %v2189_v11 = vshrl.u32 %v2041_v50, 16  ;;  %v1295_v59 = vshrl.u32 %v8583_v4, 16  ;;  %9021 = vmatprep.subr.bf16.mxu0 %v9393_v52  ;;  %v9397_v13 = vld [vmem:[%s11934_s3 + $0xf8] sm:$0xff]  }
 0x156   : > { %v1289_v46 = vrot.slane %v1287_v42, 7  ;;  %v1272_v7 = vrot.slane %v1270_v61, 7  ;;  %1615 = vst [vmem:[#allocation2 + $0x98] sm:$0x1] %v1614_v8  ;;  %v1298_v14 = vshll.u32 %v8583_v4, 16  ;;  %v1278_v16 = vshrl.u32 %v8581_v5, 16 }
 0x157   : > { %v1281_v17 = vshll.u32 %v8581_v5, 16  ;;  %v9384_v30 = vld [vmem:[#allocation2 + $0x90] sm:$0xff]   ;;  %v1297_v24 = vrot.slane %v1295_v59, 7  ;;  %v2182_v32 = vor.u32 %v2181_v6, %v2178_v58  ;;  %v2187_v33 = vrot.slane %v2185_v36, 5  ;;  %v9386_v34 = vld [vmem:[#allocation2 + $0x9c] sm:$0xff]  }
 0x158   : > { %v1292_v18 = vor.u32 %v1290_v60, %v1289_v46  ;;  %v1293_v20 = vrot.slane %v1289_v46, 4  ;;  %v1275_v23 = vor.u32 %v1273_v62, %v1272_v7  ;;  %v1276_v25 = vrot.slane %v1272_v7, 4  ;;  %v2044_v41 = vld [vmem:[#allocation2 + $0x40] sm:$0xf]  ;;  %v2045_v43 = vld [vmem:[#allocation2 + $0x44] sm:$0x1]  ;;  %8907 = vmatprep.mubr.bf16.mxu1 %v9384_v30  ;;  %9022 = vmatpush3.bf16.msra.mxu0 %v9393_v52 }
 0x159   : > { %v1280_v35 = vrot.slane %v1278_v16, 7  ;;  %v2191_v37 = vrot.slane %v2189_v11, 4  ;;  %v2195_v40 = vshll.u32 %v2042_v10, 16  ;;  %v2046_v38 = vld [vmem:[#allocation2 + $0x48] sm:$0xf]  ;;  %v1300_v31 = vor.u32 %v1298_v14, %v1297_v24  ;;  %8908 = vmatmul.mubr.bf16.gmra.mrb[24].mxu1 %v9386_v34  ;;  %9023 = vmatprep.subr.bf16.mxu0 %v9395_v27  ;;  %v10229_v36 = vld [vmem:[%s11934_s3 + $0x140] sm:$0xff]  }
 0x15a   : > { %v1502_v53 = vsel %vm9818_vm7, %v1292_v18, %v1501_v63  ;;  %v1495_v44 = vsel %vm9818_vm7, %v1275_v23, %v1494_v1  ;;  %v1302_v54 = vrot.slane %v1297_v24, 4  ;;  %v2183_v50 = vrot.slane %v2182_v32, 4  ;;  %v2047_v60 = vld [vmem:[#allocation2 + $0x4c] sm:$0xf]  ;;  %v2048_v7 = vld [vmem:[#allocation2 + $0x50] sm:$0x1] }
 0x15b   : > { %1503 = vst [vmem:[#allocation2 + $0xb4] sm:$0xf] %v1502_v53  ;;  %1496 = vst [vmem:[#allocation2 + $0xa8] sm:$0xf] %v1495_v44  ;;  %v1283_v22 = vor.u32 %v1281_v17, %v1280_v35  ;;  %v1285_v48 = vrot.slane %v1280_v35, 4  ;;  %v2192_v45 = vor.u32 %v2191_v37, %v2187_v33  ;;  %v2197_v55 = vrot.slane %v2195_v40, 5 }
 0x15c   : > { %v2200_v57 = vshrl.u32 %v2043_v49, 16  ;;  %v1301_v56 = vsel %vm9834_vm9, %v1293_v20, %v1300_v31  ;;  %v1506_v58 = vsel %vm9825_vm8, %v1302_v54, %v1505_v29  ;;  %v2188_v61 = vsel %vm10104_vm13, %v2183_v50, %v2187_v33  ;;  %9024 = vmatpush3.bf16.msra.mxu0 %v9395_v27  ;;  %v2049_v17 = vld [vmem:[#allocation2 + $0x54] sm:$0xf]  ;;  %v2050_v32 = vld [vmem:[#allocation2 + $0x58] sm:$0xf] }
 0x15d   : > { %v1284_v52 = vsel %vm9834_vm9, %v1276_v25, %v1283_v22  ;;  %v1499_v42 = vsel %vm9825_vm8, %v1285_v48, %v1498_v21  ;;  %1504 = vst [vmem:[#allocation2 + $0xb8] sm:$0xf] %v1301_v56  ;;  %1507 = vst [vmem:[#allocation2 + $0xbc] sm:$0x1] %v1506_v58  ;;  %v2193_v62 = vrot.slane %v2192_v45, 4  ;;  %v2203_v63 = vshll.u32 %v2043_v49, 16  ;;  %9025 = vmatprep.subr.bf16.mxu0 %v9397_v13 }
 0x15e   : > { %1497 = vst [vmem:[#allocation2 + $0xac] sm:$0xf] %v1284_v52  ;;  %1500 = vst [vmem:[#allocation2 + $0xb0] sm:$0x1] %v1499_v42  ;;  %v2202_v2 = vrot.slane %v2200_v57, 4  ;;  %v2209_v1 = vshll.u32 %v2044_v41, 16  ;;  %v10240_v31 = vadd.f32 %v10132_v39, %v10090_v51 }
 0x15f   : > { %v2213_v4 = vshrl.u32 %v2044_v41, 16  ;;  %v2219_v5 = vshll.u32 %v2045_v43, 16  ;;  %v2224_v6 = vshrl.u32 %v2046_v38, 16  ;;  %v2198_v8 = vsel %vm10104_vm13, %v2193_v62, %v2197_v55  ;;  %v2051_v44 = vld [vmem:[#allocation2 + $0x5c] sm:$0x1] }
 0x160   : > { %v2205_v46 = vrot.slane %v2203_v63, 5  ;;  %v2227_v10 = vshll.u32 %v2046_v38, 16  ;;  %v2233_v11 = vshll.u32 %v2047_v60, 16  ;;  %v8163_v59 = vcombine.low %v2188_v61, %v2198_v8  ;;  %9026 = vmatpush3.bf16.msra.mxu0 %v9397_v13  ;;  %v2052_v13 = vld [vmem:[#allocation2 + $0x60] sm:$0xf] }
 0x161   : > { %v2211_v14 = vrot.slane %v2209_v1, 5  ;;  %v2215_v27 = vrot.slane %v2213_v4, 4  ;;  %v2221_v16 = vrot.slane %v2219_v5, 5  ;;  %v2226_v25 = vrot.slane %v2224_v6, 4  ;;  %9107 = vmatprep.subr.bf16.mxu0 %v10229_v36  ;;  %v2053_v38 = vld [vmem:[#allocation2 + $0x64] sm:$0xf] }
 0x162   : > { %v1567_v18 = vld [vmem:[#allocation2 + $0xb4] sm:$0x1]  ;;  %v1564_v20 = vld [vmem:[#allocation2 + $0xa8] sm:$0x1]  ;;  %v2206_v23 = vor.u32 %v2205_v46, %v2202_v2  ;;  %v2229_v29 = vrot.slane %v2227_v10, 5  ;;  %8939 = vmatprep.mubr.bf16.mxu0 %v8163_v59  ;;  %v2235_v35 = vrot.slane %v2233_v11, 5 }
 0x163   : > { %v1568_v21 = vsel %vm9825_vm8, 0, %v1567_v18  ;;  %v1565_v30 = vsel %vm9825_vm8, 0, %v1564_v20  ;;  %v2216_v24 = vor.u32 %v2215_v27, %v2211_v14  ;;  %v2237_v34 = vshrl.u32 %v2047_v60, 16  ;;  %v2054_v42 = vld [vmem:[#allocation2 + $0x68] sm:$0x1] }
 0x164   : > { %1569 = vst [vmem:[#allocation2 + $0xb4] sm:$0x1] %v1568_v21  ;;  %1566 = vst [vmem:[#allocation2 + $0xa8] sm:$0x1] %v1565_v30  ;;  %v2207_v33 = vrot.slane %v2206_v23, 4  ;;  %v2230_v49 = vor.u32 %v2229_v29, %v2226_v25  ;;  %v2243_v53 = vshll.u32 %v2048_v7, 16 }
 0x165   : > { %v1622_v37 = vld [vmem:[#allocation2 + $0xbc] sm:$0x1]  ;;  %v1619_v40 = vld [vmem:[#allocation2 + $0xb0] sm:$0x1]  ;;  %v2217_v41 = vrot.slane %v2216_v24, 4  ;;  %v2248_v43 = vshrl.u32 %v2049_v17, 16 }
 0x166   : > { %v1623_v54 = vsel %vm9865_vm10, 0, %v1622_v37  ;;  %v1620_v22 = vsel %vm9865_vm10, 0, %v1619_v40  ;;  %v2212_v48 = vsel %vm10104_vm13, %v2207_v33, %v2211_v14  ;;  %v2231_v50 = vrot.slane %v2230_v49, 4  ;;  %v2055_v60 = vld [vmem:[#allocation2 + $0x6c] sm:$0xf] }
 0x167   : > { %1624 = vst [vmem:[#allocation2 + $0xbc] sm:$0x1] %v1623_v54  ;;  %1621 = vst [vmem:[#allocation2 + $0xb0] sm:$0x1] %v1620_v22  ;;  %v2222_v45 = vsel %vm10104_vm13, %v2217_v41, %v2221_v16  ;;  %v2239_v55 = vrot.slane %v2237_v34, 4  ;;  %v2245_v57 = vrot.slane %v2243_v53, 5 }
 0x168   : > { %v2250_v56 = vrot.slane %v2248_v43, 4  ;;  %v8164_v51 = vcombine.low %v2212_v48, %v2222_v45  ;;  %v2236_v39 = vsel %vm10104_vm13, %v2231_v50, %v2235_v35  ;;  %v2251_v58 = vshll.u32 %v2049_v17, 16  ;;  %v2056_v23 = vld [vmem:[#allocation2 + $0x70] sm:$0xf]  ;;  %v2058_v41 = vld [vmem:[#allocation2 + $0x78] sm:$0xf] }
 0x169   : > { %v2257_v52 = vshll.u32 %v2050_v32, 16  ;;  %v2240_v61 = vor.u32 %v2239_v55, %v2235_v35  ;;  %v2261_v62 = vshrl.u32 %v2050_v32, 16  ;;  %v2267_v2 = vshll.u32 %v2051_v44, 16  ;;  %v2057_v32 = vld [vmem:[#allocation2 + $0x74] sm:$0x1] }
 0x16a   : > { %v2272_v63 = vshrl.u32 %v2052_v13, 16  ;;  %8940 = vmatmul.mubr.bf16.gmra.mrb[44].mxu0 %v8164_v51  ;;  %v2253_v1 = vrot.slane %v2251_v58, 5  ;;  %v2275_v5 = vshll.u32 %v2052_v13, 16  ;;  %v2281_v6 = vshll.u32 %v2053_v38, 16  ;;  %v2059_v48 = vld [vmem:[#allocation2 + $0x7c] sm:$0xf] }
 0x16b   : > { %v2259_v4 = vrot.slane %v2257_v52, 5  ;;  %v2241_v8 = vrot.slane %v2240_v61, 4  ;;  %v2263_v46 = vrot.slane %v2261_v62, 4  ;;  %v2269_v7 = vrot.slane %v2267_v2, 5  ;;  %v9389_v16 = vld [vmem:[#allocation2 + $0xa8] sm:$0xff]   ;;  %v9391_v29 = vld [vmem:[#allocation2 + $0xb4] sm:$0xff]  }
 0x16c   : > { %v2274_v10 = vrot.slane %v2272_v63, 4  ;;  %v2254_v11 = vor.u32 %v2253_v1, %v2250_v56  ;;  %v2277_v59 = vrot.slane %v2275_v5, 5  ;;  %v2283_v14 = vrot.slane %v2281_v6, 5  ;;  %8911 = vmatprep.mubr.bf16.mxu1 %v9389_v16  ;;  %v2061_v56 = vld [vmem:[#allocation2 + $0x84] sm:$0xf] }
 0x16d   : > { %v2285_v27 = vshrl.u32 %v2053_v38, 16  ;;  %v2246_v17 = vsel %vm10104_vm13, %v2241_v8, %v2245_v57  ;;  %v2264_v18 = vor.u32 %v2263_v46, %v2259_v4  ;;  %v2291_v20 = vshll.u32 %v2054_v42, 16  ;;  %8912 = vmatmul.mubr.bf16.gmra.mrb[28].mxu1 %v9391_v29  ;;  %v2060_v52 = vld [vmem:[#allocation2 + $0x80] sm:$0x1] }
 0x16e   : > { %v2296_v25 = vshrl.u32 %v2055_v60, 16  ;;  %v8165_v21 = vcombine.low %v2236_v39, %v2246_v17  ;;  %v2255_v30 = vrot.slane %v2254_v11, 4  ;;  %v2278_v24 = vor.u32 %v2277_v59, %v2274_v10 }
 0x16f   : > { %v2287_v35 = vrot.slane %v2285_v27, 4  ;;  %v2265_v33 = vrot.slane %v2264_v18, 4  ;;  %v2293_v49 = vrot.slane %v2291_v20, 5  ;;  %v2299_v53 = vshll.u32 %v2055_v60, 16  ;;  %v2062_v60 = vld [vmem:[#allocation2 + $0x88] sm:$0xf] }
 0x170   : > { %v2298_v34 = vrot.slane %v2296_v25, 4  ;;  %8943 = vmatprep.mubr.bf16.mxu0 %v8165_v21  ;;  %v2260_v44 = vsel %vm10104_vm13, %v2255_v30, %v2259_v4  ;;  %v2279_v13 = vrot.slane %v2278_v24, 4  ;;  %v2305_v40 = vshll.u32 %v2056_v23, 16  ;;  %v2063_v20 = vld [vmem:[#allocation2 + $0x8c] sm:$0x1] }
 0x171   : > { %v2288_v37 = vor.u32 %v2287_v35, %v2283_v14  ;;  %v2270_v43 = vsel %vm10104_vm13, %v2265_v33, %v2269_v7  ;;  %v2301_v38 = vrot.slane %v2299_v53, 5  ;;  %v2309_v54 = vshrl.u32 %v2056_v23, 16  ;;  %v2064_v25 = vld [vmem:[#allocation2 + $0x90] sm:$0xf]  ;;  %v2065_v35 = vld [vmem:[#allocation2 + $0x94] sm:$0xf] }
 0x172   : > { %v2315_v22 = vshll.u32 %v2057_v32, 16  ;;  %v8166_v50 = vcombine.low %v2260_v44, %v2270_v43  ;;  %v2284_v45 = vsel %vm10104_vm13, %v2279_v13, %v2283_v14  ;;  %v2307_v57 = vrot.slane %v2305_v40, 5  ;;  %v2068_v40 = vld [vmem:[#allocation2 + $0xa0] sm:$0xf] }
 0x173   : > { %v2289_v55 = vrot.slane %v2288_v37, 4  ;;  %v2302_v51 = vor.u32 %v2301_v38, %v2298_v34  ;;  %v2311_v39 = vrot.slane %v2309_v54, 4  ;;  %v2320_v42 = vshrl.u32 %v2058_v41, 16  ;;  %v2066_v38 = vld [vmem:[#allocation2 + $0x98] sm:$0x1] }
 0x174   : > { %v2317_v58 = vrot.slane %v2315_v22, 5  ;;  %8944 = vmatmul.mubr.bf16.gmra.mrb[48].mxu0 %v8166_v50  ;;  %v2323_v62 = vshll.u32 %v2058_v41, 16  ;;  %v2329_v2 = vshll.u32 %v2059_v48, 16  ;;  %v2333_v63 = vshrl.u32 %v2059_v48, 16  ;;  %v2067_v48 = vld [vmem:[#allocation2 + $0x9c] sm:$0xf] }
 0x175   : > { %v2294_v61 = vsel %vm10104_vm13, %v2289_v55, %v2293_v49  ;;  %v2303_v4 = vrot.slane %v2302_v51, 4  ;;  %v2312_v5 = vor.u32 %v2311_v39, %v2307_v57  ;;  %v2322_v6 = vrot.slane %v2320_v42, 4 }
 0x176   : > { %v8167_v1 = vcombine.low %v2284_v45, %v2294_v61  ;;  %v2325_v8 = vrot.slane %v2323_v62, 5  ;;  %v2331_v46 = vrot.slane %v2329_v2, 5  ;;  %v2335_v7 = vrot.slane %v2333_v63, 4 }
 0x177   : > { %v2339_v10 = vshll.u32 %v2060_v52, 16  ;;  %v2308_v11 = vsel %vm10104_vm13, %v2303_v4, %v2307_v57  ;;  %v2313_v59 = vrot.slane %v2312_v5, 4  ;;  %v2344_v14 = vshrl.u32 %v2061_v56, 16  ;;  %v2069_v52 = vld [vmem:[#allocation2 + $0xa4] sm:$0x1] }
 0x178   : > { %8947 = vmatprep.mubr.bf16.mxu0 %v8167_v1  ;;  %v2347_v27 = vshll.u32 %v2061_v56, 16  ;;  %v2326_v16 = vor.u32 %v2325_v8, %v2322_v6  ;;  %v2336_v17 = vor.u32 %v2335_v7, %v2331_v46  ;;  %v2353_v23 = vshll.u32 %v2062_v60, 16  ;;  %v2070_v5 = vld [vmem:[#allocation2 + $0xa8] sm:$0xf] }
 0x179   : > { %v2341_v18 = vrot.slane %v2339_v10, 5  ;;  %v2318_v29 = vsel %vm10104_vm13, %v2313_v59, %v2317_v58  ;;  %v2346_v21 = vrot.slane %v2344_v14, 4  ;;  %v2357_v24 = vshrl.u32 %v2062_v60, 16 }
 0x17a   : > { %v2349_v30 = vrot.slane %v2347_v27, 5  ;;  %v8168_v32 = vcombine.low %v2308_v11, %v2318_v29  ;;  %v2327_v33 = vrot.slane %v2326_v16, 4  ;;  %v2337_v49 = vrot.slane %v2336_v17, 4  ;;  %v2071_v27 = vld [vmem:[#allocation2 + $0xac] sm:$0xf] }
 0x17b   : > { %v2355_v34 = vrot.slane %v2353_v23, 5  ;;  %v2359_v44 = vrot.slane %v2357_v24, 4  ;;  %v2363_v13 = vshll.u32 %v2063_v20, 16  ;;  %v2368_v37 = vshrl.u32 %v2064_v25, 16  ;;  %v2849_v23 = vld [vmem:[#allocation2] sm:$0xe] }
 0x17c   : > { %v2350_v53 = vor.u32 %v2349_v30, %v2346_v21  ;;  %8948 = vmatmul.mubr.bf16.gmra.mrb[52].mxu0 %v8168_v32  ;;  %v2332_v41 = vsel %vm10104_vm13, %v2327_v33, %v2331_v46  ;;  %v2342_v43 = vsel %vm10104_vm13, %v2337_v49, %v2341_v18  ;;  %v2371_v54 = vshll.u32 %v2064_v25, 16  ;;  %v2072_v30 = vld [vmem:[#allocation2 + $0xb0] sm:$0x1] }
 0x17d   : > { %v2377_v22 = vshll.u32 %v2065_v35, 16  ;;  %v8169_v50 = vcombine.low %v2332_v41, %v2342_v43  ;;  %v2360_v55 = vor.u32 %v2359_v44, %v2355_v34  ;;  %v2365_v57 = vrot.slane %v2363_v13, 5  ;;  %v2852_v44 = vld [vmem:[#allocation2 + $0xc] sm:$0xe]  ;;  %v2853_v43 = vld [vmem:[#allocation2 + $0x10] sm:$0xf] }
 0x17e   : > { %v2351_v45 = vrot.slane %v2350_v53, 4  ;;  %v2370_v56 = vrot.slane %v2368_v37, 4  ;;  %v2373_v51 = vrot.slane %v2371_v54, 5  ;;  %v2381_v58 = vshrl.u32 %v2065_v35, 16  ;;  %v2850_v35 = vld [vmem:[#allocation2 + $0x4] sm:$0xf] }
 0x17f   : > { %v2379_v39 = vrot.slane %v2377_v22, 5  ;;  %8951 = vmatprep.mubr.bf16.mxu0 %v8169_v50  ;;  %v2361_v60 = vrot.slane %v2360_v55, 4  ;;  %v2387_v61 = vshll.u32 %v2066_v38, 16  ;;  %v2392_v62 = vshrl.u32 %v2067_v48, 16  ;;  %v2851_v53 = vld [vmem:[#allocation2 + $0x8] sm:$0x1] }
 0x180   : > { %v2356_v42 = vsel %vm10104_vm13, %v2351_v45, %v2355_v34  ;;  %v2374_v2 = vor.u32 %v2373_v51, %v2370_v56  ;;  %v2383_v63 = vrot.slane %v2381_v58, 4  ;;  %v2395_v1 = vshll.u32 %v2067_v48, 16  ;;  %v2854_v38 = vld [vmem:[#allocation2 + $0x14] sm:$0x1] }
 0x181   : > { %v2401_v4 = vshll.u32 %v2068_v40, 16  ;;  %v2366_v6 = vsel %vm10104_vm13, %v2361_v60, %v2365_v57  ;;  %v2389_v8 = vrot.slane %v2387_v61, 5  ;;  %v2394_v46 = vrot.slane %v2392_v62, 4 }
 0x182   : > { %v2405_v7 = vshrl.u32 %v2068_v40, 16  ;;  %v8170_v10 = vcombine.low %v2356_v42, %v2366_v6  ;;  %v2375_v11 = vrot.slane %v2374_v2, 4  ;;  %v2384_v59 = vor.u32 %v2383_v63, %v2379_v39  ;;  %v2073_v42 = vld [vmem:[#allocation2 + $0xb4] sm:$0xf] }
 0x183   : > { %v2397_v14 = vrot.slane %v2395_v1, 5  ;;  %v2403_v16 = vrot.slane %v2401_v4, 5  ;;  %v2411_v18 = vshll.u32 %v2069_v52, 16  ;;  %v2416_v20 = vshrl.u32 %v2070_v5, 16  ;;  %v2074_v1 = vld [vmem:[#allocation2 + $0xb8] sm:$0xf] }
 0x184   : > { %v2407_v17 = vrot.slane %v2405_v7, 4  ;;  %8952 = vmatmul.mubr.bf16.gmra.mrb[56].mxu0 %v8170_v10  ;;  %v2380_v25 = vsel %vm10104_vm13, %v2375_v11, %v2379_v39  ;;  %v2385_v29 = vrot.slane %v2384_v59, 4  ;;  %v2419_v24 = vshll.u32 %v2070_v5, 16  ;;  %v2855_v59 = vld [vmem:[#allocation2 + $0x18] sm:$0xe] }
 0x185   : > { %v2398_v21 = vor.u32 %v2397_v14, %v2394_v46  ;;  %v2413_v33 = vrot.slane %v2411_v18, 5  ;;  %v2418_v49 = vrot.slane %v2416_v20, 4  ;;  %v2425_v34 = vshll.u32 %v2071_v27, 16  ;;  %v2856_v14 = vld [vmem:[#allocation2 + $0x1c] sm:$0xf] }
 0x186   : > { %v2408_v32 = vor.u32 %v2407_v17, %v2403_v16  ;;  %v2390_v13 = vsel %vm10104_vm13, %v2385_v29, %v2389_v8  ;;  %v2421_v40 = vrot.slane %v2419_v24, 5  ;;  %v2429_v41 = vshrl.u32 %v2071_v27, 16  ;;  %v2857_v27 = vld [vmem:[#allocation2 + $0x20] sm:$0x1]  ;;  %v2075_v20 = vld [vmem:[#allocation2 + $0xbc] sm:$0x1] }
 0x187   : > { %v2399_v37 = vrot.slane %v2398_v21, 4  ;;  %v8171_v54 = vcombine.low %v2380_v25, %v2390_v13  ;;  %v2427_v48 = vrot.slane %v2425_v34, 5  ;;  %v2435_v50 = vshll.u32 %v2072_v30, 16  ;;  %v2858_v25 = vld [vmem:[#allocation2 + $0x24] sm:$0xe] }
 0x188   : > { %v2409_v22 = vrot.slane %v2408_v32, 4  ;;  %v2422_v55 = vor.u32 %v2421_v40, %v2418_v49  ;;  %v2431_v57 = vrot.slane %v2429_v41, 4  ;;  %v8183_v56 = vrot.slane %v2849_v23, 9  ;;  %v2859_v29 = vld [vmem:[#allocation2 + $0x28] sm:$0xf] }
 0x189   : > { %v2404_v45 = vsel %vm10104_vm13, %v2399_v37, %v2403_v16  ;;  %8955 = vmatprep.mubr.bf16.mxu0 %v8171_v54  ;;  %v2437_v39 = vrot.slane %v2435_v50, 5  ;;  %v2950_v58 = vrot.slane %v2850_v35, 5  ;;  %v2953_v52 = vrot.slane %v2851_v53, 5  ;;  %v2860_v21 = vld [vmem:[#allocation2 + $0x2c] sm:$0x1] }
 0x18a   : > { %v2414_v51 = vsel %vm10104_vm13, %v2409_v22, %v2413_v33  ;;  %v2423_v61 = vrot.slane %v2422_v55, 4  ;;  %v2432_v62 = vor.u32 %v2431_v57, %v2427_v48  ;;  %v8184_v63 = vrot.slane %v2852_v44, 9  ;;  %v2861_v44 = vld [vmem:[#allocation2 + $0x30] sm:$0xe]  ;;  %v9398_v41 = vld [vmem:[%s11934_s3 + $0x108] sm:$0xff]  }
 0x18b   : > { %v8172_v60 = vcombine.low %v2404_v45, %v2414_v51  ;;  %v2951_v4 = vsel %vm10284_vm0, %v8183_v56, %v2950_v58  ;;  %v2952_v5 = vrot.slane %v2950_v58, 4  ;;  %v2957_v6 = vrot.slane %v2853_v43, 5  ;;  %v2862_v43 = vld [vmem:[#allocation2 + $0x34] sm:$0xf]  ;;  %v10306_v54 = vld [vmem:[%s11933_s2] ss:$0 sm:$0xff] }
 0x18c   : > { %v2960_v8 = vrot.slane %v2854_v38, 5  ;;  %v2428_v46 = vsel %vm10104_vm13, %v2423_v61, %v2427_v48  ;;  %v2433_v7 = vrot.slane %v2432_v62, 4  ;;  %v2440_v10 = vshrl.u32 %v2073_v42, 16  ;;  %v2863_v38 = vld [vmem:[#allocation2 + $0x38] sm:$0x1] }
 0x18d   : > { %8956 = vmatmul.mubr.bf16.gmra.mrb[60].mxu0 %v8172_v60  ;;  %v2443_v11 = vshll.u32 %v2073_v42, 16  ;;  %v2954_v16 = vsel %vm10284_vm0, %v2952_v5, %v2953_v52  ;;  %v2958_v17 = vsel %vm10284_vm0, %v8184_v63, %v2957_v6  ;;  %v2959_v18 = vrot.slane %v2957_v6, 4  ;;  %v2864_v57 = vld [vmem:[#allocation2 + $0x3c] sm:$0xe]  ;;  %v9599_v52 = vld [vmem:[%s11934_s3 + $0x100] sm:$0xff]  }
 0x18e   : > { %v2449_v23 = vshll.u32 %v2074_v1, 16  ;;  %v2438_v30 = vsel %vm10104_vm13, %v2433_v7, %v2437_v39  ;;  %v8215_v24 = vcombine.low %v2951_v4, %v2954_v16  ;;  %v2442_v35 = vrot.slane %v2440_v10, 4  ;;  %v2865_v62 = vld [vmem:[#allocation2 + $0x40] sm:$0xf]  ;;  %v2866_v63 = vld [vmem:[#allocation2 + $0x44] sm:$0x1] }
 0x18f   : > { %v2445_v32 = vrot.slane %v2443_v11, 5  ;;  %v8173_v33 = vcombine.low %v2428_v46, %v2438_v30  ;;  %v2961_v49 = vsel %vm10284_vm0, %v2959_v18, %v2960_v8  ;;  %v2453_v53 = vshrl.u32 %v2074_v1, 16  ;;  %v9401_v8 = vld [vmem:[%s11934_s3 + $0x110] sm:$0xff]   ;;  %v2867_v18 = vld [vmem:[#allocation2 + $0x48] sm:$0xe] }
 0x190   : > { %v2451_v34 = vrot.slane %v2449_v23, 5  ;;  %8979 = vmatprep.mubr.bf16.mxu1 %v8215_v24  ;;  %v8216_v13 = vcombine.low %v2958_v17, %v2961_v49  ;;  %v2459_v40 = vshll.u32 %v2075_v20, 16  ;;  %v10310_v22 = vadd.f32 %v10306_v54, %v10121_v28  ;;  %v2869_v20 = vld [vmem:[#allocation2 + $0x50] sm:$0x1]  ;;  %v2870_v30 = vld [vmem:[#allocation2 + $0x54] sm:$0xe] }
 0x191   : > { %v2446_v37 = vor.u32 %v2445_v32, %v2442_v35  ;;  %8959 = vmatprep.mubr.bf16.mxu0 %v8173_v33  ;;  %v2455_v48 = vrot.slane %v2453_v53, 4  ;;  %v8185_v50 = vrot.slane %v2855_v59, 9  ;;  %v2964_v45 = vrot.slane %v2856_v14, 5  ;;  %v2868_v59 = vld [vmem:[#allocation2 + $0x4c] sm:$0xf] }
 0x192   : > { %v2967_v55 = vrot.slane %v2857_v27, 5  ;;  %8980 = vmatmul.mubr.bf16.vlgmr.msra.gmra.mrb[32].mxu1 %v8216_v13  ;;  %v8186_v51 = vrot.slane %v2858_v25, 9  ;;  %v2971_v39 = vrot.slane %v2859_v29, 5  ;;  %v2974_v58 = vrot.slane %v2860_v21, 5  ;;  %v2871_v24 = vld [vmem:[#allocation2 + $0x58] sm:$0xf] }
 0x193   : > { %v2447_v56 = vrot.slane %v2446_v37, 4  ;;  %9060 = vmatpush3.bf16.msra.mxu1 %v9599_v52  ;;  %v2456_v42 = vor.u32 %v2455_v48, %v2451_v34  ;;  %v2461_v60 = vrot.slane %v2459_v40, 5  ;;  %v2965_v28 = vsel %vm10284_vm0, %v8185_v50, %v2964_v45  ;;  %v2874_v53 = vld [vmem:[#allocation2 + $0x64] sm:$0xf]  ;;  %v2876_v52 = vld [vmem:[#allocation2 + $0x6c] sm:$0xe] }
 0x194   : > { %v2966_v61 = vrot.slane %v2964_v45, 4  ;;  %9061 = vmatprep.subr.bf16.mxu1 %v9398_v41  ;;  %v2973_v4 = vrot.slane %v2971_v39, 4  ;;  %v8187_v5 = vrot.slane %v2861_v44, 9  ;;  %v2978_v6 = vrot.slane %v2862_v43, 5  ;;  %v9396_v44 = vld [vmem:[#allocation2 + $0xc] sm:$0xff]  }
 0x195   : > { %v2452_v1 = vsel %vm10104_vm13, %v2447_v56, %v2451_v34  ;;  %v2457_v46 = vrot.slane %v2456_v42, 4  ;;  %v2972_v10 = vsel %vm10284_vm0, %v8186_v51, %v2971_v39  ;;  %v2981_v11 = vrot.slane %v2863_v38, 5  ;;  %v2872_v34 = vld [vmem:[#allocation2 + $0x5c] sm:$0x1]  ;;  %v2873_v43 = vld [vmem:[#allocation2 + $0x60] sm:$0xe] }
 0x196   : > { %v2968_v7 = vsel %vm10284_vm0, %v2966_v61, %v2967_v55  ;;  %v2975_v27 = vsel %vm10284_vm0, %v2973_v4, %v2974_v58  ;;  %v2980_v16 = vrot.slane %v2978_v6, 4  ;;  %v8188_v17 = vrot.slane %v2864_v57, 9  ;;  %v2875_v57 = vld [vmem:[#allocation2 + $0x68] sm:$0x1]  ;;  %v2877_v61 = vld [vmem:[#allocation2 + $0x70] sm:$0xf] }
 0x197   : > { %v8217_v14 = vcombine.low %v2965_v28, %v2968_v7  ;;  %v2462_v23 = vsel %vm10104_vm13, %v2457_v46, %v2461_v60  ;;  %9062 = vmatpush3.bf16.msra.mxu1 %v9398_v41  ;;  %v2979_v25 = vsel %vm10284_vm0, %v8187_v5, %v2978_v6  ;;  %v2985_v29 = vrot.slane %v2865_v62, 5  ;;  %v9404_v41 = vld [vmem:[%s11934_s3 + $0x118] sm:$0xff]   ;;  %v2878_v62 = vld [vmem:[#allocation2 + $0x74] sm:$0x1]  ;;  %v9407_v6 = vld [vmem:[%s11934_s3 + $0x120] sm:$0xff]  }
 0x198   : > { %v2988_v21 = vrot.slane %v2866_v63, 5  ;;  %v8174_v35 = vcombine.low %v2452_v1, %v2462_v23  ;;  %v8218_v32 = vcombine.low %v2972_v10, %v2975_v27  ;;  %v2982_v33 = vsel %vm10284_vm0, %v2980_v16, %v2981_v11  ;;  %9063 = vmatprep.subr.bf16.mxu1 %v9401_v8  ;;  %v2880_v46 = vld [vmem:[#allocation2 + $0x7c] sm:$0xf]  ;;  %v9400_v23 = vld [vmem:[#allocation2 + $0x24] sm:$0xff]  }
 0x199   : > { %8983 = vmatprep.mubr.bf16.mxu1 %v8217_v14  ;;  %v2992_v49 = vrot.slane %v2868_v59, 5  ;;  %v8219_v13 = vcombine.low %v2979_v25, %v2982_v33  ;;  %v2987_v37 = vrot.slane %v2985_v29, 4  ;;  %v2995_v40 = vrot.slane %v2869_v20, 5  ;;  %v2881_v14 = vld [vmem:[#allocation2 + $0x80] sm:$0x1]  ;;  %v9399_v27 = vld [vmem:[#allocation2 + $0x18] sm:$0xff]  }
 0x19a   : > { %v10339_v38 = vadd.f32 %v10306_v54, %v10151_v26  ;;  %8960 = vmatmul.mubr.bf16.gmra.mrb[64].mxu0 %v8174_v35  ;;  %8984 = vmatmul.mubr.bf16.gmra.mrb[36].mxu1 %v8218_v32  ;;  %v2986_v48 = vsel %vm10284_vm0, %v8188_v17, %v2985_v29  ;;  %v8189_v50 = vrot.slane %v2867_v18, 9  ;;  %v2999_v55 = vrot.slane %v2871_v24, 5 }
 0x19b   : > { %v2994_v45 = vrot.slane %v2992_v49, 4  ;;  %9027 = vmatprep.mubr.bf16.mxu0 %v9396_v44  ;;  %8987 = vmatprep.mubr.bf16.mxu1 %v8219_v13  ;;  %v2989_v56 = vsel %vm10284_vm0, %v2987_v37, %v2988_v21  ;;  %v8190_v51 = vrot.slane %v2870_v30, 9  ;;  %v3002_v39 = vrot.slane %v2872_v34, 5  ;;  %v9410_v21 = vld [vmem:[%s11934_s3 + $0x128] sm:$0xff]  }
 0x19c   : > { %v3006_v58 = vrot.slane %v2874_v53, 5  ;;  %9064 = vmatpush3.bf16.msra.mxu1 %v9401_v8  ;;  %v2993_v26 = vsel %vm10284_vm0, %v8189_v50, %v2992_v49  ;;  %v3001_v60 = vrot.slane %v2999_v55, 4  ;;  %v8191_v28 = vrot.slane %v2873_v43, 9  ;;  %v2879_v8 = vld [vmem:[#allocation2 + $0x78] sm:$0xe]  ;;  %v9414_v30 = vld [vmem:[%s11934_s3 + $0x148] sm:$0xff]  }
 0x19d   : > { %v2996_v42 = vsel %vm10284_vm0, %v2994_v45, %v2995_v40  ;;  %v8220_v63 = vcombine.low %v2986_v48, %v2989_v56  ;;  %9065 = vmatprep.subr.bf16.mxu1 %v9404_v41  ;;  %v10351_v4 = vsel %vm10284_vm0, %v8190_v51, %v2999_v55  ;;  %v3009_v5 = vrot.slane %v2875_v57, 5  ;;  %v10378_v49 = vld [vmem:[#allocation2 + $0x84] sm:$0xe]  ;;  %v10380_v37 = vld [vmem:[#allocation2 + $0x88] sm:$0xf]  ;;  %v10396_v45 = vld [vmem:[%s11934_s3 + $0x130] sm:$0xff]  }
 0x19e   : > { %v8221_v1 = vcombine.low %v2993_v26, %v2996_v42  ;;  %v10358_v7 = vsel %vm10284_vm0, %v3001_v60, %v3002_v39  ;;  %v3008_v10 = vrot.slane %v3006_v58, 4  ;;  %v918_v11 = vmax.f32 %v10240_v31, 0.0  ;;  %v2884_v50 = vld [vmem:[#allocation2 + $0x8c] sm:$0x1] }
 0x19f   : > { %v916_v59 = vmax.f32 %v10310_v22, 0.0  ;;  %v10364_v16 = vsel %vm10284_vm0, %v8191_v28, %v3006_v58  ;;  %v8192_v17 = vrot.slane %v2876_v52, 9  ;;  %v3013_v18 = vrot.slane %v2877_v61, 5  ;;  %v1515_v57 = vld [vmem:[#allocation2 + $0xcc] sm:$0xf]  ;;  %v9402_v61 = vld [vmem:[#allocation2 + $0x30] sm:$0xff]  }
 0x1a0   : > { %v3016_v20 = vrot.slane %v2878_v62, 5  ;;  %v8222_v25 = vcombine.low %v10351_v4, %v10358_v7  ;;  %9066 = vmatpush3.bf16.msra.mxu1 %v9404_v41  ;;  %v10370_v29 = vsel %vm10284_vm0, %v3008_v10, %v3009_v5  ;;  %v8586_v31 = vpack.c.bf16 %v918_v11, %v918_v11  ;;  %v1508_v58 = vld [vmem:[#allocation2 + $0xc0] sm:$0xf]  ;;  %v2885_v28 = vld [vmem:[#allocation2 + $0x90] sm:$0xe] }
 0x1a1   : > { %v8584_v22 = vpack.c.bf16 %v916_v59, %v916_v59  ;;  %9067 = vmatprep.subr.bf16.mxu1 %v9407_v6  ;;  %v3015_v24 = vrot.slane %v3013_v18, 4  ;;  %v8193_v35 = vrot.slane %v2879_v8, 9  ;;  %v3020_v32 = vrot.slane %v2880_v46, 5  ;;  %v2886_v5 = vld [vmem:[#allocation2 + $0x94] sm:$0xf] }
 0x1a2   : > { %v3023_v33 = vrot.slane %v2881_v14, 5  ;;  %9028 = vmatmul.mubr.bf16.vlgmr.msra.gmra.mrb[68].mxu0 %v9399_v27  ;;  %8988 = vmatmul.mubr.bf16.gmra.mrb[40].mxu1 %v8220_v63  ;;  %v1321_v34 = vshrl.u32 %v8586_v31, 16  ;;  %v1324_v53 = vshll.u32 %v8586_v31, 16  ;;  %v8223_v40 = vcombine.low %v10364_v16, %v10370_v29  ;;  %v10424_v59 = vld [vmem:[#allocation2 + $0xa0] sm:$0xf] }
 0x1a3   : > { %v1304_v44 = vshrl.u32 %v8584_v22, 16  ;;  %v1307_v13 = vshll.u32 %v8584_v22, 16  ;;  %9031 = vmatprep.mubr.bf16.mxu0 %v9400_v23  ;;  %8991 = vmatprep.mubr.bf16.mxu1 %v8221_v1  ;;  %v10386_v41 = vsel %vm10284_vm0, %v8192_v17, %v3013_v18  ;;  %v10390_v43 = vsel %vm10284_vm0, %v3015_v24, %v3016_v20  ;;  %v9403_v14 = vld [vmem:[#allocation2 + $0x3c] sm:$0xff]   ;;  %v10456_v7 = vld [vmem:[#allocation2 + $0xa8] sm:$0xe] }
 0x1a4   : > { %v919_v48 = vmax.f32 %v10339_v38, 0.0  ;;  %v10398_v55 = vrot.slane %v1321_v34, 7  ;;  %9068 = vmatpush3.bf16.msra.mxu1 %v9407_v6  ;;  %v10404_v51 = vsel %vm10284_vm0, %v8193_v35, %v3020_v32  ;;  %v3022_v39 = vrot.slane %v3020_v32, 4  ;;  %9108 = vmatpush3.bf16.msra.mxu0 %v10229_v36  ;;  %v9417_v38 = vld [vmem:[%s11934_s3 + $0x150] sm:$0xff]   ;;  %v10420_v6 = vld [vmem:[#allocation2 + $0x98] sm:$0x1] }
 0x1a5   : > { %v10400_v56 = vrot.slane %v1304_v44, 7  ;;  %v8224_v52 = vcombine.low %v10386_v41, %v10390_v43  ;;  %9069 = vmatprep.subr.bf16.mxu1 %v9410_v21  ;;  %v8194_v42 = vrot.slane %v10378_v49, 9  ;;  %v3027_v60 = vrot.slane %v10380_v37, 5  ;;  %9109 = vmatprep.subr.bf16.mxu0 %v9414_v30  ;;  %v2888_v20 = vld [vmem:[#allocation2 + $0x9c] sm:$0xe] }
 0x1a6   : > { %v8587_v26 = vpack.c.bf16 %v919_v48, %v919_v48  ;;  %v1326_v62 = vor.u32 %v1324_v53, %v10398_v55  ;;  %v10418_v63 = vsel %vm10284_vm0, %v3022_v39, %v3023_v33  ;;  %v3030_v1 = vrot.slane %v2884_v50, 5  ;;  %v10435_v23 = vld [vmem:[%s11934_s3 + $0x158] sm:$0xff]   ;;  %v2890_v35 = vld [vmem:[#allocation2 + $0xa4] sm:$0x1]  ;;  %v10467_v48 = vld [vmem:[#allocation2 + $0xb4] sm:$0xe] }
 0x1a7   : > { %v1309_v36 = vor.u32 %v1307_v13, %v10400_v56  ;;  %v1327_v8 = vrot.slane %v10398_v55, 4  ;;  %v1310_v46 = vrot.slane %v10400_v56, 4  ;;  %v3029_v17 = vrot.slane %v3027_v60, 4 }
 0x1a8   : > { %v1329_v10 = vshrl.u32 %v8587_v26, 16  ;;  %v1332_v11 = vshll.u32 %v8587_v26, 16  ;;  %v1516_v27 = vsel %vm9818_vm7, %v1326_v62, %v1515_v57  ;;  %9070 = vmatpush3.bf16.msra.mxu1 %v9410_v21  ;;  %v873_v18 = vadd.f32 %v10306_v54, %v10159_v15  ;;  %9110 = vmatpush3.bf16.msra.mxu0 %v9414_v30  ;;  %v9420_v15 = vld [vmem:[%s11934_s3 + $0x138] sm:$0xff]   ;;  %v9405_v26 = vld [vmem:[#allocation2 + $0x48] sm:$0xff]  }
 0x1a9   : > { %v1509_v16 = vsel %vm9818_vm7, %v1309_v36, %v1508_v58  ;;  %1517 = vst [vmem:[#allocation2 + $0xcc] sm:$0xf] %v1516_v27  ;;  %v8225_v29 = vcombine.low %v10404_v51, %v10418_v63  ;;  %v8195_v22 = vrot.slane %v2885_v28, 9  ;;  %v3034_v24 = vrot.slane %v2886_v5, 5  ;;  %9071 = vmatprep.subr.bf16.mxu1 %v10396_v45  ;;  %9111 = vmatprep.subr.bf16.mxu0 %v9417_v38  ;;  %v10474_v58 = vld [vmem:[#allocation2 + $0xb8] sm:$0xf] }
 0x1aa   : > { %1510 = vst [vmem:[#allocation2 + $0xc0] sm:$0xf] %v1509_v16  ;;  %v1331_v31 = vrot.slane %v1329_v10, 7  ;;  %9032 = vmatmul.mubr.bf16.gmra.mrb[72].mxu0 %v9402_v61  ;;  %8992 = vmatmul.mubr.bf16.gmra.mrb[44].mxu1 %v8222_v25  ;;  %v10448_v54 = vsel %vm10284_vm0, %v3029_v17, %v3030_v1  ;;  %v917_v21 = vmax.f32 %v873_v18, 0.0  ;;  %v3037_v30 = vrot.slane %v10420_v6, 5  ;;  %v9406_v36 = vld [vmem:[#allocation2 + $0x54] sm:$0xff]  }
 0x1ab   : > { %v3041_v32 = vrot.slane %v10424_v59, 5  ;;  %9035 = vmatprep.mubr.bf16.mxu0 %v9403_v14  ;;  %8995 = vmatprep.mubr.bf16.mxu1 %v8223_v40  ;;  %v10454_v34 = vsel %vm10284_vm0, %v8194_v42, %v3027_v60  ;;  %v8196_v4 = vrot.slane %v2888_v20, 9  ;;  %v10458_v25 = vld [vmem:[#allocation2 + $0xac] sm:$0xf]  ;;  %v10464_v13 = vsel %vm10284_vm0, %v8195_v22, %v3034_v24  ;;  %v2893_v40 = vld [vmem:[#allocation2 + $0xb0] sm:$0x1] }
 0x1ac   : > { %v1334_v33 = vor.u32 %v1332_v11, %v1331_v31  ;;  %v1336_v49 = vrot.slane %v1331_v31, 4  ;;  %v8226_v53 = vcombine.low %v10454_v34, %v10448_v54  ;;  %v8585_v44 = vpack.c.bf16 %v917_v21, %v917_v21  ;;  %9072 = vmatpush3.bf16.msra.mxu1 %v10396_v45  ;;  %9112 = vmatpush3.bf16.msra.mxu0 %v9417_v38  ;;  %v9422_v45 = vld [vmem:[%s11934_s3 + $0x160] sm:$0xff]   ;;  %v2896_v62 = vld [vmem:[#allocation2 + $0xbc] sm:$0x1]  ;;  %v1512_v1 = vld [vmem:[#allocation2 + $0xc8] sm:$0x1] }
 0x1ad   : > { %v3036_v37 = vrot.slane %v3034_v24, 4  ;;  %v3043_v57 = vrot.slane %v3041_v32, 4  ;;  %v3044_v39 = vrot.slane %v2890_v35, 5  ;;  %9113 = vmatprep.subr.bf16.mxu0 %v10435_v23  ;;  %9073 = vmatprep.subr.bf16.mxu1 %v9420_v15  ;;  %v10482_v38 = vld [vmem:[%s11934_s3 + $0x180] sm:$0xff]   ;;  %v3048_v61 = vrot.slane %v10458_v25, 5  ;;  %v9424_v59 = vld [vmem:[%s11934_s3 + $0x168] sm:$0xff]  }
 0x1ae   : > { %v1335_v50 = vsel %vm9834_vm9, %v1327_v8, %v1334_v33  ;;  %v1520_v55 = vsel %vm9825_vm8, %v1336_v49, %v1519_v3  ;;  %v1312_v42 = vshrl.u32 %v8585_v44, 16  ;;  %v1315_v60 = vshll.u32 %v8585_v44, 16  ;;  %v3897_v11 = vld [vmem:[#allocation2 + $0xc] sm:$0xf]  ;;  %v3898_v21 = vld [vmem:[#allocation2 + $0x10] sm:$0xf] }
 0x1af   : > { %1518 = vst [vmem:[#allocation2 + $0xd0] sm:$0xf] %v1335_v50  ;;  %1521 = vst [vmem:[#allocation2 + $0xd4] sm:$0x1] %v1520_v55  ;;  %v10486_v28 = vsel %vm10284_vm0, %v3036_v37, %v3037_v30  ;;  %v10492_v5 = vsel %vm10284_vm0, %v8196_v4, %v3041_v32  ;;  %v8197_v6 = vrot.slane %v10456_v7, 9  ;;  %v3051_v8 = vrot.slane %v2893_v40, 5 }
 0x1b0   : > { %1640 = vst [vmem:[#allocation2 + $0xd0] sm:$0xf] %v9624_v47  ;;  %v8198_v10 = vrot.slane %v10467_v48, 9  ;;  %v1573_v14 = vld [vmem:[#allocation2 + $0xcc] sm:$0x1]  ;;  %v1314_v16 = vrot.slane %v1312_v42, 7  ;;  %v8227_v17 = vcombine.low %v10464_v13, %v10486_v28  ;;  %v10503_v18 = vsel %vm10284_vm0, %v3043_v57, %v3044_v39  ;;  %9114 = vmatpush3.bf16.msra.mxu0 %v10435_v23  ;;  %9074 = vmatpush3.bf16.msra.mxu1 %v9420_v15 }
 0x1b1   : > { %v1570_v27 = vld [vmem:[#allocation2 + $0xc0] sm:$0x1]  ;;  %v3050_v20 = vrot.slane %v3048_v61, 4  ;;  %v1574_v31 = vsel %vm9825_vm8, 0, %v1573_v14  ;;  %v3055_v22 = vrot.slane %v10474_v58, 5  ;;  %v3058_v24 = vrot.slane %v2896_v62, 5  ;;  %9115 = vmatprep.subr.bf16.mxu0 %v9422_v45  ;;  %9155 = vmatprep.subr.bf16.mxu1 %v10482_v38 }
 0x1b2   : > { %v1571_v3 = vsel %vm9825_vm8, 0, %v1570_v27  ;;  %9036 = vmatmul.mubr.bf16.gmra.mrb[76].mxu0 %v9405_v26  ;;  %1575 = vst [vmem:[#allocation2 + $0xcc] sm:$0x1] %v1574_v31  ;;  %8996 = vmatmul.mubr.bf16.gmra.mrb[48].mxu1 %v8224_v52  ;;  %v1317_v23 = vor.u32 %v1315_v60, %v1314_v16  ;;  %v1319_v15 = vrot.slane %v1314_v16, 4  ;;  %v3899_v35 = vld [vmem:[#allocation2 + $0x14] sm:$0x1]  ;;  %v8228_v33 = vcombine.low %v10492_v5, %v10503_v18 }
 0x1b3   : > { %1572 = vst [vmem:[#allocation2 + $0xc0] sm:$0x1] %v1571_v3  ;;  %v10517_v30 = vsel %vm10284_vm0, %v3050_v20, %v3051_v8  ;;  %v3946_v32 = vshrl.u32 %v3897_v11, 16  ;;  %9039 = vmatprep.mubr.bf16.mxu0 %v9406_v36  ;;  %1639 = vst [vmem:[#allocation2 + $0xcc] sm:$0xf] %v9624_v47  ;;  %8999 = vmatprep.mubr.bf16.mxu1 %v8225_v29  ;;  %v10527_v41 = vsel %vm10284_vm0, %v8197_v6, %v3048_v61  ;;  %v9408_v61 = vld [vmem:[#allocation2 + $0x60] sm:$0xff]  }
 0x1b4   : > { %v3057_v43 = vrot.slane %v3055_v22, 4  ;;  %v3949_v52 = vshll.u32 %v3897_v11, 16  ;;  %v3900_v49 = vld [vmem:[#allocation2 + $0x18] sm:$0xf]  ;;  %v1318_v4 = vsel %vm9834_vm9, %v1310_v46, %v1317_v23  ;;  %v1513_v51 = vsel %vm9825_vm8, %v1319_v15, %v1512_v1  ;;  %9116 = vmatpush3.bf16.msra.mxu0 %v9422_v45  ;;  %v3901_v7 = vld [vmem:[#allocation2 + $0x1c] sm:$0xf] }
 0x1b5   : > { %v3948_v63 = vrot.slane %v3946_v32, 4  ;;  %v3955_v29 = vshll.u32 %v3898_v21, 16  ;;  %v3902_v25 = vld [vmem:[#allocation2 + $0x20] sm:$0x1]  ;;  %1511 = vst [vmem:[#allocation2 + $0xc4] sm:$0xf] %v1318_v4  ;;  %v8229_v37 = vcombine.low %v10527_v41, %v10517_v30  ;;  %9117 = vmatprep.subr.bf16.mxu0 %v9424_v59 }
 0x1b6   : > { %v1628_v44 = vld [vmem:[#allocation2 + $0xd4] sm:$0x1]  ;;  %1514 = vst [vmem:[#allocation2 + $0xc8] sm:$0x1] %v1513_v51  ;;  %v3951_v40 = vrot.slane %v3949_v52, 5  ;;  %v3959_v50 = vshrl.u32 %v3898_v21, 16  ;;  %v10546_v46 = vsel %vm10284_vm0, %v3057_v43, %v3058_v24 }
 0x1b7   : > { %v3965_v56 = vshll.u32 %v3899_v35, 16  ;;  %v1629_v19 = vsel %vm9865_vm10, 0, %v1628_v44  ;;  %v3957_v55 = vrot.slane %v3955_v29, 5  ;;  %v3970_v57 = vshrl.u32 %v3900_v49, 16  ;;  %v3903_v39 = vld [vmem:[#allocation2 + $0x24] sm:$0xf] }
 0x1b8   : > { %1630 = vst [vmem:[#allocation2 + $0xd4] sm:$0x1] %v1629_v19  ;;  %v3952_v45 = vor.u32 %v3951_v40, %v3948_v63  ;;  %v3961_v26 = vrot.slane %v3959_v50, 4  ;;  %v3973_v60 = vshll.u32 %v3900_v49, 16  ;;  %v9409_v62 = vld [vmem:[#allocation2 + $0x6c] sm:$0xff]   ;;  %9118 = vmatpush3.bf16.msra.mxu0 %v9424_v59  ;;  %v3979_v1 = vshll.u32 %v3901_v7, 16 }
 0x1b9   : > { %v3967_v42 = vrot.slane %v3965_v56, 5  ;;  %1641 = vst [vmem:[#allocation2 + $0xd4] sm:$0x1] %v9624_v47  ;;  %v3972_v36 = vrot.slane %v3970_v57, 4  ;;  %v3983_v6 = vshrl.u32 %v3901_v7, 16  ;;  %v3989_v8 = vshll.u32 %v3902_v25, 16  ;;  %9119 = vmatprep.subr.bf16.mxu0 %v9427_v12 }
 0x1ba   : > { %v3953_v11 = vrot.slane %v3952_v45, 4  ;;  %v3962_v14 = vor.u32 %v3961_v26, %v3957_v55  ;;  %v3975_v27 = vrot.slane %v3973_v60, 5  ;;  %v3994_v16 = vshrl.u32 %v3903_v39, 16  ;;  %v9428_v20 = vld [vmem:[%s11934_s3 + $0x178] sm:$0xff]   ;;  %9040 = vmatmul.mubr.bf16.gmra.mrb[80].mxu0 %v9408_v61  ;;  %9000 = vmatmul.mubr.bf16.gmra.mrb[52].mxu1 %v8226_v53  ;;  %v3904_v3 = vld [vmem:[#allocation2 + $0x28] sm:$0xf] }
 0x1bb   : > { %v10561_v47 = vsel %vm10284_vm0, %v8198_v10, %v3055_v22  ;;  %v3981_v59 = vrot.slane %v3979_v1, 5  ;;  %v3985_v31 = vrot.slane %v3983_v6, 4  ;;  %v3997_v24 = vshll.u32 %v3903_v39, 16  ;;  %9043 = vmatprep.mubr.bf16.mxu0 %v9409_v62  ;;  %9003 = vmatprep.mubr.bf16.mxu1 %v8227_v17  ;;  %v3905_v58 = vld [vmem:[#allocation2 + $0x2c] sm:$0x1]  ;;  %v10577_v52 = vld [vmem:[%s11934_s3 + $0x1c0] sm:$0xff]  }
 0x1bc   : > { %v3958_v54 = vsel %vm10104_vm13, %v3953_v11, %v3957_v55  ;;  %v3963_v34 = vrot.slane %v3962_v14, 4  ;;  %v3976_v53 = vor.u32 %v3975_v27, %v3972_v36  ;;  %v3996_v48 = vrot.slane %v3994_v16, 4  ;;  %v4715_v21 = vld [vmem:[#allocation2 + $0xc] sm:$0xe]  ;;  %9120 = vmatpush3.bf16.msra.mxu0 %v9427_v12  ;;  %v4716_v43 = vld [vmem:[#allocation2 + $0x10] sm:$0xf] }
 0x1bd   : > { %v1625_v23 = vld [vmem:[#allocation2 + $0xc8] sm:$0x1]  ;;  %v8230_v10 = vcombine.low %v10561_v47, %v10546_v46  ;;  %v3986_v22 = vor.u32 %v3985_v31, %v3981_v59  ;;  %v3991_v15 = vrot.slane %v3989_v8, 5  ;;  %v3999_v35 = vrot.slane %v3997_v24, 5  ;;  %9121 = vmatprep.subr.bf16.mxu0 %v9428_v20  ;;  %v3906_v29 = vld [vmem:[#allocation2 + $0x30] sm:$0xf] }
 0x1be   : > { %v1626_v13 = vsel %vm9865_vm10, 0, %v1625_v23  ;;  %v3968_v28 = vsel %vm10104_vm13, %v3963_v34, %v3967_v42  ;;  %v3977_v17 = vrot.slane %v3976_v53, 4  ;;  %v4003_v32 = vshll.u32 %v3904_v3, 16  ;;  %v3907_v50 = vld [vmem:[#allocation2 + $0x34] sm:$0xf]  ;;  %v9411_v56 = vld [vmem:[#allocation2 + $0x78] sm:$0xff]  }
 0x1bf   : > { %1627 = vst [vmem:[#allocation2 + $0xc8] sm:$0x1] %v1626_v13  ;;  %v10579_v49 = vcombine.low %v3958_v54, %v3968_v28  ;;  %v3987_v4 = vrot.slane %v3986_v22, 4  ;;  %v4000_v51 = vor.u32 %v3999_v35, %v3996_v48  ;;  %v4007_v63 = vshrl.u32 %v3904_v3, 16  ;;  %v3908_v39 = vld [vmem:[#allocation2 + $0x38] sm:$0x1] }
 0x1c0   : > { %v3982_v7 = vsel %vm10104_vm13, %v3977_v17, %v3981_v59  ;;  %v4005_v25 = vrot.slane %v4003_v32, 5  ;;  %v4013_v44 = vshll.u32 %v3905_v58, 16  ;;  %v8319_v40 = vrot.slane %v4715_v21, 9  ;;  %9122 = vmatpush3.bf16.msra.mxu0 %v9428_v20  ;;  %v9413_v45 = vld [vmem:[#allocation2 + $0x84] sm:$0xff]   ;;  %v3909_v62 = vld [vmem:[#allocation2 + $0x3c] sm:$0xf] }
 0x1c1   : > { %v3992_v12 = vsel %vm10104_vm13, %v3987_v4, %v3991_v15  ;;  %v4001_v19 = vrot.slane %v4000_v51, 4  ;;  %v4009_v55 = vrot.slane %v4007_v63, 4  ;;  %v4813_v57 = vrot.slane %v4716_v43, 5  ;;  %9203 = vmatprep.subr.bf16.mxu0 %v10577_v52  ;;  %v3910_v5 = vld [vmem:[#allocation2 + $0x40] sm:$0xf] }
 0x1c2   : > { %v10585_v26 = vcombine.low %v3982_v7, %v3992_v12  ;;  %v4015_v42 = vrot.slane %v4013_v44, 5  ;;  %v4816_v60 = vrot.slane %v4717_v0, 5  ;;  %v4018_v61 = vshrl.u32 %v3906_v29, 16  ;;  %9044 = vmatmul.mubr.bf16.gmra.mrb[84].mxu0 %v9411_v56  ;;  %9004 = vmatmul.mubr.bf16.gmra.mrb[56].mxu1 %v8228_v33  ;;  %v3911_v59 = vld [vmem:[#allocation2 + $0x44] sm:$0x1]  ;;  %v9418_v23 = vld [vmem:[#allocation2 + $0x9c] sm:$0xff]  }
 0x1c3   : > { %v4006_v36 = vsel %vm10104_vm13, %v4001_v19, %v4005_v25  ;;  %v4010_v1 = vor.u32 %v4009_v55, %v4005_v25  ;;  %v10595_v6 = vsel %vm10284_vm0, %v8319_v40, %v4813_v57  ;;  %v4815_v8 = vrot.slane %v4813_v57, 4  ;;  %9047 = vmatprep.mubr.bf16.mxu0 %v9413_v45  ;;  %9007 = vmatprep.mubr.bf16.mxu1 %v8229_v37  ;;  %v4718_v41 = vld [vmem:[#allocation2 + $0x18] sm:$0xe]  ;;  %v9416_v37 = vld [vmem:[#allocation2 + $0x90] sm:$0xff]   ;;  %v4719_v21 = vld [vmem:[#allocation2 + $0x1c] sm:$0xf] }
 0x1c4   : > { %v4020_v11 = vrot.slane %v4018_v61, 4  ;;  %v4021_v14 = vshll.u32 %v3906_v29, 16  ;;  %v4027_v27 = vshll.u32 %v3907_v50, 16  ;;  %v4031_v16 = vshrl.u32 %v3907_v50, 16  ;;  %v4720_v28 = vld [vmem:[#allocation2 + $0x20] sm:$0x1] }
 0x1c5   : > { %v4011_v18 = vrot.slane %v4010_v1, 4  ;;  %v10602_v33 = vsel %vm10284_vm0, %v4815_v8, %v4816_v60  ;;  %v4037_v20 = vshll.u32 %v3908_v39, 16  ;;  %v4042_v31 = vshrl.u32 %v3909_v62, 16  ;;  %v4721_v17 = vld [vmem:[#allocation2 + $0x24] sm:$0xe] }
 0x1c6   : > { %v8351_v3 = vcombine.low %v10595_v6, %v10602_v33  ;;  %v4023_v24 = vrot.slane %v4021_v14, 5  ;;  %v4029_v54 = vrot.slane %v4027_v27, 5  ;;  %v4033_v30 = vrot.slane %v4031_v16, 4  ;;  %v4722_v63 = vld [vmem:[#allocation2 + $0x28] sm:$0xf] }
 0x1c7   : > { %v4016_v34 = vsel %vm10104_vm13, %v4011_v18, %v4015_v42  ;;  %v4039_v53 = vrot.slane %v4037_v20, 5  ;;  %v4044_v58 = vrot.slane %v4042_v31, 4  ;;  %v4045_v48 = vshll.u32 %v3909_v62, 16  ;;  %v4723_v44 = vld [vmem:[#allocation2 + $0x2c] sm:$0x1] }
 0x1c8   : > { %v10608_v22 = vcombine.low %v4006_v36, %v4016_v34  ;;  %v4024_v15 = vor.u32 %v4023_v24, %v4020_v11  ;;  %v4034_v35 = vor.u32 %v4033_v30, %v4029_v54  ;;  %v4051_v13 = vshll.u32 %v3910_v5, 16  ;;  %v3912_v19 = vld [vmem:[#allocation2 + $0x48] sm:$0xf]  ;;  %v3913_v60 = vld [vmem:[#allocation2 + $0x4c] sm:$0xf] }
 0x1c9   : > { %v4047_v32 = vrot.slane %v4045_v48, 5  ;;  %v4055_v43 = vshrl.u32 %v3910_v5, 16  ;;  %v4061_v4 = vshll.u32 %v3911_v59, 16  ;;  %v8320_v51 = vrot.slane %v4718_v41, 9  ;;  %v3914_v36 = vld [vmem:[#allocation2 + $0x50] sm:$0x1] }
 0x1ca   : > { %v4025_v0 = vrot.slane %v4024_v15, 4  ;;  %v4035_v29 = vrot.slane %v4034_v35, 4  ;;  %v4053_v7 = vrot.slane %v4051_v13, 5  ;;  %v4820_v25 = vrot.slane %v4719_v21, 5  ;;  %9048 = vmatmul.mubr.bf16.gmra.mrb[88].mxu0 %v9416_v37  ;;  %9008 = vmatmul.mubr.bf16.gmra.mrb[60].mxu1 %v8230_v10  ;;  %v3915_v16 = vld [vmem:[#allocation2 + $0x54] sm:$0xf] }
 0x1cb   : > { %v4048_v40 = vor.u32 %v4047_v32, %v4044_v58  ;;  %v4057_v50 = vrot.slane %v4055_v43, 4  ;;  %v4063_v56 = vrot.slane %v4061_v4, 5  ;;  %v4823_v12 = vrot.slane %v4720_v28, 5  ;;  %9051 = vmatprep.mubr.bf16.mxu0 %v9418_v23  ;;  %9075 = vmatprep.mubr.bf16.mxu1 %v10579_v49  ;;  %v9421_v5 = vld [vmem:[#allocation2 + $0xa8] sm:$0xff]   ;;  %v3917_v23 = vld [vmem:[#allocation2 + $0x5c] sm:$0x1] }
 0x1cc   : > { %v4030_v55 = vsel %vm10104_vm13, %v4025_v0, %v4029_v54  ;;  %v4040_v57 = vsel %vm10104_vm13, %v4035_v29, %v4039_v53  ;;  %v10620_v39 = vsel %vm10284_vm0, %v8320_v51, %v4820_v25  ;;  %v4822_v46 = vrot.slane %v4820_v25, 4  ;;  %v9429_v18 = vld [vmem:[%s11934_s3 + $0x188] sm:$0xff]   ;;  %v9423_v54 = vld [vmem:[#allocation2 + $0xb4] sm:$0xff]   ;;  %v4724_v35 = vld [vmem:[#allocation2 + $0x30] sm:$0xe] }
 0x1cd   : > { %v10622_v47 = vcombine.low %v4030_v55, %v4040_v57  ;;  %v4049_v10 = vrot.slane %v4048_v40, 4  ;;  %v4058_v45 = vor.u32 %v4057_v50, %v4053_v7  ;;  %v8321_v42 = vrot.slane %v4721_v17, 9  ;;  %v3916_v53 = vld [vmem:[#allocation2 + $0x58] sm:$0xf]  ;;  %v4725_v43 = vld [vmem:[#allocation2 + $0x34] sm:$0xf] }
 0x1ce   : > { %v10626_v49 = vsel %vm10284_vm0, %v4822_v46, %v4823_v12  ;;  %v4827_v61 = vrot.slane %v4722_v63, 5  ;;  %v4830_v62 = vrot.slane %v4723_v44, 5  ;;  %v4066_v1 = vshrl.u32 %v3912_v19, 16  ;;  %v4726_v4 = vld [vmem:[#allocation2 + $0x38] sm:$0x1]  ;;  %v9426_v46 = vld [vmem:[#allocation2 + $0xc0] sm:$0xff]  }
 0x1cf   : > { %v4054_v8 = vsel %vm10104_vm13, %v4049_v10, %v4053_v7  ;;  %v4059_v11 = vrot.slane %v4058_v45, 4  ;;  %v8352_v14 = vcombine.low %v10620_v39, %v10626_v49  ;;  %v4069_v27 = vshll.u32 %v3912_v19, 16  ;;  %v4727_v7 = vld [vmem:[#allocation2 + $0x3c] sm:$0xe]  ;;  %v4728_v25 = vld [vmem:[#allocation2 + $0x40] sm:$0xf] }
 0x1d0   : > { %v10637_v20 = vsel %vm10284_vm0, %v8321_v42, %v4827_v61  ;;  %v4829_v59 = vrot.slane %v4827_v61, 4  ;;  %v4068_v31 = vrot.slane %v4066_v1, 4  ;;  %v4075_v24 = vshll.u32 %v3913_v60, 16  ;;  %v4729_v44 = vld [vmem:[#allocation2 + $0x44] sm:$0x1]  ;;  %v10711_v39 = vld [vmem:[%s11934_s3 + $0x1b0] sm:$0xff]  }
 0x1d1   : > { %v4064_v30 = vsel %vm10104_vm13, %v4059_v11, %v4063_v56  ;;  %v4071_v41 = vrot.slane %v4069_v27, 5  ;;  %v4079_v37 = vshrl.u32 %v3913_v60, 16  ;;  %v4085_v34 = vshll.u32 %v3914_v36, 16  ;;  %v3918_v1 = vld [vmem:[#allocation2 + $0x60] sm:$0xf]  ;;  %v10716_v49 = vld [vmem:[%s11934_s3 + $0x1d0] sm:$0xff]  }
 0x1d2   : > { %v10641_v58 = vcombine.low %v4054_v8, %v4064_v30  ;;  %v10645_v48 = vsel %vm10284_vm0, %v4829_v59, %v4830_v62  ;;  %v4077_v21 = vrot.slane %v4075_v24, 5  ;;  %v4090_v15 = vshrl.u32 %v3915_v16, 16  ;;  %9052 = vmatmul.mubr.bf16.gmra.mrb[92].mxu0 %v9421_v5  ;;  %9076 = vmatmul.mubr.bf16.vlgmr.msra.gmra.mrb[64].mxu1 %v10585_v26  ;;  %v9430_v26 = vld [vmem:[%s11934_s3 + $0x190] sm:$0xff]   ;;  %v3919_v8 = vld [vmem:[#allocation2 + $0x64] sm:$0xf] }
 0x1d3   : > { %v8353_v13 = vcombine.low %v10637_v20, %v10645_v48  ;;  %v4072_v28 = vor.u32 %v4071_v41, %v4068_v31  ;;  %v4081_v17 = vrot.slane %v4079_v37, 4  ;;  %v4087_v32 = vrot.slane %v4085_v34, 5  ;;  %9055 = vmatprep.mubr.bf16.mxu0 %v9423_v54  ;;  %9156 = vmatpush3.bf16.msra.mxu1 %v10482_v38  ;;  %v3920_v30 = vld [vmem:[#allocation2 + $0x68] sm:$0x1]  ;;  %v3923_v6 = vld [vmem:[#allocation2 + $0x74] sm:$0x1] }
 0x1d4   : > { %v4092_v51 = vrot.slane %v4090_v15, 4  ;;  %v4093_v63 = vshll.u32 %v3915_v16, 16  ;;  %v4099_v0 = vshll.u32 %v3916_v53, 16  ;;  %v4103_v29 = vshrl.u32 %v3916_v53, 16  ;;  %9079 = vmatprep.mubr.bf16.mxu1 %v10608_v22  ;;  %9157 = vmatprep.subr.bf16.mxu1 %v9429_v18  ;;  %v4730_v33 = vld [vmem:[#allocation2 + $0x48] sm:$0xe] }
 0x1d5   : > { %v4073_v40 = vrot.slane %v4072_v28, 4  ;;  %v4082_v50 = vor.u32 %v4081_v17, %v4077_v21  ;;  %v4109_v56 = vshll.u32 %v3917_v23, 16  ;;  %v8322_v12 = vrot.slane %v4724_v35, 9  ;;  %v3922_v23 = vld [vmem:[#allocation2 + $0x70] sm:$0xf] }
 0x1d6   : > { %v4095_v19 = vrot.slane %v4093_v63, 5  ;;  %v4101_v38 = vrot.slane %v4099_v0, 5  ;;  %v4105_v55 = vrot.slane %v4103_v29, 4  ;;  %v4834_v57 = vrot.slane %v4725_v43, 5  ;;  %v4731_v0 = vld [vmem:[#allocation2 + $0x4c] sm:$0xf] }
 0x1d7   : > { %v4078_v10 = vsel %vm10104_vm13, %v4073_v40, %v4077_v21  ;;  %v4083_v45 = vrot.slane %v4082_v50, 4  ;;  %v4111_v42 = vrot.slane %v4109_v56, 5  ;;  %v4837_v22 = vrot.slane %v4726_v4, 5  ;;  %9158 = vmatpush3.bf16.msra.mxu1 %v9429_v18  ;;  %v9431_v18 = vld [vmem:[%s11934_s3 + $0x198] sm:$0xff]   ;;  %v3921_v21 = vld [vmem:[#allocation2 + $0x6c] sm:$0xf] }
 0x1d8   : > { %v4096_v60 = vor.u32 %v4095_v19, %v4092_v51  ;;  %v4106_v61 = vor.u32 %v4105_v55, %v4101_v38  ;;  %v10659_v62 = vsel %vm10284_vm0, %v8322_v12, %v4834_v57  ;;  %v4836_v36 = vrot.slane %v4834_v57, 4  ;;  %9159 = vmatprep.subr.bf16.mxu1 %v9430_v26  ;;  %v4732_v29 = vld [vmem:[#allocation2 + $0x50] sm:$0x1]  ;;  %v4733_v50 = vld [vmem:[#allocation2 + $0x54] sm:$0xe]  ;;  %v9433_v57 = vld [vmem:[%s11934_s3 + $0x1a8] sm:$0xff]  }
 0x1d9   : > { %v4088_v11 = vsel %vm10104_vm13, %v4083_v45, %v4087_v32  ;;  %v8323_v27 = vrot.slane %v4727_v7, 9  ;;  %v4841_v16 = vrot.slane %v4728_v25, 5  ;;  %v4844_v5 = vrot.slane %v4729_v44, 5  ;;  %v9432_v7 = vld [vmem:[%s11934_s3 + $0x1a0] sm:$0xff]   ;;  %v4734_v56 = vld [vmem:[#allocation2 + $0x58] sm:$0xf] }
 0x1da   : > { %v8300_v59 = vcombine.low %v4078_v10, %v4088_v11  ;;  %v4097_v31 = vrot.slane %v4096_v60, 4  ;;  %v4107_v24 = vrot.slane %v4106_v61, 4  ;;  %v10668_v54 = vsel %vm10284_vm0, %v4836_v36, %v4837_v22  ;;  %9056 = vmatmul.mubr.bf16.gmra.mrb[96].mxu0 %v9426_v46  ;;  %9080 = vmatmul.mubr.bf16.gmra.mrb[68].mxu1 %v10622_v47  ;;  %v9435_v22 = vld [vmem:[%s11934_s3 + $0x1c8] sm:$0xff]  }
 0x1db   : > { %v8354_v41 = vcombine.low %v10659_v62, %v10668_v54  ;;  %v10675_v37 = vsel %vm10284_vm0, %v8323_v27, %v4841_v16  ;;  %v4843_v34 = vrot.slane %v4841_v16, 4  ;;  %v4114_v53 = vshrl.u32 %v3918_v1, 16  ;;  %9123 = vmatprep.mubr.bf16.mxu0 %v8351_v3  ;;  %9083 = vmatprep.mubr.bf16.mxu1 %v10641_v58  ;;  %v9441_v62 = vld [vmem:[%s11934_s3 + $0x1e0] sm:$0xff]  }
 0x1dc   : > { %v4102_v47 = vsel %vm10104_vm13, %v4097_v31, %v4101_v38  ;;  %v4112_v15 = vsel %vm10104_vm13, %v4107_v24, %v4111_v42  ;;  %v4117_v35 = vshll.u32 %v3918_v1, 16  ;;  %v4123_v28 = vshll.u32 %v3919_v8, 16  ;;  %9160 = vmatpush3.bf16.msra.mxu1 %v9430_v26  ;;  %v4735_v31 = vld [vmem:[#allocation2 + $0x5c] sm:$0x1] }
 0x1dd   : > { %v8301_v17 = vcombine.low %v4102_v47, %v4112_v15  ;;  %v10687_v32 = vsel %vm10284_vm0, %v4843_v34, %v4844_v5  ;;  %v4116_v43 = vrot.slane %v4114_v53, 4  ;;  %v4127_v4 = vshrl.u32 %v3919_v8, 16  ;;  %9161 = vmatprep.subr.bf16.mxu1 %v9431_v18  ;;  %v3924_v34 = vld [vmem:[#allocation2 + $0x78] sm:$0xf]  ;;  %v3926_v53 = vld [vmem:[#allocation2 + $0x80] sm:$0x1] }
 0x1de   : > { %v8355_v3 = vcombine.low %v10675_v37, %v10687_v32  ;;  %v4119_v58 = vrot.slane %v4117_v35, 5  ;;  %v4125_v51 = vrot.slane %v4123_v28, 5  ;;  %v4133_v63 = vshll.u32 %v3920_v30, 16  ;;  %v3927_v35 = vld [vmem:[#allocation2 + $0x84] sm:$0xf] }
 0x1df   : > { %v4129_v25 = vrot.slane %v4127_v4, 4  ;;  %v4138_v44 = vshrl.u32 %v3921_v21, 16  ;;  %v4141_v26 = vshll.u32 %v3921_v21, 16  ;;  %v4147_v40 = vshll.u32 %v3922_v23, 16 }
 0x1e0   : > { %v4120_v12 = vor.u32 %v4119_v58, %v4116_v43  ;;  %v4135_v19 = vrot.slane %v4133_v63, 5  ;;  %v4151_v38 = vshrl.u32 %v3922_v23, 16  ;;  %v4157_v55 = vshll.u32 %v3923_v6, 16  ;;  %9162 = vmatpush3.bf16.msra.mxu1 %v9431_v18  ;;  %v10742_v63 = vld [vmem:[%s11934_s3 + $0x1d8] sm:$0xff]  }
 0x1e1   : > { %v4130_v46 = vor.u32 %v4129_v25, %v4125_v51  ;;  %v4140_v10 = vrot.slane %v4138_v44, 4  ;;  %v4143_v45 = vrot.slane %v4141_v26, 5  ;;  %v4149_v42 = vrot.slane %v4147_v40, 5  ;;  %9163 = vmatprep.subr.bf16.mxu1 %v9432_v7  ;;  %v3929_v26 = vld [vmem:[#allocation2 + $0x8c] sm:$0x1] }
 0x1e2   : > { %v4121_v60 = vrot.slane %v4120_v12, 4  ;;  %v4153_v61 = vrot.slane %v4151_v38, 4  ;;  %v4159_v36 = vrot.slane %v4157_v55, 5  ;;  %v8324_v1 = vrot.slane %v4730_v33, 9  ;;  %9124 = vmatmul.mubr.bf16.vlgmr.msra.gmra.mrb[100].mxu0 %v8352_v14  ;;  %9084 = vmatmul.mubr.bf16.gmra.mrb[72].mxu1 %v8300_v59  ;;  %v3925_v59 = vld [vmem:[#allocation2 + $0x7c] sm:$0xf] }
 0x1e3   : > { %v4131_v8 = vrot.slane %v4130_v46, 4  ;;  %v4144_v11 = vor.u32 %v4143_v45, %v4140_v10  ;;  %v4848_v27 = vrot.slane %v4731_v0, 5  ;;  %v4851_v16 = vrot.slane %v4732_v29, 5  ;;  %9127 = vmatprep.mubr.bf16.mxu0 %v8353_v13  ;;  %9087 = vmatprep.mubr.bf16.mxu1 %v8301_v17  ;;  %v10747_v0 = vld [vmem:[%s11934_s3 + $0x1b8] sm:$0xff]   ;;  %v4736_v40 = vld [vmem:[#allocation2 + $0x60] sm:$0xe] }
 0x1e4   : > { %v4126_v5 = vsel %vm10104_vm13, %v4121_v60, %v4125_v51  ;;  %v4154_v18 = vor.u32 %v4153_v61, %v4149_v42  ;;  %v8325_v24 = vrot.slane %v4733_v50, 9  ;;  %v4855_v30 = vrot.slane %v4734_v56, 5  ;;  %9164 = vmatpush3.bf16.msra.mxu1 %v9432_v7  ;;  %9204 = vmatpush3.bf16.msra.mxu0 %v10577_v52  ;;  %v3928_v51 = vld [vmem:[#allocation2 + $0x88] sm:$0xf]  ;;  %v4737_v38 = vld [vmem:[#allocation2 + $0x64] sm:$0xf] }
 0x1e5   : > { %v4136_v14 = vsel %vm10104_vm13, %v4131_v8, %v4135_v19  ;;  %v4145_v20 = vrot.slane %v4144_v11, 4  ;;  %v10722_v48 = vsel %vm10284_vm0, %v8324_v1, %v4848_v27  ;;  %v4850_v13 = vrot.slane %v4848_v27, 4  ;;  %9165 = vmatprep.subr.bf16.mxu1 %v9433_v57  ;;  %9205 = vmatprep.subr.bf16.mxu0 %v9435_v22  ;;  %v10755_v55 = vld [vmem:[#allocation2 + $0x68] sm:$0x1]  ;;  %v10759_v46 = vpop.f32.mrb[0].mxu1 }
 0x1e6   : > { %v8302_v21 = vcombine.low %v4126_v5, %v4136_v14  ;;  %v4155_v23 = vrot.slane %v4154_v18, 4  ;;  %v10727_v47 = vsel %vm10284_vm0, %v8325_v24, %v4855_v30  ;;  %v4857_v15 = vrot.slane %v4855_v30, 4  ;;  %v4740_v8 = vld [vmem:[#allocation2 + $0x70] sm:$0xf]  ;;  %v10770_v54 = vpop.f32.mrb[1].mxu1  ;;  %v10781_v30 = vld [vmem:[%s11934_s3 + $0x200] sm:$0xff]  }
 0x1e7   : > { %v4150_v28 = vsel %vm10104_vm13, %v4145_v20, %v4149_v42  ;;  %v10733_v17 = vsel %vm10284_vm0, %v4850_v13, %v4851_v16  ;;  %v4858_v43 = vrot.slane %v4735_v31, 5  ;;  %v4162_v4 = vshrl.u32 %v3924_v34, 16  ;;  %v10774_v37 = vpop.f32.mrb[2].mxu1  ;;  %v4741_v31 = vld [vmem:[#allocation2 + $0x74] sm:$0x1]  ;;  %1998 = vst.msk [vmem:[#allocation3 + $0x10] sm:$0xff] %vm1995_vm1, %v10759_v46 }
 0x1e8   : > { %v4160_v52 = vsel %vm10104_vm13, %v4155_v23, %v4159_v36  ;;  %v8356_v6 = vcombine.low %v10722_v48, %v10733_v17  ;;  %v4165_v33 = vshll.u32 %v3924_v34, 16  ;;  %v4171_v58 = vshll.u32 %v3925_v59, 16  ;;  %9166 = vmatpush3.bf16.msra.mxu1 %v9433_v57  ;;  %9206 = vmatpush3.bf16.msra.mxu0 %v9435_v22  ;;  %v4739_v22 = vld [vmem:[#allocation2 + $0x6c] sm:$0xe]  ;;  %v3930_v24 = vld [vmem:[#allocation2 + $0x90] sm:$0xf] }
 0x1e9   : > { %v8303_v29 = vcombine.low %v4150_v28, %v4160_v52  ;;  %v10751_v7 = vsel %vm10284_vm0, %v4857_v15, %v4858_v43  ;;  %v4164_v25 = vrot.slane %v4162_v4, 4  ;;  %v4175_v44 = vshrl.u32 %v3925_v59, 16  ;;  %9167 = vmatprep.subr.bf16.mxu1 %v10711_v39  ;;  %9207 = vmatprep.subr.bf16.mxu0 %v10716_v49  ;;  %v10783_v34 = vpop.f32.mrb[3].mxu1  ;;  %v3931_v43 = vld [vmem:[#allocation2 + $0x94] sm:$0xf]  ;;  %v9442_v4 = vld [vmem:[%s11934_s3 + $0x1e8] sm:$0xff]  }
 0x1ea   : > { %v8357_v50 = vcombine.low %v10727_v47, %v10751_v7  ;;  %v4167_v56 = vrot.slane %v4165_v33, 5  ;;  %v4173_v12 = vrot.slane %v4171_v58, 5  ;;  %v4181_v19 = vshll.u32 %v3926_v53, 16  ;;  %9128 = vmatmul.mubr.bf16.gmra.mrb[104].mxu0 %v8354_v41  ;;  %9088 = vmatmul.mubr.bf16.gmra.mrb[76].mxu1 %v8302_v21  ;;  %v9446_v47 = vld [vmem:[%s11934_s3 + $0x1f0] sm:$0xff]   ;;  %1996 = vst.msk [vmem:[#allocation3] sm:$0xff] %vm1995_vm1, %v10770_v54  ;;  %1999 = vst.msk [vmem:[#allocation3 + $0x18] sm:$0xff] %vm1995_vm1, %v10774_v37 }
 0x1eb   : > { %v4177_v57 = vrot.slane %v4175_v44, 4  ;;  %v4186_v10 = vshrl.u32 %v3927_v35, 16  ;;  %v4189_v45 = vshll.u32 %v3927_v35, 16  ;;  %v4195_v42 = vshll.u32 %v3928_v51, 16  ;;  %9131 = vmatprep.mubr.bf16.mxu0 %v8355_v3  ;;  %9091 = vmatprep.mubr.bf16.mxu1 %v8303_v29  ;;  %v3932_v29 = vld [vmem:[#allocation2 + $0x98] sm:$0x1] }
 0x1ec   : > { %v4168_v60 = vor.u32 %v4167_v56, %v4164_v25  ;;  %v4183_v61 = vrot.slane %v4181_v19, 5  ;;  %v4199_v36 = vshrl.u32 %v3928_v51, 16  ;;  %v4205_v1 = vshll.u32 %v3929_v26, 16  ;;  %9168 = vmatpush3.bf16.msra.mxu1 %v10711_v39  ;;  %9208 = vmatpush3.bf16.msra.mxu0 %v10716_v49  ;;  %v3933_v25 = vld [vmem:[#allocation2 + $0x9c] sm:$0xf]  ;;  %v10817_v19 = vpop.f32.mrb[4].mxu1 }
 0x1ed   : > { %v4178_v41 = vor.u32 %v4177_v57, %v4173_v12  ;;  %v4188_v11 = vrot.slane %v4186_v10, 4  ;;  %v4191_v27 = vrot.slane %v4189_v45, 5  ;;  %v4197_v16 = vrot.slane %v4195_v42, 5  ;;  %9209 = vmatprep.subr.bf16.mxu0 %v10742_v63  ;;  %9169 = vmatprep.subr.bf16.mxu1 %v10747_v0  ;;  %v3935_v56 = vld [vmem:[#allocation2 + $0xa4] sm:$0x1]  ;;  %v10824_v7 = vpop.f32.mrb[5].mxu1 }
 0x1ee   : > { %v4169_v32 = vrot.slane %v4168_v60, 4  ;;  %v4201_v3 = vrot.slane %v4199_v36, 4  ;;  %v4207_v5 = vrot.slane %v4205_v1, 5  ;;  %v8326_v18 = vrot.slane %v4736_v40, 9  ;;  %v3934_v40 = vld [vmem:[#allocation2 + $0xa0] sm:$0xf] }
 0x1ef   : > { %v4179_v39 = vrot.slane %v4178_v41, 4  ;;  %v4192_v49 = vor.u32 %v4191_v27, %v4188_v11  ;;  %v4862_v14 = vrot.slane %v4737_v38, 5  ;;  %v4865_v20 = vrot.slane %v10755_v55, 5  ;;  %v4742_v45 = vld [vmem:[#allocation2 + $0x78] sm:$0xe]  ;;  %v10827_v1 = vpop.f32.mrb[6].mxu1 }
 0x1f0   : > { %v4174_v13 = vsel %vm10104_vm13, %v4169_v32, %v4173_v12  ;;  %v4202_v59 = vor.u32 %v4201_v3, %v4197_v16  ;;  %v8327_v53 = vrot.slane %v4739_v22, 9  ;;  %v4869_v21 = vrot.slane %v4740_v8, 5  ;;  %9210 = vmatpush3.bf16.msra.mxu0 %v10742_v63  ;;  %9170 = vmatpush3.bf16.msra.mxu1 %v10747_v0  ;;  %v4744_v36 = vld [vmem:[#allocation2 + $0x80] sm:$0x1]  ;;  %v4745_v27 = vld [vmem:[#allocation2 + $0x84] sm:$0xe] }
 0x1f1   : > { %v4184_v23 = vsel %vm10104_vm13, %v4179_v39, %v4183_v61  ;;  %v4193_v15 = vrot.slane %v4192_v49, 4  ;;  %v10792_v35 = vsel %vm10284_vm0, %v8326_v18, %v4862_v14  ;;  %v4864_v28 = vrot.slane %v4862_v14, 4  ;;  %9211 = vmatprep.subr.bf16.mxu0 %v9441_v62  ;;  %9251 = vmatprep.subr.bf16.mxu1 %v10781_v30  ;;  %v4743_v61 = vld [vmem:[#allocation2 + $0x7c] sm:$0xf]  ;;  %v4746_v14 = vld [vmem:[#allocation2 + $0x88] sm:$0xf] }
 0x1f2   : > { %v8304_v52 = vcombine.low %v4174_v13, %v4184_v23  ;;  %v4203_v33 = vrot.slane %v4202_v59, 4  ;;  %v10801_v58 = vsel %vm10284_vm0, %v8327_v53, %v4869_v21  ;;  %v4871_v51 = vrot.slane %v4869_v21, 4  ;;  %9132 = vmatmul.mubr.bf16.gmra.mrb[108].mxu0 %v8356_v6  ;;  %v9447_v21 = vld [vmem:[%s11934_s3 + $0x1f8] sm:$0xff]   ;;  %1997 = vst.msk [vmem:[#allocation3 + $0x8] sm:$0xff] %vm1995_vm1, %v10783_v34  ;;  %2002 = vst.msk [vmem:[#allocation3 + $0x30] sm:$0xff] %vm1995_vm1, %v10817_v19  ;;  %v10980_v46 = vld [vmem:[%s11934_s3 + $0x220] sm:$0xff]  }
 0x1f3   : > { %v4198_v63 = vsel %vm10104_vm13, %v4193_v15, %v4197_v16  ;;  %v4866_v0 = vsel %vm10284_vm0, %v4864_v28, %v4865_v20  ;;  %v4872_v44 = vrot.slane %v4741_v31, 5  ;;  %v4210_v26 = vshrl.u32 %v3930_v24, 16  ;;  %9135 = vmatprep.mubr.bf16.mxu0 %v8357_v50  ;;  %v10829_v16 = vpop.f32.mrb[7].mxu1  ;;  %2000 = vst.msk [vmem:[#allocation3 + $0x20] sm:$0xff] %vm1995_vm1, %v10824_v7  ;;  %2003 = vst.msk [vmem:[#allocation3 + $0x38] sm:$0xff] %vm1995_vm1, %v10827_v1 }
 0x1f4   : > { %9092 = vmatmul.mubr.bf16.gmra.mrb[80].mxu1 %v8304_v52  ;;  %v4208_v12 = vsel %vm10104_vm13, %v4203_v33, %v4207_v5  ;;  %v8358_v48 = vcombine.low %v10792_v35, %v4866_v0  ;;  %v4213_v17 = vshll.u32 %v3930_v24, 16  ;;  %v4219_v6 = vshll.u32 %v3931_v43, 16  ;;  %9212 = vmatpush3.bf16.msra.mxu0 %v9441_v62  ;;  %v10834_v52 = vpop.f32.mrb[8].mxu1  ;;  %2001 = vst.msk [vmem:[#allocation3 + $0x28] sm:$0xff] %vm1995_vm1, %v10829_v16  ;;  %v5779_v1 = vld [vmem:[#allocation2 + $0x64] sm:$0xf] }
 0x1f5   : > { %v8305_v38 = vcombine.low %v4198_v63, %v4208_v12  ;;  %v4873_v55 = vsel %vm10284_vm0, %v4871_v51, %v4872_v44  ;;  %v4212_v57 = vrot.slane %v4210_v26, 4  ;;  %v4223_v10 = vshrl.u32 %v3931_v43, 16  ;;  %9213 = vmatprep.subr.bf16.mxu0 %v9442_v4  ;;  %v4747_v43 = vld [vmem:[#allocation2 + $0x8c] sm:$0x1]  ;;  %2006 = vst.msk [vmem:[#allocation3 + $0x50] sm:$0xff] %vm1995_vm1, %v10834_v52 }
 0x1f6   : > { %v8359_v50 = vcombine.low %v10801_v58, %v4873_v55  ;;  %v4215_v42 = vrot.slane %v4213_v17, 5  ;;  %v4221_v22 = vrot.slane %v4219_v6, 5  ;;  %v4229_v60 = vshll.u32 %v3932_v29, 16  ;;  %v3936_v29 = vld [vmem:[#allocation2 + $0xa8] sm:$0xf] }
 0x1f7   : > { %9095 = vmatprep.mubr.bf16.mxu1 %v8305_v38  ;;  %v4225_v8 = vrot.slane %v4223_v10, 4  ;;  %v4234_v41 = vshrl.u32 %v3933_v25, 16  ;;  %v4237_v62 = vshll.u32 %v3933_v25, 16  ;;  %v4243_v11 = vshll.u32 %v3934_v40, 16  ;;  %v3937_v25 = vld [vmem:[#allocation2 + $0xac] sm:$0xf] }
 0x1f8   : > { %v4216_v32 = vor.u32 %v4215_v42, %v4212_v57  ;;  %v4231_v3 = vrot.slane %v4229_v60, 5  ;;  %v4247_v5 = vshrl.u32 %v3934_v40, 16  ;;  %v4253_v18 = vshll.u32 %v3935_v56, 16  ;;  %9214 = vmatpush3.bf16.msra.mxu0 %v9442_v4  ;;  %v3938_v40 = vld [vmem:[#allocation2 + $0xb0] sm:$0x1]  ;;  %v10842_v56 = vpop.f32.mrb[9].mxu1 }
 0x1f9   : > { %v4226_v31 = vor.u32 %v4225_v8, %v4221_v22  ;;  %v4236_v24 = vrot.slane %v4234_v41, 4  ;;  %v4239_v39 = vrot.slane %v4237_v62, 5  ;;  %v4245_v49 = vrot.slane %v4243_v11, 5  ;;  %9215 = vmatprep.subr.bf16.mxu0 %v9446_v47  ;;  %v3939_v38 = vld [vmem:[#allocation2 + $0xb4] sm:$0xf]  ;;  %v10846_v57 = vpop.f32.mrb[10].mxu1 }
 0x1fa   : > { %v4217_v20 = vrot.slane %v4216_v32, 4  ;;  %v4249_v13 = vrot.slane %v4247_v5, 4  ;;  %v4255_v59 = vrot.slane %v4253_v18, 5  ;;  %v8328_v53 = vrot.slane %v4742_v45, 9  ;;  %9136 = vmatmul.mubr.bf16.gmra.mrb[112].mxu0 %v8358_v48  ;;  %v3940_v55 = vld [vmem:[#allocation2 + $0xb8] sm:$0xf] }
 0x1fb   : > { %v4227_v23 = vrot.slane %v4226_v31, 4  ;;  %v4240_v15 = vor.u32 %v4239_v39, %v4236_v24  ;;  %v4876_v35 = vrot.slane %v4743_v61, 5  ;;  %v4879_v28 = vrot.slane %v4744_v36, 5  ;;  %9139 = vmatprep.mubr.bf16.mxu0 %v8359_v50  ;;  %v10852_v42 = vpop.f32.mrb[11].mxu1  ;;  %v4748_v32 = vld [vmem:[#allocation2 + $0x90] sm:$0xe] }
 0x1fc   : > { %v4222_v4 = vsel %vm10104_vm13, %v4217_v20, %v4221_v22  ;;  %v4250_v33 = vor.u32 %v4249_v13, %v4245_v49  ;;  %v8329_v58 = vrot.slane %v4745_v27, 9  ;;  %v4883_v51 = vrot.slane %v4746_v14, 5  ;;  %9216 = vmatpush3.bf16.msra.mxu0 %v9446_v47  ;;  %v3941_v27 = vld [vmem:[#allocation2 + $0xbc] sm:$0x1]  ;;  %v4749_v24 = vld [vmem:[#allocation2 + $0x94] sm:$0xf] }
 0x1fd   : > { %v4232_v63 = vsel %vm10104_vm13, %v4227_v23, %v4231_v3  ;;  %v4241_v0 = vrot.slane %v4240_v15, 4  ;;  %v4877_v44 = vsel %vm10284_vm0, %v8328_v53, %v4876_v35  ;;  %v4878_v26 = vrot.slane %v4876_v35, 4  ;;  %9217 = vmatprep.subr.bf16.mxu0 %v9447_v21  ;;  %v4750_v13 = vld [vmem:[#allocation2 + $0x98] sm:$0x1]  ;;  %v4751_v35 = vld [vmem:[#allocation2 + $0x9c] sm:$0xe] }
 0x1fe   : > { %v8306_v12 = vcombine.low %v4222_v4, %v4232_v63  ;;  %v4251_v48 = vrot.slane %v4250_v33, 4  ;;  %v4884_v17 = vsel %vm10284_vm0, %v8329_v58, %v4883_v51  ;;  %v4885_v6 = vrot.slane %v4883_v51, 4  ;;  %v4752_v33 = vld [vmem:[#allocation2 + $0xa0] sm:$0xf]  ;;  %v4753_v63 = vld [vmem:[#allocation2 + $0xa4] sm:$0x1] }
 0x1ff   : > { %v4246_v10 = vsel %vm10104_vm13, %v4241_v0, %v4245_v49  ;;  %v4880_v45 = vsel %vm10284_vm0, %v4878_v26, %v4879_v28  ;;  %v4886_v47 = vrot.slane %v4747_v43, 5  ;;  %v4258_v50 = vshrl.u32 %v3936_v29, 16  ;;  %v3942_v0 = vld [vmem:[#allocation2 + $0xc0] sm:$0xf]  ;;  %2004 = vst.msk [vmem:[#allocation3 + $0x40] sm:$0xff] %vm1995_vm1, %v10842_v56  ;;  %2007 = vst.msk [vmem:[#allocation3 + $0x58] sm:$0xff] %vm1995_vm1, %v10846_v57 }
 0x200   : > { %9096 = vmatmul.mubr.bf16.gmra.mrb[84].mxu1 %v8306_v12  ;;  %v4256_v22 = vsel %vm10104_vm13, %v4251_v48, %v4255_v59  ;;  %v8360_v60 = vcombine.low %v4877_v44, %v4880_v45  ;;  %v4261_v61 = vshll.u32 %v3936_v29, 16  ;;  %v4267_v36 = vshll.u32 %v3937_v25, 16  ;;  %9218 = vmatpush3.bf16.msra.mxu0 %v9447_v21  ;;  %2005 = vst.msk [vmem:[#allocation3 + $0x48] sm:$0xff] %vm1995_vm1, %v10852_v42 }
 0x201   : > { %v8307_v8 = vcombine.low %v4246_v10, %v4256_v22  ;;  %v4887_v41 = vsel %vm10284_vm0, %v4885_v6, %v4886_v47  ;;  %v4260_v62 = vrot.slane %v4258_v50, 4  ;;  %v4271_v11 = vshrl.u32 %v3937_v25, 16  ;;  %v10858_v44 = vpop.f32.mrb[12].mxu1 }
 0x202   : > { %v8361_v3 = vcombine.low %v4884_v17, %v4887_v41  ;;  %v4263_v5 = vrot.slane %v4261_v61, 5  ;;  %v4269_v18 = vrot.slane %v4267_v36, 5  ;;  %v4277_v31 = vshll.u32 %v3938_v40, 16  ;;  %9140 = vmatmul.mubr.bf16.gmra.mrb[116].mxu0 %v8360_v60  ;;  %v3943_v17 = vld [vmem:[#allocation2 + $0xc4] sm:$0xf]  ;;  %v10860_v6 = vpop.f32.mrb[13].mxu1 }
 0x203   : > { %9099 = vmatprep.mubr.bf16.mxu1 %v8307_v8  ;;  %v4273_v39 = vrot.slane %v4271_v11, 4  ;;  %v4282_v49 = vshrl.u32 %v3939_v38, 16  ;;  %v4285_v14 = vshll.u32 %v3939_v38, 16  ;;  %v4291_v20 = vshll.u32 %v3940_v55, 16  ;;  %v10864_v47 = vpop.f32.mrb[14].mxu1  ;;  %2010 = vst.msk [vmem:[#allocation3 + $0x70] sm:$0xff] %vm1995_vm1, %v10858_v44 }
 0x204   : > { %9143 = vmatprep.mubr.bf16.mxu0 %v8361_v3  ;;  %v4264_v59 = vor.u32 %v4263_v5, %v4260_v62  ;;  %v4279_v53 = vrot.slane %v4277_v31, 5  ;;  %v4295_v23 = vshrl.u32 %v3940_v55, 16  ;;  %v4301_v15 = vshll.u32 %v3941_v27, 16  ;;  %v3944_v36 = vld [vmem:[#allocation2 + $0xc8] sm:$0x1]  ;;  %v10870_v8 = vpop.f32.mrb[15].mxu1 }
 0x205   : > { %v4274_v28 = vor.u32 %v4273_v39, %v4269_v18  ;;  %v4284_v21 = vrot.slane %v4282_v49, 4  ;;  %v4287_v43 = vrot.slane %v4285_v14, 5  ;;  %v4293_v4 = vrot.slane %v4291_v20, 5  ;;  %v4755_v3 = vld [vmem:[#allocation2 + $0xac] sm:$0xf]  ;;  %2008 = vst.msk [vmem:[#allocation3 + $0x60] sm:$0xff] %vm1995_vm1, %v10860_v6 }
 0x206   : > { %v4265_v58 = vrot.slane %v4264_v59, 4  ;;  %v4297_v51 = vrot.slane %v4295_v23, 4  ;;  %v4303_v29 = vrot.slane %v4301_v15, 5  ;;  %v8330_v25 = vrot.slane %v4748_v32, 9  ;;  %v4754_v32 = vld [vmem:[#allocation2 + $0xa8] sm:$0xe] }
 0x207   : > { %v4275_v26 = vrot.slane %v4274_v28, 4  ;;  %v4288_v40 = vor.u32 %v4287_v43, %v4284_v21  ;;  %v4890_v12 = vrot.slane %v4749_v24, 5  ;;  %v4893_v48 = vrot.slane %v4750_v13, 5  ;;  %v4756_v39 = vld [vmem:[#allocation2 + $0xb0] sm:$0x1]  ;;  %2011 = vst.msk [vmem:[#allocation3 + $0x78] sm:$0xff] %vm1995_vm1, %v10864_v47 }
 0x208   : > { %v4270_v38 = vsel %vm10104_vm13, %v4265_v58, %v4269_v18  ;;  %v4298_v55 = vor.u32 %v4297_v51, %v4293_v4  ;;  %v8331_v10 = vrot.slane %v4751_v35, 9  ;;  %v4897_v45 = vrot.slane %v4752_v33, 5  ;;  %v4757_v49 = vld [vmem:[#allocation2 + $0xb4] sm:$0xe]  ;;  %v4759_v23 = vld [vmem:[#allocation2 + $0xbc] sm:$0x1] }
 0x209   : > { %v4280_v50 = vsel %vm10104_vm13, %v4275_v26, %v4279_v53  ;;  %v4289_v22 = vrot.slane %v4288_v40, 4  ;;  %v4891_v60 = vsel %vm10284_vm0, %v8330_v25, %v4890_v12  ;;  %v4892_v61 = vrot.slane %v4890_v12, 4  ;;  %v4758_v53 = vld [vmem:[#allocation2 + $0xb8] sm:$0xf]  ;;  %v4760_v43 = vld [vmem:[#allocation2 + $0xc0] sm:$0xe] }
 0x20a   : > { %v8308_v41 = vcombine.low %v4270_v38, %v4280_v50  ;;  %v4299_v62 = vrot.slane %v4298_v55, 4  ;;  %v4898_v11 = vsel %vm10284_vm0, %v8331_v10, %v4897_v45  ;;  %v4899_v27 = vrot.slane %v4897_v45, 4  ;;  %v4761_v26 = vld [vmem:[#allocation2 + $0xc4] sm:$0xf]  ;;  %v4762_v55 = vld [vmem:[#allocation2 + $0xc8] sm:$0x1] }
 0x20b   : > { %v4294_v5 = vsel %vm10104_vm13, %v4289_v22, %v4293_v4  ;;  %v4894_v18 = vsel %vm10284_vm0, %v4892_v61, %v4893_v48  ;;  %v4900_v31 = vrot.slane %v4753_v63, 5  ;;  %v4306_v24 = vshrl.u32 %v3942_v0, 16  ;;  %v5760_v22 = vld [vmem:[#allocation2 + $0x18] sm:$0xf]  ;;  %2009 = vst.msk [vmem:[#allocation3 + $0x68] sm:$0xff] %vm1995_vm1, %v10870_v8 }
 0x20c   : > { %9100 = vmatmul.mubr.bf16.gmra.mrb[88].mxu1 %v8308_v41  ;;  %v4304_v14 = vsel %vm10104_vm13, %v4299_v62, %v4303_v29  ;;  %v8362_v20 = vcombine.low %v4891_v60, %v4894_v18  ;;  %v4309_v13 = vshll.u32 %v3942_v0, 16  ;;  %v4315_v59 = vshll.u32 %v3943_v17, 16  ;;  %v5761_v18 = vld [vmem:[#allocation2 + $0x1c] sm:$0xf]  ;;  %v5780_v8 = vld [vmem:[#allocation2 + $0x68] sm:$0x1] }
 0x20d   : > { %v8309_v15 = vcombine.low %v4294_v5, %v4304_v14  ;;  %v4901_v35 = vsel %vm10284_vm0, %v4899_v27, %v4900_v31  ;;  %v4308_v28 = vrot.slane %v4306_v24, 4  ;;  %v4319_v21 = vshrl.u32 %v3943_v17, 16  ;;  %v5762_v14 = vld [vmem:[#allocation2 + $0x20] sm:$0x1] }
 0x20e   : > { %9144 = vmatmul.mubr.bf16.gmra.mrb[120].mxu0 %v8362_v20  ;;  %v8363_v4 = vcombine.low %v4898_v11, %v4901_v35  ;;  %v4311_v33 = vrot.slane %v4309_v13, 5  ;;  %v4317_v58 = vrot.slane %v4315_v59, 5  ;;  %v4325_v51 = vshll.u32 %v3944_v36, 16  ;;  %v10884_v60 = vpop.f32.mrb[16].mxu1  ;;  %v5763_v13 = vld [vmem:[#allocation2 + $0x24] sm:$0xf] }
 0x20f   : > { %9103 = vmatprep.mubr.bf16.mxu1 %v8309_v15  ;;  %v4321_v25 = vrot.slane %v4319_v21, 4  ;;  %v8332_v29 = vrot.slane %v4754_v32, 9  ;;  %v4904_v63 = vrot.slane %v4755_v3, 5  ;;  %v4907_v0 = vrot.slane %v4756_v39, 5  ;;  %v10888_v11 = vpop.f32.mrb[17].mxu1  ;;  %2014 = vst.msk [vmem:[#allocation3 + $0x90] sm:$0xff] %vm1995_vm1, %v10884_v60 }
 0x210   : > { %9147 = vmatprep.mubr.bf16.mxu0 %v8363_v4  ;;  %v4312_v40 = vor.u32 %v4311_v33, %v4308_v28  ;;  %v4327_v12 = vrot.slane %v4325_v51, 5  ;;  %v8333_v48 = vrot.slane %v4757_v49, 9  ;;  %v4911_v38 = vrot.slane %v4758_v53, 5  ;;  %v10892_v31 = vpop.f32.mrb[18].mxu1  ;;  %v5764_v33 = vld [vmem:[#allocation2 + $0x28] sm:$0xf] }
 0x211   : > { %v4322_v10 = vor.u32 %v4321_v25, %v4317_v58  ;;  %v4905_v17 = vsel %vm10284_vm0, %v8332_v29, %v4904_v63  ;;  %v4906_v45 = vrot.slane %v4904_v63, 4  ;;  %v4914_v50 = vrot.slane %v4759_v23, 5  ;;  %v10898_v59 = vpop.f32.mrb[19].mxu1  ;;  %v5765_v63 = vld [vmem:[#allocation2 + $0x2c] sm:$0x1]  ;;  %2012 = vst.msk [vmem:[#allocation3 + $0x80] sm:$0xff] %vm1995_vm1, %v10888_v11 }
 0x212   : > { %v4313_v61 = vrot.slane %v4312_v40, 4  ;;  %v4912_v36 = vsel %vm10284_vm0, %v8333_v48, %v4911_v38  ;;  %v4913_v41 = vrot.slane %v4911_v38, 4  ;;  %v8334_v62 = vrot.slane %v4760_v43, 9  ;;  %v5766_v38 = vld [vmem:[#allocation2 + $0x30] sm:$0xf]  ;;  %2015 = vst.msk [vmem:[#allocation3 + $0x98] sm:$0xff] %vm1995_vm1, %v10892_v31 }
 0x213   : > { %v4323_v27 = vrot.slane %v4322_v10, 4  ;;  %v4908_v32 = vsel %vm10284_vm0, %v4906_v45, %v4907_v0  ;;  %v4918_v3 = vrot.slane %v4761_v26, 5  ;;  %v4921_v5 = vrot.slane %v4762_v55, 5  ;;  %2013 = vst.msk [vmem:[#allocation3 + $0x88] sm:$0xff] %vm1995_vm1, %v10898_v59  ;;  %v9452_v31 = vld [vmem:[#allocation2 + $0x54] sm:$0xff]  }
 0x214   : > { %v4318_v24 = vsel %vm10104_vm13, %v4313_v61, %v4317_v58  ;;  %v8364_v39 = vcombine.low %v4905_v17, %v4908_v32  ;;  %v4915_v49 = vsel %vm10284_vm0, %v4913_v41, %v4914_v50  ;;  %v5809_v20 = vshrl.u32 %v5760_v22, 16  ;;  %v9440_v58 = vld [vmem:[#allocation2 + $0x18] sm:$0xff]  }
 0x215   : > { %v4328_v53 = vsel %vm10104_vm13, %v4323_v27, %v4327_v12  ;;  %v8365_v23 = vcombine.low %v4912_v36, %v4915_v49  ;;  %v4919_v15 = vsel %vm10284_vm0, %v8334_v62, %v4918_v3  ;;  %v4920_v35 = vrot.slane %v4918_v3, 4  ;;  %v5767_v27 = vld [vmem:[#allocation2 + $0x34] sm:$0xf] }
 0x216   : > { %v8310_v28 = vcombine.low %v4318_v24, %v4328_v53  ;;  %9148 = vmatmul.mubr.bf16.gmra.mrb[124].mxu0 %v8364_v39  ;;  %v5811_v21 = vrot.slane %v5809_v20, 4  ;;  %v5812_v43 = vshll.u32 %v5760_v22, 16  ;;  %v5818_v4 = vshll.u32 %v5761_v18, 16  ;;  %v10906_v55 = vpop.f32.mrb[36].mxu0  ;;  %v10914_v49 = vpop.f32.mrb[20].mxu1 }
 0x217   : > { %9151 = vmatprep.mubr.bf16.mxu0 %v8365_v23  ;;  %v4922_v51 = vsel %vm10284_vm0, %v4920_v35, %v4921_v5  ;;  %v5822_v25 = vshrl.u32 %v5761_v18, 16  ;;  %v5828_v29 = vshll.u32 %v5762_v14, 16  ;;  %v5833_v0 = vshrl.u32 %v5763_v13, 16  ;;  %v10908_v22 = vpop.f32.mrb[37].mxu0  ;;  %v5768_v23 = vld [vmem:[#allocation2 + $0x38] sm:$0x1] }
 0x218   : > { %9104 = vmatmul.mubr.bf16.gmra.mrb[92].mxu1 %v8310_v28  ;;  %v8366_v26 = vcombine.low %v4919_v15, %v4922_v51  ;;  %v5814_v40 = vrot.slane %v5812_v43, 5  ;;  %v5820_v12 = vrot.slane %v5818_v4, 5  ;;  %v5836_v48 = vshll.u32 %v5763_v13, 16  ;;  %v10910_v32 = vpop.f32.mrb[38].mxu0  ;;  %v10916_v15 = vpop.f32.mrb[21].mxu1  ;;  %v9444_v35 = vld [vmem:[#allocation2 + $0x24] sm:$0xff]  }
 0x219   : > { %9171 = vmatprep.mubr.bf16.mxu1 %v9440_v58  ;;  %v5824_v10 = vrot.slane %v5822_v25, 4  ;;  %v5830_v17 = vrot.slane %v5828_v29, 5  ;;  %v5835_v45 = vrot.slane %v5833_v0, 4  ;;  %v5842_v50 = vshll.u32 %v5764_v33, 16  ;;  %v10912_v39 = vpop.f32.mrb[39].mxu0  ;;  %v9448_v51 = vld [vmem:[%s11934_s3 + $0x208] sm:$0xff]  }
 0x21a   : > { %v5815_v61 = vor.u32 %v5814_v40, %v5811_v21  ;;  %v5838_v36 = vrot.slane %v5836_v48, 5  ;;  %v5846_v41 = vshrl.u32 %v5764_v33, 16  ;;  %v5852_v62 = vshll.u32 %v5765_v63, 16  ;;  %v10918_v33 = vpop.f32.mrb[22].mxu1  ;;  %v5769_v0 = vld [vmem:[#allocation2 + $0x3c] sm:$0xf] }
 0x21b   : > { %v5825_v3 = vor.u32 %v5824_v10, %v5820_v12  ;;  %v5844_v5 = vrot.slane %v5842_v50, 5  ;;  %v5857_v18 = vshrl.u32 %v5766_v38, 16  ;;  %v5860_v24 = vshll.u32 %v5766_v38, 16  ;;  %v10925_v40 = vpop.f32.mrb[23].mxu1  ;;  %v9445_v48 = vld [vmem:[#allocation2 + $0x30] sm:$0xff]   ;;  %2018 = vst.msk [vmem:[#allocation3 + $0xb0] sm:$0xff] %vm1995_vm1, %v10914_v49 }
 0x21c   : > { %v5816_v14 = vrot.slane %v5815_v61, 4  ;;  %v5839_v20 = vor.u32 %v5838_v36, %v5835_v45  ;;  %v5848_v13 = vrot.slane %v5846_v41, 4  ;;  %v5854_v53 = vrot.slane %v5852_v62, 5  ;;  %v5770_v50 = vld [vmem:[#allocation2 + $0x40] sm:$0xf]  ;;  %v9451_v62 = vld [vmem:[%s11934_s3 + $0x210] sm:$0xff]  }
 0x21d   : > { %v5826_v28 = vrot.slane %v5825_v3, 4  ;;  %v5859_v21 = vrot.slane %v5857_v18, 4  ;;  %v5862_v43 = vrot.slane %v5860_v24, 5  ;;  %v5866_v4 = vshll.u32 %v5767_v27, 16  ;;  %v5771_v3 = vld [vmem:[#allocation2 + $0x44] sm:$0x1] }
 0x21e   : > { %9152 = vmatmul.mubr.bf16.gmra.mrb[128].mxu0 %v8366_v26  ;;  %v5821_v58 = vsel %vm10104_vm13, %v5816_v14, %v5820_v12  ;;  %v5840_v25 = vrot.slane %v5839_v20, 4  ;;  %v5849_v29 = vor.u32 %v5848_v13, %v5844_v5  ;;  %v5870_v63 = vshrl.u32 %v5767_v27, 16  ;;  %2016 = vst.msk [vmem:[#allocation3 + $0xa0] sm:$0xff] %vm1995_vm1, %v10916_v15  ;;  %2019 = vst.msk [vmem:[#allocation3 + $0xb8] sm:$0xff] %vm1995_vm1, %v10918_v33 }
 0x21f   : > { %v5831_v38 = vsel %vm10104_vm13, %v5826_v28, %v5830_v17  ;;  %v5863_v10 = vor.u32 %v5862_v43, %v5859_v21  ;;  %v5868_v45 = vrot.slane %v5866_v4, 5  ;;  %v5876_v26 = vshll.u32 %v5768_v23, 16  ;;  %v5772_v23 = vld [vmem:[#allocation2 + $0x48] sm:$0xf]  ;;  %2017 = vst.msk [vmem:[#allocation3 + $0xa8] sm:$0xff] %vm1995_vm1, %v10925_v40 }
 0x220   : > { %9172 = vmatmul.mubr.bf16.vlgmr.msra.gmra.mrb[96].mxu1 %v9444_v35  ;;  %v8431_v12 = vcombine.low %v5821_v58, %v5831_v38  ;;  %v5845_v61 = vsel %vm10104_vm13, %v5840_v25, %v5844_v5  ;;  %v5850_v36 = vrot.slane %v5849_v29, 4  ;;  %v5872_v41 = vrot.slane %v5870_v63, 4  ;;  %v5773_v35 = vld [vmem:[#allocation2 + $0x4c] sm:$0xf] }
 0x221   : > { %9252 = vmatpush3.bf16.msra.mxu1 %v10781_v30  ;;  %9175 = vmatprep.mubr.bf16.mxu1 %v9445_v48  ;;  %v5864_v27 = vrot.slane %v5863_v10, 4  ;;  %v5878_v17 = vrot.slane %v5876_v26, 5  ;;  %v5881_v18 = vshrl.u32 %v5769_v0, 16  ;;  %v5884_v24 = vshll.u32 %v5769_v0, 16  ;;  %v5774_v0 = vld [vmem:[#allocation2 + $0x50] sm:$0x1] }
 0x222   : > { %9219 = vmatprep.mubr.bf16.mxu0 %v8431_v12  ;;  %9253 = vmatprep.subr.bf16.mxu1 %v9448_v51  ;;  %v5855_v14 = vsel %vm10104_vm13, %v5850_v36, %v5854_v53  ;;  %v5873_v5 = vor.u32 %v5872_v41, %v5868_v45  ;;  %v5890_v20 = vshll.u32 %v5770_v50, 16  ;;  %v5894_v13 = vshrl.u32 %v5770_v50, 16  ;;  %v9449_v10 = vld [vmem:[#allocation2 + $0x3c] sm:$0xff]   ;;  %v9450_v36 = vld [vmem:[#allocation2 + $0x48] sm:$0xff]  }
 0x223   : > { %v8432_v28 = vcombine.low %v5845_v61, %v5855_v14  ;;  %v5869_v30 = vsel %vm10104_vm13, %v5864_v27, %v5868_v45  ;;  %v5883_v21 = vrot.slane %v5881_v18, 4  ;;  %v5886_v43 = vrot.slane %v5884_v24, 5  ;;  %v5775_v61 = vld [vmem:[#allocation2 + $0x54] sm:$0xf]  ;;  %v10947_v18 = vld [vmem:[%s11934_s3 + $0x218] sm:$0xff]  }
 0x224   : > { %v5874_v4 = vrot.slane %v5873_v5, 4  ;;  %v10939_v58 = vrot.slane %v5890_v20, 5  ;;  %v5896_v25 = vrot.slane %v5894_v13, 4  ;;  %v5900_v29 = vshll.u32 %v5771_v3, 16  ;;  %v10951_v20 = vld [vmem:[#allocation2 + $0x58] sm:$0xf] }
 0x225   : > { %9254 = vmatpush3.bf16.msra.mxu1 %v9448_v51  ;;  %v5887_v63 = vor.u32 %v5886_v43, %v5883_v21  ;;  %v5905_v53 = vshrl.u32 %v5772_v23, 16  ;;  %v5908_v48 = vshll.u32 %v5772_v23, 16  ;;  %v5914_v38 = vshll.u32 %v5773_v35, 16  ;;  %v5781_v40 = vld [vmem:[#allocation2 + $0x6c] sm:$0xf] }
 0x226   : > { %9220 = vmatmul.mubr.bf16.vlgmr.msra.gmra.mrb[132].mxu0 %v8432_v28  ;;  %v5879_v26 = vsel %vm10104_vm13, %v5874_v4, %v5878_v17  ;;  %9255 = vmatprep.subr.bf16.mxu1 %v9451_v62  ;;  %v5897_v45 = vor.u32 %v5896_v25, %v10939_v58  ;;  %v5902_v50 = vrot.slane %v5900_v29, 5  ;;  %v5918_v12 = vshrl.u32 %v5773_v35, 16  ;;  %v5777_v35 = vld [vmem:[#allocation2 + $0x5c] sm:$0x1]  ;;  %v9453_v25 = vld [vmem:[#allocation2 + $0x60] sm:$0xff]  }
 0x227   : > { %v8433_v41 = vcombine.low %v5869_v30, %v5879_v26  ;;  %v5888_v27 = vrot.slane %v5887_v63, 4  ;;  %v5907_v51 = vrot.slane %v5905_v53, 4  ;;  %v5910_v3 = vrot.slane %v5908_v48, 5  ;;  %v9460_v48 = vld [vmem:[%s11934_s3 + $0x228] sm:$0xff]  }
 0x228   : > { %9176 = vmatmul.mubr.bf16.gmra.mrb[100].mxu1 %v9449_v10  ;;  %v5898_v24 = vrot.slane %v5897_v45, 4  ;;  %v10949_v14 = vrot.slane %v5914_v38, 5  ;;  %v5920_v17 = vrot.slane %v5918_v12, 4  ;;  %v5924_v5 = vshll.u32 %v5774_v0, 16  ;;  %v10956_v30 = vpop.f32.mrb[40].mxu0 }
 0x229   : > { %9179 = vmatprep.mubr.bf16.mxu1 %v9450_v36  ;;  %9223 = vmatprep.mubr.bf16.mxu0 %v8433_v41  ;;  %v5893_v13 = vsel %vm10104_vm13, %v5888_v27, %v10939_v58  ;;  %v5911_v23 = vor.u32 %v5910_v3, %v5907_v51  ;;  %v5929_v28 = vshrl.u32 %v5775_v61, 16  ;;  %v5932_v58 = vshll.u32 %v5775_v61, 16  ;;  %v10988_v54 = vpop.f32.mrb[41].mxu0  ;;  %v5782_v12 = vld [vmem:[#allocation2 + $0x70] sm:$0xf] }
 0x22a   : > { %9256 = vmatpush3.bf16.msra.mxu1 %v9451_v62  ;;  %v5903_v21 = vsel %vm10104_vm13, %v5898_v24, %v5902_v50  ;;  %v5921_v43 = vor.u32 %v5920_v17, %v10949_v14  ;;  %v5926_v4 = vrot.slane %v5924_v5, 5  ;;  %v5778_v62 = vld [vmem:[#allocation2 + $0x60] sm:$0xf]  ;;  %v5938_v7 = vshll.u32 %v10951_v20, 16  ;;  %v11018_v16 = vpop.f32.mrb[42].mxu0  ;;  %v2755_v5 = vld [vmem:[#allocation3 + $0x10] sm:$0xff] }
 0x22b   : > { %v8434_v37 = vcombine.low %v5893_v13, %v5903_v21  ;;  %v5912_v34 = vrot.slane %v5911_v23, 4  ;;  %9257 = vmatprep.subr.bf16.mxu1 %v10947_v18  ;;  %v5931_v19 = vrot.slane %v5929_v28, 4  ;;  %v5934_v56 = vrot.slane %v5932_v58, 5  ;;  %v11021_v44 = vpop.f32.mrb[43].mxu0  ;;  %v5783_v27 = vld [vmem:[#allocation2 + $0x74] sm:$0x1] }
 0x22c   : > { %v5922_v52 = vrot.slane %v5921_v43, 4  ;;  %v5942_v57 = vshrl.u32 %v10951_v20, 16  ;;  %v5948_v42 = vshll.u32 %v5777_v35, 16  ;;  %v5940_v47 = vrot.slane %v5938_v7, 5  ;;  %v8909_v38 = vpop.f32.mrb[24].mxu1  ;;  %v2753_v20 = vld [vmem:[#allocation3] sm:$0xff] }
 0x22d   : > { %v5917_v6 = vsel %vm10104_vm13, %v5912_v34, %v10949_v14  ;;  %v5953_v60 = vshrl.u32 %v5778_v62, 16  ;;  %v5956_v11 = vshll.u32 %v5778_v62, 16  ;;  %v5935_v49 = vor.u32 %v5934_v56, %v5931_v19  ;;  %2022 = vst.msk [vmem:[#allocation3 + $0xd0] sm:$0xff] %vm1995_vm1, %v8909_v38  ;;  %v1964_v61 = vpop.f32.mrb[25].mxu1  ;;  %v2756_v13 = vld [vmem:[#allocation3 + $0x18] sm:$0xff]  ;;  %v2754_v43 = vld [vmem:[#allocation3 + $0x8] sm:$0xff] }
 0x22e   : > { %9224 = vmatmul.mubr.bf16.gmra.mrb[136].mxu0 %v8434_v37  ;;  %v5927_v59 = vsel %vm10104_vm13, %v5922_v52, %v5926_v4  ;;  %9258 = vmatpush3.bf16.msra.mxu1 %v10947_v18  ;;  %v5944_v15 = vrot.slane %v5942_v57, 4  ;;  %v5950_v33 = vrot.slane %v5948_v42, 5  ;;  %v5962_v53 = vshll.u32 %v5779_v1, 16  ;;  %2020 = vst.msk [vmem:[#allocation3 + $0xc0] sm:$0xff] %vm1995_vm1, %v1964_v61  ;;  %v5784_v4 = vld [vmem:[#allocation2 + $0x78] sm:$0xf] }
 0x22f   : > { %v8435_v29 = vcombine.low %v5917_v6, %v5927_v59  ;;  %v5955_v63 = vrot.slane %v5953_v60, 4  ;;  %v5958_v0 = vrot.slane %v5956_v11, 5  ;;  %9259 = vmatprep.subr.bf16.mxu1 %v10980_v46  ;;  %v5936_v10 = vrot.slane %v5935_v49, 4  ;;  %v9463_v58 = vld [vmem:[%s11934_s3 + $0x230] sm:$0xff]   ;;  %v8910_v62 = vpop.f32.mrb[26].mxu1 }
 0x230   : > { %9180 = vmatmul.mubr.bf16.gmra.mrb[104].mxu1 %v9452_v31  ;;  %v5945_v26 = vor.u32 %v5944_v15, %v5940_v47  ;;  %v5966_v45 = vshrl.u32 %v5779_v1, 16  ;;  %v5972_v50 = vshll.u32 %v5780_v8, 16  ;;  %v5964_v41 = vrot.slane %v5962_v53, 5  ;;  %2023 = vst.msk [vmem:[#allocation3 + $0xd8] sm:$0xff] %vm1995_vm1, %v8910_v62  ;;  %v5786_v11 = vld [vmem:[#allocation2 + $0x80] sm:$0x1] }
 0x231   : > { %9183 = vmatprep.mubr.bf16.mxu1 %v9453_v25  ;;  %9227 = vmatprep.mubr.bf16.mxu0 %v8435_v29  ;;  %v5959_v36 = vor.u32 %v5958_v0, %v5955_v63  ;;  %v5977_v51 = vshrl.u32 %v5781_v40, 16  ;;  %v5980_v3 = vshll.u32 %v5781_v40, 16  ;;  %v5941_v18 = vsel %vm10104_vm13, %v5936_v10, %v5940_v47  ;;  %v9456_v47 = vld [vmem:[#allocation2 + $0x78] sm:$0xff]   ;;  %v5787_v38 = vld [vmem:[#allocation2 + $0x84] sm:$0xf]  ;;  %v2760_v61 = vld [vmem:[#allocation3 + $0x38] sm:$0xff] }
 0x232   : > { %v5946_v24 = vrot.slane %v5945_v26, 4  ;;  %v5968_v14 = vrot.slane %v5966_v45, 4  ;;  %v5974_v17 = vrot.slane %v5972_v50, 5  ;;  %9260 = vmatpush3.bf16.msra.mxu1 %v10980_v46  ;;  %v2787_v35 = vadd.f32 %v10906_v55, %v2755_v5  ;;  %v5785_v55 = vld [vmem:[#allocation2 + $0x7c] sm:$0xf]  ;;  %v9459_v62 = vld [vmem:[#allocation2 + $0x90] sm:$0xff]  }
 0x233   : > { %v5960_v23 = vrot.slane %v5959_v36, 4  ;;  %v2785_v28 = vadd.f32 %v2753_v20, %v10908_v22  ;;  %v2788_v21 = vadd.f32 %v10910_v32, %v2756_v13  ;;  %9261 = vmatprep.subr.bf16.mxu1 %v9460_v48  ;;  %v2786_v46 = vadd.f32 %v2754_v43, %v10912_v39  ;;  %v1967_v22 = vpop.f32.mrb[27].mxu1  ;;  %v9455_v39 = vld [vmem:[#allocation2 + $0x6c] sm:$0xff]   ;;  %v9466_v25 = vld [vmem:[%s11934_s3 + $0x238] sm:$0xff]   ;;  %v5788_v36 = vld [vmem:[#allocation2 + $0x88] sm:$0xf] }
 0x234   : > { %v5951_v37 = vsel %vm10104_vm13, %v5946_v24, %v5950_v33  ;;  %v5969_v34 = vor.u32 %v5968_v14, %v5964_v41  ;;  %v5979_v19 = vrot.slane %v5977_v51, 4  ;;  %2819 = vst.msk [vmem:[#allocation3 + $0x10] sm:$0xff] %vm1995_vm1, %v2787_v35  ;;  %v5982_v1 = vrot.slane %v5980_v3, 5  ;;  %2021 = vst.msk [vmem:[#allocation3 + $0xc8] sm:$0xff] %vm1995_vm1, %v1967_v22  ;;  %v5789_v24 = vld [vmem:[#allocation2 + $0x8c] sm:$0x1] }
 0x235   : > { %v8436_v32 = vcombine.low %v5941_v18, %v5951_v37  ;;  %v5965_v7 = vsel %vm10104_vm13, %v5960_v23, %v5964_v41  ;;  %2817 = vst.msk [vmem:[#allocation3] sm:$0xff] %vm1995_vm1, %v2785_v28  ;;  %2820 = vst.msk [vmem:[#allocation3 + $0x18] sm:$0xff] %vm1995_vm1, %v2788_v21  ;;  %v5986_v52 = vshll.u32 %v5782_v12, 16  ;;  %v5990_v57 = vshrl.u32 %v5782_v12, 16  ;;  %v2757_v12 = vld [vmem:[#allocation3 + $0x20] sm:$0xff]  ;;  %v2758_v18 = vld [vmem:[#allocation3 + $0x28] sm:$0xff] }
 0x236   : > { %v5970_v56 = vrot.slane %v5969_v34, 4  ;;  %2818 = vst.msk [vmem:[#allocation3 + $0x8] sm:$0xff] %vm1995_vm1, %v2786_v46  ;;  %v5996_v42 = vshll.u32 %v5783_v27, 16  ;;  %v6001_v6 = vshrl.u32 %v5784_v4, 16  ;;  %9262 = vmatpush3.bf16.msra.mxu1 %v9460_v48  ;;  %v5983_v8 = vor.u32 %v5982_v1, %v5979_v19  ;;  %v2759_v48 = vld [vmem:[#allocation3 + $0x30] sm:$0xff] }
 0x237   : > { %9228 = vmatmul.mubr.bf16.gmra.mrb[140].mxu0 %v8436_v32  ;;  %v5988_v60 = vrot.slane %v5986_v52, 5  ;;  %v6004_v31 = vshll.u32 %v5784_v4, 16  ;;  %v6010_v59 = vshll.u32 %v5785_v55, 16  ;;  %9263 = vmatprep.subr.bf16.mxu1 %v9463_v58  ;;  %v5992_v15 = vrot.slane %v5990_v57, 4  ;;  %v5790_v35 = vld [vmem:[#allocation2 + $0x90] sm:$0xf] }
 0x238   : > { %9184 = vmatmul.mubr.bf16.gmra.mrb[108].mxu1 %v9455_v39  ;;  %v5975_v49 = vsel %vm10104_vm13, %v5970_v56, %v5974_v17  ;;  %v5998_v33 = vrot.slane %v5996_v42, 5  ;;  %v6003_v40 = vrot.slane %v6001_v6, 4  ;;  %v5984_v63 = vrot.slane %v5983_v8, 4  ;;  %v5791_v4 = vld [vmem:[#allocation2 + $0x94] sm:$0xf] }
 0x239   : > { %9187 = vmatprep.mubr.bf16.mxu1 %v9456_v47  ;;  %v8437_v29 = vcombine.low %v5965_v7, %v5975_v49  ;;  %v6006_v0 = vrot.slane %v6004_v31, 5  ;;  %v11060_v53 = vrot.slane %v6010_v59, 5  ;;  %v5993_v10 = vor.u32 %v5992_v15, %v5988_v60  ;;  %v5793_v59 = vld [vmem:[#allocation2 + $0x9c] sm:$0xf] }
 0x23a   : > { %v6014_v26 = vshrl.u32 %v5785_v55, 16  ;;  %v6020_v45 = vshll.u32 %v5786_v11, 16  ;;  %v2791_v50 = vadd.f32 %v10956_v30, %v2759_v48  ;;  %9264 = vmatpush3.bf16.msra.mxu1 %v9463_v58  ;;  %v5989_v41 = vsel %vm10104_vm13, %v5984_v63, %v5988_v60  ;;  %v5792_v55 = vld [vmem:[#allocation2 + $0x98] sm:$0x1] }
 0x23b   : > { %9231 = vmatprep.mubr.bf16.mxu0 %v8437_v29  ;;  %v6007_v27 = vor.u32 %v6006_v0, %v6003_v40  ;;  %v2789_v51 = vadd.f32 %v2757_v12, %v10988_v54  ;;  %v2792_v3 = vadd.f32 %v11018_v16, %v2760_v61  ;;  %v5994_v14 = vrot.slane %v5993_v10, 4  ;;  %9265 = vmatprep.subr.bf16.mxu1 %v9466_v25  ;;  %v9458_v16 = vld [vmem:[#allocation2 + $0x84] sm:$0xff]   ;;  %v5794_v29 = vld [vmem:[#allocation2 + $0xa0] sm:$0xf]  ;;  %v2761_v10 = vld [vmem:[#allocation3 + $0x40] sm:$0xff] }
 0x23c   : > { %v6016_v17 = vrot.slane %v6014_v26, 4  ;;  %v6022_v5 = vrot.slane %v6020_v45, 5  ;;  %2823 = vst.msk [vmem:[#allocation3 + $0x30] sm:$0xff] %vm1995_vm1, %v2791_v50  ;;  %v2790_v30 = vadd.f32 %v2758_v18, %v11021_v44  ;;  %v6025_v13 = vshrl.u32 %v5787_v38, 16 }
 0x23d   : > { %v6008_v20 = vrot.slane %v6007_v27, 4  ;;  %2821 = vst.msk [vmem:[#allocation3 + $0x20] sm:$0xff] %vm1995_vm1, %v2789_v51  ;;  %2824 = vst.msk [vmem:[#allocation3 + $0x38] sm:$0xff] %vm1995_vm1, %v2792_v3  ;;  %v6028_v23 = vshll.u32 %v5787_v38, 16  ;;  %v6034_v54 = vshll.u32 %v5788_v36, 16  ;;  %v5999_v28 = vsel %vm10104_vm13, %v5994_v14, %v5998_v33  ;;  %v8941_v58 = vpop.f32.mrb[44].mxu0 }
 0x23e   : > { %v6017_v21 = vor.u32 %v6016_v17, %v11060_v53  ;;  %2822 = vst.msk [vmem:[#allocation3 + $0x28] sm:$0xff] %vm1995_vm1, %v2790_v30  ;;  %v6038_v43 = vshrl.u32 %v5788_v36, 16  ;;  %v6044_v44 = vshll.u32 %v5789_v24, 16  ;;  %9266 = vmatpush3.bf16.msra.mxu1 %v9466_v25  ;;  %v8438_v37 = vcombine.low %v5989_v41, %v5999_v28  ;;  %v2658_v22 = vpop.f32.mrb[45].mxu0  ;;  %v2763_v25 = vld [vmem:[#allocation3 + $0x50] sm:$0xff]  ;;  %v2764_v36 = vld [vmem:[#allocation3 + $0x58] sm:$0xff] }
 0x23f   : > { %v6013_v34 = vsel %vm10104_vm13, %v6008_v20, %v11060_v53  ;;  %v6027_v46 = vrot.slane %v6025_v13, 4  ;;  %v6030_v19 = vrot.slane %v6028_v23, 5  ;;  %v6036_v7 = vrot.slane %v6034_v54, 5  ;;  %v8942_v39 = vpop.f32.mrb[46].mxu0  ;;  %v2762_v41 = vld [vmem:[#allocation3 + $0x48] sm:$0xff]  ;;  %v9462_v20 = vld [vmem:[#allocation2 + $0xa8] sm:$0xff]  }
 0x240   : > { %9188 = vmatmul.mubr.bf16.gmra.mrb[112].mxu1 %v9458_v16  ;;  %v6018_v32 = vrot.slane %v6017_v21, 4  ;;  %v6040_v1 = vrot.slane %v6038_v43, 4  ;;  %v6046_v52 = vrot.slane %v6044_v44, 5  ;;  %9232 = vmatmul.mubr.bf16.gmra.mrb[144].mxu0 %v8438_v37  ;;  %v6049_v57 = vshrl.u32 %v5790_v35, 16  ;;  %v2661_v47 = vpop.f32.mrb[47].mxu0  ;;  %v8913_v63 = vpop.f32.mrb[28].mxu1 }
 0x241   : > { %9191 = vmatprep.mubr.bf16.mxu1 %v9459_v62  ;;  %v6031_v56 = vor.u32 %v6030_v19, %v6027_v46  ;;  %v6052_v42 = vshll.u32 %v5790_v35, 16  ;;  %v6058_v6 = vshll.u32 %v5791_v4, 16  ;;  %v6062_v11 = vshrl.u32 %v5791_v4, 16  ;;  %2026 = vst.msk [vmem:[#allocation3 + $0xf0] sm:$0xff] %vm1995_vm1, %v8913_v63  ;;  %v1980_v26 = vpop.f32.mrb[29].mxu1  ;;  %v9461_v3 = vld [vmem:[#allocation2 + $0x9c] sm:$0xff]  }
 0x242   : > { %v6023_v8 = vsel %vm10104_vm13, %v6018_v32, %v6022_v5  ;;  %v6041_v60 = vor.u32 %v6040_v1, %v6036_v7  ;;  %v6068_v31 = vshll.u32 %v5792_v55, 16  ;;  %v6051_v33 = vrot.slane %v6049_v57, 4  ;;  %v5795_v27 = vld [vmem:[#allocation2 + $0xa4] sm:$0x1]  ;;  %2024 = vst.msk [vmem:[#allocation3 + $0xe0] sm:$0xff] %vm1995_vm1, %v1980_v26  ;;  %v8914_v51 = vpop.f32.mrb[30].mxu1 }
 0x243   : > { %v8439_v49 = vcombine.low %v6013_v34, %v6023_v8  ;;  %v6032_v15 = vrot.slane %v6031_v56, 4  ;;  %v6054_v40 = vrot.slane %v6052_v42, 5  ;;  %v6060_v53 = vrot.slane %v6058_v6, 5  ;;  %v5796_v5 = vld [vmem:[#allocation2 + $0xa8] sm:$0xf]  ;;  %2027 = vst.msk [vmem:[#allocation3 + $0xf8] sm:$0xff] %vm1995_vm1, %v8914_v51 }
 0x244   : > { %v6042_v0 = vrot.slane %v6041_v60, 4  ;;  %v6064_v48 = vrot.slane %v6062_v11, 4  ;;  %v6070_v38 = vrot.slane %v6068_v31, 5  ;;  %v2795_v12 = vadd.f32 %v8941_v58, %v2763_v25  ;;  %v1983_v30 = vpop.f32.mrb[31].mxu1  ;;  %v5797_v16 = vld [vmem:[#allocation2 + $0xac] sm:$0xf] }
 0x245   : > { %9235 = vmatprep.mubr.bf16.mxu0 %v8439_v49  ;;  %v6037_v45 = vsel %vm10104_vm13, %v6032_v15, %v6036_v7  ;;  %v6055_v50 = vor.u32 %v6054_v40, %v6051_v33  ;;  %v2793_v61 = vadd.f32 %v2761_v10, %v2658_v22  ;;  %v2796_v14 = vadd.f32 %v8942_v39, %v2764_v36  ;;  %v5798_v34 = vld [vmem:[#allocation2 + $0xb0] sm:$0x1]  ;;  %v9464_v6 = vld [vmem:[#allocation2 + $0xb4] sm:$0xff]   ;;  %v2767_v31 = vld [vmem:[#allocation3 + $0x70] sm:$0xff] }
 0x246   : > { %v6047_v18 = vsel %vm10104_vm13, %v6042_v0, %v6046_v52  ;;  %v6065_v24 = vor.u32 %v6064_v48, %v6060_v53  ;;  %v2794_v17 = vadd.f32 %v2762_v41, %v2661_v47  ;;  %2827 = vst.msk [vmem:[#allocation3 + $0x50] sm:$0xff] %vm1995_vm1, %v2795_v12  ;;  %v6073_v54 = vshrl.u32 %v5793_v59, 16  ;;  %2025 = vst.msk [vmem:[#allocation3 + $0xe8] sm:$0xff] %vm1995_vm1, %v1983_v30  ;;  %v9465_v49 = vld [vmem:[#allocation2 + $0xc0] sm:$0xff]   ;;  %v5800_v63 = vld [vmem:[#allocation2 + $0xb8] sm:$0xf] }
 0x247   : > { %v8440_v13 = vcombine.low %v6037_v45, %v6047_v18  ;;  %v6056_v23 = vrot.slane %v6055_v50, 4  ;;  %2825 = vst.msk [vmem:[#allocation3 + $0x40] sm:$0xff] %vm1995_vm1, %v2793_v61  ;;  %v6076_v35 = vshll.u32 %v5793_v59, 16  ;;  %2828 = vst.msk [vmem:[#allocation3 + $0x58] sm:$0xff] %vm1995_vm1, %v2796_v14  ;;  %v6082_v21 = vshll.u32 %v5794_v29, 16  ;;  %v8945_v4 = vpop.f32.mrb[48].mxu0 }
 0x248   : > { %9192 = vmatmul.mubr.bf16.gmra.mrb[116].mxu1 %v9461_v3  ;;  %v6066_v28 = vrot.slane %v6065_v24, 4  ;;  %2826 = vst.msk [vmem:[#allocation3 + $0x48] sm:$0xff] %vm1995_vm1, %v2794_v17  ;;  %v6086_v43 = vshrl.u32 %v5794_v29, 16  ;;  %v6092_v44 = vshll.u32 %v5795_v27, 16  ;;  %v6075_v62 = vrot.slane %v6073_v54, 4  ;;  %v2674_v19 = vpop.f32.mrb[49].mxu0 }
 0x249   : > { %9195 = vmatprep.mubr.bf16.mxu1 %v9462_v20  ;;  %9236 = vmatmul.mubr.bf16.gmra.mrb[148].mxu0 %v8440_v13  ;;  %v6061_v58 = vsel %vm10104_vm13, %v6056_v23, %v6060_v53  ;;  %v6078_v37 = vrot.slane %v6076_v35, 5  ;;  %v6097_v46 = vshrl.u32 %v5796_v5, 16  ;;  %v6084_v22 = vrot.slane %v6082_v21, 5  ;;  %v8946_v1 = vpop.f32.mrb[50].mxu0  ;;  %v2765_v59 = vld [vmem:[#allocation3 + $0x60] sm:$0xff]  ;;  %v2768_v10 = vld [vmem:[#allocation3 + $0x78] sm:$0xff] }
 0x24a   : > { %v6071_v55 = vsel %vm10104_vm13, %v6066_v28, %v6070_v38  ;;  %v6088_v32 = vrot.slane %v6086_v43, 4  ;;  %v6094_v7 = vrot.slane %v6092_v44, 5  ;;  %v6100_v57 = vshll.u32 %v5796_v5, 16  ;;  %v2677_v42 = vpop.f32.mrb[51].mxu0  ;;  %v5799_v29 = vld [vmem:[#allocation2 + $0xb4] sm:$0xf] }
 0x24b   : > { %v8441_v52 = vcombine.low %v6061_v58, %v6071_v55  ;;  %v6079_v39 = vor.u32 %v6078_v37, %v6075_v62  ;;  %v6099_v56 = vrot.slane %v6097_v46, 4  ;;  %v6106_v8 = vshll.u32 %v5797_v16, 16  ;;  %v2766_v26 = vld [vmem:[#allocation3 + $0x68] sm:$0xff]  ;;  %v5801_v36 = vld [vmem:[#allocation2 + $0xbc] sm:$0x1]  ;;  %v9467_v46 = vld [vmem:[#allocation2 + $0xcc] sm:$0xff]  }
 0x24c   : > { %v6089_v47 = vor.u32 %v6088_v32, %v6084_v22  ;;  %v6110_v60 = vshrl.u32 %v5797_v16, 16  ;;  %v6116_v11 = vshll.u32 %v5798_v34, 16  ;;  %v6102_v33 = vrot.slane %v6100_v57, 5  ;;  %v6578_v41 = vld [vmem:[#allocation2 + $0x18] sm:$0xe] }
 0x24d   : > { %9239 = vmatprep.mubr.bf16.mxu0 %v8441_v52  ;;  %v6080_v15 = vrot.slane %v6079_v39, 4  ;;  %v2799_v40 = vadd.f32 %v8945_v4, %v2767_v31  ;;  %v2797_v25 = vadd.f32 %v2765_v59, %v2674_v19  ;;  %v6108_v53 = vrot.slane %v6106_v8, 5  ;;  %v6579_v27 = vld [vmem:[#allocation2 + $0x1c] sm:$0xf]  ;;  %v6580_v14 = vld [vmem:[#allocation2 + $0x20] sm:$0x1] }
 0x24e   : > { %v6090_v0 = vrot.slane %v6089_v47, 4  ;;  %v6112_v48 = vrot.slane %v6110_v60, 4  ;;  %v6118_v38 = vrot.slane %v6116_v11, 5  ;;  %v6103_v50 = vor.u32 %v6102_v33, %v6099_v56  ;;  %v5802_v23 = vld [vmem:[#allocation2 + $0xc0] sm:$0xf] }
 0x24f   : > { %v6085_v45 = vsel %vm10104_vm13, %v6080_v15, %v6084_v22  ;;  %2831 = vst.msk [vmem:[#allocation3 + $0x70] sm:$0xff] %vm1995_vm1, %v2799_v40  ;;  %2829 = vst.msk [vmem:[#allocation3 + $0x60] sm:$0xff] %vm1995_vm1, %v2797_v25  ;;  %v2800_v12 = vadd.f32 %v8946_v1, %v2768_v10  ;;  %v2798_v61 = vadd.f32 %v2766_v26, %v2677_v42  ;;  %v6121_v18 = vshrl.u32 %v5799_v29, 16  ;;  %v8949_v17 = vpop.f32.mrb[52].mxu0  ;;  %v5803_v32 = vld [vmem:[#allocation2 + $0xc4] sm:$0xf] }
 0x250   : > { %9196 = vmatmul.mubr.bf16.gmra.mrb[120].mxu1 %v9464_v6  ;;  %v6095_v51 = vsel %vm10104_vm13, %v6090_v0, %v6094_v7  ;;  %v6113_v3 = vor.u32 %v6112_v48, %v6108_v53  ;;  %v6124_v24 = vshll.u32 %v5799_v29, 16  ;;  %v6104_v30 = vrot.slane %v6103_v50, 4  ;;  %v2690_v54 = vpop.f32.mrb[53].mxu0  ;;  %v5804_v39 = vld [vmem:[#allocation2 + $0xc8] sm:$0x1] }
 0x251   : > { %9199 = vmatprep.mubr.bf16.mxu1 %v9465_v49  ;;  %v8442_v5 = vcombine.low %v6085_v45, %v6095_v51  ;;  %2832 = vst.msk [vmem:[#allocation3 + $0x78] sm:$0xff] %vm1995_vm1, %v2800_v12  ;;  %2830 = vst.msk [vmem:[#allocation3 + $0x68] sm:$0xff] %vm1995_vm1, %v2798_v61  ;;  %v6130_v20 = vshll.u32 %v5800_v63, 16  ;;  %v6134_v13 = vshrl.u32 %v5800_v63, 16  ;;  %v6123_v16 = vrot.slane %v6121_v18, 4  ;;  %v8950_v43 = vpop.f32.mrb[54].mxu0 }
 0x252   : > { %v6114_v35 = vrot.slane %v6113_v3, 4  ;;  %v6126_v28 = vrot.slane %v6124_v24, 5  ;;  %v6140_v21 = vshll.u32 %v5801_v36, 16  ;;  %v6109_v44 = vsel %vm10104_vm13, %v6104_v30, %v6108_v53  ;;  %v2693_v37 = vpop.f32.mrb[55].mxu0  ;;  %v6581_v59 = vld [vmem:[#allocation2 + $0x24] sm:$0xe] }
 0x253   : > { %9240 = vmatmul.mubr.bf16.gmra.mrb[152].mxu0 %v8442_v5  ;;  %v6132_v4 = vrot.slane %v6130_v20, 5  ;;  %v6136_v58 = vrot.slane %v6134_v13, 4  ;;  %v8455_v62 = vrot.slane %v6578_v41, 9  ;;  %v6676_v22 = vrot.slane %v6579_v27, 5  ;;  %v6582_v49 = vld [vmem:[#allocation2 + $0x28] sm:$0xf] }
 0x254   : > { %v6119_v34 = vsel %vm10104_vm13, %v6114_v35, %v6118_v38  ;;  %v6127_v19 = vor.u32 %v6126_v28, %v6123_v16  ;;  %v6142_v55 = vrot.slane %v6140_v21, 5  ;;  %v6679_v52 = vrot.slane %v6580_v14, 5  ;;  %v6583_v15 = vld [vmem:[#allocation2 + $0x2c] sm:$0x1]  ;;  %v6584_v63 = vld [vmem:[#allocation2 + $0x30] sm:$0xe] }
 0x255   : > { %v8443_v7 = vcombine.low %v6109_v44, %v6119_v34  ;;  %v6137_v1 = vor.u32 %v6136_v58, %v6132_v4  ;;  %v6145_v56 = vshrl.u32 %v5802_v23, 16  ;;  %v6677_v42 = vsel %vm10284_vm0, %v8455_v62, %v6676_v22  ;;  %v6585_v0 = vld [vmem:[#allocation2 + $0x34] sm:$0xf]  ;;  %v2771_v45 = vld [vmem:[#allocation3 + $0x90] sm:$0xff]  ;;  %v6586_v50 = vld [vmem:[#allocation2 + $0x38] sm:$0x1] }
 0x256   : > { %v6128_v57 = vrot.slane %v6127_v19, 4  ;;  %v6678_v6 = vrot.slane %v6676_v22, 4  ;;  %v6148_v47 = vshll.u32 %v5802_v23, 16  ;;  %v6154_v11 = vshll.u32 %v5803_v32, 16  ;;  %v2769_v51 = vld [vmem:[#allocation3 + $0x80] sm:$0xff]  ;;  %v2772_v3 = vld [vmem:[#allocation3 + $0x98] sm:$0xff] }
 0x257   : > { %9243 = vmatprep.mubr.bf16.mxu0 %v8443_v7  ;;  %v6138_v8 = vrot.slane %v6137_v1, 4  ;;  %v6147_v60 = vrot.slane %v6145_v56, 4  ;;  %v6158_v31 = vshrl.u32 %v5803_v32, 16  ;;  %v6164_v29 = vshll.u32 %v5804_v39, 16  ;;  %v11114_v53 = vpop.f32.mrb[56].mxu0  ;;  %v2770_v18 = vld [vmem:[#allocation3 + $0x88] sm:$0xff] }
 0x258   : > { %9200 = vmatmul.mubr.bf16.gmra.mrb[124].mxu1 %v9467_v46  ;;  %v6133_v33 = vsel %vm10104_vm13, %v6128_v57, %v6132_v4  ;;  %v6680_v40 = vsel %vm10284_vm0, %v6678_v6, %v6679_v52  ;;  %v6150_v25 = vrot.slane %v6148_v47, 5  ;;  %v6156_v10 = vrot.slane %v6154_v11, 5  ;;  %v11118_v12 = vpop.f32.mrb[57].mxu0  ;;  %v5805_v13 = vld [vmem:[#allocation2 + $0xcc] sm:$0xf] }
 0x259   : > { %v6143_v48 = vsel %vm10104_vm13, %v6138_v8, %v6142_v55  ;;  %v8487_v38 = vcombine.low %v6677_v42, %v6680_v40  ;;  %v6160_v26 = vrot.slane %v6158_v31, 4  ;;  %v6166_v41 = vrot.slane %v6164_v29, 5  ;;  %v8954_v24 = vpop.f32.mrb[58].mxu0  ;;  %v5806_v4 = vld [vmem:[#allocation2 + $0xd0] sm:$0xf]  ;;  %v2775_v31 = vld [vmem:[#allocation3 + $0xb0] sm:$0xff] }
 0x25a   : > { %v8444_v61 = vcombine.low %v6133_v33, %v6143_v48  ;;  %v6151_v36 = vor.u32 %v6150_v25, %v6147_v60  ;;  %v2803_v27 = vadd.f32 %v8949_v17, %v2771_v45  ;;  %v2801_v5 = vadd.f32 %v2769_v51, %v2690_v54  ;;  %v2709_v23 = vpop.f32.mrb[59].mxu0  ;;  %v5807_v22 = vld [vmem:[#allocation2 + $0xd4] sm:$0x1]  ;;  %v6588_v7 = vld [vmem:[#allocation2 + $0x40] sm:$0xf] }
 0x25b   : > { %9267 = vmatprep.mubr.bf16.mxu1 %v8487_v38  ;;  %v6161_v14 = vor.u32 %v6160_v26, %v6156_v10  ;;  %v2804_v30 = vadd.f32 %v8950_v43, %v2772_v3  ;;  %v2802_v20 = vadd.f32 %v2770_v18, %v2693_v37  ;;  %v8456_v16 = vrot.slane %v6581_v59, 9  ;;  %v6587_v57 = vld [vmem:[#allocation2 + $0x3c] sm:$0xe]  ;;  %v6589_v42 = vld [vmem:[#allocation2 + $0x44] sm:$0x1] }
 0x25c   : > { %9244 = vmatmul.mubr.bf16.gmra.mrb[156].mxu0 %v8444_v61  ;;  %v6152_v35 = vrot.slane %v6151_v36, 4  ;;  %2835 = vst.msk [vmem:[#allocation3 + $0x90] sm:$0xff] %vm1995_vm1, %v2803_v27  ;;  %v6683_v28 = vrot.slane %v6582_v49, 5  ;;  %v6686_v21 = vrot.slane %v6583_v15, 5  ;;  %2833 = vst.msk [vmem:[#allocation3 + $0x80] sm:$0xff] %vm1995_vm1, %v2801_v5  ;;  %v8457_v17 = vrot.slane %v6584_v63, 9 }
 0x25d   : > { %v6162_v44 = vrot.slane %v6161_v14, 4  ;;  %2836 = vst.msk [vmem:[#allocation3 + $0x98] sm:$0xff] %vm1995_vm1, %v2804_v30  ;;  %2834 = vst.msk [vmem:[#allocation3 + $0x88] sm:$0xff] %vm1995_vm1, %v2802_v20  ;;  %v6690_v54 = vrot.slane %v6585_v0, 5  ;;  %v6693_v43 = vrot.slane %v6586_v50, 5  ;;  %v6169_v34 = vshrl.u32 %v5805_v13, 16 }
 0x25e   : > { %v6157_v58 = vsel %vm10104_vm13, %v6152_v35, %v6156_v10  ;;  %v6684_v62 = vsel %vm10284_vm0, %v8456_v16, %v6683_v28  ;;  %v6685_v37 = vrot.slane %v6683_v28, 4  ;;  %v6172_v32 = vshll.u32 %v5805_v13, 16  ;;  %v6590_v59 = vld [vmem:[#allocation2 + $0x48] sm:$0xe]  ;;  %v6591_v49 = vld [vmem:[#allocation2 + $0x4c] sm:$0xf] }
 0x25f   : > { %v6167_v46 = vsel %vm10104_vm13, %v6162_v44, %v6166_v41  ;;  %v6691_v19 = vsel %vm10284_vm0, %v8457_v17, %v6690_v54  ;;  %v6692_v55 = vrot.slane %v6690_v54, 4  ;;  %v6171_v39 = vrot.slane %v6169_v34, 4  ;;  %v2773_v63 = vld [vmem:[#allocation3 + $0xa0] sm:$0xff]  ;;  %v2776_v0 = vld [vmem:[#allocation3 + $0xb8] sm:$0xff]  ;;  %v2774_v50 = vld [vmem:[#allocation3 + $0xa8] sm:$0xff] }
 0x260   : > { %v8445_v1 = vcombine.low %v6157_v58, %v6167_v46  ;;  %v6687_v52 = vsel %vm10284_vm0, %v6685_v37, %v6686_v21  ;;  %v6178_v56 = vshll.u32 %v5806_v4, 16  ;;  %v8957_v6 = vpop.f32.mrb[60].mxu0  ;;  %v6174_v60 = vrot.slane %v6172_v32, 5  ;;  %v6592_v61 = vld [vmem:[#allocation2 + $0x50] sm:$0x1]  ;;  %v2779_v5 = vld [vmem:[#allocation3 + $0xd0] sm:$0xff] }
 0x261   : > { %v8488_v47 = vcombine.low %v6684_v62, %v6687_v52  ;;  %v6694_v8 = vsel %vm10284_vm0, %v6692_v55, %v6693_v43  ;;  %v6182_v11 = vshrl.u32 %v5806_v4, 16  ;;  %v2722_v15 = vpop.f32.mrb[61].mxu0  ;;  %v6188_v25 = vshll.u32 %v5807_v22, 16  ;;  %v2780_v54 = vld [vmem:[#allocation3 + $0xd8] sm:$0xff]  ;;  %v11146_v43 = vld [vmem:[#allocation2 + $0x64] sm:$0xf] }
 0x262   : > { %9247 = vmatprep.mubr.bf16.mxu0 %v8445_v1  ;;  %v8489_v33 = vcombine.low %v6691_v19, %v6694_v8  ;;  %v6180_v40 = vrot.slane %v6178_v56, 5  ;;  %v2807_v29 = vadd.f32 %v11114_v53, %v2775_v31  ;;  %v8958_v48 = vpop.f32.mrb[62].mxu0  ;;  %v6175_v38 = vor.u32 %v6174_v60, %v6171_v39  ;;  %v2778_v46 = vld [vmem:[#allocation3 + $0xc8] sm:$0xff]  ;;  %v6598_v19 = vld [vmem:[#allocation2 + $0x68] sm:$0x1]  ;;  %v3350_v31 = vld [vmem:[#allocation3] sm:$0xff] }
 0x263   : > { %9268 = vmatmul.mubr.bf16.vlgmr.msra.gmra.mrb[128].mxu1 %v8488_v47  ;;  %v6184_v10 = vrot.slane %v6182_v11, 4  ;;  %v2805_v26 = vadd.f32 %v2773_v63, %v11118_v12  ;;  %v2808_v45 = vadd.f32 %v8954_v24, %v2776_v0  ;;  %v2725_v36 = vpop.f32.mrb[63].mxu0  ;;  %v6190_v41 = vrot.slane %v6188_v25, 5  ;;  %v11141_v12 = vld [vmem:[#allocation2 + $0x58] sm:$0xf]  ;;  %v3352_v11 = vld [vmem:[#allocation3 + $0x10] sm:$0xff] }
 0x264   : > { %9271 = vmatprep.mubr.bf16.mxu1 %v8489_v33  ;;  %2839 = vst.msk [vmem:[#allocation3 + $0xb0] sm:$0xff] %vm1995_vm1, %v2807_v29  ;;  %v2806_v27 = vadd.f32 %v2774_v50, %v2709_v23  ;;  %v6697_v51 = vrot.slane %v6588_v7, 5  ;;  %v6176_v3 = vrot.slane %v6175_v38, 4  ;;  %v8458_v18 = vrot.slane %v6587_v57, 9  ;;  %v6595_v24 = vld [vmem:[#allocation2 + $0x5c] sm:$0x1] }
 0x265   : > { %v6185_v53 = vor.u32 %v6184_v10, %v6180_v40  ;;  %2837 = vst.msk [vmem:[#allocation3 + $0xa0] sm:$0xff] %vm1995_vm1, %v2805_v26  ;;  %2840 = vst.msk [vmem:[#allocation3 + $0xb8] sm:$0xff] %vm1995_vm1, %v2808_v45  ;;  %v6700_v14 = vrot.slane %v6589_v42, 5  ;;  %v8459_v20 = vrot.slane %v6590_v59, 9  ;;  %v6704_v13 = vrot.slane %v6591_v49, 5  ;;  %v2777_v23 = vld [vmem:[#allocation3 + $0xc0] sm:$0xff] }
 0x266   : > { %2838 = vst.msk [vmem:[#allocation3 + $0xa8] sm:$0xff] %vm1995_vm1, %v2806_v27  ;;  %v6699_v30 = vrot.slane %v6697_v51, 4  ;;  %v6707_v35 = vrot.slane %v6592_v61, 5  ;;  %v8981_v16 = vpop.f32.mrb[32].mxu1  ;;  %v6181_v28 = vsel %vm10104_vm13, %v6176_v3, %v6180_v40  ;;  %v2811_v44 = vadd.f32 %v8957_v6, %v2779_v5  ;;  %v6593_v57 = vld [vmem:[#allocation2 + $0x54] sm:$0xe] }
 0x267   : > { %v6186_v21 = vrot.slane %v6185_v53, 4  ;;  %v2809_v17 = vadd.f32 %v2777_v23, %v2722_v15  ;;  %v3223_v4 = vpop.f32.mrb[33].mxu1  ;;  %v6698_v58 = vsel %vm10284_vm0, %v8458_v18, %v6697_v51  ;;  %v6706_v37 = vrot.slane %v6704_v13, 4  ;;  %v6596_v47 = vld [vmem:[#allocation2 + $0x60] sm:$0xe]  ;;  %v3353_v33 = vld [vmem:[#allocation3 + $0x18] sm:$0xff] }
 0x268   : > { %v6701_v62 = vsel %vm10284_vm0, %v6699_v30, %v6700_v14  ;;  %v2812_v34 = vadd.f32 %v8958_v48, %v2780_v54  ;;  %v8982_v55 = vpop.f32.mrb[34].mxu1  ;;  %v6705_v7 = vsel %vm10284_vm0, %v8459_v20, %v6704_v13  ;;  %2843 = vst.msk [vmem:[#allocation3 + $0xd0] sm:$0xff] %vm1995_vm1, %v2811_v44  ;;  %v2810_v1 = vadd.f32 %v2778_v46, %v2725_v36  ;;  %v3351_v40 = vld [vmem:[#allocation3 + $0x8] sm:$0xff]  ;;  %v11164_v25 = vld [vmem:[#allocation2 + $0x70] sm:$0xf]  ;;  %v2783_v61 = vld [vmem:[#allocation3 + $0xf0] sm:$0xff] }
 0x269   : > { %v6191_v22 = vsel %vm10104_vm13, %v6186_v21, %v6190_v41  ;;  %v8490_v32 = vcombine.low %v6698_v58, %v6701_v62  ;;  %2841 = vst.msk [vmem:[#allocation3 + $0xc0] sm:$0xff] %vm1995_vm1, %v2809_v17  ;;  %v3226_v52 = vpop.f32.mrb[35].mxu1  ;;  %v6708_v56 = vsel %vm10284_vm0, %v6706_v37, %v6707_v35  ;;  %v6711_v9 = vrot.slane %v11141_v12, 5  ;;  %v6601_v48 = vld [vmem:[#allocation2 + $0x74] sm:$0x1]  ;;  %v2781_v3 = vld [vmem:[#allocation3 + $0xe0] sm:$0xff] }
 0x26a   : > { %v8446_v39 = vcombine.low %v6181_v28, %v6191_v22  ;;  %2844 = vst.msk [vmem:[#allocation3 + $0xd8] sm:$0xff] %vm1995_vm1, %v2812_v34  ;;  %v6714_v42 = vrot.slane %v6595_v24, 5  ;;  %v8491_v6 = vcombine.low %v6705_v7, %v6708_v56  ;;  %2842 = vst.msk [vmem:[#allocation3 + $0xc8] sm:$0xff] %vm1995_vm1, %v2810_v1  ;;  %v6718_v8 = vrot.slane %v11146_v43, 5  ;;  %v11166_v38 = vld [vmem:[#allocation2 + $0x7c] sm:$0xf] }
 0x26b   : > { %9272 = vmatmul.mubr.bf16.gmra.mrb[132].mxu1 %v8490_v32  ;;  %v6721_v60 = vrot.slane %v6598_v19, 5  ;;  %v6713_v59 = vrot.slane %v6711_v9, 4  ;;  %v3384_v49 = vadd.f32 %v8981_v16, %v3352_v11  ;;  %v3382_v15 = vadd.f32 %v3350_v31, %v3223_v4  ;;  %v6604_v18 = vld [vmem:[#allocation2 + $0x80] sm:$0x1]  ;;  %v2784_v20 = vld [vmem:[#allocation3 + $0xf8] sm:$0xff]  ;;  %v3356_v35 = vld [vmem:[#allocation3 + $0x30] sm:$0xff] }
 0x26c   : > { %9248 = vmatmul.mubr.bf16.gmra.mrb[160].mxu0 %v8446_v39  ;;  %9275 = vmatprep.mubr.bf16.mxu1 %v8491_v6  ;;  %v6720_v29 = vrot.slane %v6718_v8, 4  ;;  %v3385_v63 = vadd.f32 %v8982_v55, %v3353_v33  ;;  %v3383_v0 = vadd.f32 %v3351_v40, %v3226_v52  ;;  %v8460_v10 = vrot.slane %v6593_v57, 9  ;;  %v2782_v44 = vld [vmem:[#allocation3 + $0xe8] sm:$0xff]  ;;  %v3354_v43 = vld [vmem:[#allocation3 + $0x20] sm:$0xff]  ;;  %v3357_v4 = vld [vmem:[#allocation3 + $0x38] sm:$0xff] }
 0x26d   : > { %v6715_v26 = vsel %vm10284_vm0, %v6713_v59, %v6714_v42  ;;  %v8461_v45 = vrot.slane %v6596_v47, 9  ;;  %3416 = vst.msk [vmem:[#allocation3 + $0x10] sm:$0xff] %vm1995_vm1, %v3384_v49  ;;  %v8961_v50 = vpop.f32.mrb[64].mxu0  ;;  %3414 = vst.msk [vmem:[#allocation3] sm:$0xff] %vm1995_vm1, %v3382_v15  ;;  %v8985_v36 = vpop.f32.mrb[36].mxu1  ;;  %v6725_v53 = vrot.slane %v11164_v25, 5 }
 0x26e   : > { %v6722_v41 = vsel %vm10284_vm0, %v6720_v29, %v6721_v60  ;;  %v2815_v27 = vadd.f32 %v8961_v50, %v2783_v61  ;;  %v2738_v51 = vpop.f32.mrb[65].mxu0  ;;  %3417 = vst.msk [vmem:[#allocation3 + $0x18] sm:$0xff] %vm1995_vm1, %v3385_v63  ;;  %3415 = vst.msk [vmem:[#allocation3 + $0x8] sm:$0xff] %vm1995_vm1, %v3383_v0  ;;  %v3239_v14 = vpop.f32.mrb[37].mxu1  ;;  %v6712_v5 = vsel %vm10284_vm0, %v8460_v10, %v6711_v9  ;;  %v6728_v13 = vrot.slane %v6601_v48, 5  ;;  %v3355_v55 = vld [vmem:[#allocation3 + $0x28] sm:$0xff] }
 0x26f   : > { %v6719_v12 = vsel %vm10284_vm0, %v8461_v45, %v6718_v8  ;;  %v2813_v24 = vadd.f32 %v2781_v3, %v2738_v51  ;;  %v8962_v30 = vpop.f32.mrb[66].mxu0  ;;  %v8986_v23 = vpop.f32.mrb[38].mxu1  ;;  %v8492_v16 = vcombine.low %v6712_v5, %v6715_v26  ;;  %v6732_v17 = vrot.slane %v11166_v38, 5  ;;  %v6599_v34 = vld [vmem:[#allocation2 + $0x6c] sm:$0xe]  ;;  %v3358_v0 = vld [vmem:[#allocation3 + $0x40] sm:$0xff] }
 0x270   : > { %2847 = vst.msk [vmem:[#allocation3 + $0xf0] sm:$0xff] %vm1995_vm1, %v2815_v27  ;;  %v2816_v28 = vadd.f32 %v8962_v30, %v2784_v20  ;;  %v2741_v21 = vpop.f32.mrb[67].mxu0  ;;  %v3388_v54 = vadd.f32 %v8985_v36, %v3356_v35  ;;  %v3242_v58 = vpop.f32.mrb[39].mxu1  ;;  %v8493_v62 = vcombine.low %v6719_v12, %v6722_v41  ;;  %v3386_v46 = vadd.f32 %v3354_v43, %v3239_v14  ;;  %v6602_v32 = vld [vmem:[#allocation2 + $0x78] sm:$0xe]  ;;  %v3360_v31 = vld [vmem:[#allocation3 + $0x50] sm:$0xff] }
 0x271   : > { %2845 = vst.msk [vmem:[#allocation3 + $0xe0] sm:$0xff] %vm1995_vm1, %v2813_v24  ;;  %v2814_v37 = vadd.f32 %v2782_v44, %v2741_v21  ;;  %v3389_v19 = vadd.f32 %v8986_v23, %v3357_v4  ;;  %v6727_v22 = vrot.slane %v6725_v53, 4  ;;  %v6735_v7 = vrot.slane %v6604_v18, 5  ;;  %v11189_v52 = vld [vmem:[#allocation2 + $0x88] sm:$0xf]  ;;  %v3361_v36 = vld [vmem:[#allocation3 + $0x58] sm:$0xff] }
 0x272   : > { %2848 = vst.msk [vmem:[#allocation3 + $0xf8] sm:$0xff] %vm1995_vm1, %v2816_v28  ;;  %3420 = vst.msk [vmem:[#allocation3 + $0x30] sm:$0xff] %vm1995_vm1, %v3388_v54  ;;  %v3387_v1 = vadd.f32 %v3355_v55, %v3242_v58  ;;  %v8462_v39 = vrot.slane %v6599_v34, 9  ;;  %v6734_v57 = vrot.slane %v6732_v17, 4  ;;  %v11194_v6 = vld [vmem:[#allocation2 + $0x94] sm:$0xf] }
 0x273   : > { %9276 = vmatmul.mubr.bf16.gmra.mrb[136].mxu1 %v8492_v16  ;;  %2846 = vst.msk [vmem:[#allocation3 + $0xe8] sm:$0xff] %vm1995_vm1, %v2814_v37  ;;  %3418 = vst.msk [vmem:[#allocation3 + $0x20] sm:$0xff] %vm1995_vm1, %v3386_v46  ;;  %v6729_v56 = vsel %vm10284_vm0, %v6727_v22, %v6728_v13  ;;  %v8463_v47 = vrot.slane %v6602_v32, 9  ;;  %v6607_v25 = vld [vmem:[#allocation2 + $0x8c] sm:$0x1]  ;;  %v6739_v26 = vrot.slane %v11189_v52, 5 }
 0x274   : > { %9279 = vmatprep.mubr.bf16.mxu1 %v8493_v62  ;;  %3421 = vst.msk [vmem:[#allocation3 + $0x38] sm:$0xff] %vm1995_vm1, %v3389_v19  ;;  %v3803_v9 = vld [vmem:[#allocation3 + $0x10] sm:$0xff]  ;;  %v3801_v42 = vld [vmem:[#allocation3] sm:$0xff]  ;;  %3419 = vst.msk [vmem:[#allocation3 + $0x28] sm:$0xff] %vm1995_vm1, %v3387_v1  ;;  %v6726_v59 = vsel %vm10284_vm0, %v8462_v39, %v6725_v53  ;;  %v6736_v49 = vsel %vm10284_vm0, %v6734_v57, %v6735_v7  ;;  %v6746_v3 = vrot.slane %v11194_v6, 5  ;;  %v6742_v30 = vrot.slane %v6607_v25, 5 }
 0x275   : > { %v9029_v8 = vpop.f32.mrb[68].mxu0  ;;  %v3804_v60 = vld [vmem:[#allocation3 + $0x18] sm:$0xff]  ;;  %v8989_v11 = vpop.f32.mrb[40].mxu1  ;;  %v3802_v40 = vld [vmem:[#allocation3 + $0x8] sm:$0xff]  ;;  %v8494_v48 = vcombine.low %v6726_v59, %v6729_v56  ;;  %v6610_v45 = vld [vmem:[#allocation2 + $0x98] sm:$0x1]  ;;  %v6733_v41 = vsel %vm10284_vm0, %v8463_v47, %v6732_v17 }
 0x276   : > { %v3835_v15 = vadd.f32 %v9029_v8, %v3803_v9  ;;  %v3674_v33 = vpop.f32.mrb[69].mxu0  ;;  %v3392_v29 = vadd.f32 %v8989_v11, %v3360_v31  ;;  %v3255_v63 = vpop.f32.mrb[41].mxu1  ;;  %v3359_v14 = vld [vmem:[#allocation3 + $0x48] sm:$0xff]  ;;  %v8495_v5 = vcombine.low %v6733_v41, %v6736_v49  ;;  %v6608_v13 = vld [vmem:[#allocation2 + $0x90] sm:$0xe]  ;;  %v6749_v35 = vrot.slane %v6610_v45, 5 }
 0x277   : > { %v3833_v38 = vadd.f32 %v3801_v42, %v3674_v33  ;;  %v9030_v10 = vpop.f32.mrb[70].mxu0  ;;  %v3390_v50 = vadd.f32 %v3358_v0, %v3255_v63  ;;  %v8990_v61 = vpop.f32.mrb[42].mxu1  ;;  %v6605_v24 = vld [vmem:[#allocation2 + $0x84] sm:$0xe]  ;;  %v6741_v23 = vrot.slane %v6739_v26, 4  ;;  %v6748_v44 = vrot.slane %v6746_v3, 4 }
 0x278   : > { %3867 = vst.msk [vmem:[#allocation3 + $0x10] sm:$0xff] %vm1995_vm1, %v3835_v15  ;;  %v3836_v27 = vadd.f32 %v9030_v10, %v3804_v60  ;;  %v3677_v51 = vpop.f32.mrb[71].mxu0  ;;  %3424 = vst.msk [vmem:[#allocation3 + $0x50] sm:$0xff] %vm1995_vm1, %v3392_v29  ;;  %v3393_v53 = vadd.f32 %v8990_v61, %v3361_v36  ;;  %v3258_v18 = vpop.f32.mrb[43].mxu1  ;;  %v11212_v28 = vld [vmem:[#allocation2 + $0xa0] sm:$0xf] }
 0x279   : > { %3865 = vst.msk [vmem:[#allocation3] sm:$0xff] %vm1995_vm1, %v3833_v38  ;;  %v3834_v12 = vadd.f32 %v3802_v40, %v3677_v51  ;;  %3422 = vst.msk [vmem:[#allocation3 + $0x40] sm:$0xff] %vm1995_vm1, %v3390_v50  ;;  %v3391_v20 = vadd.f32 %v3359_v14, %v3258_v18  ;;  %v3807_v16 = vld [vmem:[#allocation3 + $0x30] sm:$0xff]  ;;  %v8464_v21 = vrot.slane %v6605_v24, 9  ;;  %v6743_v43 = vsel %vm10284_vm0, %v6741_v23, %v6742_v30  ;;  %v6613_v7 = vld [vmem:[#allocation2 + $0xa4] sm:$0x1] }
 0x27a   : > { %3868 = vst.msk [vmem:[#allocation3 + $0x18] sm:$0xff] %vm1995_vm1, %v3836_v27  ;;  %3425 = vst.msk [vmem:[#allocation3 + $0x58] sm:$0xff] %vm1995_vm1, %v3393_v53  ;;  %v3805_v17 = vld [vmem:[#allocation3 + $0x20] sm:$0xff]  ;;  %v11214_v54 = vld [vmem:[#allocation2 + $0xac] sm:$0xf]  ;;  %v8465_v4 = vrot.slane %v6608_v13, 9  ;;  %v6750_v19 = vsel %vm10284_vm0, %v6748_v44, %v6749_v35 }
 0x27b   : > { %9280 = vmatmul.mubr.bf16.gmra.mrb[140].mxu1 %v8494_v48  ;;  %3866 = vst.msk [vmem:[#allocation3 + $0x8] sm:$0xff] %vm1995_vm1, %v3834_v12  ;;  %3423 = vst.msk [vmem:[#allocation3 + $0x48] sm:$0xff] %vm1995_vm1, %v3391_v20  ;;  %v3808_v62 = vld [vmem:[#allocation3 + $0x38] sm:$0xff]  ;;  %v3364_v34 = vld [vmem:[#allocation3 + $0x70] sm:$0xff]  ;;  %v6740_v46 = vsel %vm10284_vm0, %v8464_v21, %v6739_v26  ;;  %v6753_v42 = vrot.slane %v11212_v28, 5  ;;  %v6760_v15 = vrot.slane %v11214_v54, 5 }
 0x27c   : > { %9283 = vmatprep.mubr.bf16.mxu1 %v8495_v5  ;;  %v3806_v32 = vld [vmem:[#allocation3 + $0x28] sm:$0xff]  ;;  %v3362_v39 = vld [vmem:[#allocation3 + $0x60] sm:$0xff]  ;;  %v6747_v56 = vsel %vm10284_vm0, %v8465_v4, %v6746_v3  ;;  %v6616_v6 = vld [vmem:[#allocation2 + $0xb0] sm:$0x1]  ;;  %v8496_v11 = vcombine.low %v6740_v46, %v6743_v43  ;;  %v6756_v0 = vrot.slane %v6613_v7, 5 }
 0x27d   : > { %v9033_v58 = vpop.f32.mrb[72].mxu0  ;;  %v8993_v37 = vpop.f32.mrb[44].mxu1  ;;  %v3365_v60 = vld [vmem:[#allocation3 + $0x78] sm:$0xff]  ;;  %v6611_v49 = vld [vmem:[#allocation2 + $0x9c] sm:$0xe]  ;;  %v3363_v25 = vld [vmem:[#allocation3 + $0x68] sm:$0xff]  ;;  %v8497_v29 = vcombine.low %v6747_v56, %v6750_v19 }
 0x27e   : > { %v3839_v55 = vadd.f32 %v9033_v58, %v3807_v16  ;;  %v3690_v22 = vpop.f32.mrb[73].mxu0  ;;  %v3396_v1 = vadd.f32 %v8993_v37, %v3364_v34  ;;  %v3271_v52 = vpop.f32.mrb[45].mxu1  ;;  %v6614_v38 = vld [vmem:[#allocation2 + $0xa8] sm:$0xe]  ;;  %v6763_v10 = vrot.slane %v6616_v6, 5  ;;  %v8466_v45 = vrot.slane %v6611_v49, 9 }
 0x27f   : > { %v3837_v57 = vadd.f32 %v3805_v17, %v3690_v22  ;;  %v9034_v9 = vpop.f32.mrb[74].mxu0  ;;  %v3394_v47 = vadd.f32 %v3362_v39, %v3271_v52  ;;  %v8994_v8 = vpop.f32.mrb[46].mxu1  ;;  %v11232_v26 = vld [vmem:[#allocation2 + $0xb8] sm:$0xf]  ;;  %v6755_v50 = vrot.slane %v6753_v42, 4  ;;  %v3811_v61 = vld [vmem:[#allocation3 + $0x50] sm:$0xff] }
 0x280   : > { %3871 = vst.msk [vmem:[#allocation3 + $0x30] sm:$0xff] %vm1995_vm1, %v3839_v55  ;;  %v3840_v31 = vadd.f32 %v9034_v9, %v3808_v62  ;;  %v3693_v59 = vpop.f32.mrb[75].mxu0  ;;  %3428 = vst.msk [vmem:[#allocation3 + $0x70] sm:$0xff] %vm1995_vm1, %v3396_v1  ;;  %v3397_v33 = vadd.f32 %v8994_v8, %v3365_v60  ;;  %v3274_v40 = vpop.f32.mrb[47].mxu1  ;;  %v11236_v36 = vld [vmem:[#allocation2 + $0xc4] sm:$0xf]  ;;  %v6754_v53 = vsel %vm10284_vm0, %v8466_v45, %v6753_v42 }
 0x281   : > { %3869 = vst.msk [vmem:[#allocation3 + $0x20] sm:$0xff] %vm1995_vm1, %v3837_v57  ;;  %v3838_v63 = vadd.f32 %v3806_v32, %v3693_v59  ;;  %3426 = vst.msk [vmem:[#allocation3 + $0x60] sm:$0xff] %vm1995_vm1, %v3394_v47  ;;  %v3395_v48 = vadd.f32 %v3363_v25, %v3274_v40  ;;  %v6762_v41 = vrot.slane %v6760_v15, 4  ;;  %v3809_v27 = vld [vmem:[#allocation3 + $0x40] sm:$0xff]  ;;  %v6620_v3 = vld [vmem:[#allocation2 + $0xc0] sm:$0xe]  ;;  %v6757_v18 = vsel %vm10284_vm0, %v6755_v50, %v6756_v0 }
 0x282   : > { %3872 = vst.msk [vmem:[#allocation3 + $0x38] sm:$0xff] %vm1995_vm1, %v3840_v31  ;;  %3429 = vst.msk [vmem:[#allocation3 + $0x78] sm:$0xff] %vm1995_vm1, %v3397_v33  ;;  %v6619_v51 = vld [vmem:[#allocation2 + $0xbc] sm:$0x1]  ;;  %v8467_v14 = vrot.slane %v6614_v38, 9  ;;  %v3812_v12 = vld [vmem:[#allocation3 + $0x58] sm:$0xff]  ;;  %v8498_v19 = vcombine.low %v6754_v53, %v6757_v18 }
 0x283   : > { %9284 = vmatmul.mubr.bf16.gmra.mrb[144].mxu1 %v8496_v11  ;;  %3870 = vst.msk [vmem:[#allocation3 + $0x28] sm:$0xff] %vm1995_vm1, %v3838_v63  ;;  %3427 = vst.msk [vmem:[#allocation3 + $0x68] sm:$0xff] %vm1995_vm1, %v3395_v48  ;;  %v6622_v24 = vld [vmem:[#allocation2 + $0xc8] sm:$0x1]  ;;  %v6764_v13 = vsel %vm10284_vm0, %v6762_v41, %v6763_v10  ;;  %v3810_v16 = vld [vmem:[#allocation3 + $0x48] sm:$0xff]  ;;  %v6774_v21 = vrot.slane %v11236_v36, 5 }
 0x284   : > { %9287 = vmatprep.mubr.bf16.mxu1 %v8497_v29  ;;  %v3368_v20 = vld [vmem:[#allocation3 + $0x90] sm:$0xff]  ;;  %v6617_v28 = vld [vmem:[#allocation2 + $0xb4] sm:$0xe]  ;;  %v3366_v54 = vld [vmem:[#allocation3 + $0x80] sm:$0xff]  ;;  %v6767_v58 = vrot.slane %v11232_v26, 5  ;;  %v6770_v62 = vrot.slane %v6619_v51, 5  ;;  %v6761_v55 = vsel %vm10284_vm0, %v8467_v14, %v6760_v15 }
 0x285   : > { %v9037_v5 = vpop.f32.mrb[76].mxu0  ;;  %v8997_v30 = vpop.f32.mrb[48].mxu1  ;;  %v3369_v46 = vld [vmem:[#allocation3 + $0x98] sm:$0xff]  ;;  %v3367_v52 = vld [vmem:[#allocation3 + $0x88] sm:$0xff]  ;;  %v8499_v56 = vcombine.low %v6761_v55, %v6764_v13  ;;  %v8469_v9 = vrot.slane %v6620_v3, 9  ;;  %v6776_v6 = vrot.slane %v6774_v21, 4 }
 0x286   : > { %v3843_v35 = vadd.f32 %v9037_v5, %v3811_v61  ;;  %v3706_v23 = vpop.f32.mrb[77].mxu0  ;;  %v3400_v44 = vadd.f32 %v8997_v30, %v3368_v20  ;;  %v3287_v17 = vpop.f32.mrb[49].mxu1  ;;  %v11250_v39 = vld [vmem:[#allocation2 + $0xd0] sm:$0xf]  ;;  %v6777_v47 = vrot.slane %v6622_v24, 5  ;;  %v8468_v8 = vrot.slane %v6617_v28, 9 }
 0x287   : > { %v3841_v43 = vadd.f32 %v3809_v27, %v3706_v23  ;;  %v9038_v4 = vpop.f32.mrb[78].mxu0  ;;  %v3398_v37 = vadd.f32 %v3366_v54, %v3287_v17  ;;  %v8998_v34 = vpop.f32.mrb[50].mxu1  ;;  %v6769_v60 = vrot.slane %v6767_v58, 4  ;;  %v3815_v11 = vld [vmem:[#allocation3 + $0x70] sm:$0xff]  ;;  %v6781_v59 = vrot.slane %v11250_v39, 5  ;;  %v3370_v41 = vld [vmem:[#allocation3 + $0xa0] sm:$0xff] }
 0x288   : > { %3875 = vst.msk [vmem:[#allocation3 + $0x50] sm:$0xff] %vm1995_vm1, %v3843_v35  ;;  %v3844_v22 = vadd.f32 %v9038_v4, %v3812_v12  ;;  %v3709_v32 = vpop.f32.mrb[79].mxu0  ;;  %3432 = vst.msk [vmem:[#allocation3 + $0x90] sm:$0xff] %vm1995_vm1, %v3400_v44  ;;  %v3401_v7 = vadd.f32 %v8998_v34, %v3369_v46  ;;  %v3290_v1 = vpop.f32.mrb[51].mxu1  ;;  %v6623_v31 = vld [vmem:[#allocation2 + $0xcc] sm:$0xe]  ;;  %v6768_v33 = vsel %vm10284_vm0, %v8468_v8, %v6767_v58 }
 0x289   : > { %3873 = vst.msk [vmem:[#allocation3 + $0x40] sm:$0xff] %vm1995_vm1, %v3841_v43  ;;  %v3842_v57 = vadd.f32 %v3810_v16, %v3709_v32  ;;  %3430 = vst.msk [vmem:[#allocation3 + $0x80] sm:$0xff] %vm1995_vm1, %v3398_v37  ;;  %v3399_v42 = vadd.f32 %v3367_v52, %v3290_v1  ;;  %v3813_v49 = vld [vmem:[#allocation3 + $0x60] sm:$0xff]  ;;  %v6625_v15 = vld [vmem:[#allocation2 + $0xd4] sm:$0x1]  ;;  %v6771_v40 = vsel %vm10284_vm0, %v6769_v60, %v6770_v62  ;;  %v8470_v50 = vrot.slane %v6623_v31, 9 }
 0x28a   : > { %3876 = vst.msk [vmem:[#allocation3 + $0x58] sm:$0xff] %vm1995_vm1, %v3844_v22  ;;  %3433 = vst.msk [vmem:[#allocation3 + $0x98] sm:$0xff] %vm1995_vm1, %v3401_v7  ;;  %v6775_v25 = vsel %vm10284_vm0, %v8469_v9, %v6774_v21  ;;  %v3816_v63 = vld [vmem:[#allocation3 + $0x78] sm:$0xff]  ;;  %v3372_v48 = vld [vmem:[#allocation3 + $0xb0] sm:$0xff]  ;;  %v6778_v38 = vsel %vm10284_vm0, %v6776_v6, %v6777_v47  ;;  %v6783_v3 = vrot.slane %v6781_v59, 4  ;;  %v6784_v53 = vrot.slane %v6625_v15, 5 }
 0x28b   : > { %9288 = vmatmul.mubr.bf16.gmra.mrb[148].mxu1 %v8498_v19  ;;  %3874 = vst.msk [vmem:[#allocation3 + $0x48] sm:$0xff] %vm1995_vm1, %v3842_v57  ;;  %3431 = vst.msk [vmem:[#allocation3 + $0x88] sm:$0xff] %vm1995_vm1, %v3399_v42  ;;  %v3814_v45 = vld [vmem:[#allocation3 + $0x68] sm:$0xff]  ;;  %v3373_v5 = vld [vmem:[#allocation3 + $0xb8] sm:$0xff]  ;;  %v8500_v12 = vcombine.low %v6768_v33, %v6771_v40  ;;  %v8501_v23 = vcombine.low %v6775_v25, %v6778_v38  ;;  %v6782_v21 = vsel %vm10284_vm0, %v8470_v50, %v6781_v59 }
 0x28c   : > { %9291 = vmatprep.mubr.bf16.mxu1 %v8499_v56  ;;  %v3371_v35 = vld [vmem:[#allocation3 + $0xa8] sm:$0xff]  ;;  %v6785_v44 = vsel %vm10284_vm0, %v6783_v3, %v6784_v53  ;;  %v3376_v62 = vld [vmem:[#allocation3 + $0xd0] sm:$0xff]  ;;  %v3374_v32 = vld [vmem:[#allocation3 + $0xc0] sm:$0xff] }
 0x28d   : > { %v9041_v29 = vpop.f32.mrb[80].mxu0  ;;  %v9001_v0 = vpop.f32.mrb[52].mxu1  ;;  %v8502_v37 = vcombine.low %v6782_v21, %v6785_v44  ;;  %v3377_v39 = vld [vmem:[#allocation3 + $0xd8] sm:$0xff]  ;;  %v3375_v6 = vld [vmem:[#allocation3 + $0xc8] sm:$0xff]  ;;  %v3380_v15 = vld [vmem:[#allocation3 + $0xf0] sm:$0xff] }
 0x28e   : > { %v3847_v10 = vadd.f32 %v9041_v29, %v3815_v11  ;;  %v3722_v26 = vpop.f32.mrb[81].mxu0  ;;  %v3404_v61 = vadd.f32 %v9001_v0, %v3372_v48  ;;  %v3303_v36 = vpop.f32.mrb[53].mxu1  ;;  %v3378_v0 = vld [vmem:[#allocation3 + $0xe0] sm:$0xff] }
 0x28f   : > { %v3845_v27 = vadd.f32 %v3813_v49, %v3722_v26  ;;  %v9042_v51 = vpop.f32.mrb[82].mxu0  ;;  %v3402_v18 = vadd.f32 %v3370_v41, %v3303_v36  ;;  %v9002_v14 = vpop.f32.mrb[54].mxu1  ;;  %v3819_v17 = vld [vmem:[#allocation3 + $0x90] sm:$0xff] }
 0x290   : > { %3879 = vst.msk [vmem:[#allocation3 + $0x70] sm:$0xff] %vm1995_vm1, %v3847_v10  ;;  %v3848_v24 = vadd.f32 %v9042_v51, %v3816_v63  ;;  %v3725_v30 = vpop.f32.mrb[83].mxu0  ;;  %3436 = vst.msk [vmem:[#allocation3 + $0xb0] sm:$0xff] %vm1995_vm1, %v3404_v61  ;;  %v3405_v20 = vadd.f32 %v9002_v14, %v3373_v5  ;;  %v3306_v13 = vpop.f32.mrb[55].mxu1  ;;  %v3817_v54 = vld [vmem:[#allocation3 + $0x80] sm:$0xff] }
 0x291   : > { %3877 = vst.msk [vmem:[#allocation3 + $0x60] sm:$0xff] %vm1995_vm1, %v3845_v27  ;;  %v3846_v16 = vadd.f32 %v3814_v45, %v3725_v30  ;;  %3434 = vst.msk [vmem:[#allocation3 + $0xa0] sm:$0xff] %vm1995_vm1, %v3402_v18  ;;  %v3403_v28 = vadd.f32 %v3371_v35, %v3306_v13  ;;  %v3820_v4 = vld [vmem:[#allocation3 + $0x98] sm:$0xff]  ;;  %v3379_v27 = vld [vmem:[#allocation3 + $0xe8] sm:$0xff] }
 0x292   : > { %3880 = vst.msk [vmem:[#allocation3 + $0x78] sm:$0xff] %vm1995_vm1, %v3848_v24  ;;  %3437 = vst.msk [vmem:[#allocation3 + $0xb8] sm:$0xff] %vm1995_vm1, %v3405_v20  ;;  %v3818_v19 = vld [vmem:[#allocation3 + $0x88] sm:$0xff]  ;;  %v3381_v45 = vld [vmem:[#allocation3 + $0xf8] sm:$0xff] }
 0x293   : > { %9292 = vmatmul.mubr.bf16.gmra.mrb[152].mxu1 %v8500_v12  ;;  %3878 = vst.msk [vmem:[#allocation3 + $0x68] sm:$0xff] %vm1995_vm1, %v3846_v16  ;;  %3435 = vst.msk [vmem:[#allocation3 + $0xa8] sm:$0xff] %vm1995_vm1, %v3403_v28  ;;  %v4621_v24 = vld [vmem:[#allocation3 + $0x10] sm:$0xff]  ;;  %v4619_v16 = vld [vmem:[#allocation3] sm:$0xff] }
 0x294   : > { %9295 = vmatprep.mubr.bf16.mxu1 %v8501_v23 }
 0x295   : > { %v9045_v43 = vpop.f32.mrb[84].mxu0  ;;  %v9005_v58 = vpop.f32.mrb[56].mxu1 }
 0x296   : > { %v3851_v34 = vadd.f32 %v9045_v43, %v3819_v17  ;;  %v3738_v46 = vpop.f32.mrb[85].mxu0  ;;  %v3408_v55 = vadd.f32 %v9005_v58, %v3376_v62  ;;  %v3319_v22 = vpop.f32.mrb[57].mxu1 }
 0x297   : > { %v3849_v7 = vadd.f32 %v3817_v54, %v3738_v46  ;;  %v9046_v1 = vpop.f32.mrb[86].mxu0  ;;  %v3406_v52 = vadd.f32 %v3374_v32, %v3319_v22  ;;  %v9006_v2 = vpop.f32.mrb[58].mxu1  ;;  %v3823_v60 = vld [vmem:[#allocation3 + $0xb0] sm:$0xff]  ;;  %v4622_v54 = vld [vmem:[#allocation3 + $0x18] sm:$0xff] }
 0x298   : > { %3883 = vst.msk [vmem:[#allocation3 + $0x90] sm:$0xff] %vm1995_vm1, %v3851_v34  ;;  %v3852_v56 = vadd.f32 %v9046_v1, %v3820_v4  ;;  %v3741_v57 = vpop.f32.mrb[87].mxu0  ;;  %3440 = vst.msk [vmem:[#allocation3 + $0xd0] sm:$0xff] %vm1995_vm1, %v3408_v55  ;;  %v3409_v9 = vadd.f32 %v9006_v2, %v3377_v39  ;;  %v3322_v42 = vpop.f32.mrb[59].mxu1  ;;  %v3821_v11 = vld [vmem:[#allocation3 + $0xa0] sm:$0xff]  ;;  %v4625_v1 = vld [vmem:[#allocation3 + $0x30] sm:$0xff] }
 0x299   : > { %3881 = vst.msk [vmem:[#allocation3 + $0x80] sm:$0xff] %vm1995_vm1, %v3849_v7  ;;  %v3850_v47 = vadd.f32 %v3818_v19, %v3741_v57  ;;  %3438 = vst.msk [vmem:[#allocation3 + $0xc0] sm:$0xff] %vm1995_vm1, %v3406_v52  ;;  %v3407_v8 = vadd.f32 %v3375_v6, %v3322_v42  ;;  %v3824_v59 = vld [vmem:[#allocation3 + $0xb8] sm:$0xff] }
 0x29a   : > { %3884 = vst.msk [vmem:[#allocation3 + $0x98] sm:$0xff] %vm1995_vm1, %v3852_v56  ;;  %3441 = vst.msk [vmem:[#allocation3 + $0xd8] sm:$0xff] %vm1995_vm1, %v3409_v9  ;;  %v3822_v25 = vld [vmem:[#allocation3 + $0xa8] sm:$0xff]  ;;  %v4623_v9 = vld [vmem:[#allocation3 + $0x20] sm:$0xff] }
 0x29b   : > { %9296 = vmatmul.mubr.bf16.gmra.mrb[156].mxu1 %v8502_v37  ;;  %3882 = vst.msk [vmem:[#allocation3 + $0x88] sm:$0xff] %vm1995_vm1, %v3850_v47  ;;  %3439 = vst.msk [vmem:[#allocation3 + $0xc8] sm:$0xff] %vm1995_vm1, %v3407_v8  ;;  %v4620_v37 = vld [vmem:[#allocation3 + $0x8] sm:$0xff] }
 0x29d   : > { %v9049_v31 = vpop.f32.mrb[88].mxu0  ;;  %v9009_v49 = vpop.f32.mrb[60].mxu1 }
 0x29e   : > { %v3855_v33 = vadd.f32 %v9049_v31, %v3823_v60  ;;  %v3754_v40 = vpop.f32.mrb[89].mxu0  ;;  %v3412_v29 = vadd.f32 %v9009_v49, %v3380_v15  ;;  %v3335_v63 = vpop.f32.mrb[61].mxu1  ;;  %v4626_v60 = vld [vmem:[#allocation3 + $0x38] sm:$0xff]  ;;  %v4624_v15 = vld [vmem:[#allocation3 + $0x28] sm:$0xff] }
 0x29f   : > { %v3853_v48 = vadd.f32 %v3821_v11, %v3754_v40  ;;  %v9050_v38 = vpop.f32.mrb[90].mxu0  ;;  %v3410_v10 = vadd.f32 %v3378_v0, %v3335_v63  ;;  %v9010_v26 = vpop.f32.mrb[62].mxu1  ;;  %v3827_v53 = vld [vmem:[#allocation3 + $0xd0] sm:$0xff] }
 0x2a0   : > { %3887 = vst.msk [vmem:[#allocation3 + $0xb0] sm:$0xff] %vm1995_vm1, %v3855_v33  ;;  %v3856_v50 = vadd.f32 %v9050_v38, %v3824_v59  ;;  %v3757_v61 = vpop.f32.mrb[91].mxu0  ;;  %3444 = vst.msk [vmem:[#allocation3 + $0xf0] sm:$0xff] %vm1995_vm1, %v3412_v29  ;;  %v3413_v36 = vadd.f32 %v9010_v26, %v3381_v45  ;;  %v3338_v41 = vpop.f32.mrb[63].mxu1  ;;  %v3825_v18 = vld [vmem:[#allocation3 + $0xc0] sm:$0xff]  ;;  %v4629_v38 = vld [vmem:[#allocation3 + $0x50] sm:$0xff] }
 0x2a1   : > { %3885 = vst.msk [vmem:[#allocation3 + $0xa0] sm:$0xff] %vm1995_vm1, %v3853_v48  ;;  %v3854_v51 = vadd.f32 %v3822_v25, %v3757_v61  ;;  %3442 = vst.msk [vmem:[#allocation3 + $0xe0] sm:$0xff] %vm1995_vm1, %v3410_v10  ;;  %v3411_v3 = vadd.f32 %v3379_v27, %v3338_v41  ;;  %v3828_v5 = vld [vmem:[#allocation3 + $0xd8] sm:$0xff] }
 0x2a2   : > { %3888 = vst.msk [vmem:[#allocation3 + $0xb8] sm:$0xff] %vm1995_vm1, %v3856_v50  ;;  %3445 = vst.msk [vmem:[#allocation3 + $0xf8] sm:$0xff] %vm1995_vm1, %v3413_v36  ;;  %v3826_v13 = vld [vmem:[#allocation3 + $0xc8] sm:$0xff]  ;;  %v4627_v36 = vld [vmem:[#allocation3 + $0x40] sm:$0xff] }
 0x2a3   : > { %3886 = vst.msk [vmem:[#allocation3 + $0xa8] sm:$0xff] %vm1995_vm1, %v3854_v51  ;;  %3443 = vst.msk [vmem:[#allocation3 + $0xe8] sm:$0xff] %vm1995_vm1, %v3411_v3 }
 0x2a5   : > { %v9053_v14 = vpop.f32.mrb[92].mxu0  ;;  %v9077_v12 = vpop.f32.mrb[64].mxu1 }
 0x2a6   : > { %v3859_v30 = vadd.f32 %v9053_v14, %v3827_v53  ;;  %v3770_v20 = vpop.f32.mrb[93].mxu0  ;;  %v4653_v35 = vadd.f32 %v9077_v12, %v4621_v24  ;;  %v4492_v23 = vpop.f32.mrb[65].mxu1  ;;  %v4630_v53 = vld [vmem:[#allocation3 + $0x58] sm:$0xff]  ;;  %v4628_v24 = vld [vmem:[#allocation3 + $0x48] sm:$0xff] }
 0x2a7   : > { %v3857_v28 = vadd.f32 %v3825_v18, %v3770_v20  ;;  %v9054_v21 = vpop.f32.mrb[94].mxu0  ;;  %v4651_v44 = vadd.f32 %v4619_v16, %v4492_v23  ;;  %v9078_v17 = vpop.f32.mrb[66].mxu1  ;;  %v3831_v19 = vld [vmem:[#allocation3 + $0xf0] sm:$0xff] }
 0x2a8   : > { %3891 = vst.msk [vmem:[#allocation3 + $0xd0] sm:$0xff] %vm1995_vm1, %v3859_v30  ;;  %v3860_v43 = vadd.f32 %v9054_v21, %v3828_v5  ;;  %v3773_v4 = vpop.f32.mrb[95].mxu0  ;;  %4685 = vst.msk [vmem:[#allocation3 + $0x10] sm:$0xff] %vm1995_vm1, %v4653_v35  ;;  %v4654_v58 = vadd.f32 %v9078_v17, %v4622_v54  ;;  %v4495_v62 = vpop.f32.mrb[67].mxu1  ;;  %v3829_v55 = vld [vmem:[#allocation3 + $0xe0] sm:$0xff]  ;;  %v4633_v21 = vld [vmem:[#allocation3 + $0x70] sm:$0xff] }
 0x2a9   : > { %3889 = vst.msk [vmem:[#allocation3 + $0xc0] sm:$0xff] %vm1995_vm1, %v3857_v28  ;;  %v3858_v34 = vadd.f32 %v3826_v13, %v3773_v4  ;;  %4683 = vst.msk [vmem:[#allocation3] sm:$0xff] %vm1995_vm1, %v4651_v44  ;;  %v4652_v46 = vadd.f32 %v4620_v37, %v4495_v62  ;;  %v3832_v32 = vld [vmem:[#allocation3 + $0xf8] sm:$0xff] }
 0x2aa   : > { %3892 = vst.msk [vmem:[#allocation3 + $0xd8] sm:$0xff] %vm1995_vm1, %v3860_v43  ;;  %4686 = vst.msk [vmem:[#allocation3 + $0x18] sm:$0xff] %vm1995_vm1, %v4654_v58  ;;  %v3830_v39 = vld [vmem:[#allocation3 + $0xe8] sm:$0xff]  ;;  %v4631_v58 = vld [vmem:[#allocation3 + $0x60] sm:$0xff] }
 0x2ab   : > { %3890 = vst.msk [vmem:[#allocation3 + $0xc8] sm:$0xff] %vm1995_vm1, %v3858_v34  ;;  %4684 = vst.msk [vmem:[#allocation3 + $0x8] sm:$0xff] %vm1995_vm1, %v4652_v46 }
 0x2ad   : > { %v9057_v22 = vpop.f32.mrb[96].mxu0  ;;  %v9081_v7 = vpop.f32.mrb[68].mxu1 }
 0x2ae   : > { %v3863_v52 = vadd.f32 %v9057_v22, %v3831_v19  ;;  %v3786_v2 = vpop.f32.mrb[97].mxu0  ;;  %v4657_v56 = vadd.f32 %v9081_v7, %v4625_v1  ;;  %v4508_v57 = vpop.f32.mrb[69].mxu1  ;;  %v4634_v19 = vld [vmem:[#allocation3 + $0x78] sm:$0xff]  ;;  %v4632_v1 = vld [vmem:[#allocation3 + $0x68] sm:$0xff] }
 0x2af   : > { %v3861_v42 = vadd.f32 %v3829_v55, %v3786_v2  ;;  %v9058_v6 = vpop.f32.mrb[98].mxu0  ;;  %v4655_v47 = vadd.f32 %v4623_v9, %v4508_v57  ;;  %v9082_v8 = vpop.f32.mrb[70].mxu1  ;;  %v5215_v25 = vld [vmem:[#allocation3 + $0x10] sm:$0xff] }
 0x2b0   : > { %3895 = vst.msk [vmem:[#allocation3 + $0xf0] sm:$0xff] %vm1995_vm1, %v3863_v52  ;;  %v3864_v11 = vadd.f32 %v9058_v6, %v3832_v32  ;;  %v3789_v31 = vpop.f32.mrb[99].mxu0  ;;  %4689 = vst.msk [vmem:[#allocation3 + $0x30] sm:$0xff] %vm1995_vm1, %v4657_v56  ;;  %v4658_v59 = vadd.f32 %v9082_v8, %v4626_v60  ;;  %v4511_v49 = vpop.f32.mrb[71].mxu1  ;;  %v5213_v29 = vld [vmem:[#allocation3] sm:$0xff]  ;;  %v4637_v60 = vld [vmem:[#allocation3 + $0x90] sm:$0xff] }
 0x2b1   : > { %3893 = vst.msk [vmem:[#allocation3 + $0xe0] sm:$0xff] %vm1995_vm1, %v3861_v42  ;;  %v3862_v33 = vadd.f32 %v3830_v39, %v3789_v31  ;;  %4687 = vst.msk [vmem:[#allocation3 + $0x20] sm:$0xff] %vm1995_vm1, %v4655_v47  ;;  %v4656_v40 = vadd.f32 %v4624_v15, %v4511_v49  ;;  %v5216_v0 = vld [vmem:[#allocation3 + $0x18] sm:$0xff]  ;;  %v4635_v15 = vld [vmem:[#allocation3 + $0x80] sm:$0xff] }
 0x2b2   : > { %3896 = vst.msk [vmem:[#allocation3 + $0xf8] sm:$0xff] %vm1995_vm1, %v3864_v11  ;;  %4690 = vst.msk [vmem:[#allocation3 + $0x38] sm:$0xff] %vm1995_vm1, %v4658_v59  ;;  %v5214_v45 = vld [vmem:[#allocation3 + $0x8] sm:$0xff] }
 0x2b3   : > { %3894 = vst.msk [vmem:[#allocation3 + $0xe8] sm:$0xff] %vm1995_vm1, %v3862_v33  ;;  %4688 = vst.msk [vmem:[#allocation3 + $0x28] sm:$0xff] %vm1995_vm1, %v4656_v40 }
 0x2b5   : > { %v9125_v63 = vpop.f32.mrb[100].mxu0  ;;  %v9085_v48 = vpop.f32.mrb[72].mxu1 }
 0x2b6   : > { %v5247_v10 = vadd.f32 %v9125_v63, %v5215_v25  ;;  %v5086_v26 = vpop.f32.mrb[101].mxu0  ;;  %v4661_v50 = vadd.f32 %v9085_v48, %v4629_v38  ;;  %v4524_v61 = vpop.f32.mrb[73].mxu1  ;;  %v4638_v63 = vld [vmem:[#allocation3 + $0x98] sm:$0xff] }
 0x2b7   : > { %v5245_v41 = vadd.f32 %v5213_v29, %v5086_v26  ;;  %v9126_v27 = vpop.f32.mrb[102].mxu0  ;;  %v4659_v51 = vadd.f32 %v4627_v36, %v4524_v61  ;;  %v9086_v3 = vpop.f32.mrb[74].mxu1  ;;  %v5219_v13 = vld [vmem:[#allocation3 + $0x30] sm:$0xff] }
 0x2b8   : > { %5279 = vst.msk [vmem:[#allocation3 + $0x10] sm:$0xff] %vm1995_vm1, %v5247_v10  ;;  %v5248_v18 = vadd.f32 %v9126_v27, %v5216_v0  ;;  %v5089_v14 = vpop.f32.mrb[103].mxu0  ;;  %4693 = vst.msk [vmem:[#allocation3 + $0x50] sm:$0xff] %vm1995_vm1, %v4661_v50  ;;  %v4662_v5 = vadd.f32 %v9086_v3, %v4630_v53  ;;  %v4527_v12 = vpop.f32.mrb[75].mxu1  ;;  %v5217_v35 = vld [vmem:[#allocation3 + $0x20] sm:$0xff]  ;;  %v4636_v10 = vld [vmem:[#allocation3 + $0x88] sm:$0xff] }
 0x2b9   : > { %5277 = vst.msk [vmem:[#allocation3] sm:$0xff] %vm1995_vm1, %v5245_v41  ;;  %v5246_v30 = vadd.f32 %v5214_v45, %v5089_v14  ;;  %4691 = vst.msk [vmem:[#allocation3 + $0x40] sm:$0xff] %vm1995_vm1, %v4659_v51  ;;  %v4660_v20 = vadd.f32 %v4628_v24, %v4527_v12  ;;  %v5220_v16 = vld [vmem:[#allocation3 + $0x38] sm:$0xff]  ;;  %v4641_v24 = vld [vmem:[#allocation3 + $0xb0] sm:$0xff] }
 0x2ba   : > { %5280 = vst.msk [vmem:[#allocation3 + $0x18] sm:$0xff] %vm1995_vm1, %v5248_v18  ;;  %4694 = vst.msk [vmem:[#allocation3 + $0x58] sm:$0xff] %vm1995_vm1, %v4662_v5  ;;  %v5218_v54 = vld [vmem:[#allocation3 + $0x28] sm:$0xff] }
 0x2bb   : > { %5278 = vst.msk [vmem:[#allocation3 + $0x8] sm:$0xff] %vm1995_vm1, %v5246_v30  ;;  %4692 = vst.msk [vmem:[#allocation3 + $0x48] sm:$0xff] %vm1995_vm1, %v4660_v20 }
 0x2bd   : > { %v9129_v23 = vpop.f32.mrb[104].mxu0  ;;  %v9089_v28 = vpop.f32.mrb[76].mxu1 }
 0x2be   : > { %v5251_v44 = vadd.f32 %v9129_v23, %v5219_v13  ;;  %v5102_v17 = vpop.f32.mrb[105].mxu0  ;;  %v4665_v43 = vadd.f32 %v9089_v28, %v4633_v21  ;;  %v4540_v4 = vpop.f32.mrb[77].mxu1  ;;  %v4639_v13 = vld [vmem:[#allocation3 + $0xa0] sm:$0xff]  ;;  %v4642_v28 = vld [vmem:[#allocation3 + $0xb8] sm:$0xff] }
 0x2bf   : > { %v5249_v62 = vadd.f32 %v5217_v35, %v5102_v17  ;;  %v9130_v37 = vpop.f32.mrb[106].mxu0  ;;  %v4663_v34 = vadd.f32 %v4631_v58, %v4540_v4  ;;  %v9090_v46 = vpop.f32.mrb[78].mxu1  ;;  %v5223_v39 = vld [vmem:[#allocation3 + $0x50] sm:$0xff] }
 0x2c0   : > { %5283 = vst.msk [vmem:[#allocation3 + $0x30] sm:$0xff] %vm1995_vm1, %v5251_v44  ;;  %v5252_v55 = vadd.f32 %v9130_v37, %v5220_v16  ;;  %v5105_v22 = vpop.f32.mrb[107].mxu0  ;;  %4697 = vst.msk [vmem:[#allocation3 + $0x70] sm:$0xff] %vm1995_vm1, %v4665_v43  ;;  %v4666_v32 = vadd.f32 %v9090_v46, %v4634_v19  ;;  %v4543_v7 = vpop.f32.mrb[79].mxu1  ;;  %v5221_v56 = vld [vmem:[#allocation3 + $0x40] sm:$0xff]  ;;  %v4640_v43 = vld [vmem:[#allocation3 + $0xa8] sm:$0xff] }
 0x2c1   : > { %5281 = vst.msk [vmem:[#allocation3 + $0x20] sm:$0xff] %vm1995_vm1, %v5249_v62  ;;  %v5250_v52 = vadd.f32 %v5218_v54, %v5105_v22  ;;  %4695 = vst.msk [vmem:[#allocation3 + $0x60] sm:$0xff] %vm1995_vm1, %v4663_v34  ;;  %v4664_v2 = vadd.f32 %v4632_v1, %v4543_v7  ;;  %v5224_v9 = vld [vmem:[#allocation3 + $0x58] sm:$0xff]  ;;  %v4645_v1 = vld [vmem:[#allocation3 + $0xd0] sm:$0xff] }
 0x2c2   : > { %5284 = vst.msk [vmem:[#allocation3 + $0x38] sm:$0xff] %vm1995_vm1, %v5252_v55  ;;  %4698 = vst.msk [vmem:[#allocation3 + $0x78] sm:$0xff] %vm1995_vm1, %v4666_v32  ;;  %v5222_v47 = vld [vmem:[#allocation3 + $0x48] sm:$0xff] }
 0x2c3   : > { %5282 = vst.msk [vmem:[#allocation3 + $0x28] sm:$0xff] %vm1995_vm1, %v5250_v52  ;;  %4696 = vst.msk [vmem:[#allocation3 + $0x68] sm:$0xff] %vm1995_vm1, %v4664_v2 }
 0x2c5   : > { %v9133_v57 = vpop.f32.mrb[108].mxu0 }
 0x2c6   : > { %v5255_v42 = vadd.f32 %v9133_v57, %v5223_v39  ;;  %v5118_v6 = vpop.f32.mrb[109].mxu0 }
 0x2c7   : > { %v9093_v8 = vpop.f32.mrb[80].mxu1  ;;  %v5253_v11 = vadd.f32 %v5221_v56, %v5118_v6  ;;  %v9134_v31 = vpop.f32.mrb[110].mxu0  ;;  %v5227_v45 = vld [vmem:[#allocation3 + $0x70] sm:$0xff]  ;;  %v4643_v56 = vld [vmem:[#allocation3 + $0xc0] sm:$0xff] }
 0x2c8   : > { %v4669_v59 = vadd.f32 %v9093_v8, %v4637_v60  ;;  %v4556_v49 = vpop.f32.mrb[81].mxu1  ;;  %5287 = vst.msk [vmem:[#allocation3 + $0x50] sm:$0xff] %vm1995_vm1, %v5255_v42  ;;  %v5256_v33 = vadd.f32 %v9134_v31, %v5224_v9  ;;  %v5121_v40 = vpop.f32.mrb[111].mxu0  ;;  %v5225_v50 = vld [vmem:[#allocation3 + $0x60] sm:$0xff] }
 0x2c9   : > { %v4667_v25 = vadd.f32 %v4635_v15, %v4556_v49  ;;  %v9094_v29 = vpop.f32.mrb[82].mxu1  ;;  %5285 = vst.msk [vmem:[#allocation3 + $0x40] sm:$0xff] %vm1995_vm1, %v5253_v11  ;;  %v5254_v0 = vadd.f32 %v5222_v47, %v5121_v40  ;;  %v5228_v36 = vld [vmem:[#allocation3 + $0x78] sm:$0xff]  ;;  %v4644_v49 = vld [vmem:[#allocation3 + $0xc8] sm:$0xff] }
 0x2ca   : > { %4701 = vst.msk [vmem:[#allocation3 + $0x90] sm:$0xff] %vm1995_vm1, %v4669_v59  ;;  %v4670_v48 = vadd.f32 %v9094_v29, %v4638_v63  ;;  %v4559_v38 = vpop.f32.mrb[83].mxu1  ;;  %5288 = vst.msk [vmem:[#allocation3 + $0x58] sm:$0xff] %vm1995_vm1, %v5256_v33  ;;  %v5226_v51 = vld [vmem:[#allocation3 + $0x68] sm:$0xff]  ;;  %v4646_v47 = vld [vmem:[#allocation3 + $0xd8] sm:$0xff] }
 0x2cb   : > { %4699 = vst.msk [vmem:[#allocation3 + $0x80] sm:$0xff] %vm1995_vm1, %v4667_v25  ;;  %v4668_v26 = vadd.f32 %v4636_v10, %v4559_v38  ;;  %5286 = vst.msk [vmem:[#allocation3 + $0x48] sm:$0xff] %vm1995_vm1, %v5254_v0 }
 0x2cc   : > { %4702 = vst.msk [vmem:[#allocation3 + $0x98] sm:$0xff] %vm1995_vm1, %v4670_v48 }
 0x2cd   : > { %4700 = vst.msk [vmem:[#allocation3 + $0x88] sm:$0xff] %vm1995_vm1, %v4668_v26  ;;  %v9137_v61 = vpop.f32.mrb[112].mxu0 }
 0x2ce   : > { %v5259_v41 = vadd.f32 %v9137_v61, %v5227_v45  ;;  %v5134_v27 = vpop.f32.mrb[113].mxu0  ;;  %v4649_v61 = vld [vmem:[#allocation3 + $0xf0] sm:$0xff] }
 0x2cf   : > { %v5257_v3 = vadd.f32 %v5225_v50, %v5134_v27  ;;  %v9138_v53 = vpop.f32.mrb[114].mxu0 }
 0x2d0   : > { %5291 = vst.msk [vmem:[#allocation3 + $0x70] sm:$0xff] %vm1995_vm1, %v5259_v41  ;;  %v5260_v18 = vadd.f32 %v9138_v53, %v5228_v36  ;;  %v5137_v14 = vpop.f32.mrb[115].mxu0  ;;  %v4647_v53 = vld [vmem:[#allocation3 + $0xe0] sm:$0xff] }
 0x2d1   : > { %5289 = vst.msk [vmem:[#allocation3 + $0x60] sm:$0xff] %vm1995_vm1, %v5257_v3  ;;  %v5258_v5 = vadd.f32 %v5226_v51, %v5137_v14  ;;  %v5231_v35 = vld [vmem:[#allocation3 + $0x90] sm:$0xff] }
 0x2d2   : > { %5292 = vst.msk [vmem:[#allocation3 + $0x78] sm:$0xff] %vm1995_vm1, %v5260_v18  ;;  %v5229_v21 = vld [vmem:[#allocation3 + $0x80] sm:$0xff] }
 0x2d3   : > { %v9097_v12 = vpop.f32.mrb[84].mxu1  ;;  %5290 = vst.msk [vmem:[#allocation3 + $0x68] sm:$0xff] %vm1995_vm1, %v5258_v5  ;;  %v5232_v4 = vld [vmem:[#allocation3 + $0x98] sm:$0xff] }
 0x2d4   : > { %v4673_v30 = vadd.f32 %v9097_v12, %v4641_v24  ;;  %v4572_v20 = vpop.f32.mrb[85].mxu1  ;;  %v5230_v34 = vld [vmem:[#allocation3 + $0x88] sm:$0xff] }
 0x2d5   : > { %v4671_v23 = vadd.f32 %v4639_v13, %v4572_v20  ;;  %v9098_v16 = vpop.f32.mrb[86].mxu1  ;;  %v9141_v44 = vpop.f32.mrb[116].mxu0 }
 0x2d6   : > { %4705 = vst.msk [vmem:[#allocation3 + $0xb0] sm:$0xff] %vm1995_vm1, %v4673_v30  ;;  %v4674_v17 = vadd.f32 %v9098_v16, %v4642_v28  ;;  %v4575_v54 = vpop.f32.mrb[87].mxu1  ;;  %v5263_v58 = vadd.f32 %v9141_v44, %v5231_v35  ;;  %v5150_v62 = vpop.f32.mrb[117].mxu0  ;;  %v4650_v30 = vld [vmem:[#allocation3 + $0xf8] sm:$0xff] }
 0x2d7   : > { %4703 = vst.msk [vmem:[#allocation3 + $0xa0] sm:$0xff] %vm1995_vm1, %v4671_v23  ;;  %v4672_v37 = vadd.f32 %v4640_v43, %v4575_v54  ;;  %v5261_v46 = vadd.f32 %v5229_v21, %v5150_v62  ;;  %v9142_v19 = vpop.f32.mrb[118].mxu0  ;;  %v4648_v23 = vld [vmem:[#allocation3 + $0xe8] sm:$0xff] }
 0x2d8   : > { %4706 = vst.msk [vmem:[#allocation3 + $0xb8] sm:$0xff] %vm1995_vm1, %v4674_v17  ;;  %5295 = vst.msk [vmem:[#allocation3 + $0x90] sm:$0xff] %vm1995_vm1, %v5263_v58  ;;  %v5264_v55 = vadd.f32 %v9142_v19, %v5232_v4  ;;  %v5153_v22 = vpop.f32.mrb[119].mxu0  ;;  %v5666_v17 = vld [vmem:[#allocation3 + $0x10] sm:$0xff]  ;;  %v5664_v58 = vld [vmem:[#allocation3] sm:$0xff] }
 0x2d9   : > { %4704 = vst.msk [vmem:[#allocation3 + $0xa8] sm:$0xff] %vm1995_vm1, %v4672_v37  ;;  %5293 = vst.msk [vmem:[#allocation3 + $0x80] sm:$0xff] %vm1995_vm1, %v5261_v46  ;;  %v5262_v32 = vadd.f32 %v5230_v34, %v5153_v22  ;;  %v5667_v19 = vld [vmem:[#allocation3 + $0x18] sm:$0xff] }
 0x2da   : > { %5296 = vst.msk [vmem:[#allocation3 + $0x98] sm:$0xff] %vm1995_vm1, %v5264_v55 }
 0x2db   : > { %5294 = vst.msk [vmem:[#allocation3 + $0x88] sm:$0xff] %vm1995_vm1, %v5262_v32 }
 0x2dd   : > { %v5235_v52 = vld [vmem:[#allocation3 + $0xb0] sm:$0xff] }
 0x2de   : > { %v5233_v57 = vld [vmem:[#allocation3 + $0xa0] sm:$0xff] }
 0x2df   : > { %v9101_v7 = vpop.f32.mrb[88].mxu1  ;;  %v5236_v8 = vld [vmem:[#allocation3 + $0xb8] sm:$0xff] }
 0x2e0   : > { %v4677_v2 = vadd.f32 %v9101_v7, %v4645_v1  ;;  %v4588_v39 = vpop.f32.mrb[89].mxu1  ;;  %v5234_v15 = vld [vmem:[#allocation3 + $0xa8] sm:$0xff] }
 0x2e1   : > { %v4675_v9 = vadd.f32 %v4643_v56, %v4588_v39  ;;  %v9145_v42 = vpop.f32.mrb[120].mxu0  ;;  %v9102_v6 = vpop.f32.mrb[90].mxu1  ;;  %v5665_v1 = vld [vmem:[#allocation3 + $0x8] sm:$0xff] }
 0x2e2   : > { %4709 = vst.msk [vmem:[#allocation3 + $0xd0] sm:$0xff] %vm1995_vm1, %v4677_v2  ;;  %v5267_v60 = vadd.f32 %v9145_v42, %v5235_v52  ;;  %v4678_v11 = vadd.f32 %v9102_v6, %v4646_v47  ;;  %v5166_v31 = vpop.f32.mrb[121].mxu0  ;;  %v4591_v59 = vpop.f32.mrb[91].mxu1 }
 0x2e3   : > { %4707 = vst.msk [vmem:[#allocation3 + $0xc0] sm:$0xff] %vm1995_vm1, %v4675_v9  ;;  %v5265_v33 = vadd.f32 %v5233_v57, %v5166_v31  ;;  %v4676_v40 = vadd.f32 %v4644_v49, %v4591_v59  ;;  %v9146_v25 = vpop.f32.mrb[122].mxu0  ;;  %v5668_v59 = vld [vmem:[#allocation3 + $0x20] sm:$0xff] }
 0x2e4   : > { %5299 = vst.msk [vmem:[#allocation3 + $0xb0] sm:$0xff] %vm1995_vm1, %v5267_v60  ;;  %4710 = vst.msk [vmem:[#allocation3 + $0xd8] sm:$0xff] %vm1995_vm1, %v4678_v11  ;;  %v5268_v29 = vadd.f32 %v9146_v25, %v5236_v8  ;;  %v5169_v63 = vpop.f32.mrb[123].mxu0  ;;  %v5670_v8 = vld [vmem:[#allocation3 + $0x30] sm:$0xff]  ;;  %v5671_v25 = vld [vmem:[#allocation3 + $0x38] sm:$0xff] }
 0x2e5   : > { %5297 = vst.msk [vmem:[#allocation3 + $0xa0] sm:$0xff] %vm1995_vm1, %v5265_v33  ;;  %4708 = vst.msk [vmem:[#allocation3 + $0xc8] sm:$0xff] %vm1995_vm1, %v4676_v40  ;;  %v5266_v0 = vadd.f32 %v5234_v15, %v5169_v63 }
 0x2e6   : > { %5300 = vst.msk [vmem:[#allocation3 + $0xb8] sm:$0xff] %vm1995_vm1, %v5268_v29 }
 0x2e7   : > { %5298 = vst.msk [vmem:[#allocation3 + $0xa8] sm:$0xff] %vm1995_vm1, %v5266_v0 }
 0x2e9   : > { %v9149_v48 = vpop.f32.mrb[124].mxu0  ;;  %v5239_v38 = vld [vmem:[#allocation3 + $0xd0] sm:$0xff] }
 0x2ea   : > { %v5271_v10 = vadd.f32 %v9149_v48, %v5239_v38  ;;  %v5182_v26 = vpop.f32.mrb[125].mxu0  ;;  %v5237_v45 = vld [vmem:[#allocation3 + $0xc0] sm:$0xff]  ;;  %v5669_v38 = vld [vmem:[#allocation3 + $0x28] sm:$0xff] }
 0x2eb   : > { %v9105_v50 = vpop.f32.mrb[92].mxu1  ;;  %v5269_v36 = vadd.f32 %v5237_v45, %v5182_v26  ;;  %v9150_v41 = vpop.f32.mrb[126].mxu0  ;;  %v5240_v27 = vld [vmem:[#allocation3 + $0xd8] sm:$0xff] }
 0x2ec   : > { %v4681_v51 = vadd.f32 %v9105_v50, %v4649_v61  ;;  %v4604_v3 = vpop.f32.mrb[93].mxu1  ;;  %5303 = vst.msk [vmem:[#allocation3 + $0xd0] sm:$0xff] %vm1995_vm1, %v5271_v10  ;;  %v5272_v18 = vadd.f32 %v9150_v41, %v5240_v27  ;;  %v5185_v14 = vpop.f32.mrb[127].mxu0  ;;  %v5238_v5 = vld [vmem:[#allocation3 + $0xc8] sm:$0xff] }
 0x2ed   : > { %v4679_v12 = vadd.f32 %v4647_v53, %v4604_v3  ;;  %v9106_v24 = vpop.f32.mrb[94].mxu1  ;;  %5301 = vst.msk [vmem:[#allocation3 + $0xc0] sm:$0xff] %vm1995_vm1, %v5269_v36  ;;  %v5270_v20 = vadd.f32 %v5238_v5, %v5185_v14  ;;  %v5674_v3 = vld [vmem:[#allocation3 + $0x50] sm:$0xff]  ;;  %v5672_v5 = vld [vmem:[#allocation3 + $0x40] sm:$0xff] }
 0x2ee   : > { %4713 = vst.msk [vmem:[#allocation3 + $0xf0] sm:$0xff] %vm1995_vm1, %v4681_v51  ;;  %v4682_v13 = vadd.f32 %v9106_v24, %v4650_v30  ;;  %v4607_v35 = vpop.f32.mrb[95].mxu1  ;;  %5304 = vst.msk [vmem:[#allocation3 + $0xd8] sm:$0xff] %vm1995_vm1, %v5272_v18 }
 0x2ef   : > { %4711 = vst.msk [vmem:[#allocation3 + $0xe0] sm:$0xff] %vm1995_vm1, %v4679_v12  ;;  %v4680_v16 = vadd.f32 %v4648_v23, %v4607_v35  ;;  %5302 = vst.msk [vmem:[#allocation3 + $0xc8] sm:$0xff] %vm1995_vm1, %v5270_v20 }
 0x2f0   : > { %4714 = vst.msk [vmem:[#allocation3 + $0xf8] sm:$0xff] %vm1995_vm1, %v4682_v13  ;;  %v5675_v13 = vld [vmem:[#allocation3 + $0x58] sm:$0xff] }
 0x2f1   : > { %4712 = vst.msk [vmem:[#allocation3 + $0xe8] sm:$0xff] %vm1995_vm1, %v4680_v16  ;;  %v9153_v28 = vpop.f32.mrb[128].mxu0 }
 0x2f2   : > { %v5198_v21 = vpop.f32.mrb[129].mxu0 }
 0x2f3   : > { %v9173_v44 = vpop.f32.mrb[96].mxu1  ;;  %v9154_v54 = vpop.f32.mrb[130].mxu0 }
 0x2f4   : > { %v5698_v43 = vadd.f32 %v9173_v44, %v5666_v17  ;;  %v5537_v4 = vpop.f32.mrb[97].mxu1  ;;  %v5201_v62 = vpop.f32.mrb[131].mxu0 }
 0x2f5   : > { %v5243_v37 = vld [vmem:[#allocation3 + $0xf0] sm:$0xff]  ;;  %v5696_v34 = vadd.f32 %v5664_v58, %v5537_v4  ;;  %v9174_v46 = vpop.f32.mrb[98].mxu1 }
 0x2f6   : > { %5730 = vst.msk [vmem:[#allocation3 + $0x10] sm:$0xff] %vm1995_vm1, %v5698_v43  ;;  %v5275_v55 = vadd.f32 %v9153_v28, %v5243_v37  ;;  %v5241_v22 = vld [vmem:[#allocation3 + $0xe0] sm:$0xff]  ;;  %v5699_v32 = vadd.f32 %v9174_v46, %v5667_v19  ;;  %v5540_v7 = vpop.f32.mrb[99].mxu1 }
 0x2f7   : > { %5728 = vst.msk [vmem:[#allocation3] sm:$0xff] %vm1995_vm1, %v5696_v34  ;;  %v5273_v52 = vadd.f32 %v5241_v22, %v5198_v21  ;;  %v5244_v2 = vld [vmem:[#allocation3 + $0xf8] sm:$0xff]  ;;  %v5697_v39 = vadd.f32 %v5665_v1, %v5540_v7  ;;  %v5673_v21 = vld [vmem:[#allocation3 + $0x48] sm:$0xff]  ;;  %v5678_v34 = vld [vmem:[#allocation3 + $0x70] sm:$0xff] }
 0x2f8   : > { %5307 = vst.msk [vmem:[#allocation3 + $0xf0] sm:$0xff] %vm1995_vm1, %v5275_v55  ;;  %5731 = vst.msk [vmem:[#allocation3 + $0x18] sm:$0xff] %vm1995_vm1, %v5699_v32  ;;  %v5276_v56 = vadd.f32 %v9154_v54, %v5244_v2  ;;  %v5242_v57 = vld [vmem:[#allocation3 + $0xe8] sm:$0xff]  ;;  %v5676_v22 = vld [vmem:[#allocation3 + $0x60] sm:$0xff] }
 0x2f9   : > { %5305 = vst.msk [vmem:[#allocation3 + $0xe0] sm:$0xff] %vm1995_vm1, %v5273_v52  ;;  %5729 = vst.msk [vmem:[#allocation3 + $0x8] sm:$0xff] %vm1995_vm1, %v5697_v39  ;;  %v5274_v9 = vadd.f32 %v5242_v57, %v5201_v62  ;;  %v9221_v42 = vpop.f32.mrb[132].mxu0  ;;  %v5679_v2 = vld [vmem:[#allocation3 + $0x78] sm:$0xff] }
 0x2fa   : > { %5308 = vst.msk [vmem:[#allocation3 + $0xf8] sm:$0xff] %vm1995_vm1, %v5276_v56  ;;  %v6355_v6 = vpop.f32.mrb[133].mxu0 }
 0x2fb   : > { %5306 = vst.msk [vmem:[#allocation3 + $0xe8] sm:$0xff] %vm1995_vm1, %v5274_v9  ;;  %v9177_v47 = vpop.f32.mrb[100].mxu1  ;;  %v9222_v60 = vpop.f32.mrb[134].mxu0 }
 0x2fc   : > { %v5702_v11 = vadd.f32 %v9177_v47, %v5670_v8  ;;  %v5553_v31 = vpop.f32.mrb[101].mxu1  ;;  %v6358_v49 = vpop.f32.mrb[135].mxu0 }
 0x2fd   : > { %v5700_v15 = vadd.f32 %v5668_v59, %v5553_v31  ;;  %v6484_v33 = vld [vmem:[#allocation3 + $0x10] sm:$0xff]  ;;  %v9178_v40 = vpop.f32.mrb[102].mxu1 }
 0x2fe   : > { %5734 = vst.msk [vmem:[#allocation3 + $0x30] sm:$0xff] %vm1995_vm1, %v5702_v11  ;;  %v6516_v29 = vadd.f32 %v9221_v42, %v6484_v33  ;;  %v5703_v63 = vadd.f32 %v9178_v40, %v5671_v25  ;;  %v6482_v0 = vld [vmem:[#allocation3] sm:$0xff]  ;;  %v5556_v48 = vpop.f32.mrb[103].mxu1 }
 0x2ff   : > { %5732 = vst.msk [vmem:[#allocation3 + $0x20] sm:$0xff] %vm1995_vm1, %v5700_v15  ;;  %v6514_v10 = vadd.f32 %v6482_v0, %v6355_v6  ;;  %v5701_v26 = vadd.f32 %v5669_v38, %v5556_v48  ;;  %v6485_v45 = vld [vmem:[#allocation3 + $0x18] sm:$0xff]  ;;  %v5677_v6 = vld [vmem:[#allocation3 + $0x68] sm:$0xff]  ;;  %v5682_v15 = vld [vmem:[#allocation3 + $0x90] sm:$0xff] }
 0x300   : > { %6548 = vst.msk [vmem:[#allocation3 + $0x10] sm:$0xff] %vm1995_vm1, %v6516_v29  ;;  %5735 = vst.msk [vmem:[#allocation3 + $0x38] sm:$0xff] %vm1995_vm1, %v5703_v63  ;;  %v6517_v50 = vadd.f32 %v9222_v60, %v6485_v45  ;;  %v6483_v61 = vld [vmem:[#allocation3 + $0x8] sm:$0xff]  ;;  %v5680_v25 = vld [vmem:[#allocation3 + $0x80] sm:$0xff] }
 0x301   : > { %6546 = vst.msk [vmem:[#allocation3] sm:$0xff] %vm1995_vm1, %v6514_v10  ;;  %5733 = vst.msk [vmem:[#allocation3 + $0x28] sm:$0xff] %vm1995_vm1, %v5701_v26  ;;  %v6515_v36 = vadd.f32 %v6483_v61, %v6358_v49  ;;  %v9225_v41 = vpop.f32.mrb[136].mxu0  ;;  %v5683_v38 = vld [vmem:[#allocation3 + $0x98] sm:$0xff] }
 0x302   : > { %6549 = vst.msk [vmem:[#allocation3 + $0x18] sm:$0xff] %vm1995_vm1, %v6517_v50  ;;  %v6371_v27 = vpop.f32.mrb[137].mxu0 }
 0x303   : > { %6547 = vst.msk [vmem:[#allocation3 + $0x8] sm:$0xff] %vm1995_vm1, %v6515_v36  ;;  %v9181_v51 = vpop.f32.mrb[104].mxu1  ;;  %v9226_v53 = vpop.f32.mrb[138].mxu0  ;;  %v5681_v36 = vld [vmem:[#allocation3 + $0x88] sm:$0xff] }
 0x304   : > { %v5706_v18 = vadd.f32 %v9181_v51, %v5674_v3  ;;  %v5569_v14 = vpop.f32.mrb[105].mxu1  ;;  %v6374_v12 = vpop.f32.mrb[139].mxu0 }
 0x305   : > { %v5704_v24 = vadd.f32 %v5672_v5, %v5569_v14  ;;  %v6488_v30 = vld [vmem:[#allocation3 + $0x30] sm:$0xff]  ;;  %v9182_v20 = vpop.f32.mrb[106].mxu1 }
 0x306   : > { %5738 = vst.msk [vmem:[#allocation3 + $0x50] sm:$0xff] %vm1995_vm1, %v5706_v18  ;;  %v6520_v35 = vadd.f32 %v9225_v41, %v6488_v30  ;;  %v5707_v23 = vadd.f32 %v9182_v20, %v5675_v13  ;;  %v6486_v16 = vld [vmem:[#allocation3 + $0x20] sm:$0xff]  ;;  %v5572_v28 = vpop.f32.mrb[107].mxu1 }
 0x307   : > { %5736 = vst.msk [vmem:[#allocation3 + $0x40] sm:$0xff] %vm1995_vm1, %v5704_v24  ;;  %v6518_v44 = vadd.f32 %v6486_v16, %v6371_v27  ;;  %v5705_v17 = vadd.f32 %v5673_v21, %v5572_v28  ;;  %v6489_v54 = vld [vmem:[#allocation3 + $0x38] sm:$0xff]  ;;  %v5686_v24 = vld [vmem:[#allocation3 + $0xb0] sm:$0xff]  ;;  %v5684_v13 = vld [vmem:[#allocation3 + $0xa0] sm:$0xff] }
 0x308   : > { %6552 = vst.msk [vmem:[#allocation3 + $0x30] sm:$0xff] %vm1995_vm1, %v6520_v35  ;;  %5739 = vst.msk [vmem:[#allocation3 + $0x58] sm:$0xff] %vm1995_vm1, %v5707_v23  ;;  %v6521_v43 = vadd.f32 %v9226_v53, %v6489_v54  ;;  %v6487_v4 = vld [vmem:[#allocation3 + $0x28] sm:$0xff]  ;;  %v5687_v21 = vld [vmem:[#allocation3 + $0xb8] sm:$0xff] }
 0x309   : > { %6550 = vst.msk [vmem:[#allocation3 + $0x20] sm:$0xff] %vm1995_vm1, %v6518_v44  ;;  %5737 = vst.msk [vmem:[#allocation3 + $0x48] sm:$0xff] %vm1995_vm1, %v5705_v17  ;;  %v6519_v58 = vadd.f32 %v6487_v4, %v6374_v12 }
 0x30a   : > { %6553 = vst.msk [vmem:[#allocation3 + $0x38] sm:$0xff] %vm1995_vm1, %v6521_v43  ;;  %v9229_v62 = vpop.f32.mrb[140].mxu0 }
 0x30b   : > { %6551 = vst.msk [vmem:[#allocation3 + $0x28] sm:$0xff] %vm1995_vm1, %v6519_v58  ;;  %v9185_v37 = vpop.f32.mrb[108].mxu1  ;;  %v6387_v46 = vpop.f32.mrb[141].mxu0  ;;  %v5685_v58 = vld [vmem:[#allocation3 + $0xa8] sm:$0xff] }
 0x30c   : > { %v5710_v19 = vadd.f32 %v9185_v37, %v5678_v34  ;;  %v5585_v55 = vpop.f32.mrb[109].mxu1  ;;  %v9230_v32 = vpop.f32.mrb[142].mxu0 }
 0x30d   : > { %v5708_v7 = vadd.f32 %v5676_v22, %v5585_v55  ;;  %v6492_v1 = vld [vmem:[#allocation3 + $0x50] sm:$0xff]  ;;  %v9186_v52 = vpop.f32.mrb[110].mxu1  ;;  %v6390_v39 = vpop.f32.mrb[143].mxu0 }
 0x30e   : > { %5742 = vst.msk [vmem:[#allocation3 + $0x70] sm:$0xff] %vm1995_vm1, %v5710_v19  ;;  %v6524_v56 = vadd.f32 %v9229_v62, %v6492_v1  ;;  %v5711_v57 = vadd.f32 %v9186_v52, %v5679_v2  ;;  %v6490_v9 = vld [vmem:[#allocation3 + $0x40] sm:$0xff]  ;;  %v5588_v42 = vpop.f32.mrb[111].mxu1  ;;  %v5690_v1 = vld [vmem:[#allocation3 + $0xd0] sm:$0xff] }
 0x30f   : > { %5740 = vst.msk [vmem:[#allocation3 + $0x60] sm:$0xff] %vm1995_vm1, %v5708_v7  ;;  %v6522_v47 = vadd.f32 %v6490_v9, %v6387_v46  ;;  %v5709_v8 = vadd.f32 %v5677_v6, %v5588_v42  ;;  %v6493_v60 = vld [vmem:[#allocation3 + $0x58] sm:$0xff] }
 0x310   : > { %6556 = vst.msk [vmem:[#allocation3 + $0x50] sm:$0xff] %vm1995_vm1, %v6524_v56  ;;  %5743 = vst.msk [vmem:[#allocation3 + $0x78] sm:$0xff] %vm1995_vm1, %v5711_v57  ;;  %v6525_v11 = vadd.f32 %v9230_v32, %v6493_v60  ;;  %v6491_v31 = vld [vmem:[#allocation3 + $0x48] sm:$0xff]  ;;  %v5691_v42 = vld [vmem:[#allocation3 + $0xd8] sm:$0xff] }
 0x311   : > { %6554 = vst.msk [vmem:[#allocation3 + $0x40] sm:$0xff] %vm1995_vm1, %v6522_v47  ;;  %5741 = vst.msk [vmem:[#allocation3 + $0x68] sm:$0xff] %vm1995_vm1, %v5709_v8  ;;  %v6523_v59 = vadd.f32 %v6491_v31, %v6390_v39  ;;  %v5688_v39 = vld [vmem:[#allocation3 + $0xc0] sm:$0xff] }
 0x312   : > { %6557 = vst.msk [vmem:[#allocation3 + $0x58] sm:$0xff] %vm1995_vm1, %v6525_v11  ;;  %v5689_v11 = vld [vmem:[#allocation3 + $0xc8] sm:$0xff] }
 0x313   : > { %6555 = vst.msk [vmem:[#allocation3 + $0x48] sm:$0xff] %vm1995_vm1, %v6523_v59  ;;  %v9189_v49 = vpop.f32.mrb[112].mxu1  ;;  %v9233_v29 = vpop.f32.mrb[144].mxu0 }
 0x314   : > { %v5714_v33 = vadd.f32 %v9189_v49, %v5682_v15  ;;  %v5601_v40 = vpop.f32.mrb[113].mxu1  ;;  %v6403_v10 = vpop.f32.mrb[145].mxu0 }
 0x315   : > { %v5712_v63 = vadd.f32 %v5680_v25, %v5601_v40  ;;  %v6496_v0 = vld [vmem:[#allocation3 + $0x70] sm:$0xff]  ;;  %v9190_v48 = vpop.f32.mrb[114].mxu1  ;;  %v9234_v41 = vpop.f32.mrb[146].mxu0 }
 0x316   : > { %5746 = vst.msk [vmem:[#allocation3 + $0x90] sm:$0xff] %vm1995_vm1, %v5714_v33  ;;  %v6528_v26 = vadd.f32 %v9233_v29, %v6496_v0  ;;  %v5715_v45 = vadd.f32 %v9190_v48, %v5683_v38  ;;  %v6494_v50 = vld [vmem:[#allocation3 + $0x60] sm:$0xff]  ;;  %v5604_v61 = vpop.f32.mrb[115].mxu1  ;;  %v6406_v53 = vpop.f32.mrb[147].mxu0  ;;  %v5694_v38 = vld [vmem:[#allocation3 + $0xf0] sm:$0xff] }
 0x317   : > { %5744 = vst.msk [vmem:[#allocation3 + $0x80] sm:$0xff] %vm1995_vm1, %v5712_v63  ;;  %v6526_v27 = vadd.f32 %v6494_v50, %v6403_v10  ;;  %v5713_v51 = vadd.f32 %v5681_v36, %v5604_v61  ;;  %v6497_v3 = vld [vmem:[#allocation3 + $0x78] sm:$0xff] }
 0x318   : > { %6560 = vst.msk [vmem:[#allocation3 + $0x70] sm:$0xff] %vm1995_vm1, %v6528_v26  ;;  %5747 = vst.msk [vmem:[#allocation3 + $0x98] sm:$0xff] %vm1995_vm1, %v5715_v45  ;;  %v6529_v18 = vadd.f32 %v9234_v41, %v6497_v3  ;;  %v6495_v14 = vld [vmem:[#allocation3 + $0x68] sm:$0xff]  ;;  %v5692_v45 = vld [vmem:[#allocation3 + $0xe0] sm:$0xff] }
 0x319   : > { %6558 = vst.msk [vmem:[#allocation3 + $0x60] sm:$0xff] %vm1995_vm1, %v6526_v27  ;;  %5745 = vst.msk [vmem:[#allocation3 + $0x88] sm:$0xff] %vm1995_vm1, %v5713_v51  ;;  %v6527_v5 = vadd.f32 %v6495_v14, %v6406_v53  ;;  %v5695_v41 = vld [vmem:[#allocation3 + $0xf8] sm:$0xff]  ;;  %v5693_v53 = vld [vmem:[#allocation3 + $0xe8] sm:$0xff] }
 0x31a   : > { %6561 = vst.msk [vmem:[#allocation3 + $0x78] sm:$0xff] %vm1995_vm1, %v6529_v18 }
 0x31b   : > { %6559 = vst.msk [vmem:[#allocation3 + $0x68] sm:$0xff] %vm1995_vm1, %v6527_v5  ;;  %v9193_v12 = vpop.f32.mrb[116].mxu1 }
 0x31c   : > { %v5718_v30 = vadd.f32 %v9193_v12, %v5686_v24  ;;  %v5617_v20 = vpop.f32.mrb[117].mxu1  ;;  %v9237_v35 = vpop.f32.mrb[148].mxu0 }
 0x31d   : > { %v5716_v23 = vadd.f32 %v5684_v13, %v5617_v20  ;;  %v6500_v16 = vld [vmem:[#allocation3 + $0x90] sm:$0xff]  ;;  %v9194_v28 = vpop.f32.mrb[118].mxu1  ;;  %v6419_v44 = vpop.f32.mrb[149].mxu0 }
 0x31e   : > { %5750 = vst.msk [vmem:[#allocation3 + $0xb0] sm:$0xff] %vm1995_vm1, %v5718_v30  ;;  %v6532_v17 = vadd.f32 %v9237_v35, %v6500_v16  ;;  %v5719_v54 = vadd.f32 %v9194_v28, %v5687_v21  ;;  %v6498_v43 = vld [vmem:[#allocation3 + $0x80] sm:$0xff]  ;;  %v5620_v4 = vpop.f32.mrb[119].mxu1  ;;  %v9238_v62 = vpop.f32.mrb[150].mxu0  ;;  %v7078_v21 = vld [vmem:[#allocation3 + $0x10] sm:$0xff] }
 0x31f   : > { %5748 = vst.msk [vmem:[#allocation3 + $0xa0] sm:$0xff] %vm1995_vm1, %v5716_v23  ;;  %v6530_v37 = vadd.f32 %v6498_v43, %v6419_v44  ;;  %v5717_v34 = vadd.f32 %v5685_v58, %v5620_v4  ;;  %v6501_v46 = vld [vmem:[#allocation3 + $0x98] sm:$0xff]  ;;  %v6422_v19 = vpop.f32.mrb[151].mxu0 }
 0x320   : > { %6564 = vst.msk [vmem:[#allocation3 + $0x90] sm:$0xff] %vm1995_vm1, %v6532_v17  ;;  %5751 = vst.msk [vmem:[#allocation3 + $0xb8] sm:$0xff] %vm1995_vm1, %v5719_v54  ;;  %v6533_v55 = vadd.f32 %v9238_v62, %v6501_v46  ;;  %v6499_v22 = vld [vmem:[#allocation3 + $0x88] sm:$0xff]  ;;  %v7076_v54 = vld [vmem:[#allocation3] sm:$0xff] }
 0x321   : > { %6562 = vst.msk [vmem:[#allocation3 + $0x80] sm:$0xff] %vm1995_vm1, %v6530_v37  ;;  %5749 = vst.msk [vmem:[#allocation3 + $0xa8] sm:$0xff] %vm1995_vm1, %v5717_v34  ;;  %v6531_v32 = vadd.f32 %v6499_v22, %v6422_v19  ;;  %v7079_v58 = vld [vmem:[#allocation3 + $0x18] sm:$0xff]  ;;  %v7077_v34 = vld [vmem:[#allocation3 + $0x8] sm:$0xff] }
 0x322   : > { %6565 = vst.msk [vmem:[#allocation3 + $0x98] sm:$0xff] %vm1995_vm1, %v6533_v55 }
 0x323   : > { %6563 = vst.msk [vmem:[#allocation3 + $0x88] sm:$0xff] %vm1995_vm1, %v6531_v32  ;;  %v9197_v7 = vpop.f32.mrb[120].mxu1  ;;  %v7082_v32 = vld [vmem:[#allocation3 + $0x30] sm:$0xff] }
 0x324   : > { %v5722_v52 = vadd.f32 %v9197_v7, %v5690_v1  ;;  %v5633_v2 = vpop.f32.mrb[121].mxu1  ;;  %v11434_v7 = vld [vmem:[%s11935_s4] ss:$0 sm:$0xff] }
 0x325   : > { %v5720_v56 = vadd.f32 %v5688_v39, %v5633_v2  ;;  %v6504_v57 = vld [vmem:[#allocation3 + $0xb0] sm:$0xff]  ;;  %v9198_v9 = vpop.f32.mrb[122].mxu1 }
 0x326   : > { %5754 = vst.msk [vmem:[#allocation3 + $0xd0] sm:$0xff] %vm1995_vm1, %v5722_v52  ;;  %v9241_v6 = vpop.f32.mrb[152].mxu0  ;;  %v5723_v47 = vadd.f32 %v9198_v9, %v5691_v42  ;;  %v6502_v8 = vld [vmem:[#allocation3 + $0xa0] sm:$0xff]  ;;  %v5636_v60 = vpop.f32.mrb[123].mxu1 }
 0x327   : > { %5752 = vst.msk [vmem:[#allocation3 + $0xc0] sm:$0xff] %vm1995_vm1, %v5720_v56  ;;  %v6536_v31 = vadd.f32 %v9241_v6, %v6504_v57  ;;  %v6435_v59 = vpop.f32.mrb[153].mxu0  ;;  %v5721_v49 = vadd.f32 %v5689_v11, %v5636_v60  ;;  %v6505_v15 = vld [vmem:[#allocation3 + $0xb8] sm:$0xff]  ;;  %v7080_v56 = vld [vmem:[#allocation3 + $0x20] sm:$0xff] }
 0x328   : > { %5755 = vst.msk [vmem:[#allocation3 + $0xd8] sm:$0xff] %vm1995_vm1, %v5723_v47  ;;  %v6534_v33 = vadd.f32 %v6502_v8, %v6435_v59  ;;  %v9242_v40 = vpop.f32.mrb[154].mxu0  ;;  %v6503_v25 = vld [vmem:[#allocation3 + $0xa8] sm:$0xff]  ;;  %v7083_v8 = vld [vmem:[#allocation3 + $0x38] sm:$0xff] }
 0x329   : > { %6568 = vst.msk [vmem:[#allocation3 + $0xb0] sm:$0xff] %vm1995_vm1, %v6536_v31  ;;  %5753 = vst.msk [vmem:[#allocation3 + $0xc8] sm:$0xff] %vm1995_vm1, %v5721_v49  ;;  %v6537_v29 = vadd.f32 %v9242_v40, %v6505_v15  ;;  %v6438_v63 = vpop.f32.mrb[155].mxu0  ;;  %v7081_v15 = vld [vmem:[#allocation3 + $0x28] sm:$0xff] }
 0x32a   : > { %6566 = vst.msk [vmem:[#allocation3 + $0xa0] sm:$0xff] %vm1995_vm1, %v6534_v33  ;;  %v6535_v0 = vadd.f32 %v6503_v25, %v6438_v63 }
 0x32b   : > { %6569 = vst.msk [vmem:[#allocation3 + $0xb8] sm:$0xff] %vm1995_vm1, %v6537_v29  ;;  %v9201_v48 = vpop.f32.mrb[124].mxu1 }
 0x32c   : > { %6567 = vst.msk [vmem:[#allocation3 + $0xa8] sm:$0xff] %vm1995_vm1, %v6535_v0  ;;  %v5726_v10 = vadd.f32 %v9201_v48, %v5694_v38  ;;  %v5649_v26 = vpop.f32.mrb[125].mxu1 }
 0x32d   : > { %v5724_v50 = vadd.f32 %v5692_v45, %v5649_v26  ;;  %v6508_v61 = vld [vmem:[#allocation3 + $0xd0] sm:$0xff]  ;;  %v9202_v36 = vpop.f32.mrb[126].mxu1 }
 0x32e   : > { %5758 = vst.msk [vmem:[#allocation3 + $0xf0] sm:$0xff] %vm1995_vm1, %v5726_v10  ;;  %v5727_v27 = vadd.f32 %v9202_v36, %v5695_v41  ;;  %v6506_v51 = vld [vmem:[#allocation3 + $0xc0] sm:$0xff]  ;;  %v5652_v3 = vpop.f32.mrb[127].mxu1 }
 0x32f   : > { %5756 = vst.msk [vmem:[#allocation3 + $0xe0] sm:$0xff] %vm1995_vm1, %v5724_v50  ;;  %v9245_v18 = vpop.f32.mrb[156].mxu0  ;;  %v5725_v14 = vadd.f32 %v5693_v53, %v5652_v3  ;;  %v6509_v5 = vld [vmem:[#allocation3 + $0xd8] sm:$0xff] }
 0x330   : > { %v6540_v12 = vadd.f32 %v9245_v18, %v6508_v61  ;;  %5759 = vst.msk [vmem:[#allocation3 + $0xf8] sm:$0xff] %vm1995_vm1, %v5727_v27  ;;  %v6451_v24 = vpop.f32.mrb[157].mxu0  ;;  %v6507_v30 = vld [vmem:[#allocation3 + $0xc8] sm:$0xff]  ;;  %v7086_v27 = vld [vmem:[#allocation3 + $0x50] sm:$0xff]  ;;  %v7084_v18 = vld [vmem:[#allocation3 + $0x40] sm:$0xff] }
 0x331   : > { %v6538_v20 = vadd.f32 %v6506_v51, %v6451_v24  ;;  %5757 = vst.msk [vmem:[#allocation3 + $0xe8] sm:$0xff] %vm1995_vm1, %v5725_v14  ;;  %v9246_v13 = vpop.f32.mrb[158].mxu0 }
 0x332   : > { %6572 = vst.msk [vmem:[#allocation3 + $0xd0] sm:$0xff] %vm1995_vm1, %v6540_v12  ;;  %v6541_v35 = vadd.f32 %v9246_v13, %v6509_v5  ;;  %v6454_v23 = vpop.f32.mrb[159].mxu0  ;;  %v7087_v12 = vld [vmem:[#allocation3 + $0x58] sm:$0xff]  ;;  %v7085_v13 = vld [vmem:[#allocation3 + $0x48] sm:$0xff] }
 0x333   : > { %6570 = vst.msk [vmem:[#allocation3 + $0xc0] sm:$0xff] %vm1995_vm1, %v6538_v20  ;;  %v6539_v16 = vadd.f32 %v6507_v30, %v6454_v23 }
 0x334   : > { %6573 = vst.msk [vmem:[#allocation3 + $0xd8] sm:$0xff] %vm1995_vm1, %v6541_v35 }
 0x335   : > { %6571 = vst.msk [vmem:[#allocation3 + $0xc8] sm:$0xff] %vm1995_vm1, %v6539_v16  ;;  %v6512_v19 = vld [vmem:[#allocation3 + $0xf0] sm:$0xff] }
 0x336   : > { %v9269_v28 = vpop.f32.mrb[128].mxu1  ;;  %v6510_v55 = vld [vmem:[#allocation3 + $0xe0] sm:$0xff] }
 0x337   : > { %v7110_v44 = vadd.f32 %v9269_v28, %v7078_v21  ;;  %v6949_v17 = vpop.f32.mrb[129].mxu1  ;;  %v6513_v52 = vld [vmem:[#allocation3 + $0xf8] sm:$0xff] }
 0x338   : > { %v7108_v43 = vadd.f32 %v7076_v54, %v6949_v17  ;;  %v9270_v4 = vpop.f32.mrb[130].mxu1  ;;  %v6511_v42 = vld [vmem:[#allocation3 + $0xe8] sm:$0xff] }
 0x339   : > { %7142 = vst.msk [vmem:[#allocation3 + $0x10] sm:$0xff] %vm1995_vm1, %v7110_v44  ;;  %v7111_v62 = vadd.f32 %v9270_v4, %v7079_v58  ;;  %v6952_v37 = vpop.f32.mrb[131].mxu1 }
 0x33a   : > { %7140 = vst.msk [vmem:[#allocation3] sm:$0xff] %vm1995_vm1, %v7108_v43  ;;  %v7109_v46 = vadd.f32 %v7077_v34, %v6952_v37  ;;  %v7090_v37 = vld [vmem:[#allocation3 + $0x70] sm:$0xff] }
 0x33b   : > { %7143 = vst.msk [vmem:[#allocation3 + $0x18] sm:$0xff] %vm1995_vm1, %v7111_v62 }
 0x33c   : > { %7141 = vst.msk [vmem:[#allocation3 + $0x8] sm:$0xff] %vm1995_vm1, %v7109_v46 }
 0x33e   : > { %v9273_v22 = vpop.f32.mrb[132].mxu1 }
 0x33f   : > { %v9249_v1 = vpop.f32.mrb[160].mxu0  ;;  %v7114_v2 = vadd.f32 %v9273_v22, %v7082_v32  ;;  %v6965_v39 = vpop.f32.mrb[133].mxu1  ;;  %v7088_v22 = vld [vmem:[#allocation3 + $0x60] sm:$0xff] }
 0x340   : > { %v6544_v57 = vadd.f32 %v9249_v1, %v6512_v19  ;;  %v6467_v9 = vpop.f32.mrb[161].mxu0  ;;  %v7112_v6 = vadd.f32 %v7080_v56, %v6965_v39  ;;  %v9274_v47 = vpop.f32.mrb[134].mxu1  ;;  %v7174_v60 = vld [vmem:[#allocation3 + $0x10] sm:$0xff] }
 0x341   : > { %v6542_v11 = vadd.f32 %v6510_v55, %v6467_v9  ;;  %v9250_v31 = vpop.f32.mrb[162].mxu0  ;;  %7146 = vst.msk [vmem:[#allocation3 + $0x30] sm:$0xff] %vm1995_vm1, %v7114_v2  ;;  %v7115_v59 = vadd.f32 %v9274_v47, %v7083_v8  ;;  %v6968_v49 = vpop.f32.mrb[135].mxu1  ;;  %v7213_v33 = vadd.f32 %v11434_v7, %v7174_v60  ;;  %v7172_v40 = vld [vmem:[#allocation3] sm:$0xff]  ;;  %v7091_v2 = vld [vmem:[#allocation3 + $0x78] sm:$0xff] }
 0x342   : > { %6576 = vst.msk [vmem:[#allocation3 + $0xf0] sm:$0xff] %vm1995_vm1, %v6544_v57  ;;  %v6545_v25 = vadd.f32 %v9250_v31, %v6513_v52  ;;  %v6470_v29 = vpop.f32.mrb[163].mxu0  ;;  %7144 = vst.msk [vmem:[#allocation3 + $0x20] sm:$0xff] %vm1995_vm1, %v7112_v6  ;;  %v7113_v63 = vadd.f32 %v7081_v15, %v6968_v49  ;;  %v7211_v0 = vadd.f32 %v11434_v7, %v7172_v40  ;;  %v7175_v48 = vld [vmem:[#allocation3 + $0x18] sm:$0xff]  ;;  %v7089_v6 = vld [vmem:[#allocation3 + $0x68] sm:$0xff] }
 0x343   : > { %6574 = vst.msk [vmem:[#allocation3 + $0xe0] sm:$0xff] %vm1995_vm1, %v6542_v11  ;;  %v6543_v38 = vadd.f32 %v6511_v42, %v6470_v29  ;;  %7147 = vst.msk [vmem:[#allocation3 + $0x38] sm:$0xff] %vm1995_vm1, %v7115_v59  ;;  %v8514_v10 = vmul.f32 -1.442695, %v7213_v33  ;;  %v7214_v26 = vadd.f32 %v11434_v7, %v7175_v48  ;;  %v7173_v45 = vld [vmem:[#allocation3 + $0x8] sm:$0xff] }
 0x344   : > { %6577 = vst.msk [vmem:[#allocation3 + $0xf8] sm:$0xff] %vm1995_vm1, %v6545_v25  ;;  %7145 = vst.msk [vmem:[#allocation3 + $0x28] sm:$0xff] %vm1995_vm1, %v7113_v63  ;;  %v8512_v50 = vmul.f32 -1.442695, %v7211_v0  ;;  %v7212_v61 = vadd.f32 %v11434_v7, %v7173_v45 }
 0x345   : > { %6575 = vst.msk [vmem:[#allocation3 + $0xe8] sm:$0xff] %vm1995_vm1, %v6543_v38  ;;  %9468 = vpow2.f32 %v8514_v10  ;;  %v8515_v36 = vmul.f32 -1.442695, %v7214_v26  ;;  %v7094_v10 = vld [vmem:[#allocation3 + $0x90] sm:$0xff] }
 0x346   : > { %v9277_v41 = vpop.f32.mrb[136].mxu1  ;;  %9470 = vpow2.f32 %v8512_v50  ;;  %v8513_v51 = vmul.f32 -1.442695, %v7212_v61 }
 0x347   : > { %v7118_v3 = vadd.f32 %v9277_v41, %v7086_v27  ;;  %v6981_v53 = vpop.f32.mrb[137].mxu1  ;;  %9472 = vpow2.f32 %v8515_v36  ;;  %v7092_v36 = vld [vmem:[#allocation3 + $0x80] sm:$0xff] }
 0x348   : > { %v7116_v14 = vadd.f32 %v7084_v18, %v6981_v53  ;;  %v9278_v5 = vpop.f32.mrb[138].mxu1  ;;  %9474 = vpow2.f32 %v8513_v51  ;;  %v7178_v24 = vld [vmem:[#allocation3 + $0x30] sm:$0xff] }
 0x349   : > { %7150 = vst.msk [vmem:[#allocation3 + $0x50] sm:$0xff] %vm1995_vm1, %v7118_v3  ;;  %v7119_v30 = vadd.f32 %v9278_v5, %v7087_v12  ;;  %v6984_v20 = vpop.f32.mrb[139].mxu1  ;;  %v7217_v35 = vadd.f32 %v11434_v7, %v7178_v24  ;;  %v7176_v23 = vld [vmem:[#allocation3 + $0x20] sm:$0xff]  ;;  %v7095_v3 = vld [vmem:[#allocation3 + $0x98] sm:$0xff]  ;;  %v7093_v24 = vld [vmem:[#allocation3 + $0x88] sm:$0xff] }
 0x34a   : > { %7148 = vst.msk [vmem:[#allocation3 + $0x40] sm:$0xff] %vm1995_vm1, %v7116_v14  ;;  %v7117_v16 = vadd.f32 %v7085_v13, %v6984_v20  ;;  %v7179_v28 = vld [vmem:[#allocation3 + $0x38] sm:$0xff]  ;;  %v7215_v21 = vadd.f32 %v11434_v7, %v7176_v23 }
 0x34b   : > { %7151 = vst.msk [vmem:[#allocation3 + $0x58] sm:$0xff] %vm1995_vm1, %v7119_v30  ;;  %v8518_v44 = vmul.f32 -1.442695, %v7217_v35  ;;  %v7218_v17 = vadd.f32 %v11434_v7, %v7179_v28  ;;  %v7177_v54 = vld [vmem:[#allocation3 + $0x28] sm:$0xff] }
 0x34c   : > { %7149 = vst.msk [vmem:[#allocation3 + $0x48] sm:$0xff] %vm1995_vm1, %v7117_v16  ;;  %v8516_v43 = vmul.f32 -1.442695, %v7215_v21  ;;  %v7216_v4 = vadd.f32 %v11434_v7, %v7177_v54 }
 0x34d   : > { %9476 = vpow2.f32 %v8518_v44  ;;  %v8519_v58 = vmul.f32 -1.442695, %v7218_v17 }
 0x34e   : > { %v9281_v62 = vpop.f32.mrb[140].mxu1  ;;  %9478 = vpow2.f32 %v8516_v43  ;;  %v8517_v34 = vmul.f32 -1.442695, %v7216_v4 }
 0x34f   : > { %v9469_v46 = vpop.eup %9468  ;;  %v7122_v19 = vadd.f32 %v9281_v62, %v7090_v37  ;;  %v6997_v55 = vpop.f32.mrb[141].mxu1  ;;  %9480 = vpow2.f32 %v8519_v58 }
 0x350   : > { %v9471_v32 = vpop.eup %9470  ;;  %v7120_v1 = vadd.f32 %v7088_v22, %v6997_v55  ;;  %v9282_v52 = vpop.f32.mrb[142].mxu1  ;;  %v7341_v39 = vadd.f32 1.0, %v9469_v46  ;;  %9482 = vpow2.f32 %v8517_v34  ;;  %v7182_v56 = vld [vmem:[#allocation3 + $0x50] sm:$0xff] }
 0x351   : > { %v9473_v57 = vpop.eup %9472  ;;  %7154 = vst.msk [vmem:[#allocation3 + $0x70] sm:$0xff] %vm1995_vm1, %v7122_v19  ;;  %v7123_v9 = vadd.f32 %v9282_v52, %v7091_v2  ;;  %v7000_v42 = vpop.f32.mrb[143].mxu1  ;;  %v7339_v47 = vadd.f32 1.0, %v9471_v32  ;;  %v7221_v8 = vadd.f32 %v11434_v7, %v7182_v56  ;;  %v7180_v60 = vld [vmem:[#allocation3 + $0x40] sm:$0xff]  ;;  %v7098_v55 = vld [vmem:[#allocation3 + $0xb0] sm:$0xff] }
 0x352   : > { %v9475_v11 = vpop.eup %9474  ;;  %7152 = vst.msk [vmem:[#allocation3 + $0x60] sm:$0xff] %vm1995_vm1, %v7120_v1  ;;  %v7121_v31 = vadd.f32 %v7089_v6, %v7000_v42  ;;  %9484 = vrcp.f32 %v7341_v39  ;;  %v7342_v59 = vadd.f32 1.0, %v9473_v57  ;;  %v7183_v49 = vld [vmem:[#allocation3 + $0x58] sm:$0xff]  ;;  %v7219_v15 = vadd.f32 %v11434_v7, %v7180_v60  ;;  %v7096_v2 = vld [vmem:[#allocation3 + $0xa0] sm:$0xff]  ;;  %v7097_v60 = vld [vmem:[#allocation3 + $0xa8] sm:$0xff] }
 0x353   : > { %7155 = vst.msk [vmem:[#allocation3 + $0x78] sm:$0xff] %vm1995_vm1, %v7123_v9  ;;  %9486 = vrcp.f32 %v7339_v47  ;;  %v7340_v33 = vadd.f32 1.0, %v9475_v11  ;;  %v8522_v40 = vmul.f32 -1.442695, %v7221_v8  ;;  %v7222_v25 = vadd.f32 %v11434_v7, %v7183_v49  ;;  %v7181_v29 = vld [vmem:[#allocation3 + $0x48] sm:$0xff]  ;;  %v7099_v9 = vld [vmem:[#allocation3 + $0xb8] sm:$0xff] }
 0x354   : > { %7153 = vst.msk [vmem:[#allocation3 + $0x68] sm:$0xff] %vm1995_vm1, %v7121_v31  ;;  %9488 = vrcp.f32 %v7342_v59  ;;  %v8520_v63 = vmul.f32 -1.442695, %v7219_v15  ;;  %v7220_v0 = vadd.f32 %v11434_v7, %v7181_v29 }
 0x355   : > { %9490 = vrcp.f32 %v7340_v33  ;;  %v8523_v48 = vmul.f32 -1.442695, %v7222_v25 }
 0x356   : > { %v9285_v38 = vpop.f32.mrb[144].mxu1  ;;  %9492 = vpow2.f32 %v8522_v40  ;;  %v8521_v26 = vmul.f32 -1.442695, %v7220_v0 }
 0x357   : > { %v9477_v45 = vpop.eup %9476  ;;  %v7126_v50 = vadd.f32 %v9285_v38, %v7094_v10  ;;  %v7013_v61 = vpop.f32.mrb[145].mxu1  ;;  %9494 = vpow2.f32 %v8523_v48 }
 0x358   : > { %v9479_v41 = vpop.eup %9478  ;;  %v7124_v27 = vadd.f32 %v7092_v36, %v7013_v61  ;;  %v9286_v51 = vpop.f32.mrb[146].mxu1  ;;  %v7345_v53 = vadd.f32 1.0, %v9477_v45  ;;  %9496 = vpow2.f32 %v8520_v63  ;;  %v7186_v18 = vld [vmem:[#allocation3 + $0x70] sm:$0xff] }
 0x359   : > { %v9481_v14 = vpop.eup %9480  ;;  %7158 = vst.msk [vmem:[#allocation3 + $0x90] sm:$0xff] %vm1995_vm1, %v7126_v50  ;;  %v7127_v5 = vadd.f32 %v9286_v51, %v7095_v3  ;;  %v7016_v12 = vpop.f32.mrb[147].mxu1  ;;  %v7343_v30 = vadd.f32 1.0, %v9479_v41  ;;  %9498 = vpow2.f32 %v8521_v26  ;;  %v7225_v20 = vadd.f32 %v11434_v7, %v7186_v18  ;;  %v7184_v13 = vld [vmem:[#allocation3 + $0x60] sm:$0xff]  ;;  %v7102_v51 = vld [vmem:[#allocation3 + $0xd0] sm:$0xff] }
 0x35a   : > { %v9483_v35 = vpop.eup %9482  ;;  %7156 = vst.msk [vmem:[#allocation3 + $0x80] sm:$0xff] %vm1995_vm1, %v7124_v27  ;;  %v7125_v23 = vadd.f32 %v7093_v24, %v7016_v12  ;;  %9500 = vrcp.f32 %v7345_v53  ;;  %v7346_v16 = vadd.f32 1.0, %v9481_v14  ;;  %v7187_v28 = vld [vmem:[#allocation3 + $0x78] sm:$0xff]  ;;  %v7223_v21 = vadd.f32 %v11434_v7, %v7184_v13 }
 0x35b   : > { %7159 = vst.msk [vmem:[#allocation3 + $0x98] sm:$0xff] %vm1995_vm1, %v7127_v5  ;;  %9502 = vrcp.f32 %v7343_v30  ;;  %v7344_v44 = vadd.f32 1.0, %v9483_v35  ;;  %v8526_v17 = vmul.f32 -1.442695, %v7225_v20  ;;  %v7226_v54 = vadd.f32 %v11434_v7, %v7187_v28  ;;  %v7185_v43 = vld [vmem:[#allocation3 + $0x68] sm:$0xff]  ;;  %v7100_v5 = vld [vmem:[#allocation3 + $0xc0] sm:$0xff] }
 0x35c   : > { %v11470_v4 = vpop.eup %9484  ;;  %7157 = vst.msk [vmem:[#allocation3 + $0x88] sm:$0xff] %vm1995_vm1, %v7125_v23  ;;  %9504 = vrcp.f32 %v7346_v16  ;;  %v8524_v58 = vmul.f32 -1.442695, %v7223_v21  ;;  %v7224_v62 = vadd.f32 %v11434_v7, %v7185_v43  ;;  %v7103_v20 = vld [vmem:[#allocation3 + $0xd8] sm:$0xff]  ;;  %v7101_v28 = vld [vmem:[#allocation3 + $0xc8] sm:$0xff] }
 0x35d   : > { %v11474_v37 = vpop.eup %9486  ;;  %7691 = vrot.lane.b32.xlu1 %v11470_v4, %s9625_s23  ;;  %9506 = vrcp.f32 %v7344_v44  ;;  %v8527_v34 = vmul.f32 -1.442695, %v7226_v54 }
 0x35e   : > { %v11478_v46 = vpop.eup %9488  ;;  %7687 = vrot.lane.b32.xlu0 %v11474_v37, %s9625_s23  ;;  %v9289_v19 = vpop.f32.mrb[148].mxu1  ;;  %9508 = vpow2.f32 %v8526_v17  ;;  %v8525_v22 = vmul.f32 -1.442695, %v7224_v62 }
 0x35f   : > { %v11482_v32 = vpop.eup %9490  ;;  %v7130_v1 = vadd.f32 %v9289_v19, %v7098_v55  ;;  %v7029_v52 = vpop.f32.mrb[149].mxu1  ;;  %9510 = vpow2.f32 %v8527_v34 }
 0x360   : > { %v9493_v39 = vpop.eup %9492  ;;  %v7128_v56 = vadd.f32 %v7096_v2, %v7029_v52  ;;  %v9290_v57 = vpop.f32.mrb[150].mxu1  ;;  %9512 = vpow2.f32 %v8524_v58  ;;  %v7190_v42 = vld [vmem:[#allocation3 + $0x90] sm:$0xff] }
 0x361   : > { %v9495_v6 = vpop.eup %9494  ;;  %7162 = vst.msk [vmem:[#allocation3 + $0xb0] sm:$0xff] %vm1995_vm1, %v7130_v1  ;;  %v7131_v47 = vadd.f32 %v9290_v57, %v7099_v9  ;;  %7693 = vrot.lane.b32.xlu1 %v11478_v46, %s9625_s23  ;;  %v7032_v8 = vpop.f32.mrb[151].mxu1  ;;  %v7349_v11 = vadd.f32 1.0, %v9493_v39  ;;  %9514 = vpow2.f32 %v8525_v22  ;;  %v7229_v31 = vadd.f32 %v11434_v7, %v7190_v42  ;;  %v7188_v59 = vld [vmem:[#allocation3 + $0x80] sm:$0xff] }
 0x362   : > { %v9497_v49 = vpop.eup %9496  ;;  %7160 = vst.msk [vmem:[#allocation3 + $0xa0] sm:$0xff] %vm1995_vm1, %v7128_v56  ;;  %v7129_v15 = vadd.f32 %v7097_v60, %v7032_v8  ;;  %7689 = vrot.lane.b32.xlu0 %v11482_v32, %s9625_s23  ;;  %v7350_v33 = vadd.f32 1.0, %v9495_v6  ;;  %v7191_v40 = vld [vmem:[#allocation3 + $0x98] sm:$0xff]  ;;  %v7227_v25 = vadd.f32 %v11434_v7, %v7188_v59  ;;  %v7104_v59 = vld [vmem:[#allocation3 + $0xe0] sm:$0xff] }
 0x363   : > { %v9499_v29 = vpop.eup %9498  ;;  %7163 = vst.msk [vmem:[#allocation3 + $0xb8] sm:$0xff] %vm1995_vm1, %v7131_v47  ;;  %9516 = vrcp.f32 %v7349_v11  ;;  %v7347_v63 = vadd.f32 1.0, %v9497_v49  ;;  %v8530_v0 = vmul.f32 -1.442695, %v7229_v31  ;;  %v7230_v48 = vadd.f32 %v11434_v7, %v7191_v40  ;;  %v7189_v38 = vld [vmem:[#allocation3 + $0x88] sm:$0xff]  ;;  %v7106_v47 = vld [vmem:[#allocation3 + $0xf0] sm:$0xff] }
 0x364   : > { %v11494_v10 = vpop.eup %9500  ;;  %7161 = vst.msk [vmem:[#allocation3 + $0xa8] sm:$0xff] %vm1995_vm1, %v7129_v15  ;;  %9518 = vrcp.f32 %v7350_v33  ;;  %v7348_v26 = vadd.f32 1.0, %v9499_v29  ;;  %v7228_v45 = vadd.f32 %v11434_v7, %v7189_v38  ;;  %v8528_v36 = vmul.f32 -1.442695, %v7227_v25  ;;  %v7107_v40 = vld [vmem:[#allocation3 + $0xf8] sm:$0xff] }
 0x365   : > { %v11498_v50 = vpop.eup %9502  ;;  %9520 = vrcp.f32 %v7347_v63  ;;  %v8531_v61 = vmul.f32 -1.442695, %v7230_v48  ;;  %v7105_v48 = vld [vmem:[#allocation3 + $0xe8] sm:$0xff] }
 0x366   : > { %v11500_v41 = vpop.eup %9504  ;;  %7699 = vrot.lane.b32.xlu0 %v11494_v10, %s9625_s23  ;;  %v9293_v27 = vpop.f32.mrb[152].mxu1  ;;  %9522 = vrcp.f32 %v7348_v26  ;;  %v8529_v3 = vmul.f32 -1.442695, %v7228_v45 }
 0x367   : > { %v11504_v53 = vpop.eup %9506  ;;  %v7134_v18 = vadd.f32 %v9293_v27, %v7102_v51  ;;  %7701 = vrot.lane.b32.xlu1 %v11500_v41, %s9625_s23  ;;  %v7045_v14 = vpop.f32.mrb[153].mxu1  ;;  %9524 = vpow2.f32 %v8530_v0 }
 0x368   : > { %v9509_v12 = vpop.eup %9508  ;;  %v7132_v24 = vadd.f32 %v7100_v5, %v7045_v14  ;;  %v9294_v30 = vpop.f32.mrb[154].mxu1  ;;  %9526 = vpow2.f32 %v8531_v61  ;;  %v7194_v13 = vld [vmem:[#allocation3 + $0xb0] sm:$0xff] }
 0x369   : > { %v9511_v35 = vpop.eup %9510  ;;  %7166 = vst.msk [vmem:[#allocation3 + $0xd0] sm:$0xff] %vm1995_vm1, %v7134_v18  ;;  %v7135_v23 = vadd.f32 %v9294_v30, %v7103_v20  ;;  %v7048_v16 = vpop.f32.mrb[155].mxu1  ;;  %v7353_v21 = vadd.f32 1.0, %v9509_v12  ;;  %9528 = vpow2.f32 %v8528_v36  ;;  %v7233_v44 = vadd.f32 %v11434_v7, %v7194_v13  ;;  %v7192_v17 = vld [vmem:[#allocation3 + $0xa0] sm:$0xff] }
 0x36a   : > { %v9513_v54 = vpop.eup %9512  ;;  %7164 = vst.msk [vmem:[#allocation3 + $0xc0] sm:$0xff] %vm1995_vm1, %v7132_v24  ;;  %v7133_v43 = vadd.f32 %v7101_v28, %v7048_v16  ;;  %7695 = vrot.lane.b32.xlu0 %v11498_v50, %s9625_s23  ;;  %v7354_v58 = vadd.f32 1.0, %v9511_v35  ;;  %9530 = vpow2.f32 %v8529_v3  ;;  %v7195_v62 = vld [vmem:[#allocation3 + $0xb8] sm:$0xff]  ;;  %v7231_v34 = vadd.f32 %v11434_v7, %v7192_v17 }
 0x36b   : > { %v9515_v19 = vpop.eup %9514  ;;  %7167 = vst.msk [vmem:[#allocation3 + $0xd8] sm:$0xff] %vm1995_vm1, %v7135_v23  ;;  %7697 = vrot.lane.b32.xlu1 %v11504_v53, %s9625_s23  ;;  %9532 = vrcp.f32 %v7353_v21  ;;  %v7351_v55 = vadd.f32 1.0, %v9513_v54  ;;  %v8534_v22 = vmul.f32 -1.442695, %v7233_v44  ;;  %v7234_v1 = vadd.f32 %v11434_v7, %v7195_v62  ;;  %v7193_v52 = vld [vmem:[#allocation3 + $0xa8] sm:$0xff] }
 0x36c   : > { %7165 = vst.msk [vmem:[#allocation3 + $0xc8] sm:$0xff] %vm1995_vm1, %v7133_v43  ;;  %9534 = vrcp.f32 %v7354_v58  ;;  %v7352_v2 = vadd.f32 1.0, %v9515_v19  ;;  %v7232_v39 = vadd.f32 %v11434_v7, %v7193_v52  ;;  %v8532_v9 = vmul.f32 -1.442695, %v7231_v34 }
 0x36d   : > { %v11520_v56 = vpop.eup %9516  ;;  %9536 = vrcp.f32 %v7351_v55  ;;  %v8535_v57 = vmul.f32 -1.442695, %v7234_v1 }
 0x36e   : > { %v11522_v42 = vpop.eup %9518  ;;  %7707 = vrot.lane.b32.xlu0 %v11520_v56, %s9625_s23  ;;  %v9297_v6 = vpop.f32.mrb[156].mxu1  ;;  %9538 = vrcp.f32 %v7352_v2  ;;  %v8533_v8 = vmul.f32 -1.442695, %v7232_v39 }
 0x36f   : > { %v11526_v60 = vpop.eup %9520  ;;  %v7138_v11 = vadd.f32 %v9297_v6, %v7106_v47  ;;  %7709 = vrot.lane.b32.xlu1 %v11522_v42, %s9625_s23  ;;  %v7061_v31 = vpop.f32.mrb[157].mxu1  ;;  %9540 = vpow2.f32 %v8534_v22 }
 0x370   : > { %v11530_v49 = vpop.eup %9522  ;;  %v7136_v15 = vadd.f32 %v7104_v59, %v7061_v31  ;;  %v9298_v33 = vpop.f32.mrb[158].mxu1  ;;  %9542 = vpow2.f32 %v8535_v57  ;;  %v7198_v25 = vld [vmem:[#allocation3 + $0xd0] sm:$0xff] }
 0x371   : > { %v9525_v29 = vpop.eup %9524  ;;  %7170 = vst.msk [vmem:[#allocation3 + $0xf0] sm:$0xff] %vm1995_vm1, %v7138_v11  ;;  %v7139_v63 = vadd.f32 %v9298_v33, %v7107_v40  ;;  %v7064_v0 = vpop.f32.mrb[159].mxu1  ;;  %9544 = vpow2.f32 %v8532_v9  ;;  %v7237_v38 = vadd.f32 %v11434_v7, %v7198_v25  ;;  %v7196_v26 = vld [vmem:[#allocation3 + $0xc0] sm:$0xff] }
 0x372   : > { %v9527_v45 = vpop.eup %9526  ;;  %7168 = vst.msk [vmem:[#allocation3 + $0xe0] sm:$0xff] %vm1995_vm1, %v7136_v15  ;;  %v7137_v61 = vadd.f32 %v7105_v48, %v7064_v0  ;;  %7703 = vrot.lane.b32.xlu0 %v11526_v60, %s9625_s23  ;;  %v7357_v36 = vadd.f32 1.0, %v9525_v29  ;;  %9546 = vpow2.f32 %v8533_v8  ;;  %v7199_v27 = vld [vmem:[#allocation3 + $0xd8] sm:$0xff]  ;;  %v7235_v51 = vadd.f32 %v11434_v7, %v7196_v26 }
 0x373   : > { %v9529_v3 = vpop.eup %9528  ;;  %7171 = vst.msk [vmem:[#allocation3 + $0xf8] sm:$0xff] %vm1995_vm1, %v7139_v63  ;;  %7705 = vrot.lane.b32.xlu1 %v11530_v49, %s9625_s23  ;;  %v7358_v18 = vadd.f32 1.0, %v9527_v45  ;;  %v7238_v14 = vadd.f32 %v11434_v7, %v7199_v27  ;;  %v7197_v5 = vld [vmem:[#allocation3 + $0xc8] sm:$0xff]  ;;  %v8538_v30 = vmul.f32 -1.442695, %v7237_v38 }
 0x374   : > { %v9531_v12 = vpop.eup %9530  ;;  %7169 = vst.msk [vmem:[#allocation3 + $0xe8] sm:$0xff] %vm1995_vm1, %v7137_v61  ;;  %9548 = vrcp.f32 %v7357_v36  ;;  %v7355_v24 = vadd.f32 1.0, %v9529_v3  ;;  %v7236_v20 = vadd.f32 %v11434_v7, %v7197_v5  ;;  %v8536_v28 = vmul.f32 -1.442695, %v7235_v51 }
 0x375   : > { %v11544_v13 = vpop.eup %9532  ;;  %9550 = vrcp.f32 %v7358_v18  ;;  %v7356_v35 = vadd.f32 1.0, %v9531_v12  ;;  %v8539_v23 = vmul.f32 -1.442695, %v7238_v14 }
 0x376   : > { %v11546_v16 = vpop.eup %9534  ;;  %7715 = vrot.lane.b32.xlu0 %v11544_v13, %s9625_s23  ;;  %9552 = vrcp.f32 %v7355_v24  ;;  %v8537_v44 = vmul.f32 -1.442695, %v7236_v20 }
 0x377   : > { %v11550_v21 = vpop.eup %9536  ;;  %7717 = vrot.lane.b32.xlu1 %v11546_v16, %s9625_s23  ;;  %9554 = vrcp.f32 %v7356_v35 }
 0x378   : > { %v11554_v17 = vpop.eup %9538  ;;  %9556 = vpow2.f32 %v8538_v30  ;;  %v7202_v54 = vld [vmem:[#allocation3 + $0xf0] sm:$0xff] }
 0x379   : > { %v9541_v43 = vpop.eup %9540  ;;  %9558 = vpow2.f32 %v8539_v23  ;;  %v7200_v58 = vld [vmem:[#allocation3 + $0xe0] sm:$0xff]  ;;  %v7241_v55 = vadd.f32 %v11434_v7, %v7202_v54 }
 0x37a   : > { %v9543_v62 = vpop.eup %9542  ;;  %7711 = vrot.lane.b32.xlu0 %v11550_v21, %s9625_s23  ;;  %v7361_v34 = vadd.f32 1.0, %v9541_v43  ;;  %9560 = vpow2.f32 %v8536_v28  ;;  %v7239_v19 = vadd.f32 %v11434_v7, %v7200_v58  ;;  %v7203_v22 = vld [vmem:[#allocation3 + $0xf8] sm:$0xff] }
 0x37b   : > { %v9545_v1 = vpop.eup %9544  ;;  %7713 = vrot.lane.b32.xlu1 %v11554_v17, %s9625_s23  ;;  %v7362_v52 = vadd.f32 1.0, %v9543_v62  ;;  %9562 = vpow2.f32 %v8537_v44  ;;  %v7201_v2 = vld [vmem:[#allocation3 + $0xe8] sm:$0xff]  ;;  %v7242_v39 = vadd.f32 %v11434_v7, %v7203_v22  ;;  %v8542_v59 = vmul.f32 -1.442695, %v7241_v55  ;;  %v7466_v62 = vld [vmem:[%s11630_s30 + $0xf8] sm:$0xff] }
 0x37c   : > { %v9547_v57 = vpop.eup %9546  ;;  %9564 = vrcp.f32 %v7361_v34  ;;  %v7359_v9 = vadd.f32 1.0, %v9545_v1  ;;  %v8540_v6 = vmul.f32 -1.442695, %v7239_v19  ;;  %v7240_v47 = vadd.f32 %v11434_v7, %v7201_v2  ;;  %v11645_v19 = vld [vmem:[%s473_s27] ss:$0 sm:$0xff]  ;;  %s11694_s27 = scalar_lea.vmem %s11941_s10, %s8550_s24 }
 0x37d   : > { %9566 = vrcp.f32 %v7362_v52  ;;  %v7360_v8 = vadd.f32 1.0, %v9547_v57  ;;  %v8543_v33 = vmul.f32 -1.442695, %v7242_v39  ;;  %v11647_v55 = vld [vmem:[%s479_s17] ss:$0 sm:$0xff]  ;;  %v7505_v22 = vsub.f32 %v7466_v62, %v11645_v19 }
 0x37e   : > { %v11564_v11 = vpop.eup %9548  ;;  %9568 = vrcp.f32 %v7359_v9  ;;  %v8541_v31 = vmul.f32 -1.442695, %v7240_v47  ;;  %v11652_v52 = vld [vmem:[%s476_s20] ss:$0 sm:$0xff]  ;;  %v7437_v9 = vld [vmem:[%s11630_s30 + $0x10] sm:$0xff]  ;;  %v7558_v62 = vmul.f32 %v11494_v10, %v11647_v55 }
 0x37f   : > { %v11566_v15 = vpop.eup %9550  ;;  %7723 = vrot.lane.b32.xlu0 %v11564_v11, %s9625_s23  ;;  %9570 = vrcp.f32 %v7360_v8  ;;  %v7544_v2 = vmul.f32 %v11652_v52, %v7505_v22  ;;  %v7476_v47 = vsub.f32 %v7437_v9, %v11645_v19  ;;  %v7554_v8 = vmul.f32 %v11470_v4, %v11647_v55  ;;  %v7439_v9 = vld [vmem:[%s11630_s30 + $0x20] sm:$0xff] }
 0x380   : > { %v11570_v40 = vpop.eup %9552  ;;  %7725 = vrot.lane.b32.xlu1 %v11566_v15, %s9625_s23  ;;  %9572 = vpow2.f32 %v8540_v6  ;;  %v7435_v6 = vld [vmem:[%s11630_s30] sm:$0xff] }
 0x381   : > { %v11574_v7 = vpop.eup %9554  ;;  %9574 = vpow2.f32 %v8541_v31  ;;  %v7438_v31 = vld [vmem:[%s11630_s30 + $0x18] sm:$0xff]  ;;  %v7515_v4 = vmul.f32 %v11652_v52, %v7476_v47 }
 0x382   : > { %v9557_v25 = vpop.eup %9556  ;;  %9576 = vpow2.f32 %v8542_v59  ;;  %v7436_v59 = vld [vmem:[%s11630_s30 + $0x8] sm:$0xff] }
 0x383   : > { %v9559_v29 = vpop.eup %9558  ;;  %7719 = vrot.lane.b32.xlu0 %v11570_v40, %s9625_s23  ;;  %v7365_v63 = vadd.f32 1.0, %v9557_v25  ;;  %9578 = vpow2.f32 %v8543_v33  ;;  %v7474_v33 = vsub.f32 %v7435_v6, %v11645_v19  ;;  %v7552_v25 = vmul.f32 %v11474_v37, %v11647_v55 }
 0x384   : > { %v9561_v0 = vpop.eup %9560  ;;  %7721 = vrot.lane.b32.xlu1 %v11574_v7, %s9625_s23  ;;  %v7366_v48 = vadd.f32 1.0, %v9559_v29  ;;  %v7477_v29 = vsub.f32 %v7438_v31, %v11645_v19 }
 0x385   : > { %v9563_v38 = vpop.eup %9562  ;;  %9580 = vrcp.f32 %v7365_v63  ;;  %v7363_v26 = vadd.f32 1.0, %v9561_v0  ;;  %v7555_v63 = vmul.f32 %v11478_v46, %v11647_v55  ;;  %v7475_v0 = vsub.f32 %v7436_v59, %v11645_v19  ;;  %v7440_v59 = vld [vmem:[%s11630_s30 + $0x28] sm:$0xff] }
 0x386   : > { %v11580_v45 = vpop.eup %9564  ;;  %9582 = vrcp.f32 %v7366_v48  ;;  %v7364_v61 = vadd.f32 1.0, %v9563_v38  ;;  %v7586_v48 = vadd.f32 1.0, %v7554_v8  ;;  %v7553_v38 = vmul.f32 %v11482_v32, %v11647_v55 }
 0x387   : > { %v11582_v36 = vpop.eup %9566  ;;  %7731 = vrot.lane.b32.xlu0 %v11580_v45, %s9625_s23  ;;  %9584 = vrcp.f32 %v7363_v26  ;;  %v7441_v26 = vld [vmem:[%s11630_s30 + $0x30] sm:$0xff]  ;;  %v7516_v46 = vmul.f32 %v11652_v52, %v7477_v29 }
 0x388   : > { %v11586_v27 = vpop.eup %9568  ;;  %7733 = vrot.lane.b32.xlu1 %v11582_v36, %s9625_s23  ;;  %9586 = vrcp.f32 %v7364_v61  ;;  %v7513_v61 = vmul.f32 %v11652_v52, %v7474_v33 }
 0x389   : > { %v11590_v51 = vpop.eup %9570 }
 0x38a   : > { %v9573_v3 = vpop.eup %9572 }
 0x38b   : > { %v9575_v18 = vpop.eup %9574  ;;  %7727 = vrot.lane.b32.xlu0 %v11586_v27, %s9625_s23  ;;  %v7367_v14 = vadd.f32 1.0, %v9573_v3  ;;  %v7584_v3 = vadd.f32 1.0, %v7552_v25 }
 0x38c   : > { %v9577_v5 = vpop.eup %9576  ;;  %7729 = vrot.lane.b32.xlu1 %v11590_v51, %s9625_s23  ;;  %v7368_v12 = vadd.f32 1.0, %v9575_v18  ;;  %v7442_v18 = vld [vmem:[%s11630_s30 + $0x38] sm:$0xff] }
 0x38d   : > { %v9579_v24 = vpop.eup %9578  ;;  %9588 = vrcp.f32 %v7367_v14  ;;  %v7369_v30 = vadd.f32 1.0, %v9577_v5  ;;  %v7587_v5 = vadd.f32 1.0, %v7555_v63  ;;  %v7616_v22 = vmul.f32 %v7584_v3, %v7513_v61 }
 0x38e   : > { %9590 = vrcp.f32 %v7368_v12  ;;  %v7370_v20 = vadd.f32 1.0, %v9579_v24  ;;  %v7514_v12 = vmul.f32 %v11652_v52, %v7475_v0  ;;  %v7480_v24 = vsub.f32 %v7441_v26, %v11645_v19 }
 0x38f   : > { %v11596_v35 = vpop.eup %9580  ;;  %v7619_v8 = vmul.f32 %v7587_v5, %v7516_v46  ;;  %v7590_v63 = vadd.f32 1.0, %v7558_v62  ;;  %v7478_v0 = vsub.f32 %v7439_v9, %v11645_v19  ;;  %v7556_v26 = vmul.f32 %v11498_v50, %v11647_v55 }
 0x390   : > { %v11598_v23 = vpop.eup %9582  ;;  %7739 = vrot.lane.b32.xlu0 %v11596_v35, %s9625_s23  ;;  %9592 = vrcp.f32 %v7370_v20  ;;  %v7519_v31 = vmul.f32 %v11652_v52, %v7480_v24  ;;  %v7479_v3 = vsub.f32 %v7440_v59, %v11645_v19  ;;  %v7563_v9 = vmul.f32 %v11522_v42, %v11647_v55 }
 0x391   : > { %7741 = vrot.lane.b32.xlu1 %v11598_v23, %s9625_s23  ;;  %9594 = vrcp.f32 %v7369_v30  ;;  %v11604_v28 = vpop.eup %9584  ;;  %v7618_v30 = vmul.f32 %v7586_v48, %v7515_v4  ;;  %v7517_v50 = vmul.f32 %v11652_v52, %v7478_v0 }
 0x392   : > { %v11606_v44 = vpop.eup %9586 }
 0x394   : > { %7735 = vrot.lane.b32.xlu0 %v11604_v28, %s9625_s23 }
 0x395   : > { %7737 = vrot.lane.b32.xlu1 %v11606_v44, %s9625_s23 }
 0x397   : > { %v11613_v54 = vpop.eup %9588 }
 0x398   : > { %v11615_v43 = vpop.eup %9590  ;;  %7743 = vrot.lane.b32.xlu0 %v11613_v54, %s9625_s23 }
 0x399   : > { %7745 = vrot.lane.b32.xlu1 %v11615_v43, %s9625_s23 }
 0x39a   : > { %v9593_v58 = vpop.eup %9592 }
 0x39b   : > { %v11637_v34 = vpop.eup %9594  ;;  %v7583_v1 = vmul.f32 %v9593_v58, %v11647_v55 }
 0x39c   : > { %7747 = vrot.lane.b32.xlu0 %v11637_v34, %s9625_s23 }
 0x39d   : > { %7749 = vrot.lane.b32.xlu1 %v9593_v58, %s9625_s23  ;;  %v7615_v39 = vadd.f32 1.0, %v7583_v1  ;;  %s482_s23 = scalar_lea.vmem %s11940_s9, %s11959_s13  ;;  %v7585_v58 = vadd.f32 1.0, %v7553_v38 }
 0x39e   : > { %v11679_v37 = vld [vmem:[%s482_s23] ss:$0 sm:$0xff] }
 0x39f   : > { %v11655_v57 = vmul.f32 %v7615_v39, %v7544_v2  ;;  %v7481_v2 = vsub.f32 %v7442_v18, %v11645_v19  ;;  %v7559_v39 = vmul.f32 %v11500_v41, %v11647_v55  ;;  %v7617_v29 = vmul.f32 %v7585_v58, %v7514_v12  ;;  %v7445_v41 = vld [vmem:[%s11630_s30 + $0x50] sm:$0xff] }
 0x3a0   : > { %v7557_v18 = vmul.f32 %v11504_v53, %v11647_v55  ;;  %v7484_v5 = vsub.f32 %v7445_v41, %v11645_v19  ;;  %v7562_v12 = vmul.f32 %v11520_v56, %v11647_v55  ;;  %v7588_v58 = vadd.f32 1.0, %v7556_v26  ;;  %v7450_v26 = vld [vmem:[%s11630_s30 + $0x78] sm:$0xff] }
 0x3a1   : > { %v7520_v48 = vmul.f32 %v11652_v52, %v7481_v2  ;;  %v7591_v38 = vadd.f32 1.0, %v7559_v39  ;;  %v7518_v2 = vmul.f32 %v11652_v52, %v7479_v3  ;;  %v7561_v41 = vmul.f32 %v11530_v49, %v11647_v55 }
 0x3a2   : > { %v7589_v39 = vadd.f32 1.0, %v7557_v18 }
 0x3a3   : > { %v7623_v53 = vmul.f32 %v7591_v38, %v7520_v48  ;;  %v7595_v38 = vadd.f32 1.0, %v7563_v9 }
 0x3cf   : > { %v7692_v14 = vpop.permute.xlu1 %7691 }
 0x3d0   : > { %v7785_v32 = vmul.f32 %v11679_v37, %v7692_v14  ;;  %v7688_v20 = vpop.permute.xlu0 %7687  ;;  %v7446_v14 = vld [vmem:[%s11630_s30 + $0x58] sm:$0xff] }
 0x3d1   : > { %v7783_v1 = vmul.f32 %v11679_v37, %v7688_v20  ;;  %v7485_v62 = vsub.f32 %v7446_v14, %v11645_v19 }
 0x3d2   : > { %v7817_v6 = vadd.f32 %v7785_v32, %v7618_v30  ;;  %v7622_v30 = vmul.f32 %v7590_v63, %v7519_v31  ;;  %v7620_v63 = vmul.f32 %v7588_v58, %v7517_v50  ;;  %v7593_v50 = vadd.f32 1.0, %v7561_v41 }
 0x3d3   : > { %v7815_v10 = vadd.f32 %v7783_v1, %v7616_v22  ;;  %v7694_v47 = vpop.permute.xlu1 %7693  ;;  %v7443_v22 = vld [vmem:[%s11630_s30 + $0x40] sm:$0xff]  ;;  %v7444_v1 = vld [vmem:[%s11630_s30 + $0x48] sm:$0xff] }
 0x3d4   : > { %7850 = vst.msk [vmem:[%s11694_s27 + $0x10] sm:$0xff] %vm7847_vm2, %v7817_v6  ;;  %v7786_v33 = vmul.f32 %v11679_v37, %v7694_v47  ;;  %v7690_v25 = vpop.permute.xlu0 %7689  ;;  %v7594_v47 = vadd.f32 1.0, %v7562_v12  ;;  %v7482_v59 = vsub.f32 %v7443_v22, %v11645_v19  ;;  %v7567_v22 = vmul.f32 %v11546_v16, %v11647_v55 }
 0x3d5   : > { %7848 = vst.msk [vmem:[%s11694_s27] sm:$0xff] %vm7847_vm2, %v7815_v10  ;;  %v7784_v4 = vmul.f32 %v11679_v37, %v7690_v25  ;;  %v7523_v10 = vmul.f32 %v11652_v52, %v7484_v5  ;;  %v7483_v25 = vsub.f32 %v7444_v1, %v11645_v19 }
 0x3d6   : > { %v7818_v61 = vadd.f32 %v7786_v33, %v7619_v8  ;;  %v7560_v33 = vmul.f32 %v11526_v60, %v11647_v55  ;;  %v7524_v60 = vmul.f32 %v11652_v52, %v7485_v62  ;;  %v7521_v5 = vmul.f32 %v11652_v52, %v7482_v59 }
 0x3d7   : > { %v7816_v46 = vadd.f32 %v7784_v4, %v7617_v29  ;;  %v7449_v29 = vld [vmem:[%s11630_s30 + $0x70] sm:$0xff]  ;;  %v7621_v4 = vmul.f32 %v7589_v39, %v7518_v2  ;;  %v7626_v3 = vmul.f32 %v7594_v47, %v7523_v10  ;;  %v7522_v12 = vmul.f32 %v11652_v52, %v7483_v25  ;;  %v7448_v2 = vld [vmem:[%s11630_s30 + $0x68] sm:$0xff] }
 0x3d8   : > { %7851 = vst.msk [vmem:[%s11694_s27 + $0x18] sm:$0xff] %vm7847_vm2, %v7818_v61  ;;  %v7700_v24 = vpop.permute.xlu0 %7699  ;;  %v7488_v18 = vsub.f32 %v7449_v29, %v11645_v19  ;;  %v7592_v49 = vadd.f32 1.0, %v7560_v33  ;;  %v7627_v58 = vmul.f32 %v7595_v38, %v7524_v60  ;;  %v7564_v10 = vmul.f32 %v11550_v21, %v11647_v55  ;;  %v7453_v47 = vld [vmem:[%s11630_s30 + $0x90] sm:$0xff] }
 0x3d9   : > { %7849 = vst.msk [vmem:[%s11694_s27 + $0x8] sm:$0xff] %vm7847_vm2, %v7816_v46  ;;  %v7789_v32 = vmul.f32 %v11679_v37, %v7700_v24  ;;  %v7702_v20 = vpop.permute.xlu1 %7701  ;;  %v7599_v29 = vadd.f32 1.0, %v7567_v22  ;;  %v7565_v21 = vmul.f32 %v11554_v17, %v11647_v55  ;;  %v7492_v41 = vsub.f32 %v7453_v47, %v11645_v19  ;;  %v7457_v47 = vld [vmem:[%s11630_s30 + $0xb0] sm:$0xff] }
 0x3da   : > { %v7790_v56 = vmul.f32 %v11679_v37, %v7702_v20  ;;  %v7489_v20 = vsub.f32 %v7450_v26, %v11645_v19  ;;  %v7596_v38 = vadd.f32 1.0, %v7564_v10  ;;  %v7570_v26 = vmul.f32 %v11564_v11, %v11647_v55 }
 0x3db   : > { %v7821_v6 = vadd.f32 %v7789_v32, %v7622_v30  ;;  %v7566_v32 = vmul.f32 %v11544_v13, %v11647_v55  ;;  %v7624_v13 = vmul.f32 %v7592_v49, %v7521_v5  ;;  %v7569_v10 = vmul.f32 %v11574_v7, %v11647_v55 }
 0x3dc   : > { %v7822_v8 = vadd.f32 %v7790_v56, %v7623_v53  ;;  %v7696_v31 = vpop.permute.xlu0 %7695  ;;  %v7447_v53 = vld [vmem:[%s11630_s30 + $0x60] sm:$0xff]  ;;  %v7527_v56 = vmul.f32 %v11652_v52, %v7488_v18  ;;  %v7528_v33 = vmul.f32 %v11652_v52, %v7489_v20 }
 0x3dd   : > { %7854 = vst.msk [vmem:[%s11694_s27 + $0x30] sm:$0xff] %vm7847_vm2, %v7821_v6  ;;  %v7787_v42 = vmul.f32 %v11679_v37, %v7696_v31  ;;  %v7698_v0 = vpop.permute.xlu1 %7697  ;;  %v7486_v6 = vsub.f32 %v7447_v53, %v11645_v19  ;;  %v7625_v31 = vmul.f32 %v7593_v50, %v7522_v12  ;;  %v7598_v59 = vadd.f32 1.0, %v7566_v32  ;;  %v7452_v50 = vld [vmem:[%s11630_s30 + $0x88] sm:$0xff] }
 0x3de   : > { %7855 = vst.msk [vmem:[%s11694_s27 + $0x38] sm:$0xff] %vm7847_vm2, %v7822_v8  ;;  %v7788_v48 = vmul.f32 %v11679_v37, %v7698_v0  ;;  %v7631_v5 = vmul.f32 %v7599_v29, %v7528_v33  ;;  %v7597_v12 = vadd.f32 1.0, %v7565_v21  ;;  %v7455_v29 = vld [vmem:[%s11630_s30 + $0xa0] sm:$0xff] }
 0x3df   : > { %v7819_v61 = vadd.f32 %v7787_v42, %v7620_v63  ;;  %v7487_v63 = vsub.f32 %v7448_v2, %v11645_v19  ;;  %v7454_v42 = vld [vmem:[%s11630_s30 + $0x98] sm:$0xff]  ;;  %v7525_v60 = vmul.f32 %v11652_v52, %v7486_v6  ;;  %v7568_v2 = vmul.f32 %v11570_v40, %v11647_v55 }
 0x3e0   : > { %v7820_v14 = vadd.f32 %v7788_v48, %v7621_v4  ;;  %v7708_v46 = vpop.permute.xlu0 %7707  ;;  %v7493_v18 = vsub.f32 %v7454_v42, %v11645_v19  ;;  %v7496_v42 = vsub.f32 %v7457_v47, %v11645_v19  ;;  %v7579_v47 = vmul.f32 %v11598_v23, %v11647_v55 }
 0x3e1   : > { %7852 = vst.msk [vmem:[%s11694_s27 + $0x20] sm:$0xff] %vm7847_vm2, %v7819_v61  ;;  %v7793_v24 = vmul.f32 %v11679_v37, %v7708_v46  ;;  %v7710_v30 = vpop.permute.xlu1 %7709  ;;  %v7630_v61 = vmul.f32 %v7598_v59, %v7527_v56  ;;  %v7451_v46 = vld [vmem:[%s11630_s30 + $0x80] sm:$0xff]  ;;  %v7526_v11 = vmul.f32 %v11652_v52, %v7487_v63  ;;  %v7628_v53 = vmul.f32 %v7596_v38, %v7525_v60 }
 0x3e2   : > { %7853 = vst.msk [vmem:[%s11694_s27 + $0x28] sm:$0xff] %vm7847_vm2, %v7820_v14  ;;  %v7794_v62 = vmul.f32 %v11679_v37, %v7710_v30  ;;  %v7571_v14 = vmul.f32 %v11566_v15, %v11647_v55  ;;  %v7531_v30 = vmul.f32 %v11652_v52, %v7492_v41  ;;  %v7490_v15 = vsub.f32 %v7451_v46, %v11645_v19  ;;  %v7456_v41 = vld [vmem:[%s11630_s30 + $0xa8] sm:$0xff] }
 0x3e3   : > { %v7825_v1 = vadd.f32 %v7793_v24, %v7626_v3  ;;  %v7575_v38 = vmul.f32 %v11582_v36, %v11647_v55 }
 0x3e4   : > { %v7826_v39 = vadd.f32 %v7794_v62, %v7627_v58  ;;  %v7704_v9 = vpop.permute.xlu0 %7703  ;;  %v7602_v58 = vadd.f32 1.0, %v7570_v26  ;;  %v7603_v56 = vadd.f32 1.0, %v7571_v14  ;;  %v7529_v33 = vmul.f32 %v11652_v52, %v7490_v15 }
 0x3e5   : > { %7858 = vst.msk [vmem:[%s11694_s27 + $0x50] sm:$0xff] %vm7847_vm2, %v7825_v1  ;;  %v7791_v8 = vmul.f32 %v11679_v37, %v7704_v9  ;;  %v7706_v16 = vpop.permute.xlu1 %7705  ;;  %v7532_v1 = vmul.f32 %v11652_v52, %v7493_v18  ;;  %v7573_v14 = vmul.f32 %v11590_v51, %v11647_v55  ;;  %v7607_v51 = vadd.f32 1.0, %v7575_v38 }
 0x3e6   : > { %7859 = vst.msk [vmem:[%s11694_s27 + $0x58] sm:$0xff] %vm7847_vm2, %v7826_v39  ;;  %v7792_v25 = vmul.f32 %v11679_v37, %v7706_v16  ;;  %v7629_v39 = vmul.f32 %v7597_v12, %v7526_v11  ;;  %v7458_v16 = vld [vmem:[%s11630_s30 + $0xb8] sm:$0xff]  ;;  %v7461_v12 = vld [vmem:[%s11630_s30 + $0xd0] sm:$0xff]  ;;  %v7577_v38 = vmul.f32 %v11606_v44, %v11647_v55 }
 0x3e7   : > { %v7823_v0 = vadd.f32 %v7791_v8, %v7624_v13  ;;  %v7491_v13 = vsub.f32 %v7452_v50, %v11645_v19  ;;  %v7635_v59 = vmul.f32 %v7603_v56, %v7532_v1  ;;  %v7497_v60 = vsub.f32 %v7458_v16, %v11645_v19 }
 0x3e8   : > { %v7824_v4 = vadd.f32 %v7792_v25, %v7625_v31  ;;  %v7716_v48 = vpop.permute.xlu0 %7715  ;;  %v7634_v31 = vmul.f32 %v7602_v58, %v7531_v30  ;;  %v7600_v25 = vadd.f32 1.0, %v7568_v2  ;;  %v7500_v1 = vsub.f32 %v7461_v12, %v11645_v19 }
 0x3e9   : > { %7856 = vst.msk [vmem:[%s11694_s27 + $0x40] sm:$0xff] %vm7847_vm2, %v7823_v0  ;;  %v7797_v3 = vmul.f32 %v11679_v37, %v7716_v48  ;;  %v7718_v17 = vpop.permute.xlu1 %7717  ;;  %v7530_v7 = vmul.f32 %v11652_v52, %v7491_v13  ;;  %v7574_v0 = vmul.f32 %v11580_v45, %v11647_v55  ;;  %v7601_v48 = vadd.f32 1.0, %v7569_v10 }
 0x3ea   : > { %7857 = vst.msk [vmem:[%s11694_s27 + $0x48] sm:$0xff] %vm7847_vm2, %v7824_v4  ;;  %v7798_v49 = vmul.f32 %v11679_v37, %v7718_v17  ;;  %v7495_v45 = vsub.f32 %v7456_v41, %v11645_v19  ;;  %v7632_v46 = vmul.f32 %v7600_v25, %v7529_v33  ;;  %v7536_v30 = vmul.f32 %v11652_v52, %v7497_v60 }
 0x3eb   : > { %v7829_v24 = vadd.f32 %v7797_v3, %v7630_v61  ;;  %v7494_v61 = vsub.f32 %v7455_v29, %v11645_v19  ;;  %v7572_v3 = vmul.f32 %v11586_v27, %v11647_v55  ;;  %v7606_v11 = vadd.f32 1.0, %v7574_v0 }
 0x3ec   : > { %v7830_v32 = vadd.f32 %v7798_v49, %v7631_v5  ;;  %v7712_v20 = vpop.permute.xlu0 %7711  ;;  %v7535_v49 = vmul.f32 %v11652_v52, %v7496_v42  ;;  %v7633_v27 = vmul.f32 %v7601_v48, %v7530_v7  ;;  %v7639_v13 = vmul.f32 %v7607_v51, %v7536_v30  ;;  %v7463_v48 = vld [vmem:[%s11630_s30 + $0xe0] sm:$0xff] }
 0x3ed   : > { %7862 = vst.msk [vmem:[%s11694_s27 + $0x70] sm:$0xff] %vm7847_vm2, %v7829_v24  ;;  %v7795_v62 = vmul.f32 %v11679_v37, %v7712_v20  ;;  %v7714_v22 = vpop.permute.xlu1 %7713  ;;  %v7604_v20 = vadd.f32 1.0, %v7572_v3  ;;  %v7576_v7 = vmul.f32 %v11604_v28, %v11647_v55  ;;  %v7611_v41 = vadd.f32 1.0, %v7579_v47 }
 0x3ee   : > { %7863 = vst.msk [vmem:[%s11694_s27 + $0x78] sm:$0xff] %vm7847_vm2, %v7830_v32  ;;  %v7796_v9 = vmul.f32 %v11679_v37, %v7714_v22  ;;  %v7533_v32 = vmul.f32 %v11652_v52, %v7494_v61  ;;  %v7605_v22 = vadd.f32 1.0, %v7573_v14  ;;  %v7638_v56 = vmul.f32 %v7606_v11, %v7535_v49  ;;  %v7464_v61 = vld [vmem:[%s11630_s30 + $0xe8] sm:$0xff] }
 0x3ef   : > { %v7827_v6 = vadd.f32 %v7795_v62, %v7628_v53  ;;  %v7462_v53 = vld [vmem:[%s11630_s30 + $0xd8] sm:$0xff]  ;;  %v7534_v62 = vmul.f32 %v11652_v52, %v7495_v45  ;;  %v7502_v45 = vsub.f32 %v7463_v48, %v11645_v19  ;;  %v7609_v11 = vadd.f32 1.0, %v7577_v38 }
 0x3f0   : > { %v7828_v8 = vadd.f32 %v7796_v9, %v7629_v39  ;;  %v7578_v9 = vmul.f32 %v11596_v35, %v11647_v55  ;;  %v7501_v10 = vsub.f32 %v7462_v53, %v11645_v19  ;;  %v7636_v33 = vmul.f32 %v7604_v20, %v7533_v32 }
 0x3f1   : > { %7860 = vst.msk [vmem:[%s11694_s27 + $0x60] sm:$0xff] %vm7847_vm2, %v7827_v6  ;;  %v7724_v40 = vpop.permute.xlu0 %7723  ;;  %v7637_v25 = vmul.f32 %v7605_v22, %v7534_v62  ;;  %v7539_v35 = vmul.f32 %v11652_v52, %v7500_v1  ;;  %v7503_v12 = vsub.f32 %v7464_v61, %v11645_v19  ;;  %v7541_v20 = vmul.f32 %v11652_v52, %v7502_v45 }
 0x3f2   : > { %7861 = vst.msk [vmem:[%s11694_s27 + $0x68] sm:$0xff] %vm7847_vm2, %v7828_v8  ;;  %v7801_v63 = vmul.f32 %v11679_v37, %v7724_v40  ;;  %v7726_v21 = vpop.permute.xlu1 %7725  ;;  %v7459_v8 = vld [vmem:[%s11630_s30 + $0xc0] sm:$0xff]  ;;  %v7460_v40 = vld [vmem:[%s11630_s30 + $0xc8] sm:$0xff]  ;;  %v7540_v0 = vmul.f32 %v11652_v52, %v7501_v10 }
 0x3f3   : > { %v7802_v4 = vmul.f32 %v11679_v37, %v7726_v21  ;;  %v7610_v21 = vadd.f32 1.0, %v7578_v9  ;;  %v7498_v23 = vsub.f32 %v7459_v8, %v11645_v19  ;;  %v7542_v1 = vmul.f32 %v11652_v52, %v7503_v12 }
 0x3f4   : > { %v7833_v26 = vadd.f32 %v7801_v63, %v7634_v31 }
 0x3f5   : > { %v7834_v17 = vadd.f32 %v7802_v4, %v7635_v59  ;;  %v7720_v18 = vpop.permute.xlu0 %7719  ;;  %v7499_v4 = vsub.f32 %v7460_v40, %v11645_v19  ;;  %v7642_v3 = vmul.f32 %v7610_v21, %v7539_v35 }
 0x3f6   : > { %7866 = vst.msk [vmem:[%s11694_s27 + $0x90] sm:$0xff] %vm7847_vm2, %v7833_v26  ;;  %v7799_v5 = vmul.f32 %v11679_v37, %v7720_v18  ;;  %v7722_v36 = vpop.permute.xlu1 %7721  ;;  %v7608_v18 = vadd.f32 1.0, %v7576_v7 }
 0x3f7   : > { %7867 = vst.msk [vmem:[%s11694_s27 + $0x98] sm:$0xff] %vm7847_vm2, %v7834_v17  ;;  %v7800_v24 = vmul.f32 %v11679_v37, %v7722_v36  ;;  %v7537_v17 = vmul.f32 %v11652_v52, %v7498_v23  ;;  %v7538_v44 = vmul.f32 %v11652_v52, %v7499_v4  ;;  %v7580_v36 = vmul.f32 %v11613_v54, %v11647_v55 }
 0x3f8   : > { %v7831_v50 = vadd.f32 %v7799_v5, %v7632_v46  ;;  %v7643_v5 = vmul.f32 %v7611_v41, %v7540_v0 }
 0x3f9   : > { %v7832_v58 = vadd.f32 %v7800_v24, %v7633_v27  ;;  %v7732_v15 = vpop.permute.xlu0 %7731  ;;  %v7581_v27 = vmul.f32 %v11615_v43, %v11647_v55  ;;  %v7465_v24 = vld [vmem:[%s11630_s30 + $0xf0] sm:$0xff]  ;;  %v7640_v32 = vmul.f32 %v7608_v18, %v7537_v17  ;;  %v7582_v43 = vmul.f32 %v11637_v34, %v11647_v55 }
 0x3fa   : > { %7864 = vst.msk [vmem:[%s11694_s27 + $0x80] sm:$0xff] %vm7847_vm2, %v7831_v50  ;;  %v7805_v2 = vmul.f32 %v11679_v37, %v7732_v15  ;;  %v7734_v39 = vpop.permute.xlu1 %7733  ;;  %v7504_v15 = vsub.f32 %v7465_v24, %v11645_v19  ;;  %v7641_v62 = vmul.f32 %v7609_v11, %v7538_v44 }
 0x3fb   : > { %7865 = vst.msk [vmem:[%s11694_s27 + $0x88] sm:$0xff] %vm7847_vm2, %v7832_v58  ;;  %v7806_v6 = vmul.f32 %v11679_v37, %v7734_v39  ;;  %v7612_v58 = vadd.f32 1.0, %v7580_v36  ;;  %v7614_v55 = vadd.f32 1.0, %v7582_v43 }
 0x3fc   : > { %v7837_v16 = vadd.f32 %v7805_v2, %v7638_v56  ;;  %v7613_v56 = vadd.f32 1.0, %v7581_v27  ;;  %v7543_v34 = vmul.f32 %v11652_v52, %v7504_v15 }
 0x3fd   : > { %v7838_v31 = vadd.f32 %v7806_v6, %v7639_v13  ;;  %v7728_v59 = vpop.permute.xlu0 %7727  ;;  %v7644_v19 = vmul.f32 %v7612_v58, %v7541_v20 }
 0x3fe   : > { %7870 = vst.msk [vmem:[%s11694_s27 + $0xb0] sm:$0xff] %vm7847_vm2, %v7837_v16  ;;  %v7803_v29 = vmul.f32 %v11679_v37, %v7728_v59  ;;  %v7730_v63 = vpop.permute.xlu1 %7729  ;;  %v7645_v10 = vmul.f32 %v7613_v56, %v7542_v1 }
 0x3ff   : > { %7871 = vst.msk [vmem:[%s11694_s27 + $0xb8] sm:$0xff] %vm7847_vm2, %v7838_v31  ;;  %v7804_v42 = vmul.f32 %v11679_v37, %v7730_v63  ;;  %v7646_v31 = vmul.f32 %v7614_v55, %v7543_v34 }
 0x400   : > { %v7835_v60 = vadd.f32 %v7803_v29, %v7636_v33 }
 0x401   : > { %v7836_v26 = vadd.f32 %v7804_v42, %v7637_v25 }
 0x402   : > { %7868 = vst.msk [vmem:[%s11694_s27 + $0xa0] sm:$0xff] %vm7847_vm2, %v7835_v60  ;;  %v7740_v28 = vpop.permute.xlu0 %7739 }
 0x403   : > { %7869 = vst.msk [vmem:[%s11694_s27 + $0xa8] sm:$0xff] %vm7847_vm2, %v7836_v26  ;;  %v7809_v14 = vmul.f32 %v11679_v37, %v7740_v28  ;;  %v7742_v46 = vpop.permute.xlu1 %7741 }
 0x404   : > { %v7810_v49 = vmul.f32 %v11679_v37, %v7742_v46 }
 0x405   : > { %v7841_v30 = vadd.f32 %v7809_v14, %v7642_v3 }
 0x406   : > { %v7842_v51 = vadd.f32 %v7810_v49, %v7643_v5  ;;  %v7736_v50 = vpop.permute.xlu0 %7735 }
 0x407   : > { %7874 = vst.msk [vmem:[%s11694_s27 + $0xd0] sm:$0xff] %vm7847_vm2, %v7841_v30  ;;  %v7807_v54 = vmul.f32 %v11679_v37, %v7736_v50  ;;  %v7738_v53 = vpop.permute.xlu1 %7737 }
 0x408   : > { %7875 = vst.msk [vmem:[%s11694_s27 + $0xd8] sm:$0xff] %vm7847_vm2, %v7842_v51  ;;  %v7808_v22 = vmul.f32 %v11679_v37, %v7738_v53 }
 0x409   : > { %v7839_v2 = vadd.f32 %v7807_v54, %v7640_v32 }
 0x40a   : > { %v7840_v39 = vadd.f32 %v7808_v22, %v7641_v62  ;;  %v7744_v9 = vpop.permute.xlu0 %7743 }
 0x40b   : > { %7872 = vst.msk [vmem:[%s11694_s27 + $0xc0] sm:$0xff] %vm7847_vm2, %v7839_v2  ;;  %v7811_v13 = vmul.f32 %v11679_v37, %v7744_v9  ;;  %v7746_v6 = vpop.permute.xlu1 %7745 }
 0x40c   : > { %7873 = vst.msk [vmem:[%s11694_s27 + $0xc8] sm:$0xff] %vm7847_vm2, %v7840_v39  ;;  %v7812_v47 = vmul.f32 %v11679_v37, %v7746_v6 }
 0x40d   : > { %v7843_v8 = vadd.f32 %v7811_v13, %v7644_v19 }
 0x40e   : > { %v7844_v16 = vadd.f32 %v7812_v47, %v7645_v10  ;;  %v7748_v40 = vpop.permute.xlu0 %7747 }
 0x40f   : > { %7876 = vst.msk [vmem:[%s11694_s27 + $0xe0] sm:$0xff] %vm7847_vm2, %v7843_v8  ;;  %v7813_v59 = vmul.f32 %v11679_v37, %v7748_v40  ;;  %v7750_v33 = vpop.permute.xlu1 %7749 }
 0x410   : > { %7877 = vst.msk [vmem:[%s11694_s27 + $0xe8] sm:$0xff] %vm7847_vm2, %v7844_v16  ;;  %v7814_v52 = vmul.f32 %v11679_v37, %v7750_v33 }
 0x411   : > { %v7845_v25 = vadd.f32 %v7813_v59, %v7646_v31 }
 0x412   : > { %v7846_v35 = vadd.f32 %v7814_v52, %v11655_v57 }
 0x413   : > { %7878 = vst.msk [vmem:[%s11694_s27 + $0xf0] sm:$0xff] %vm7847_vm2, %v7845_v25 }
 0x414   : > { %7879 = vst.msk [vmem:[%s11694_s27 + $0xf8] sm:$0xff] %vm7847_vm2, %v7846_v35 }
 0x415 PF: > { %s20_s15 = sadd.s32 1, %s9622_s15   ;;  %s11954_s13 = smov %s9618_s14 }
 0x416   : > { %p17_p5 = scmp.ge.s32.totalorder %s20_s15, 4   ;;  %s11955_s14 = smov %s11957_s16 }
 0x418   :  { %19 = sbr.rel (!%p17_p5) target bundleno = 2 (0x2), region = 120 }

</bundles_post_ra>
